<compile_context>
chip_gen: v7x
topology: tpu7x:2x2x1
jax: 0.10.0
libtpu: 0.0.40
codegen_flags: <defaults>
</compile_context>

<pallas_src>
import jax
import jax.numpy as jnp
from jax.experimental import pallas as pl
from jax.experimental.pallas import tpu as pltpu


# ----------------------------------------------------------------------------
# helpers
# ----------------------------------------------------------------------------
def _round_up(x, m):
    return ((x + m - 1) // m) * m


# ----------------------------------------------------------------------------
# Tiled Pallas matmul: bf16 MXU inputs, f32 accumulation, lane-dense padded N
# ----------------------------------------------------------------------------
def _mm_kernel(a_ref, b_ref, o_ref, acc_ref):
    @pl.when(pl.program_id(2) == 0)
    def _():
        acc_ref[...] = jnp.zeros_like(acc_ref)

    acc_ref[...] += jnp.dot(a_ref[...], b_ref[...],
                            preferred_element_type=jnp.float32)

    @pl.when(pl.program_id(2) == pl.num_programs(2) - 1)
    def _():
        o_ref[...] = acc_ref[...]


def pallas_matmul(a, b):
    """[M, K] @ [K, N] -> [M, N] f32.  Operands are padded (M->16, K->128,
    N->128 multiples), cast to bf16 and tiled over a (M, N, K) grid."""
    m, k = a.shape
    _, n = b.shape
    tm = min(256, _round_up(m, 16))
    tn = min(256, _round_up(n, 128))
    tk = min(2048, _round_up(k, 128))
    mp, np_, kp = _round_up(m, tm), _round_up(n, tn), _round_up(k, tk)
    a_p = jnp.pad(a.astype(jnp.bfloat16), ((0, mp - m), (0, kp - k)))
    b_p = jnp.pad(b.astype(jnp.bfloat16), ((0, kp - k), (0, np_ - n)))
    out = pl.pallas_call(
        _mm_kernel,
        out_shape=jax.ShapeDtypeStruct((mp, np_), jnp.float32),
        grid=(mp // tm, np_ // tn, kp // tk),
        in_specs=[
            pl.BlockSpec((tm, tk), lambda i, j, kk: (i, kk)),
            pl.BlockSpec((tk, tn), lambda i, j, kk: (kk, j)),
        ],
        out_specs=pl.BlockSpec((tm, tn), lambda i, j, kk: (i, j)),
        scratch_shapes=[pltpu.VMEM((tm, tn), jnp.float32)],
        compiler_params=pltpu.CompilerParams(
            dimension_semantics=("parallel", "parallel", "arbitrary"),
            vmem_limit_bytes=48 * 1024 * 1024),   # fits v7x's 64 MiB VMEM
    )(a_p, b_p)
    return out[:m, :n]


# ----------------------------------------------------------------------------
# Fused cell kernels
# ----------------------------------------------------------------------------
def _cell_core_kernel(g_ref, ct_ref, hist_ref, lnw_ref, lnb_ref, nc_ref, ng_ref):
    """Fused gate math + eidetic recall attention + LayerNorm cell update +
    global-memory update; whole batch in one VMEM-resident block.

    g:    [B, 15, L, C] gate pre-activations, order:
          0:i_x 1:g_x 2:r_x 3:i_x' 4:g_x' 5:f_x' 6:o_x |
          7:i_h 8:g_h 9:r_h 10:o_h | 11:i_m 12:f_m 13:g_m 14:m_m
    ct:   [B, L, C]  cell state   (channel-major flat "quirky" view)
    hist: [B, Lk, C] eidetic cell history (same view)
    """
    g = g_ref[...]
    r_t = jax.nn.sigmoid(g[:, 2] + g[:, 9])
    ig = jax.nn.sigmoid(g[:, 0] + g[:, 7]) * jnp.tanh(g[:, 1] + g[:, 8])

    # recall attention: softmax(Q K^T) V with K = V = history
    keys = hist_ref[...]
    s = jnp.einsum('blc,bkc->blk', r_t, keys, preferred_element_type=jnp.float32)
    s = s - jnp.max(s, axis=-1, keepdims=True)
    p = jnp.exp(s)
    p = p * pl.reciprocal(jnp.sum(p, axis=-1, keepdims=True), approx=True)
    attn = jnp.einsum('blk,bkc->blc', p, keys, preferred_element_type=jnp.float32)

    # LayerNorm(c_t + attn) over all non-batch elements, affine, + i_t * g_t
    x = ct_ref[...] + attn
    inv_n = 1.0 / (x.shape[1] * x.shape[2])
    mu = jnp.sum(jnp.sum(x, axis=2, keepdims=True), axis=1, keepdims=True) * inv_n
    xc = x - mu
    var = jnp.sum(jnp.sum(xc * xc, axis=2, keepdims=True), axis=1, keepdims=True) * inv_n
    nc_ref[...] = xc * jax.lax.rsqrt(var + 1e-5) * lnw_ref[...] + lnb_ref[...] + ig

    # eidetic global-memory update (forget bias = 1.0)
    ti = jax.nn.sigmoid(g[:, 3] + g[:, 11])
    tf = jax.nn.sigmoid(g[:, 5] + g[:, 12] + 1.0)
    tg = jnp.tanh(g[:, 4] + g[:, 13])
    ng_ref[...] = tf * jnp.tanh(g[:, 14]) + ti * tg


def _hidden_kernel(g_ref, o_ref, h_ref):
    """Fused output gate: h = tanh(mem) * sigmoid(tanh(o_x + o_h + o_c + o_m)).
    o: [B, 4, L, C] = [o_c, mem_cell_part, o_m, mem_gm_part] from the fused
    output conv (the 1x1x1 'conv_last' is already embedded there)."""
    g = g_ref[...]
    o = o_ref[...]
    og = jnp.tanh(g[:, 6] + g[:, 10] + o[:, 0] + o[:, 2])
    h_ref[...] = jnp.tanh(o[:, 1] + o[:, 3]) * jax.nn.sigmoid(og)


# ----------------------------------------------------------------------------
# Conv3d (bias-free, PyTorch cross-correlation) via channels-last im2col + matmul
# ----------------------------------------------------------------------------
def conv3d_mat(x, w_mat, ksize, stride=(1, 1, 1),
               padding=((0, 0), (0, 0), (0, 0))):
    """x: [B, Cin, T, H, W]; w_mat: [kt*kh*kw*Cin, Cout] -> [B, Cout, To, Ho, Wo]."""
    b, cin, t, h, w = x.shape
    kt, kh, kw = ksize
    cout = w_mat.shape[1]
    st, sh, sw = stride
    xl = jnp.transpose(x, (0, 2, 3, 4, 1))                        # channels-last
    xl = jnp.pad(xl, ((0, 0), padding[0], padding[1], padding[2], (0, 0)))
    to = (t + sum(padding[0]) - kt) // st + 1
    ho = (h + sum(padding[1]) - kh) // sh + 1
    wo = (w + sum(padding[2]) - kw) // sw + 1
    cols = []
    for dt in range(kt):
        for dy in range(kh):
            for dx in range(kw):
                cols.append(xl[:, dt:dt + to * st:st,
                               dy:dy + ho * sh:sh,
                               dx:dx + wo * sw:sw, :])
    p = jnp.stack(cols, axis=4)                                   # [B,To,Ho,Wo,K,Cin]
    p = p.reshape(b * to * ho * wo, kt * kh * kw * cin)
    out = pallas_matmul(p, w_mat)                                 # MXU hot path
    out = out.reshape(b, to, ho, wo, cout)
    return jnp.transpose(out, (0, 4, 1, 2, 3))


def conv3d_same_mat(x, w_mat, ksize):
    pads = tuple(((k - 1) // 2, (k - 1) - (k - 1) // 2) for k in ksize)
    return conv3d_mat(x, w_mat, ksize, (1, 1, 1), pads)


# ----------------------------------------------------------------------------
# Eidetic 3D LSTM cell (4 pallas_calls per step)
# ----------------------------------------------------------------------------
def eidetic_cell_forward(p, nh, filter_size, x_t, h_t, c_t, global_memory,
                         c_history):
    b = x_t.shape[0]
    t, hh, ww = c_t.shape[2], c_t.shape[3], c_t.shape[4]
    l = t * hh * ww

    # one fused conv for x / h / global-memory gate stacks (block-diag weights)
    inp = jnp.concatenate([x_t, h_t, global_memory], axis=1)
    gates = conv3d_same_mat(inp, p['w_gates'], filter_size)       # [B,15nh,T,H,W]

    # free reshape views (channel-major "quirky" layout used by the reference
    # attention reshape(b, -1, c))
    g_q = gates.reshape(b, 15, l, nh)
    ct_q = c_t.reshape(b, l, nh)
    hist_q = c_history.reshape(b, -1, nh)
    lnw_q = p['ln_w'].reshape(1, l, nh)
    lnb_q = p['ln_b'].reshape(1, l, nh)

    nc_q, ng_q = pl.pallas_call(
        _cell_core_kernel,
        out_shape=(jax.ShapeDtypeStruct((b, l, nh), jnp.float32),
                   jax.ShapeDtypeStruct((b, l, nh), jnp.float32)),
    )(g_q, ct_q, hist_q, lnw_q, lnb_q)

    new_cell = nc_q.reshape(b, nh, t, hh, ww)
    new_gm = ng_q.reshape(b, nh, t, hh, ww)

    # one fused conv producing o_c, o_m and the (embedded 1x1x1) 'last' memory
    o_all = conv3d_same_mat(jnp.concatenate([new_cell, new_gm], axis=1),
                            p['w_out'], filter_size)              # [B,4nh,T,H,W]

    h_q = pl.pallas_call(
        _hidden_kernel,
        out_shape=jax.ShapeDtypeStruct((b, l, nh), jnp.float32),
    )(g_q, o_all.reshape(b, 4, l, nh))
    return h_q.reshape(b, nh, t, hh, ww), new_cell, new_gm


# ----------------------------------------------------------------------------
# Model
# ----------------------------------------------------------------------------
class Configs:
    seq_len = 4
    pred_len = 2
    e_layers = 2
    d_model = 8          # num_hidden
    enc_in = 1
    patch_size = 2
    height = 8
    width = 8
    curriculum_learning_strategy = 'none'


def init_params(key, cfg, window_length=2, filter_size=(2, 5, 5)):
    nh = cfg.d_model
    d_patch = cfg.patch_size * cfg.patch_size * cfg.enc_in
    h = cfg.height // cfg.patch_size
    w = cfg.width // cfg.patch_size
    kt, kh, kw = filter_size
    ct_, ch_, cw_ = (kt - 1) // 2, (kh - 1) // 2, (kw - 1) // 2

    def conv_w(k, cout, cin, kkt, kkh, kkw):
        fan_in = cin * kkt * kkh * kkw
        return jax.random.normal(k, (cout, cin, kkt, kkh, kkw),
                                 jnp.float32) / jnp.sqrt(fan_in)

    def to_mat(wc):   # [Cout, Cin, kt, kh, kw] -> [kt*kh*kw*Cin, Cout]
        return jnp.transpose(wc, (2, 3, 4, 1, 0)).reshape(-1, wc.shape[0])

    keys = jax.random.split(key, cfg.e_layers * 6 + 1)
    cells = []
    for i in range(cfg.e_layers):
        in_ch = d_patch if i == 0 else nh
        k0, k1, k2, k3, k4, k5 = keys[i * 6:(i + 1) * 6]
        wx = conv_w(k0, nh * 7, in_ch, kt, kh, kw)
        wh = conv_w(k1, nh * 4, nh, kt, kh, kw)
        wgm = conv_w(k2, nh * 4, nh, kt, kh, kw)
        wnc = conv_w(k3, nh, nh, kt, kh, kw)
        wngm = conv_w(k4, nh, nh, kt, kh, kw)
        wlast = conv_w(k5, nh, nh * 2, 1, 1, 1)

        # block-diagonal combined gate conv over concat([x, h, gm], ch)
        cin_tot = in_ch + 2 * nh
        wg = jnp.zeros((15 * nh, cin_tot, kt, kh, kw), jnp.float32)
        wg = wg.at[0:7 * nh, 0:in_ch].set(wx)
        wg = wg.at[7 * nh:11 * nh, in_ch:in_ch + nh].set(wh)
        wg = wg.at[11 * nh:15 * nh, in_ch + nh:].set(wgm)

        # combined output conv over concat([new_cell, new_gm], ch) producing
        # [o_c | wlast(cell) | o_m | wlast(gm)]; the 1x1x1 wlast sits at the
        # centre tap of the 'same' kernel (rides in the padded output lanes).
        wo = jnp.zeros((4 * nh, 2 * nh, kt, kh, kw), jnp.float32)
        wo = wo.at[0:nh, 0:nh].set(wnc)
        wo = wo.at[nh:2 * nh, 0:nh, ct_, ch_, cw_].set(wlast[:, :nh, 0, 0, 0])
        wo = wo.at[2 * nh:3 * nh, nh:].set(wngm)
        wo = wo.at[3 * nh:4 * nh, nh:, ct_, ch_, cw_].set(wlast[:, nh:, 0, 0, 0])

        cells.append(dict(
            w_gates=to_mat(wg),
            w_out=to_mat(wo),
            ln_w=jnp.ones((nh, window_length, h, w), jnp.float32),
            ln_b=jnp.zeros((nh, window_length, h, w), jnp.float32),
        ))
    w_conv_last = conv_w(keys[-1], d_patch, nh, window_length, 1, 1)
    return dict(cells=cells, w_last=to_mat(w_conv_last))


def e3dlstm_forward(params, cfg, x_enc, x_mark_enc, x_dec, x_mark_dec, mask_true,
                    window_length=2, window_stride=1, filter_size=(2, 5, 5)):
    del x_mark_enc, x_mark_dec                                    # unused by reference
    nh = cfg.d_model
    nl = cfg.e_layers
    p_sz = cfg.patch_size

    mask_true = jnp.transpose(mask_true, (0, 1, 4, 2, 3))         # b t h w c -> b t c h w
    x = jnp.concatenate([x_enc, x_dec[:, -cfg.pred_len:]], axis=1)
    b, t, htot, wtot, cch = x.shape
    h, w = htot // p_sz, wtot // p_sz
    # b t (p1 h) (p2 w) c -> b t (c p1 p2) h w
    x_ts = x.reshape(b, t, p_sz, h, p_sz, w, cch).transpose(0, 1, 6, 2, 4, 3, 5)
    x_ts = x_ts.reshape(b, t, cch * p_sz * p_sz, h, w)

    zeros = jnp.zeros((b, nh, window_length, h, w), jnp.float32)
    h_t = [zeros] * nl
    c_t = [zeros] * nl
    c_history = [None] * nl
    input_list = [jnp.zeros_like(x_ts[:, 0]) for _ in range(window_length - 1)]
    memory = zeros

    predictions = []
    x_gen = None
    x_win = None
    cls = cfg.curriculum_learning_strategy
    for step in range(cfg.seq_len + cfg.pred_len - 1):
        if cls == 'rss':
            if step == 0:
                x_cur = x_ts[:, step]
            else:
                m = mask_true[:, step - 1]
                x_cur = m * x_ts[:, step] + (1 - m) * x_gen
        elif cls == 'ss':
            if step < cfg.seq_len:
                x_cur = x_ts[:, step]
            else:
                m = mask_true[:, step - cfg.seq_len]
                x_cur = m * x_ts[:, step] + (1 - m) * x_gen
        elif step < cfg.seq_len:
            x_cur = x_ts[:, step]
        else:
            x_cur = x_gen

        input_list.append(x_cur)
        if step % (window_length - window_stride) == 0:
            x_win = jnp.stack(input_list[step:], axis=2)          # [B, D, wl, h, w]

        for i in range(nl):
            if step == 0:
                c_history[i] = c_t[i]
            else:
                c_history[i] = jnp.concatenate([c_history[i], c_t[i]], axis=1)
            inp = x_win if i == 0 else h_t[i - 1]
            h_t[i], c_t[i], memory = eidetic_cell_forward(
                params['cells'][i], nh, filter_size, inp, h_t[i], c_t[i], memory,
                c_history[i])

        x_gen = conv3d_mat(h_t[nl - 1], params['w_last'], (window_length, 1, 1),
                           stride=(window_length, 1, 1))[:, :, 0]
        if step >= cfg.seq_len - 1:
            predictions.append(x_gen)

    dec_out = jnp.stack(predictions, axis=1)                      # [B, pred_len, d_patch, h, w]
    tp = dec_out.shape[1]
    dec_out = dec_out.reshape(b, tp, cch, p_sz, p_sz, h, w)
    dec_out = dec_out.transpose(0, 1, 3, 5, 4, 6, 2).reshape(
        b, tp, p_sz * h, p_sz * w, cch)
    return dec_out, None


# ----------------------------------------------------------------------------
if __name__ == "__main__":
    cfg = Configs()
    key = jax.random.PRNGKey(0)
    kparam, k1, k2, k3 = jax.random.split(key, 4)
    params = init_params(kparam, cfg)

    B = 2
    label_len = 2
    x_enc = jax.random.normal(k1, (B, cfg.seq_len, cfg.height, cfg.width, cfg.enc_in),
                              jnp.float32)
    x_dec = jax.random.normal(k2, (B, label_len + cfg.pred_len, cfg.height, cfg.width,
                                   cfg.enc_in), jnp.float32)
    x_mark_enc = jnp.zeros((B, cfg.seq_len, 4), jnp.float32)
    x_mark_dec = jnp.zeros((B, label_len + cfg.pred_len, 4), jnp.float32)

    d_patch = cfg.patch_size * cfg.patch_size * cfg.enc_in
    hp, wp = cfg.height // cfg.patch_size, cfg.width // cfg.patch_size
    total_t = cfg.seq_len + cfg.pred_len
    mask_true = jax.random.uniform(k3, (B, total_t - 1, hp, wp, d_patch), jnp.float32)

    forward = jax.jit(
        lambda prm, xe, xme, xd, xmd, mt: e3dlstm_forward(prm, cfg, xe, xme, xd, xmd, mt))

    dec_out, _ = forward(params, x_enc, x_mark_enc, x_dec, x_mark_dec, mask_true)
    dec_out = jax.block_until_ready(dec_out)

    assert dec_out.shape == (B, cfg.pred_len, cfg.height, cfg.width, cfg.enc_in), dec_out.shape
    assert bool(jnp.all(jnp.isfinite(dec_out)))
    print("KERNEL_OK")
</pallas_src>

<mosaic_0001>
module attributes {stable_mosaic.version = 11 : i64} {
  func.func @_mm_kernel(%arg0: i32, %arg1: i32, %arg2: i32, %arg3: memref<64x1024xbf16, #tpu.memory_space<vmem>>, %arg4: memref<1024x128xbf16, #tpu.memory_space<vmem>>, %arg5: memref<64x128xf32, #tpu.memory_space<vmem>>, %arg6: memref<64x128xf32, #tpu.memory_space<vmem>>) attributes {dimension_semantics = [#tpu.dimension_semantics<parallel>, #tpu.dimension_semantics<parallel>, #tpu.dimension_semantics<arbitrary>], iteration_bounds = array<i64: 1, 1, 1>, scalar_prefetch = 0 : i64, scratch_operands = 1 : i64, tpu.core_type = #tpu.core_type<tc>, window_params = [{transform_indices = @transform_0, window_bounds = array<i64: 64, 1024>}, {transform_indices = @transform_1, window_bounds = array<i64: 1024, 128>}, {transform_indices = @transform_2, window_bounds = array<i64: 64, 128>}]} {
    %c0_i32 = arith.constant 0 : i32
    %0 = arith.cmpi eq, %arg2, %c0_i32 : i32
    %1 = arith.extui %0 : i1 to i32
    %c0_i32_0 = arith.constant 0 : i32
    %2 = arith.cmpi ne, %1, %c0_i32_0 : i32
    scf.if %2 {
      %cst_10 = arith.constant 0.000000e+00 : f32
      %12 = vector.broadcast %cst_10 : f32 to vector<64x128xf32>
      %c0_11 = arith.constant 0 : index
      %c0_12 = arith.constant 0 : index
      %13 = vector.load %arg6[%c0_11, %c0_12] : memref<64x128xf32, #tpu.memory_space<vmem>>, vector<64x128xf32>
      tpu.vector_store %arg6[%c0_11, %c0_12], %12 {strides = array<i32>} : memref<64x128xf32, #tpu.memory_space<vmem>>, vector<64x128xf32>,
    } else {
    }
    %c0 = arith.constant 0 : index
    %c0_1 = arith.constant 0 : index
    %3 = vector.load %arg6[%c0, %c0_1] : memref<64x128xf32, #tpu.memory_space<vmem>>, vector<64x128xf32>
    %c0_2 = arith.constant 0 : index
    %c0_3 = arith.constant 0 : index
    %4 = vector.load %arg3[%c0_2, %c0_3] : memref<64x1024xbf16, #tpu.memory_space<vmem>>, vector<64x1024xbf16>
    %c0_4 = arith.constant 0 : index
    %c0_5 = arith.constant 0 : index
    %5 = vector.load %arg4[%c0_4, %c0_5] : memref<1024x128xbf16, #tpu.memory_space<vmem>>, vector<1024x128xbf16>
    %cst = arith.constant dense<0.000000e+00> : vector<64x128xf32>
    %6 = tpu.matmul %4, %5, %cst {dimension_numbers = #tpu.dot_dimension_numbers<[1], [0], [0], [1], [0, 0, 1, 1], [], []>} : vector<64x1024xbf16>, vector<1024x128xbf16>, vector<64x128xf32> -> vector<64x128xf32>
    %7 = arith.addf %3, %6 : vector<64x128xf32>
    %c0_6 = arith.constant 0 : index
    %c0_7 = arith.constant 0 : index
    %8 = vector.load %arg6[%c0_6, %c0_7] : memref<64x128xf32, #tpu.memory_space<vmem>>, vector<64x128xf32>
    tpu.vector_store %arg6[%c0_6, %c0_7], %7 {strides = array<i32>} : memref<64x128xf32, #tpu.memory_space<vmem>>, vector<64x128xf32>,
    %c0_i32_8 = arith.constant 0 : i32
    %9 = arith.cmpi eq, %arg2, %c0_i32_8 : i32
    %10 = arith.extui %9 : i1 to i32
    %c0_i32_9 = arith.constant 0 : i32
    %11 = arith.cmpi ne, %10, %c0_i32_9 : i32
    scf.if %11 {
      %c0_10 = arith.constant 0 : index
      %c0_11 = arith.constant 0 : index
      %12 = vector.load %arg6[%c0_10, %c0_11] : memref<64x128xf32, #tpu.memory_space<vmem>>, vector<64x128xf32>
      %c0_12 = arith.constant 0 : index
      %c0_13 = arith.constant 0 : index
      %13 = vector.load %arg5[%c0_12, %c0_13] : memref<64x128xf32, #tpu.memory_space<vmem>>, vector<64x128xf32>
      tpu.vector_store %arg5[%c0_12, %c0_13], %12 {strides = array<i32>} : memref<64x128xf32, #tpu.memory_space<vmem>>, vector<64x128xf32>,
    } else {
    }
    return
  }
  func.func @transform_0(%arg0: i32, %arg1: i32, %arg2: i32) -> (i32, i32) {
    %c0_i32 = arith.constant 0 : i32
    return %arg0, %arg2 : i32, i32
  }
  func.func @transform_1(%arg0: i32, %arg1: i32, %arg2: i32) -> (i32, i32) {
    %c0_i32 = arith.constant 0 : i32
    return %arg2, %arg1 : i32, i32
  }
  func.func @transform_2(%arg0: i32, %arg1: i32, %arg2: i32) -> (i32, i32) {
    %c0_i32 = arith.constant 0 : i32
    return %arg0, %arg1 : i32, i32
  }
}

module attributes {stable_mosaic.version = 11 : i64} {
  func.func @_cell_core_kernel(%arg0: memref<2x15x32x8xf32, #tpu.memory_space<vmem>>, %arg1: memref<2x32x8xf32, #tpu.memory_space<vmem>>, %arg2: memref<2x32x8xf32, #tpu.memory_space<vmem>>, %arg3: memref<1x32x8xf32, #tpu.memory_space<vmem>>, %arg4: memref<1x32x8xf32, #tpu.memory_space<vmem>>, %arg5: memref<2x32x8xf32, #tpu.memory_space<vmem>>, %arg6: memref<2x32x8xf32, #tpu.memory_space<vmem>>) attributes {dimension_semantics = [], scalar_prefetch = 0 : i64, scratch_operands = 0 : i64, tpu.core_type = #tpu.core_type<tc>} {
    %c0 = arith.constant 0 : index
    %c0_0 = arith.constant 0 : index
    %c0_1 = arith.constant 0 : index
    %c0_2 = arith.constant 0 : index
    %0 = vector.load %arg0[%c0, %c0_0, %c0_1, %c0_2] : memref<2x15x32x8xf32, #tpu.memory_space<vmem>>, vector<2x15x32x8xf32>
    %1 = vector.extract_strided_slice %0 {offsets = [0, 2, 0, 0], sizes = [2, 1, 32, 8], strides = [1, 1, 1, 1]} : vector<2x15x32x8xf32> to vector<2x1x32x8xf32>
    %2 = vector.shape_cast %1 : vector<2x1x32x8xf32> to vector<2x32x8xf32>
    %3 = vector.extract_strided_slice %0 {offsets = [0, 9, 0, 0], sizes = [2, 1, 32, 8], strides = [1, 1, 1, 1]} : vector<2x15x32x8xf32> to vector<2x1x32x8xf32>
    %4 = vector.shape_cast %3 : vector<2x1x32x8xf32> to vector<2x32x8xf32>
    %5 = arith.addf %2, %4 : vector<2x32x8xf32>
    %6 = arith.negf %5 : vector<2x32x8xf32>
    %7 = math.exp %6 : vector<2x32x8xf32>
    %cst = arith.constant 1.000000e+00 : f32
    %8 = vector.broadcast %cst : f32 to vector<2x32x8xf32>
    %9 = arith.addf %8, %7 : vector<2x32x8xf32>
    %10 = arith.divf %8, %9 : vector<2x32x8xf32>
    %11 = vector.extract_strided_slice %0 {offsets = [0, 0, 0, 0], sizes = [2, 1, 32, 8], strides = [1, 1, 1, 1]} : vector<2x15x32x8xf32> to vector<2x1x32x8xf32>
    %12 = vector.shape_cast %11 : vector<2x1x32x8xf32> to vector<2x32x8xf32>
    %13 = vector.extract_strided_slice %0 {offsets = [0, 7, 0, 0], sizes = [2, 1, 32, 8], strides = [1, 1, 1, 1]} : vector<2x15x32x8xf32> to vector<2x1x32x8xf32>
    %14 = vector.shape_cast %13 : vector<2x1x32x8xf32> to vector<2x32x8xf32>
    %15 = arith.addf %12, %14 : vector<2x32x8xf32>
    %16 = arith.negf %15 : vector<2x32x8xf32>
    %17 = math.exp %16 : vector<2x32x8xf32>
    %cst_3 = arith.constant 1.000000e+00 : f32
    %18 = vector.broadcast %cst_3 : f32 to vector<2x32x8xf32>
    %19 = arith.addf %18, %17 : vector<2x32x8xf32>
    %20 = arith.divf %18, %19 : vector<2x32x8xf32>
    %21 = vector.extract_strided_slice %0 {offsets = [0, 1, 0, 0], sizes = [2, 1, 32, 8], strides = [1, 1, 1, 1]} : vector<2x15x32x8xf32> to vector<2x1x32x8xf32>
    %22 = vector.shape_cast %21 : vector<2x1x32x8xf32> to vector<2x32x8xf32>
    %23 = vector.extract_strided_slice %0 {offsets = [0, 8, 0, 0], sizes = [2, 1, 32, 8], strides = [1, 1, 1, 1]} : vector<2x15x32x8xf32> to vector<2x1x32x8xf32>
    %24 = vector.shape_cast %23 : vector<2x1x32x8xf32> to vector<2x32x8xf32>
    %25 = arith.addf %22, %24 : vector<2x32x8xf32>
    %26 = math.tanh %25 : vector<2x32x8xf32>
    %27 = arith.mulf %20, %26 : vector<2x32x8xf32>
    %c0_4 = arith.constant 0 : index
    %c0_5 = arith.constant 0 : index
    %c0_6 = arith.constant 0 : index
    %28 = vector.load %arg2[%c0_4, %c0_5, %c0_6] : memref<2x32x8xf32, #tpu.memory_space<vmem>>, vector<2x32x8xf32>
    "tpu.trace_start"() <{level = 10 : i32, message = "blc,bkc->blk"}> : () -> ()
    %cst_7 = arith.constant dense<0.000000e+00> : vector<2x32x32xf32>
    %29 = tpu.matmul %10, %28, %cst_7 {dimension_numbers = #tpu.dot_dimension_numbers<[2], [2], [1], [1], [0, 0, 0, 1, 1, 1], [0], [0]>} : vector<2x32x8xf32>, vector<2x32x8xf32>, vector<2x32x32xf32> -> vector<2x32x32xf32>
    "tpu.trace_stop"() : () -> ()
    %cst_8 = arith.constant dense<0xFF800000> : vector<2x32xf32>
    %30 = vector.multi_reduction <maximumf>, %29, %cst_8 [2] : vector<2x32x32xf32> to vector<2x32xf32>
    %31 = vector.shape_cast %30 : vector<2x32xf32> to vector<2x32x1xf32>
    %32 = vector.broadcast %31 : vector<2x32x1xf32> to vector<2x32x32xf32>
    %33 = arith.subf %29, %32 : vector<2x32x32xf32>
    %34 = math.exp %33 : vector<2x32x32xf32>
    %cst_9 = arith.constant dense<0.000000e+00> : vector<2x32xf32>
    %35 = vector.multi_reduction <add>, %34, %cst_9 [2] : vector<2x32x32xf32> to vector<2x32xf32>
    %36 = vector.shape_cast %35 : vector<2x32xf32> to vector<2x32x1xf32>
    %37 = tpu.reciprocal %36 {approx = true} : vector<2x32x1xf32> -> vector<2x32x1xf32>
    %38 = vector.broadcast %37 : vector<2x32x1xf32> to vector<2x32x32xf32>
    %39 = arith.mulf %34, %38 : vector<2x32x32xf32>
    "tpu.trace_start"() <{level = 10 : i32, message = "blk,bkc->blc"}> : () -> ()
    %cst_10 = arith.constant dense<0.000000e+00> : vector<2x32x8xf32>
    %40 = tpu.matmul %39, %28, %cst_10 {dimension_numbers = #tpu.dot_dimension_numbers<[2], [1], [1], [2], [0, 0, 0, 1, 1, 2], [0], [0]>} : vector<2x32x32xf32>, vector<2x32x8xf32>, vector<2x32x8xf32> -> vector<2x32x8xf32>
    "tpu.trace_stop"() : () -> ()
    %c0_11 = arith.constant 0 : index
    %c0_12 = arith.constant 0 : index
    %c0_13 = arith.constant 0 : index
    %41 = vector.load %arg1[%c0_11, %c0_12, %c0_13] : memref<2x32x8xf32, #tpu.memory_space<vmem>>, vector<2x32x8xf32>
    %42 = arith.addf %41, %40 : vector<2x32x8xf32>
    %cst_14 = arith.constant dense<0.000000e+00> : vector<2x32xf32>
    %43 = vector.multi_reduction <add>, %42, %cst_14 [2] : vector<2x32x8xf32> to vector<2x32xf32>
    %44 = vector.shape_cast %43 : vector<2x32xf32> to vector<2x32x1xf32>
    %cst_15 = arith.constant dense<0.000000e+00> : vector<2x1xf32>
    %45 = vector.multi_reduction <add>, %44, %cst_15 [1] : vector<2x32x1xf32> to vector<2x1xf32>
    %46 = vector.shape_cast %45 : vector<2x1xf32> to vector<2x1x1xf32>
    %cst_16 = arith.constant 3.906250e-03 : f32
    %47 = vector.broadcast %cst_16 : f32 to vector<2x1x1xf32>
    %48 = arith.mulf %46, %47 : vector<2x1x1xf32>
    %49 = vector.broadcast %48 : vector<2x1x1xf32> to vector<2x32x8xf32>
    %50 = arith.subf %42, %49 : vector<2x32x8xf32>
    %51 = arith.mulf %50, %50 : vector<2x32x8xf32>
    %cst_17 = arith.constant dense<0.000000e+00> : vector<2x32xf32>
    %52 = vector.multi_reduction <add>, %51, %cst_17 [2] : vector<2x32x8xf32> to vector<2x32xf32>
    %53 = vector.shape_cast %52 : vector<2x32xf32> to vector<2x32x1xf32>
    %cst_18 = arith.constant dense<0.000000e+00> : vector<2x1xf32>
    %54 = vector.multi_reduction <add>, %53, %cst_18 [1] : vector<2x32x1xf32> to vector<2x1xf32>
    %55 = vector.shape_cast %54 : vector<2x1xf32> to vector<2x1x1xf32>
    %cst_19 = arith.constant 3.906250e-03 : f32
    %56 = vector.broadcast %cst_19 : f32 to vector<2x1x1xf32>
    %57 = arith.mulf %55, %56 : vector<2x1x1xf32>
    %cst_20 = arith.constant 9.99999974E-6 : f32
    %58 = vector.broadcast %cst_20 : f32 to vector<2x1x1xf32>
    %59 = arith.addf %57, %58 : vector<2x1x1xf32>
    %60 = math.rsqrt %59 : vector<2x1x1xf32>
    %61 = vector.broadcast %60 : vector<2x1x1xf32> to vector<2x32x8xf32>
    %62 = arith.mulf %50, %61 : vector<2x32x8xf32>
    %c0_21 = arith.constant 0 : index
    %c0_22 = arith.constant 0 : index
    %c0_23 = arith.constant 0 : index
    %63 = vector.load %arg3[%c0_21, %c0_22, %c0_23] : memref<1x32x8xf32, #tpu.memory_space<vmem>>, vector<1x32x8xf32>
    %64 = vector.broadcast %63 : vector<1x32x8xf32> to vector<2x32x8xf32>
    %65 = arith.mulf %62, %64 : vector<2x32x8xf32>
    %c0_24 = arith.constant 0 : index
    %c0_25 = arith.constant 0 : index
    %c0_26 = arith.constant 0 : index
    %66 = vector.load %arg4[%c0_24, %c0_25, %c0_26] : memref<1x32x8xf32, #tpu.memory_space<vmem>>, vector<1x32x8xf32>
    %67 = vector.broadcast %66 : vector<1x32x8xf32> to vector<2x32x8xf32>
    %68 = arith.addf %65, %67 : vector<2x32x8xf32>
    %69 = arith.addf %68, %27 : vector<2x32x8xf32>
    %c0_27 = arith.constant 0 : index
    %c0_28 = arith.constant 0 : index
    %c0_29 = arith.constant 0 : index
    %70 = vector.load %arg5[%c0_27, %c0_28, %c0_29] : memref<2x32x8xf32, #tpu.memory_space<vmem>>, vector<2x32x8xf32>
    tpu.vector_store %arg5[%c0_27, %c0_28, %c0_29], %69 {strides = array<i32>} : memref<2x32x8xf32, #tpu.memory_space<vmem>>, vector<2x32x8xf32>,
    %71 = vector.extract_strided_slice %0 {offsets = [0, 3, 0, 0], sizes = [2, 1, 32, 8], strides = [1, 1, 1, 1]} : vector<2x15x32x8xf32> to vector<2x1x32x8xf32>
    %72 = vector.shape_cast %71 : vector<2x1x32x8xf32> to vector<2x32x8xf32>
    %73 = vector.extract_strided_slice %0 {offsets = [0, 11, 0, 0], sizes = [2, 1, 32, 8], strides = [1, 1, 1, 1]} : vector<2x15x32x8xf32> to vector<2x1x32x8xf32>
    %74 = vector.shape_cast %73 : vector<2x1x32x8xf32> to vector<2x32x8xf32>
    %75 = arith.addf %72, %74 : vector<2x32x8xf32>
    %76 = arith.negf %75 : vector<2x32x8xf32>
    %77 = math.exp %76 : vector<2x32x8xf32>
    %cst_30 = arith.constant 1.000000e+00 : f32
    %78 = vector.broadcast %cst_30 : f32 to vector<2x32x8xf32>
    %79 = arith.addf %78, %77 : vector<2x32x8xf32>
    %80 = arith.divf %78, %79 : vector<2x32x8xf32>
    %81 = vector.extract_strided_slice %0 {offsets = [0, 5, 0, 0], sizes = [2, 1, 32, 8], strides = [1, 1, 1, 1]} : vector<2x15x32x8xf32> to vector<2x1x32x8xf32>
    %82 = vector.shape_cast %81 : vector<2x1x32x8xf32> to vector<2x32x8xf32>
    %83 = vector.extract_strided_slice %0 {offsets = [0, 12, 0, 0], sizes = [2, 1, 32, 8], strides = [1, 1, 1, 1]} : vector<2x15x32x8xf32> to vector<2x1x32x8xf32>
    %84 = vector.shape_cast %83 : vector<2x1x32x8xf32> to vector<2x32x8xf32>
    %85 = arith.addf %82, %84 : vector<2x32x8xf32>
    %cst_31 = arith.constant 1.000000e+00 : f32
    %86 = vector.broadcast %cst_31 : f32 to vector<2x32x8xf32>
    %87 = arith.addf %85, %86 : vector<2x32x8xf32>
    %88 = arith.negf %87 : vector<2x32x8xf32>
    %89 = math.exp %88 : vector<2x32x8xf32>
    %cst_32 = arith.constant 1.000000e+00 : f32
    %90 = vector.broadcast %cst_32 : f32 to vector<2x32x8xf32>
    %91 = arith.addf %90, %89 : vector<2x32x8xf32>
    %92 = arith.divf %90, %91 : vector<2x32x8xf32>
    %93 = vector.extract_strided_slice %0 {offsets = [0, 4, 0, 0], sizes = [2, 1, 32, 8], strides = [1, 1, 1, 1]} : vector<2x15x32x8xf32> to vector<2x1x32x8xf32>
    %94 = vector.shape_cast %93 : vector<2x1x32x8xf32> to vector<2x32x8xf32>
    %95 = vector.extract_strided_slice %0 {offsets = [0, 13, 0, 0], sizes = [2, 1, 32, 8], strides = [1, 1, 1, 1]} : vector<2x15x32x8xf32> to vector<2x1x32x8xf32>
    %96 = vector.shape_cast %95 : vector<2x1x32x8xf32> to vector<2x32x8xf32>
    %97 = arith.addf %94, %96 : vector<2x32x8xf32>
    %98 = math.tanh %97 : vector<2x32x8xf32>
    %99 = vector.extract_strided_slice %0 {offsets = [0, 14, 0, 0], sizes = [2, 1, 32, 8], strides = [1, 1, 1, 1]} : vector<2x15x32x8xf32> to vector<2x1x32x8xf32>
    %100 = vector.shape_cast %99 : vector<2x1x32x8xf32> to vector<2x32x8xf32>
    %101 = math.tanh %100 : vector<2x32x8xf32>
    %102 = arith.mulf %92, %101 : vector<2x32x8xf32>
    %103 = arith.mulf %80, %98 : vector<2x32x8xf32>
    %104 = arith.addf %102, %103 : vector<2x32x8xf32>
    %c0_33 = arith.constant 0 : index
    %c0_34 = arith.constant 0 : index
    %c0_35 = arith.constant 0 : index
    %105 = vector.load %arg6[%c0_33, %c0_34, %c0_35] : memref<2x32x8xf32, #tpu.memory_space<vmem>>, vector<2x32x8xf32>
    tpu.vector_store %arg6[%c0_33, %c0_34, %c0_35], %104 {strides = array<i32>} : memref<2x32x8xf32, #tpu.memory_space<vmem>>, vector<2x32x8xf32>,
    return
  }
}

module attributes {stable_mosaic.version = 11 : i64} {
  func.func @_mm_kernel(%arg0: i32, %arg1: i32, %arg2: i32, %arg3: memref<64x896xbf16, #tpu.memory_space<vmem>>, %arg4: memref<896x128xbf16, #tpu.memory_space<vmem>>, %arg5: memref<64x128xf32, #tpu.memory_space<vmem>>, %arg6: memref<64x128xf32, #tpu.memory_space<vmem>>) attributes {dimension_semantics = [#tpu.dimension_semantics<parallel>, #tpu.dimension_semantics<parallel>, #tpu.dimension_semantics<arbitrary>], iteration_bounds = array<i64: 1, 1, 1>, scalar_prefetch = 0 : i64, scratch_operands = 1 : i64, tpu.core_type = #tpu.core_type<tc>, window_params = [{transform_indices = @transform_0, window_bounds = array<i64: 64, 896>}, {transform_indices = @transform_1, window_bounds = array<i64: 896, 128>}, {transform_indices = @transform_2, window_bounds = array<i64: 64, 128>}]} {
    %c0_i32 = arith.constant 0 : i32
    %0 = arith.cmpi eq, %arg2, %c0_i32 : i32
    %1 = arith.extui %0 : i1 to i32
    %c0_i32_0 = arith.constant 0 : i32
    %2 = arith.cmpi ne, %1, %c0_i32_0 : i32
    scf.if %2 {
      %cst_10 = arith.constant 0.000000e+00 : f32
      %12 = vector.broadcast %cst_10 : f32 to vector<64x128xf32>
      %c0_11 = arith.constant 0 : index
      %c0_12 = arith.constant 0 : index
      %13 = vector.load %arg6[%c0_11, %c0_12] : memref<64x128xf32, #tpu.memory_space<vmem>>, vector<64x128xf32>
      tpu.vector_store %arg6[%c0_11, %c0_12], %12 {strides = array<i32>} : memref<64x128xf32, #tpu.memory_space<vmem>>, vector<64x128xf32>,
    } else {
    }
    %c0 = arith.constant 0 : index
    %c0_1 = arith.constant 0 : index
    %3 = vector.load %arg6[%c0, %c0_1] : memref<64x128xf32, #tpu.memory_space<vmem>>, vector<64x128xf32>
    %c0_2 = arith.constant 0 : index
    %c0_3 = arith.constant 0 : index
    %4 = vector.load %arg3[%c0_2, %c0_3] : memref<64x896xbf16, #tpu.memory_space<vmem>>, vector<64x896xbf16>
    %c0_4 = arith.constant 0 : index
    %c0_5 = arith.constant 0 : index
    %5 = vector.load %arg4[%c0_4, %c0_5] : memref<896x128xbf16, #tpu.memory_space<vmem>>, vector<896x128xbf16>
    %cst = arith.constant dense<0.000000e+00> : vector<64x128xf32>
    %6 = tpu.matmul %4, %5, %cst {dimension_numbers = #tpu.dot_dimension_numbers<[1], [0], [0], [1], [0, 0, 1, 1], [], []>} : vector<64x896xbf16>, vector<896x128xbf16>, vector<64x128xf32> -> vector<64x128xf32>
    %7 = arith.addf %3, %6 : vector<64x128xf32>
    %c0_6 = arith.constant 0 : index
    %c0_7 = arith.constant 0 : index
    %8 = vector.load %arg6[%c0_6, %c0_7] : memref<64x128xf32, #tpu.memory_space<vmem>>, vector<64x128xf32>
    tpu.vector_store %arg6[%c0_6, %c0_7], %7 {strides = array<i32>} : memref<64x128xf32, #tpu.memory_space<vmem>>, vector<64x128xf32>,
    %c0_i32_8 = arith.constant 0 : i32
    %9 = arith.cmpi eq, %arg2, %c0_i32_8 : i32
    %10 = arith.extui %9 : i1 to i32
    %c0_i32_9 = arith.constant 0 : i32
    %11 = arith.cmpi ne, %10, %c0_i32_9 : i32
    scf.if %11 {
      %c0_10 = arith.constant 0 : index
      %c0_11 = arith.constant 0 : index
      %12 = vector.load %arg6[%c0_10, %c0_11] : memref<64x128xf32, #tpu.memory_space<vmem>>, vector<64x128xf32>
      %c0_12 = arith.constant 0 : index
      %c0_13 = arith.constant 0 : index
      %13 = vector.load %arg5[%c0_12, %c0_13] : memref<64x128xf32, #tpu.memory_space<vmem>>, vector<64x128xf32>
      tpu.vector_store %arg5[%c0_12, %c0_13], %12 {strides = array<i32>} : memref<64x128xf32, #tpu.memory_space<vmem>>, vector<64x128xf32>,
    } else {
    }
    return
  }
  func.func @transform_0(%arg0: i32, %arg1: i32, %arg2: i32) -> (i32, i32) {
    %c0_i32 = arith.constant 0 : i32
    return %arg0, %arg2 : i32, i32
  }
  func.func @transform_1(%arg0: i32, %arg1: i32, %arg2: i32) -> (i32, i32) {
    %c0_i32 = arith.constant 0 : i32
    return %arg2, %arg1 : i32, i32
  }
  func.func @transform_2(%arg0: i32, %arg1: i32, %arg2: i32) -> (i32, i32) {
    %c0_i32 = arith.constant 0 : i32
    return %arg0, %arg1 : i32, i32
  }
}

module attributes {stable_mosaic.version = 11 : i64} {
  func.func @_hidden_kernel(%arg0: memref<2x15x32x8xf32, #tpu.memory_space<vmem>>, %arg1: memref<2x4x32x8xf32, #tpu.memory_space<vmem>>, %arg2: memref<2x32x8xf32, #tpu.memory_space<vmem>>) attributes {dimension_semantics = [], scalar_prefetch = 0 : i64, scratch_operands = 0 : i64, tpu.core_type = #tpu.core_type<tc>} {
    %c0 = arith.constant 0 : index
    %c0_0 = arith.constant 0 : index
    %c0_1 = arith.constant 0 : index
    %c0_2 = arith.constant 0 : index
    %0 = vector.load %arg0[%c0, %c0_0, %c0_1, %c0_2] : memref<2x15x32x8xf32, #tpu.memory_space<vmem>>, vector<2x15x32x8xf32>
    %c0_3 = arith.constant 0 : index
    %c0_4 = arith.constant 0 : index
    %c0_5 = arith.constant 0 : index
    %c0_6 = arith.constant 0 : index
    %1 = vector.load %arg1[%c0_3, %c0_4, %c0_5, %c0_6] : memref<2x4x32x8xf32, #tpu.memory_space<vmem>>, vector<2x4x32x8xf32>
    %2 = vector.extract_strided_slice %0 {offsets = [0, 6, 0, 0], sizes = [2, 1, 32, 8], strides = [1, 1, 1, 1]} : vector<2x15x32x8xf32> to vector<2x1x32x8xf32>
    %3 = vector.shape_cast %2 : vector<2x1x32x8xf32> to vector<2x32x8xf32>
    %4 = vector.extract_strided_slice %0 {offsets = [0, 10, 0, 0], sizes = [2, 1, 32, 8], strides = [1, 1, 1, 1]} : vector<2x15x32x8xf32> to vector<2x1x32x8xf32>
    %5 = vector.shape_cast %4 : vector<2x1x32x8xf32> to vector<2x32x8xf32>
    %6 = arith.addf %3, %5 : vector<2x32x8xf32>
    %7 = vector.extract_strided_slice %1 {offsets = [0, 0, 0, 0], sizes = [2, 1, 32, 8], strides = [1, 1, 1, 1]} : vector<2x4x32x8xf32> to vector<2x1x32x8xf32>
    %8 = vector.shape_cast %7 : vector<2x1x32x8xf32> to vector<2x32x8xf32>
    %9 = arith.addf %6, %8 : vector<2x32x8xf32>
    %10 = vector.extract_strided_slice %1 {offsets = [0, 2, 0, 0], sizes = [2, 1, 32, 8], strides = [1, 1, 1, 1]} : vector<2x4x32x8xf32> to vector<2x1x32x8xf32>
    %11 = vector.shape_cast %10 : vector<2x1x32x8xf32> to vector<2x32x8xf32>
    %12 = arith.addf %9, %11 : vector<2x32x8xf32>
    %13 = math.tanh %12 : vector<2x32x8xf32>
    %14 = vector.extract_strided_slice %1 {offsets = [0, 1, 0, 0], sizes = [2, 1, 32, 8], strides = [1, 1, 1, 1]} : vector<2x4x32x8xf32> to vector<2x1x32x8xf32>
    %15 = vector.shape_cast %14 : vector<2x1x32x8xf32> to vector<2x32x8xf32>
    %16 = vector.extract_strided_slice %1 {offsets = [0, 3, 0, 0], sizes = [2, 1, 32, 8], strides = [1, 1, 1, 1]} : vector<2x4x32x8xf32> to vector<2x1x32x8xf32>
    %17 = vector.shape_cast %16 : vector<2x1x32x8xf32> to vector<2x32x8xf32>
    %18 = arith.addf %15, %17 : vector<2x32x8xf32>
    %19 = math.tanh %18 : vector<2x32x8xf32>
    %20 = arith.negf %13 : vector<2x32x8xf32>
    %21 = math.exp %20 : vector<2x32x8xf32>
    %cst = arith.constant 1.000000e+00 : f32
    %22 = vector.broadcast %cst : f32 to vector<2x32x8xf32>
    %23 = arith.addf %22, %21 : vector<2x32x8xf32>
    %24 = arith.divf %22, %23 : vector<2x32x8xf32>
    %25 = arith.mulf %19, %24 : vector<2x32x8xf32>
    %c0_7 = arith.constant 0 : index
    %c0_8 = arith.constant 0 : index
    %c0_9 = arith.constant 0 : index
    %26 = vector.load %arg2[%c0_7, %c0_8, %c0_9] : memref<2x32x8xf32, #tpu.memory_space<vmem>>, vector<2x32x8xf32>
    tpu.vector_store %arg2[%c0_7, %c0_8, %c0_9], %25 {strides = array<i32>} : memref<2x32x8xf32, #tpu.memory_space<vmem>>, vector<2x32x8xf32>,
    return
  }
}

module attributes {stable_mosaic.version = 11 : i64} {
  func.func @_mm_kernel(%arg0: i32, %arg1: i32, %arg2: i32, %arg3: memref<64x1280xbf16, #tpu.memory_space<vmem>>, %arg4: memref<1280x128xbf16, #tpu.memory_space<vmem>>, %arg5: memref<64x128xf32, #tpu.memory_space<vmem>>, %arg6: memref<64x128xf32, #tpu.memory_space<vmem>>) attributes {dimension_semantics = [#tpu.dimension_semantics<parallel>, #tpu.dimension_semantics<parallel>, #tpu.dimension_semantics<arbitrary>], iteration_bounds = array<i64: 1, 1, 1>, scalar_prefetch = 0 : i64, scratch_operands = 1 : i64, tpu.core_type = #tpu.core_type<tc>, window_params = [{transform_indices = @transform_0, window_bounds = array<i64: 64, 1280>}, {transform_indices = @transform_1, window_bounds = array<i64: 1280, 128>}, {transform_indices = @transform_2, window_bounds = array<i64: 64, 128>}]} {
    %c0_i32 = arith.constant 0 : i32
    %0 = arith.cmpi eq, %arg2, %c0_i32 : i32
    %1 = arith.extui %0 : i1 to i32
    %c0_i32_0 = arith.constant 0 : i32
    %2 = arith.cmpi ne, %1, %c0_i32_0 : i32
    scf.if %2 {
      %cst_10 = arith.constant 0.000000e+00 : f32
      %12 = vector.broadcast %cst_10 : f32 to vector<64x128xf32>
      %c0_11 = arith.constant 0 : index
      %c0_12 = arith.constant 0 : index
      %13 = vector.load %arg6[%c0_11, %c0_12] : memref<64x128xf32, #tpu.memory_space<vmem>>, vector<64x128xf32>
      tpu.vector_store %arg6[%c0_11, %c0_12], %12 {strides = array<i32>} : memref<64x128xf32, #tpu.memory_space<vmem>>, vector<64x128xf32>,
    } else {
    }
    %c0 = arith.constant 0 : index
    %c0_1 = arith.constant 0 : index
    %3 = vector.load %arg6[%c0, %c0_1] : memref<64x128xf32, #tpu.memory_space<vmem>>, vector<64x128xf32>
    %c0_2 = arith.constant 0 : index
    %c0_3 = arith.constant 0 : index
    %4 = vector.load %arg3[%c0_2, %c0_3] : memref<64x1280xbf16, #tpu.memory_space<vmem>>, vector<64x1280xbf16>
    %c0_4 = arith.constant 0 : index
    %c0_5 = arith.constant 0 : index
    %5 = vector.load %arg4[%c0_4, %c0_5] : memref<1280x128xbf16, #tpu.memory_space<vmem>>, vector<1280x128xbf16>
    %cst = arith.constant dense<0.000000e+00> : vector<64x128xf32>
    %6 = tpu.matmul %4, %5, %cst {dimension_numbers = #tpu.dot_dimension_numbers<[1], [0], [0], [1], [0, 0, 1, 1], [], []>} : vector<64x1280xbf16>, vector<1280x128xbf16>, vector<64x128xf32> -> vector<64x128xf32>
    %7 = arith.addf %3, %6 : vector<64x128xf32>
    %c0_6 = arith.constant 0 : index
    %c0_7 = arith.constant 0 : index
    %8 = vector.load %arg6[%c0_6, %c0_7] : memref<64x128xf32, #tpu.memory_space<vmem>>, vector<64x128xf32>
    tpu.vector_store %arg6[%c0_6, %c0_7], %7 {strides = array<i32>} : memref<64x128xf32, #tpu.memory_space<vmem>>, vector<64x128xf32>,
    %c0_i32_8 = arith.constant 0 : i32
    %9 = arith.cmpi eq, %arg2, %c0_i32_8 : i32
    %10 = arith.extui %9 : i1 to i32
    %c0_i32_9 = arith.constant 0 : i32
    %11 = arith.cmpi ne, %10, %c0_i32_9 : i32
    scf.if %11 {
      %c0_10 = arith.constant 0 : index
      %c0_11 = arith.constant 0 : index
      %12 = vector.load %arg6[%c0_10, %c0_11] : memref<64x128xf32, #tpu.memory_space<vmem>>, vector<64x128xf32>
      %c0_12 = arith.constant 0 : index
      %c0_13 = arith.constant 0 : index
      %13 = vector.load %arg5[%c0_12, %c0_13] : memref<64x128xf32, #tpu.memory_space<vmem>>, vector<64x128xf32>
      tpu.vector_store %arg5[%c0_12, %c0_13], %12 {strides = array<i32>} : memref<64x128xf32, #tpu.memory_space<vmem>>, vector<64x128xf32>,
    } else {
    }
    return
  }
  func.func @transform_0(%arg0: i32, %arg1: i32, %arg2: i32) -> (i32, i32) {
    %c0_i32 = arith.constant 0 : i32
    return %arg0, %arg2 : i32, i32
  }
  func.func @transform_1(%arg0: i32, %arg1: i32, %arg2: i32) -> (i32, i32) {
    %c0_i32 = arith.constant 0 : i32
    return %arg2, %arg1 : i32, i32
  }
  func.func @transform_2(%arg0: i32, %arg1: i32, %arg2: i32) -> (i32, i32) {
    %c0_i32 = arith.constant 0 : i32
    return %arg0, %arg1 : i32, i32
  }
}

module attributes {stable_mosaic.version = 11 : i64} {
  func.func @_cell_core_kernel(%arg0: memref<2x15x32x8xf32, #tpu.memory_space<vmem>>, %arg1: memref<2x32x8xf32, #tpu.memory_space<vmem>>, %arg2: memref<2x64x8xf32, #tpu.memory_space<vmem>>, %arg3: memref<1x32x8xf32, #tpu.memory_space<vmem>>, %arg4: memref<1x32x8xf32, #tpu.memory_space<vmem>>, %arg5: memref<2x32x8xf32, #tpu.memory_space<vmem>>, %arg6: memref<2x32x8xf32, #tpu.memory_space<vmem>>) attributes {dimension_semantics = [], scalar_prefetch = 0 : i64, scratch_operands = 0 : i64, tpu.core_type = #tpu.core_type<tc>} {
    %c0 = arith.constant 0 : index
    %c0_0 = arith.constant 0 : index
    %c0_1 = arith.constant 0 : index
    %c0_2 = arith.constant 0 : index
    %0 = vector.load %arg0[%c0, %c0_0, %c0_1, %c0_2] : memref<2x15x32x8xf32, #tpu.memory_space<vmem>>, vector<2x15x32x8xf32>
    %1 = vector.extract_strided_slice %0 {offsets = [0, 2, 0, 0], sizes = [2, 1, 32, 8], strides = [1, 1, 1, 1]} : vector<2x15x32x8xf32> to vector<2x1x32x8xf32>
    %2 = vector.shape_cast %1 : vector<2x1x32x8xf32> to vector<2x32x8xf32>
    %3 = vector.extract_strided_slice %0 {offsets = [0, 9, 0, 0], sizes = [2, 1, 32, 8], strides = [1, 1, 1, 1]} : vector<2x15x32x8xf32> to vector<2x1x32x8xf32>
    %4 = vector.shape_cast %3 : vector<2x1x32x8xf32> to vector<2x32x8xf32>
    %5 = arith.addf %2, %4 : vector<2x32x8xf32>
    %6 = arith.negf %5 : vector<2x32x8xf32>
    %7 = math.exp %6 : vector<2x32x8xf32>
    %cst = arith.constant 1.000000e+00 : f32
    %8 = vector.broadcast %cst : f32 to vector<2x32x8xf32>
    %9 = arith.addf %8, %7 : vector<2x32x8xf32>
    %10 = arith.divf %8, %9 : vector<2x32x8xf32>
    %11 = vector.extract_strided_slice %0 {offsets = [0, 0, 0, 0], sizes = [2, 1, 32, 8], strides = [1, 1, 1, 1]} : vector<2x15x32x8xf32> to vector<2x1x32x8xf32>
    %12 = vector.shape_cast %11 : vector<2x1x32x8xf32> to vector<2x32x8xf32>
    %13 = vector.extract_strided_slice %0 {offsets = [0, 7, 0, 0], sizes = [2, 1, 32, 8], strides = [1, 1, 1, 1]} : vector<2x15x32x8xf32> to vector<2x1x32x8xf32>
    %14 = vector.shape_cast %13 : vector<2x1x32x8xf32> to vector<2x32x8xf32>
    %15 = arith.addf %12, %14 : vector<2x32x8xf32>
    %16 = arith.negf %15 : vector<2x32x8xf32>
    %17 = math.exp %16 : vector<2x32x8xf32>
    %cst_3 = arith.constant 1.000000e+00 : f32
    %18 = vector.broadcast %cst_3 : f32 to vector<2x32x8xf32>
    %19 = arith.addf %18, %17 : vector<2x32x8xf32>
    %20 = arith.divf %18, %19 : vector<2x32x8xf32>
    %21 = vector.extract_strided_slice %0 {offsets = [0, 1, 0, 0], sizes = [2, 1, 32, 8], strides = [1, 1, 1, 1]} : vector<2x15x32x8xf32> to vector<2x1x32x8xf32>
    %22 = vector.shape_cast %21 : vector<2x1x32x8xf32> to vector<2x32x8xf32>
    %23 = vector.extract_strided_slice %0 {offsets = [0, 8, 0, 0], sizes = [2, 1, 32, 8], strides = [1, 1, 1, 1]} : vector<2x15x32x8xf32> to vector<2x1x32x8xf32>
    %24 = vector.shape_cast %23 : vector<2x1x32x8xf32> to vector<2x32x8xf32>
    %25 = arith.addf %22, %24 : vector<2x32x8xf32>
    %26 = math.tanh %25 : vector<2x32x8xf32>
    %27 = arith.mulf %20, %26 : vector<2x32x8xf32>
    %c0_4 = arith.constant 0 : index
    %c0_5 = arith.constant 0 : index
    %c0_6 = arith.constant 0 : index
    %28 = vector.load %arg2[%c0_4, %c0_5, %c0_6] : memref<2x64x8xf32, #tpu.memory_space<vmem>>, vector<2x64x8xf32>
    "tpu.trace_start"() <{level = 10 : i32, message = "blc,bkc->blk"}> : () -> ()
    %cst_7 = arith.constant dense<0.000000e+00> : vector<2x32x64xf32>
    %29 = tpu.matmul %10, %28, %cst_7 {dimension_numbers = #tpu.dot_dimension_numbers<[2], [2], [1], [1], [0, 0, 0, 1, 1, 1], [0], [0]>} : vector<2x32x8xf32>, vector<2x64x8xf32>, vector<2x32x64xf32> -> vector<2x32x64xf32>
    "tpu.trace_stop"() : () -> ()
    %cst_8 = arith.constant dense<0xFF800000> : vector<2x32xf32>
    %30 = vector.multi_reduction <maximumf>, %29, %cst_8 [2] : vector<2x32x64xf32> to vector<2x32xf32>
    %31 = vector.shape_cast %30 : vector<2x32xf32> to vector<2x32x1xf32>
    %32 = vector.broadcast %31 : vector<2x32x1xf32> to vector<2x32x64xf32>
    %33 = arith.subf %29, %32 : vector<2x32x64xf32>
    %34 = math.exp %33 : vector<2x32x64xf32>
    %cst_9 = arith.constant dense<0.000000e+00> : vector<2x32xf32>
    %35 = vector.multi_reduction <add>, %34, %cst_9 [2] : vector<2x32x64xf32> to vector<2x32xf32>
    %36 = vector.shape_cast %35 : vector<2x32xf32> to vector<2x32x1xf32>
    %37 = tpu.reciprocal %36 {approx = true} : vector<2x32x1xf32> -> vector<2x32x1xf32>
    %38 = vector.broadcast %37 : vector<2x32x1xf32> to vector<2x32x64xf32>
    %39 = arith.mulf %34, %38 : vector<2x32x64xf32>
    "tpu.trace_start"() <{level = 10 : i32, message = "blk,bkc->blc"}> : () -> ()
    %cst_10 = arith.constant dense<0.000000e+00> : vector<2x32x8xf32>
    %40 = tpu.matmul %39, %28, %cst_10 {dimension_numbers = #tpu.dot_dimension_numbers<[2], [1], [1], [2], [0, 0, 0, 1, 1, 2], [0], [0]>} : vector<2x32x64xf32>, vector<2x64x8xf32>, vector<2x32x8xf32> -> vector<2x32x8xf32>
    "tpu.trace_stop"() : () -> ()
    %c0_11 = arith.constant 0 : index
    %c0_12 = arith.constant 0 : index
    %c0_13 = arith.constant 0 : index
    %41 = vector.load %arg1[%c0_11, %c0_12, %c0_13] : memref<2x32x8xf32, #tpu.memory_space<vmem>>, vector<2x32x8xf32>
    %42 = arith.addf %41, %40 : vector<2x32x8xf32>
    %cst_14 = arith.constant dense<0.000000e+00> : vector<2x32xf32>
    %43 = vector.multi_reduction <add>, %42, %cst_14 [2] : vector<2x32x8xf32> to vector<2x32xf32>
    %44 = vector.shape_cast %43 : vector<2x32xf32> to vector<2x32x1xf32>
    %cst_15 = arith.constant dense<0.000000e+00> : vector<2x1xf32>
    %45 = vector.multi_reduction <add>, %44, %cst_15 [1] : vector<2x32x1xf32> to vector<2x1xf32>
    %46 = vector.shape_cast %45 : vector<2x1xf32> to vector<2x1x1xf32>
    %cst_16 = arith.constant 3.906250e-03 : f32
    %47 = vector.broadcast %cst_16 : f32 to vector<2x1x1xf32>
    %48 = arith.mulf %46, %47 : vector<2x1x1xf32>
    %49 = vector.broadcast %48 : vector<2x1x1xf32> to vector<2x32x8xf32>
    %50 = arith.subf %42, %49 : vector<2x32x8xf32>
    %51 = arith.mulf %50, %50 : vector<2x32x8xf32>
    %cst_17 = arith.constant dense<0.000000e+00> : vector<2x32xf32>
    %52 = vector.multi_reduction <add>, %51, %cst_17 [2] : vector<2x32x8xf32> to vector<2x32xf32>
    %53 = vector.shape_cast %52 : vector<2x32xf32> to vector<2x32x1xf32>
    %cst_18 = arith.constant dense<0.000000e+00> : vector<2x1xf32>
    %54 = vector.multi_reduction <add>, %53, %cst_18 [1] : vector<2x32x1xf32> to vector<2x1xf32>
    %55 = vector.shape_cast %54 : vector<2x1xf32> to vector<2x1x1xf32>
    %cst_19 = arith.constant 3.906250e-03 : f32
    %56 = vector.broadcast %cst_19 : f32 to vector<2x1x1xf32>
    %57 = arith.mulf %55, %56 : vector<2x1x1xf32>
    %cst_20 = arith.constant 9.99999974E-6 : f32
    %58 = vector.broadcast %cst_20 : f32 to vector<2x1x1xf32>
    %59 = arith.addf %57, %58 : vector<2x1x1xf32>
    %60 = math.rsqrt %59 : vector<2x1x1xf32>
    %61 = vector.broadcast %60 : vector<2x1x1xf32> to vector<2x32x8xf32>
    %62 = arith.mulf %50, %61 : vector<2x32x8xf32>
    %c0_21 = arith.constant 0 : index
    %c0_22 = arith.constant 0 : index
    %c0_23 = arith.constant 0 : index
    %63 = vector.load %arg3[%c0_21, %c0_22, %c0_23] : memref<1x32x8xf32, #tpu.memory_space<vmem>>, vector<1x32x8xf32>
    %64 = vector.broadcast %63 : vector<1x32x8xf32> to vector<2x32x8xf32>
    %65 = arith.mulf %62, %64 : vector<2x32x8xf32>
    %c0_24 = arith.constant 0 : index
    %c0_25 = arith.constant 0 : index
    %c0_26 = arith.constant 0 : index
    %66 = vector.load %arg4[%c0_24, %c0_25, %c0_26] : memref<1x32x8xf32, #tpu.memory_space<vmem>>, vector<1x32x8xf32>
    %67 = vector.broadcast %66 : vector<1x32x8xf32> to vector<2x32x8xf32>
    %68 = arith.addf %65, %67 : vector<2x32x8xf32>
    %69 = arith.addf %68, %27 : vector<2x32x8xf32>
    %c0_27 = arith.constant 0 : index
    %c0_28 = arith.constant 0 : index
    %c0_29 = arith.constant 0 : index
    %70 = vector.load %arg5[%c0_27, %c0_28, %c0_29] : memref<2x32x8xf32, #tpu.memory_space<vmem>>, vector<2x32x8xf32>
    tpu.vector_store %arg5[%c0_27, %c0_28, %c0_29], %69 {strides = array<i32>} : memref<2x32x8xf32, #tpu.memory_space<vmem>>, vector<2x32x8xf32>,
    %71 = vector.extract_strided_slice %0 {offsets = [0, 3, 0, 0], sizes = [2, 1, 32, 8], strides = [1, 1, 1, 1]} : vector<2x15x32x8xf32> to vector<2x1x32x8xf32>
    %72 = vector.shape_cast %71 : vector<2x1x32x8xf32> to vector<2x32x8xf32>
    %73 = vector.extract_strided_slice %0 {offsets = [0, 11, 0, 0], sizes = [2, 1, 32, 8], strides = [1, 1, 1, 1]} : vector<2x15x32x8xf32> to vector<2x1x32x8xf32>
    %74 = vector.shape_cast %73 : vector<2x1x32x8xf32> to vector<2x32x8xf32>
    %75 = arith.addf %72, %74 : vector<2x32x8xf32>
    %76 = arith.negf %75 : vector<2x32x8xf32>
    %77 = math.exp %76 : vector<2x32x8xf32>
    %cst_30 = arith.constant 1.000000e+00 : f32
    %78 = vector.broadcast %cst_30 : f32 to vector<2x32x8xf32>
    %79 = arith.addf %78, %77 : vector<2x32x8xf32>
    %80 = arith.divf %78, %79 : vector<2x32x8xf32>
    %81 = vector.extract_strided_slice %0 {offsets = [0, 5, 0, 0], sizes = [2, 1, 32, 8], strides = [1, 1, 1, 1]} : vector<2x15x32x8xf32> to vector<2x1x32x8xf32>
    %82 = vector.shape_cast %81 : vector<2x1x32x8xf32> to vector<2x32x8xf32>
    %83 = vector.extract_strided_slice %0 {offsets = [0, 12, 0, 0], sizes = [2, 1, 32, 8], strides = [1, 1, 1, 1]} : vector<2x15x32x8xf32> to vector<2x1x32x8xf32>
    %84 = vector.shape_cast %83 : vector<2x1x32x8xf32> to vector<2x32x8xf32>
    %85 = arith.addf %82, %84 : vector<2x32x8xf32>
    %cst_31 = arith.constant 1.000000e+00 : f32
    %86 = vector.broadcast %cst_31 : f32 to vector<2x32x8xf32>
    %87 = arith.addf %85, %86 : vector<2x32x8xf32>
    %88 = arith.negf %87 : vector<2x32x8xf32>
    %89 = math.exp %88 : vector<2x32x8xf32>
    %cst_32 = arith.constant 1.000000e+00 : f32
    %90 = vector.broadcast %cst_32 : f32 to vector<2x32x8xf32>
    %91 = arith.addf %90, %89 : vector<2x32x8xf32>
    %92 = arith.divf %90, %91 : vector<2x32x8xf32>
    %93 = vector.extract_strided_slice %0 {offsets = [0, 4, 0, 0], sizes = [2, 1, 32, 8], strides = [1, 1, 1, 1]} : vector<2x15x32x8xf32> to vector<2x1x32x8xf32>
    %94 = vector.shape_cast %93 : vector<2x1x32x8xf32> to vector<2x32x8xf32>
    %95 = vector.extract_strided_slice %0 {offsets = [0, 13, 0, 0], sizes = [2, 1, 32, 8], strides = [1, 1, 1, 1]} : vector<2x15x32x8xf32> to vector<2x1x32x8xf32>
    %96 = vector.shape_cast %95 : vector<2x1x32x8xf32> to vector<2x32x8xf32>
    %97 = arith.addf %94, %96 : vector<2x32x8xf32>
    %98 = math.tanh %97 : vector<2x32x8xf32>
    %99 = vector.extract_strided_slice %0 {offsets = [0, 14, 0, 0], sizes = [2, 1, 32, 8], strides = [1, 1, 1, 1]} : vector<2x15x32x8xf32> to vector<2x1x32x8xf32>
    %100 = vector.shape_cast %99 : vector<2x1x32x8xf32> to vector<2x32x8xf32>
    %101 = math.tanh %100 : vector<2x32x8xf32>
    %102 = arith.mulf %92, %101 : vector<2x32x8xf32>
    %103 = arith.mulf %80, %98 : vector<2x32x8xf32>
    %104 = arith.addf %102, %103 : vector<2x32x8xf32>
    %c0_33 = arith.constant 0 : index
    %c0_34 = arith.constant 0 : index
    %c0_35 = arith.constant 0 : index
    %105 = vector.load %arg6[%c0_33, %c0_34, %c0_35] : memref<2x32x8xf32, #tpu.memory_space<vmem>>, vector<2x32x8xf32>
    tpu.vector_store %arg6[%c0_33, %c0_34, %c0_35], %104 {strides = array<i32>} : memref<2x32x8xf32, #tpu.memory_space<vmem>>, vector<2x32x8xf32>,
    return
  }
}

module attributes {stable_mosaic.version = 11 : i64} {
  func.func @_cell_core_kernel(%arg0: memref<2x15x32x8xf32, #tpu.memory_space<vmem>>, %arg1: memref<2x32x8xf32, #tpu.memory_space<vmem>>, %arg2: memref<2x96x8xf32, #tpu.memory_space<vmem>>, %arg3: memref<1x32x8xf32, #tpu.memory_space<vmem>>, %arg4: memref<1x32x8xf32, #tpu.memory_space<vmem>>, %arg5: memref<2x32x8xf32, #tpu.memory_space<vmem>>, %arg6: memref<2x32x8xf32, #tpu.memory_space<vmem>>) attributes {dimension_semantics = [], scalar_prefetch = 0 : i64, scratch_operands = 0 : i64, tpu.core_type = #tpu.core_type<tc>} {
    %c0 = arith.constant 0 : index
    %c0_0 = arith.constant 0 : index
    %c0_1 = arith.constant 0 : index
    %c0_2 = arith.constant 0 : index
    %0 = vector.load %arg0[%c0, %c0_0, %c0_1, %c0_2] : memref<2x15x32x8xf32, #tpu.memory_space<vmem>>, vector<2x15x32x8xf32>
    %1 = vector.extract_strided_slice %0 {offsets = [0, 2, 0, 0], sizes = [2, 1, 32, 8], strides = [1, 1, 1, 1]} : vector<2x15x32x8xf32> to vector<2x1x32x8xf32>
    %2 = vector.shape_cast %1 : vector<2x1x32x8xf32> to vector<2x32x8xf32>
    %3 = vector.extract_strided_slice %0 {offsets = [0, 9, 0, 0], sizes = [2, 1, 32, 8], strides = [1, 1, 1, 1]} : vector<2x15x32x8xf32> to vector<2x1x32x8xf32>
    %4 = vector.shape_cast %3 : vector<2x1x32x8xf32> to vector<2x32x8xf32>
    %5 = arith.addf %2, %4 : vector<2x32x8xf32>
    %6 = arith.negf %5 : vector<2x32x8xf32>
    %7 = math.exp %6 : vector<2x32x8xf32>
    %cst = arith.constant 1.000000e+00 : f32
    %8 = vector.broadcast %cst : f32 to vector<2x32x8xf32>
    %9 = arith.addf %8, %7 : vector<2x32x8xf32>
    %10 = arith.divf %8, %9 : vector<2x32x8xf32>
    %11 = vector.extract_strided_slice %0 {offsets = [0, 0, 0, 0], sizes = [2, 1, 32, 8], strides = [1, 1, 1, 1]} : vector<2x15x32x8xf32> to vector<2x1x32x8xf32>
    %12 = vector.shape_cast %11 : vector<2x1x32x8xf32> to vector<2x32x8xf32>
    %13 = vector.extract_strided_slice %0 {offsets = [0, 7, 0, 0], sizes = [2, 1, 32, 8], strides = [1, 1, 1, 1]} : vector<2x15x32x8xf32> to vector<2x1x32x8xf32>
    %14 = vector.shape_cast %13 : vector<2x1x32x8xf32> to vector<2x32x8xf32>
    %15 = arith.addf %12, %14 : vector<2x32x8xf32>
    %16 = arith.negf %15 : vector<2x32x8xf32>
    %17 = math.exp %16 : vector<2x32x8xf32>
    %cst_3 = arith.constant 1.000000e+00 : f32
    %18 = vector.broadcast %cst_3 : f32 to vector<2x32x8xf32>
    %19 = arith.addf %18, %17 : vector<2x32x8xf32>
    %20 = arith.divf %18, %19 : vector<2x32x8xf32>
    %21 = vector.extract_strided_slice %0 {offsets = [0, 1, 0, 0], sizes = [2, 1, 32, 8], strides = [1, 1, 1, 1]} : vector<2x15x32x8xf32> to vector<2x1x32x8xf32>
    %22 = vector.shape_cast %21 : vector<2x1x32x8xf32> to vector<2x32x8xf32>
    %23 = vector.extract_strided_slice %0 {offsets = [0, 8, 0, 0], sizes = [2, 1, 32, 8], strides = [1, 1, 1, 1]} : vector<2x15x32x8xf32> to vector<2x1x32x8xf32>
    %24 = vector.shape_cast %23 : vector<2x1x32x8xf32> to vector<2x32x8xf32>
    %25 = arith.addf %22, %24 : vector<2x32x8xf32>
    %26 = math.tanh %25 : vector<2x32x8xf32>
    %27 = arith.mulf %20, %26 : vector<2x32x8xf32>
    %c0_4 = arith.constant 0 : index
    %c0_5 = arith.constant 0 : index
    %c0_6 = arith.constant 0 : index
    %28 = vector.load %arg2[%c0_4, %c0_5, %c0_6] : memref<2x96x8xf32, #tpu.memory_space<vmem>>, vector<2x96x8xf32>
    "tpu.trace_start"() <{level = 10 : i32, message = "blc,bkc->blk"}> : () -> ()
    %cst_7 = arith.constant dense<0.000000e+00> : vector<2x32x96xf32>
    %29 = tpu.matmul %10, %28, %cst_7 {dimension_numbers = #tpu.dot_dimension_numbers<[2], [2], [1], [1], [0, 0, 0, 1, 1, 1], [0], [0]>} : vector<2x32x8xf32>, vector<2x96x8xf32>, vector<2x32x96xf32> -> vector<2x32x96xf32>
    "tpu.trace_stop"() : () -> ()
    %cst_8 = arith.constant dense<0xFF800000> : vector<2x32xf32>
    %30 = vector.multi_reduction <maximumf>, %29, %cst_8 [2] : vector<2x32x96xf32> to vector<2x32xf32>
    %31 = vector.shape_cast %30 : vector<2x32xf32> to vector<2x32x1xf32>
    %32 = vector.broadcast %31 : vector<2x32x1xf32> to vector<2x32x96xf32>
    %33 = arith.subf %29, %32 : vector<2x32x96xf32>
    %34 = math.exp %33 : vector<2x32x96xf32>
    %cst_9 = arith.constant dense<0.000000e+00> : vector<2x32xf32>
    %35 = vector.multi_reduction <add>, %34, %cst_9 [2] : vector<2x32x96xf32> to vector<2x32xf32>
    %36 = vector.shape_cast %35 : vector<2x32xf32> to vector<2x32x1xf32>
    %37 = tpu.reciprocal %36 {approx = true} : vector<2x32x1xf32> -> vector<2x32x1xf32>
    %38 = vector.broadcast %37 : vector<2x32x1xf32> to vector<2x32x96xf32>
    %39 = arith.mulf %34, %38 : vector<2x32x96xf32>
    "tpu.trace_start"() <{level = 10 : i32, message = "blk,bkc->blc"}> : () -> ()
    %cst_10 = arith.constant dense<0.000000e+00> : vector<2x32x8xf32>
    %40 = tpu.matmul %39, %28, %cst_10 {dimension_numbers = #tpu.dot_dimension_numbers<[2], [1], [1], [2], [0, 0, 0, 1, 1, 2], [0], [0]>} : vector<2x32x96xf32>, vector<2x96x8xf32>, vector<2x32x8xf32> -> vector<2x32x8xf32>
    "tpu.trace_stop"() : () -> ()
    %c0_11 = arith.constant 0 : index
    %c0_12 = arith.constant 0 : index
    %c0_13 = arith.constant 0 : index
    %41 = vector.load %arg1[%c0_11, %c0_12, %c0_13] : memref<2x32x8xf32, #tpu.memory_space<vmem>>, vector<2x32x8xf32>
    %42 = arith.addf %41, %40 : vector<2x32x8xf32>
    %cst_14 = arith.constant dense<0.000000e+00> : vector<2x32xf32>
    %43 = vector.multi_reduction <add>, %42, %cst_14 [2] : vector<2x32x8xf32> to vector<2x32xf32>
    %44 = vector.shape_cast %43 : vector<2x32xf32> to vector<2x32x1xf32>
    %cst_15 = arith.constant dense<0.000000e+00> : vector<2x1xf32>
    %45 = vector.multi_reduction <add>, %44, %cst_15 [1] : vector<2x32x1xf32> to vector<2x1xf32>
    %46 = vector.shape_cast %45 : vector<2x1xf32> to vector<2x1x1xf32>
    %cst_16 = arith.constant 3.906250e-03 : f32
    %47 = vector.broadcast %cst_16 : f32 to vector<2x1x1xf32>
    %48 = arith.mulf %46, %47 : vector<2x1x1xf32>
    %49 = vector.broadcast %48 : vector<2x1x1xf32> to vector<2x32x8xf32>
    %50 = arith.subf %42, %49 : vector<2x32x8xf32>
    %51 = arith.mulf %50, %50 : vector<2x32x8xf32>
    %cst_17 = arith.constant dense<0.000000e+00> : vector<2x32xf32>
    %52 = vector.multi_reduction <add>, %51, %cst_17 [2] : vector<2x32x8xf32> to vector<2x32xf32>
    %53 = vector.shape_cast %52 : vector<2x32xf32> to vector<2x32x1xf32>
    %cst_18 = arith.constant dense<0.000000e+00> : vector<2x1xf32>
    %54 = vector.multi_reduction <add>, %53, %cst_18 [1] : vector<2x32x1xf32> to vector<2x1xf32>
    %55 = vector.shape_cast %54 : vector<2x1xf32> to vector<2x1x1xf32>
    %cst_19 = arith.constant 3.906250e-03 : f32
    %56 = vector.broadcast %cst_19 : f32 to vector<2x1x1xf32>
    %57 = arith.mulf %55, %56 : vector<2x1x1xf32>
    %cst_20 = arith.constant 9.99999974E-6 : f32
    %58 = vector.broadcast %cst_20 : f32 to vector<2x1x1xf32>
    %59 = arith.addf %57, %58 : vector<2x1x1xf32>
    %60 = math.rsqrt %59 : vector<2x1x1xf32>
    %61 = vector.broadcast %60 : vector<2x1x1xf32> to vector<2x32x8xf32>
    %62 = arith.mulf %50, %61 : vector<2x32x8xf32>
    %c0_21 = arith.constant 0 : index
    %c0_22 = arith.constant 0 : index
    %c0_23 = arith.constant 0 : index
    %63 = vector.load %arg3[%c0_21, %c0_22, %c0_23] : memref<1x32x8xf32, #tpu.memory_space<vmem>>, vector<1x32x8xf32>
    %64 = vector.broadcast %63 : vector<1x32x8xf32> to vector<2x32x8xf32>
    %65 = arith.mulf %62, %64 : vector<2x32x8xf32>
    %c0_24 = arith.constant 0 : index
    %c0_25 = arith.constant 0 : index
    %c0_26 = arith.constant 0 : index
    %66 = vector.load %arg4[%c0_24, %c0_25, %c0_26] : memref<1x32x8xf32, #tpu.memory_space<vmem>>, vector<1x32x8xf32>
    %67 = vector.broadcast %66 : vector<1x32x8xf32> to vector<2x32x8xf32>
    %68 = arith.addf %65, %67 : vector<2x32x8xf32>
    %69 = arith.addf %68, %27 : vector<2x32x8xf32>
    %c0_27 = arith.constant 0 : index
    %c0_28 = arith.constant 0 : index
    %c0_29 = arith.constant 0 : index
    %70 = vector.load %arg5[%c0_27, %c0_28, %c0_29] : memref<2x32x8xf32, #tpu.memory_space<vmem>>, vector<2x32x8xf32>
    tpu.vector_store %arg5[%c0_27, %c0_28, %c0_29], %69 {strides = array<i32>} : memref<2x32x8xf32, #tpu.memory_space<vmem>>, vector<2x32x8xf32>,
    %71 = vector.extract_strided_slice %0 {offsets = [0, 3, 0, 0], sizes = [2, 1, 32, 8], strides = [1, 1, 1, 1]} : vector<2x15x32x8xf32> to vector<2x1x32x8xf32>
    %72 = vector.shape_cast %71 : vector<2x1x32x8xf32> to vector<2x32x8xf32>
    %73 = vector.extract_strided_slice %0 {offsets = [0, 11, 0, 0], sizes = [2, 1, 32, 8], strides = [1, 1, 1, 1]} : vector<2x15x32x8xf32> to vector<2x1x32x8xf32>
    %74 = vector.shape_cast %73 : vector<2x1x32x8xf32> to vector<2x32x8xf32>
    %75 = arith.addf %72, %74 : vector<2x32x8xf32>
    %76 = arith.negf %75 : vector<2x32x8xf32>
    %77 = math.exp %76 : vector<2x32x8xf32>
    %cst_30 = arith.constant 1.000000e+00 : f32
    %78 = vector.broadcast %cst_30 : f32 to vector<2x32x8xf32>
    %79 = arith.addf %78, %77 : vector<2x32x8xf32>
    %80 = arith.divf %78, %79 : vector<2x32x8xf32>
    %81 = vector.extract_strided_slice %0 {offsets = [0, 5, 0, 0], sizes = [2, 1, 32, 8], strides = [1, 1, 1, 1]} : vector<2x15x32x8xf32> to vector<2x1x32x8xf32>
    %82 = vector.shape_cast %81 : vector<2x1x32x8xf32> to vector<2x32x8xf32>
    %83 = vector.extract_strided_slice %0 {offsets = [0, 12, 0, 0], sizes = [2, 1, 32, 8], strides = [1, 1, 1, 1]} : vector<2x15x32x8xf32> to vector<2x1x32x8xf32>
    %84 = vector.shape_cast %83 : vector<2x1x32x8xf32> to vector<2x32x8xf32>
    %85 = arith.addf %82, %84 : vector<2x32x8xf32>
    %cst_31 = arith.constant 1.000000e+00 : f32
    %86 = vector.broadcast %cst_31 : f32 to vector<2x32x8xf32>
    %87 = arith.addf %85, %86 : vector<2x32x8xf32>
    %88 = arith.negf %87 : vector<2x32x8xf32>
    %89 = math.exp %88 : vector<2x32x8xf32>
    %cst_32 = arith.constant 1.000000e+00 : f32
    %90 = vector.broadcast %cst_32 : f32 to vector<2x32x8xf32>
    %91 = arith.addf %90, %89 : vector<2x32x8xf32>
    %92 = arith.divf %90, %91 : vector<2x32x8xf32>
    %93 = vector.extract_strided_slice %0 {offsets = [0, 4, 0, 0], sizes = [2, 1, 32, 8], strides = [1, 1, 1, 1]} : vector<2x15x32x8xf32> to vector<2x1x32x8xf32>
    %94 = vector.shape_cast %93 : vector<2x1x32x8xf32> to vector<2x32x8xf32>
    %95 = vector.extract_strided_slice %0 {offsets = [0, 13, 0, 0], sizes = [2, 1, 32, 8], strides = [1, 1, 1, 1]} : vector<2x15x32x8xf32> to vector<2x1x32x8xf32>
    %96 = vector.shape_cast %95 : vector<2x1x32x8xf32> to vector<2x32x8xf32>
    %97 = arith.addf %94, %96 : vector<2x32x8xf32>
    %98 = math.tanh %97 : vector<2x32x8xf32>
    %99 = vector.extract_strided_slice %0 {offsets = [0, 14, 0, 0], sizes = [2, 1, 32, 8], strides = [1, 1, 1, 1]} : vector<2x15x32x8xf32> to vector<2x1x32x8xf32>
    %100 = vector.shape_cast %99 : vector<2x1x32x8xf32> to vector<2x32x8xf32>
    %101 = math.tanh %100 : vector<2x32x8xf32>
    %102 = arith.mulf %92, %101 : vector<2x32x8xf32>
    %103 = arith.mulf %80, %98 : vector<2x32x8xf32>
    %104 = arith.addf %102, %103 : vector<2x32x8xf32>
    %c0_33 = arith.constant 0 : index
    %c0_34 = arith.constant 0 : index
    %c0_35 = arith.constant 0 : index
    %105 = vector.load %arg6[%c0_33, %c0_34, %c0_35] : memref<2x32x8xf32, #tpu.memory_space<vmem>>, vector<2x32x8xf32>
    tpu.vector_store %arg6[%c0_33, %c0_34, %c0_35], %104 {strides = array<i32>} : memref<2x32x8xf32, #tpu.memory_space<vmem>>, vector<2x32x8xf32>,
    return
  }
}

module attributes {stable_mosaic.version = 11 : i64} {
  func.func @_cell_core_kernel(%arg0: memref<2x15x32x8xf32, #tpu.memory_space<vmem>>, %arg1: memref<2x32x8xf32, #tpu.memory_space<vmem>>, %arg2: memref<2x128x8xf32, #tpu.memory_space<vmem>>, %arg3: memref<1x32x8xf32, #tpu.memory_space<vmem>>, %arg4: memref<1x32x8xf32, #tpu.memory_space<vmem>>, %arg5: memref<2x32x8xf32, #tpu.memory_space<vmem>>, %arg6: memref<2x32x8xf32, #tpu.memory_space<vmem>>) attributes {dimension_semantics = [], scalar_prefetch = 0 : i64, scratch_operands = 0 : i64, tpu.core_type = #tpu.core_type<tc>} {
    %c0 = arith.constant 0 : index
    %c0_0 = arith.constant 0 : index
    %c0_1 = arith.constant 0 : index
    %c0_2 = arith.constant 0 : index
    %0 = vector.load %arg0[%c0, %c0_0, %c0_1, %c0_2] : memref<2x15x32x8xf32, #tpu.memory_space<vmem>>, vector<2x15x32x8xf32>
    %1 = vector.extract_strided_slice %0 {offsets = [0, 2, 0, 0], sizes = [2, 1, 32, 8], strides = [1, 1, 1, 1]} : vector<2x15x32x8xf32> to vector<2x1x32x8xf32>
    %2 = vector.shape_cast %1 : vector<2x1x32x8xf32> to vector<2x32x8xf32>
    %3 = vector.extract_strided_slice %0 {offsets = [0, 9, 0, 0], sizes = [2, 1, 32, 8], strides = [1, 1, 1, 1]} : vector<2x15x32x8xf32> to vector<2x1x32x8xf32>
    %4 = vector.shape_cast %3 : vector<2x1x32x8xf32> to vector<2x32x8xf32>
    %5 = arith.addf %2, %4 : vector<2x32x8xf32>
    %6 = arith.negf %5 : vector<2x32x8xf32>
    %7 = math.exp %6 : vector<2x32x8xf32>
    %cst = arith.constant 1.000000e+00 : f32
    %8 = vector.broadcast %cst : f32 to vector<2x32x8xf32>
    %9 = arith.addf %8, %7 : vector<2x32x8xf32>
    %10 = arith.divf %8, %9 : vector<2x32x8xf32>
    %11 = vector.extract_strided_slice %0 {offsets = [0, 0, 0, 0], sizes = [2, 1, 32, 8], strides = [1, 1, 1, 1]} : vector<2x15x32x8xf32> to vector<2x1x32x8xf32>
    %12 = vector.shape_cast %11 : vector<2x1x32x8xf32> to vector<2x32x8xf32>
    %13 = vector.extract_strided_slice %0 {offsets = [0, 7, 0, 0], sizes = [2, 1, 32, 8], strides = [1, 1, 1, 1]} : vector<2x15x32x8xf32> to vector<2x1x32x8xf32>
    %14 = vector.shape_cast %13 : vector<2x1x32x8xf32> to vector<2x32x8xf32>
    %15 = arith.addf %12, %14 : vector<2x32x8xf32>
    %16 = arith.negf %15 : vector<2x32x8xf32>
    %17 = math.exp %16 : vector<2x32x8xf32>
    %cst_3 = arith.constant 1.000000e+00 : f32
    %18 = vector.broadcast %cst_3 : f32 to vector<2x32x8xf32>
    %19 = arith.addf %18, %17 : vector<2x32x8xf32>
    %20 = arith.divf %18, %19 : vector<2x32x8xf32>
    %21 = vector.extract_strided_slice %0 {offsets = [0, 1, 0, 0], sizes = [2, 1, 32, 8], strides = [1, 1, 1, 1]} : vector<2x15x32x8xf32> to vector<2x1x32x8xf32>
    %22 = vector.shape_cast %21 : vector<2x1x32x8xf32> to vector<2x32x8xf32>
    %23 = vector.extract_strided_slice %0 {offsets = [0, 8, 0, 0], sizes = [2, 1, 32, 8], strides = [1, 1, 1, 1]} : vector<2x15x32x8xf32> to vector<2x1x32x8xf32>
    %24 = vector.shape_cast %23 : vector<2x1x32x8xf32> to vector<2x32x8xf32>
    %25 = arith.addf %22, %24 : vector<2x32x8xf32>
    %26 = math.tanh %25 : vector<2x32x8xf32>
    %27 = arith.mulf %20, %26 : vector<2x32x8xf32>
    %c0_4 = arith.constant 0 : index
    %c0_5 = arith.constant 0 : index
    %c0_6 = arith.constant 0 : index
    %28 = vector.load %arg2[%c0_4, %c0_5, %c0_6] : memref<2x128x8xf32, #tpu.memory_space<vmem>>, vector<2x128x8xf32>
    "tpu.trace_start"() <{level = 10 : i32, message = "blc,bkc->blk"}> : () -> ()
    %cst_7 = arith.constant dense<0.000000e+00> : vector<2x32x128xf32>
    %29 = tpu.matmul %10, %28, %cst_7 {dimension_numbers = #tpu.dot_dimension_numbers<[2], [2], [1], [1], [0, 0, 0, 1, 1, 1], [0], [0]>} : vector<2x32x8xf32>, vector<2x128x8xf32>, vector<2x32x128xf32> -> vector<2x32x128xf32>
    "tpu.trace_stop"() : () -> ()
    %cst_8 = arith.constant dense<0xFF800000> : vector<2x32xf32>
    %30 = vector.multi_reduction <maximumf>, %29, %cst_8 [2] : vector<2x32x128xf32> to vector<2x32xf32>
    %31 = vector.shape_cast %30 : vector<2x32xf32> to vector<2x32x1xf32>
    %32 = vector.broadcast %31 : vector<2x32x1xf32> to vector<2x32x128xf32>
    %33 = arith.subf %29, %32 : vector<2x32x128xf32>
    %34 = math.exp %33 : vector<2x32x128xf32>
    %cst_9 = arith.constant dense<0.000000e+00> : vector<2x32xf32>
    %35 = vector.multi_reduction <add>, %34, %cst_9 [2] : vector<2x32x128xf32> to vector<2x32xf32>
    %36 = vector.shape_cast %35 : vector<2x32xf32> to vector<2x32x1xf32>
    %37 = tpu.reciprocal %36 {approx = true} : vector<2x32x1xf32> -> vector<2x32x1xf32>
    %38 = vector.broadcast %37 : vector<2x32x1xf32> to vector<2x32x128xf32>
    %39 = arith.mulf %34, %38 : vector<2x32x128xf32>
    "tpu.trace_start"() <{level = 10 : i32, message = "blk,bkc->blc"}> : () -> ()
    %cst_10 = arith.constant dense<0.000000e+00> : vector<2x32x8xf32>
    %40 = tpu.matmul %39, %28, %cst_10 {dimension_numbers = #tpu.dot_dimension_numbers<[2], [1], [1], [2], [0, 0, 0, 1, 1, 2], [0], [0]>} : vector<2x32x128xf32>, vector<2x128x8xf32>, vector<2x32x8xf32> -> vector<2x32x8xf32>
    "tpu.trace_stop"() : () -> ()
    %c0_11 = arith.constant 0 : index
    %c0_12 = arith.constant 0 : index
    %c0_13 = arith.constant 0 : index
    %41 = vector.load %arg1[%c0_11, %c0_12, %c0_13] : memref<2x32x8xf32, #tpu.memory_space<vmem>>, vector<2x32x8xf32>
    %42 = arith.addf %41, %40 : vector<2x32x8xf32>
    %cst_14 = arith.constant dense<0.000000e+00> : vector<2x32xf32>
    %43 = vector.multi_reduction <add>, %42, %cst_14 [2] : vector<2x32x8xf32> to vector<2x32xf32>
    %44 = vector.shape_cast %43 : vector<2x32xf32> to vector<2x32x1xf32>
    %cst_15 = arith.constant dense<0.000000e+00> : vector<2x1xf32>
    %45 = vector.multi_reduction <add>, %44, %cst_15 [1] : vector<2x32x1xf32> to vector<2x1xf32>
    %46 = vector.shape_cast %45 : vector<2x1xf32> to vector<2x1x1xf32>
    %cst_16 = arith.constant 3.906250e-03 : f32
    %47 = vector.broadcast %cst_16 : f32 to vector<2x1x1xf32>
    %48 = arith.mulf %46, %47 : vector<2x1x1xf32>
    %49 = vector.broadcast %48 : vector<2x1x1xf32> to vector<2x32x8xf32>
    %50 = arith.subf %42, %49 : vector<2x32x8xf32>
    %51 = arith.mulf %50, %50 : vector<2x32x8xf32>
    %cst_17 = arith.constant dense<0.000000e+00> : vector<2x32xf32>
    %52 = vector.multi_reduction <add>, %51, %cst_17 [2] : vector<2x32x8xf32> to vector<2x32xf32>
    %53 = vector.shape_cast %52 : vector<2x32xf32> to vector<2x32x1xf32>
    %cst_18 = arith.constant dense<0.000000e+00> : vector<2x1xf32>
    %54 = vector.multi_reduction <add>, %53, %cst_18 [1] : vector<2x32x1xf32> to vector<2x1xf32>
    %55 = vector.shape_cast %54 : vector<2x1xf32> to vector<2x1x1xf32>
    %cst_19 = arith.constant 3.906250e-03 : f32
    %56 = vector.broadcast %cst_19 : f32 to vector<2x1x1xf32>
    %57 = arith.mulf %55, %56 : vector<2x1x1xf32>
    %cst_20 = arith.constant 9.99999974E-6 : f32
    %58 = vector.broadcast %cst_20 : f32 to vector<2x1x1xf32>
    %59 = arith.addf %57, %58 : vector<2x1x1xf32>
    %60 = math.rsqrt %59 : vector<2x1x1xf32>
    %61 = vector.broadcast %60 : vector<2x1x1xf32> to vector<2x32x8xf32>
    %62 = arith.mulf %50, %61 : vector<2x32x8xf32>
    %c0_21 = arith.constant 0 : index
    %c0_22 = arith.constant 0 : index
    %c0_23 = arith.constant 0 : index
    %63 = vector.load %arg3[%c0_21, %c0_22, %c0_23] : memref<1x32x8xf32, #tpu.memory_space<vmem>>, vector<1x32x8xf32>
    %64 = vector.broadcast %63 : vector<1x32x8xf32> to vector<2x32x8xf32>
    %65 = arith.mulf %62, %64 : vector<2x32x8xf32>
    %c0_24 = arith.constant 0 : index
    %c0_25 = arith.constant 0 : index
    %c0_26 = arith.constant 0 : index
    %66 = vector.load %arg4[%c0_24, %c0_25, %c0_26] : memref<1x32x8xf32, #tpu.memory_space<vmem>>, vector<1x32x8xf32>
    %67 = vector.broadcast %66 : vector<1x32x8xf32> to vector<2x32x8xf32>
    %68 = arith.addf %65, %67 : vector<2x32x8xf32>
    %69 = arith.addf %68, %27 : vector<2x32x8xf32>
    %c0_27 = arith.constant 0 : index
    %c0_28 = arith.constant 0 : index
    %c0_29 = arith.constant 0 : index
    %70 = vector.load %arg5[%c0_27, %c0_28, %c0_29] : memref<2x32x8xf32, #tpu.memory_space<vmem>>, vector<2x32x8xf32>
    tpu.vector_store %arg5[%c0_27, %c0_28, %c0_29], %69 {strides = array<i32>} : memref<2x32x8xf32, #tpu.memory_space<vmem>>, vector<2x32x8xf32>,
    %71 = vector.extract_strided_slice %0 {offsets = [0, 3, 0, 0], sizes = [2, 1, 32, 8], strides = [1, 1, 1, 1]} : vector<2x15x32x8xf32> to vector<2x1x32x8xf32>
    %72 = vector.shape_cast %71 : vector<2x1x32x8xf32> to vector<2x32x8xf32>
    %73 = vector.extract_strided_slice %0 {offsets = [0, 11, 0, 0], sizes = [2, 1, 32, 8], strides = [1, 1, 1, 1]} : vector<2x15x32x8xf32> to vector<2x1x32x8xf32>
    %74 = vector.shape_cast %73 : vector<2x1x32x8xf32> to vector<2x32x8xf32>
    %75 = arith.addf %72, %74 : vector<2x32x8xf32>
    %76 = arith.negf %75 : vector<2x32x8xf32>
    %77 = math.exp %76 : vector<2x32x8xf32>
    %cst_30 = arith.constant 1.000000e+00 : f32
    %78 = vector.broadcast %cst_30 : f32 to vector<2x32x8xf32>
    %79 = arith.addf %78, %77 : vector<2x32x8xf32>
    %80 = arith.divf %78, %79 : vector<2x32x8xf32>
    %81 = vector.extract_strided_slice %0 {offsets = [0, 5, 0, 0], sizes = [2, 1, 32, 8], strides = [1, 1, 1, 1]} : vector<2x15x32x8xf32> to vector<2x1x32x8xf32>
    %82 = vector.shape_cast %81 : vector<2x1x32x8xf32> to vector<2x32x8xf32>
    %83 = vector.extract_strided_slice %0 {offsets = [0, 12, 0, 0], sizes = [2, 1, 32, 8], strides = [1, 1, 1, 1]} : vector<2x15x32x8xf32> to vector<2x1x32x8xf32>
    %84 = vector.shape_cast %83 : vector<2x1x32x8xf32> to vector<2x32x8xf32>
    %85 = arith.addf %82, %84 : vector<2x32x8xf32>
    %cst_31 = arith.constant 1.000000e+00 : f32
    %86 = vector.broadcast %cst_31 : f32 to vector<2x32x8xf32>
    %87 = arith.addf %85, %86 : vector<2x32x8xf32>
    %88 = arith.negf %87 : vector<2x32x8xf32>
    %89 = math.exp %88 : vector<2x32x8xf32>
    %cst_32 = arith.constant 1.000000e+00 : f32
    %90 = vector.broadcast %cst_32 : f32 to vector<2x32x8xf32>
    %91 = arith.addf %90, %89 : vector<2x32x8xf32>
    %92 = arith.divf %90, %91 : vector<2x32x8xf32>
    %93 = vector.extract_strided_slice %0 {offsets = [0, 4, 0, 0], sizes = [2, 1, 32, 8], strides = [1, 1, 1, 1]} : vector<2x15x32x8xf32> to vector<2x1x32x8xf32>
    %94 = vector.shape_cast %93 : vector<2x1x32x8xf32> to vector<2x32x8xf32>
    %95 = vector.extract_strided_slice %0 {offsets = [0, 13, 0, 0], sizes = [2, 1, 32, 8], strides = [1, 1, 1, 1]} : vector<2x15x32x8xf32> to vector<2x1x32x8xf32>
    %96 = vector.shape_cast %95 : vector<2x1x32x8xf32> to vector<2x32x8xf32>
    %97 = arith.addf %94, %96 : vector<2x32x8xf32>
    %98 = math.tanh %97 : vector<2x32x8xf32>
    %99 = vector.extract_strided_slice %0 {offsets = [0, 14, 0, 0], sizes = [2, 1, 32, 8], strides = [1, 1, 1, 1]} : vector<2x15x32x8xf32> to vector<2x1x32x8xf32>
    %100 = vector.shape_cast %99 : vector<2x1x32x8xf32> to vector<2x32x8xf32>
    %101 = math.tanh %100 : vector<2x32x8xf32>
    %102 = arith.mulf %92, %101 : vector<2x32x8xf32>
    %103 = arith.mulf %80, %98 : vector<2x32x8xf32>
    %104 = arith.addf %102, %103 : vector<2x32x8xf32>
    %c0_33 = arith.constant 0 : index
    %c0_34 = arith.constant 0 : index
    %c0_35 = arith.constant 0 : index
    %105 = vector.load %arg6[%c0_33, %c0_34, %c0_35] : memref<2x32x8xf32, #tpu.memory_space<vmem>>, vector<2x32x8xf32>
    tpu.vector_store %arg6[%c0_33, %c0_34, %c0_35], %104 {strides = array<i32>} : memref<2x32x8xf32, #tpu.memory_space<vmem>>, vector<2x32x8xf32>,
    return
  }
}

module attributes {stable_mosaic.version = 11 : i64} {
  func.func @_mm_kernel(%arg0: i32, %arg1: i32, %arg2: i32, %arg3: memref<32x128xbf16, #tpu.memory_space<vmem>>, %arg4: memref<128x128xbf16, #tpu.memory_space<vmem>>, %arg5: memref<32x128xf32, #tpu.memory_space<vmem>>, %arg6: memref<32x128xf32, #tpu.memory_space<vmem>>) attributes {dimension_semantics = [#tpu.dimension_semantics<parallel>, #tpu.dimension_semantics<parallel>, #tpu.dimension_semantics<arbitrary>], iteration_bounds = array<i64: 1, 1, 1>, scalar_prefetch = 0 : i64, scratch_operands = 1 : i64, tpu.core_type = #tpu.core_type<tc>, window_params = [{transform_indices = @transform_0, window_bounds = array<i64: 32, 128>}, {transform_indices = @transform_1, window_bounds = array<i64: 128, 128>}, {transform_indices = @transform_2, window_bounds = array<i64: 32, 128>}]} {
    %c0_i32 = arith.constant 0 : i32
    %0 = arith.cmpi eq, %arg2, %c0_i32 : i32
    %1 = arith.extui %0 : i1 to i32
    %c0_i32_0 = arith.constant 0 : i32
    %2 = arith.cmpi ne, %1, %c0_i32_0 : i32
    scf.if %2 {
      %cst_10 = arith.constant 0.000000e+00 : f32
      %12 = vector.broadcast %cst_10 : f32 to vector<32x128xf32>
      %c0_11 = arith.constant 0 : index
      %c0_12 = arith.constant 0 : index
      %13 = vector.load %arg6[%c0_11, %c0_12] : memref<32x128xf32, #tpu.memory_space<vmem>>, vector<32x128xf32>
      tpu.vector_store %arg6[%c0_11, %c0_12], %12 {strides = array<i32>} : memref<32x128xf32, #tpu.memory_space<vmem>>, vector<32x128xf32>,
    } else {
    }
    %c0 = arith.constant 0 : index
    %c0_1 = arith.constant 0 : index
    %3 = vector.load %arg6[%c0, %c0_1] : memref<32x128xf32, #tpu.memory_space<vmem>>, vector<32x128xf32>
    %c0_2 = arith.constant 0 : index
    %c0_3 = arith.constant 0 : index
    %4 = vector.load %arg3[%c0_2, %c0_3] : memref<32x128xbf16, #tpu.memory_space<vmem>>, vector<32x128xbf16>
    %c0_4 = arith.constant 0 : index
    %c0_5 = arith.constant 0 : index
    %5 = vector.load %arg4[%c0_4, %c0_5] : memref<128x128xbf16, #tpu.memory_space<vmem>>, vector<128x128xbf16>
    %cst = arith.constant dense<0.000000e+00> : vector<32x128xf32>
    %6 = tpu.matmul %4, %5, %cst {dimension_numbers = #tpu.dot_dimension_numbers<[1], [0], [0], [1], [0, 0, 1, 1], [], []>} : vector<32x128xbf16>, vector<128x128xbf16>, vector<32x128xf32> -> vector<32x128xf32>
    %7 = arith.addf %3, %6 : vector<32x128xf32>
    %c0_6 = arith.constant 0 : index
    %c0_7 = arith.constant 0 : index
    %8 = vector.load %arg6[%c0_6, %c0_7] : memref<32x128xf32, #tpu.memory_space<vmem>>, vector<32x128xf32>
    tpu.vector_store %arg6[%c0_6, %c0_7], %7 {strides = array<i32>} : memref<32x128xf32, #tpu.memory_space<vmem>>, vector<32x128xf32>,
    %c0_i32_8 = arith.constant 0 : i32
    %9 = arith.cmpi eq, %arg2, %c0_i32_8 : i32
    %10 = arith.extui %9 : i1 to i32
    %c0_i32_9 = arith.constant 0 : i32
    %11 = arith.cmpi ne, %10, %c0_i32_9 : i32
    scf.if %11 {
      %c0_10 = arith.constant 0 : index
      %c0_11 = arith.constant 0 : index
      %12 = vector.load %arg6[%c0_10, %c0_11] : memref<32x128xf32, #tpu.memory_space<vmem>>, vector<32x128xf32>
      %c0_12 = arith.constant 0 : index
      %c0_13 = arith.constant 0 : index
      %13 = vector.load %arg5[%c0_12, %c0_13] : memref<32x128xf32, #tpu.memory_space<vmem>>, vector<32x128xf32>
      tpu.vector_store %arg5[%c0_12, %c0_13], %12 {strides = array<i32>} : memref<32x128xf32, #tpu.memory_space<vmem>>, vector<32x128xf32>,
    } else {
    }
    return
  }
  func.func @transform_0(%arg0: i32, %arg1: i32, %arg2: i32) -> (i32, i32) {
    %c0_i32 = arith.constant 0 : i32
    return %arg0, %arg2 : i32, i32
  }
  func.func @transform_1(%arg0: i32, %arg1: i32, %arg2: i32) -> (i32, i32) {
    %c0_i32 = arith.constant 0 : i32
    return %arg2, %arg1 : i32, i32
  }
  func.func @transform_2(%arg0: i32, %arg1: i32, %arg2: i32) -> (i32, i32) {
    %c0_i32 = arith.constant 0 : i32
    return %arg0, %arg1 : i32, i32
  }
}

module attributes {stable_mosaic.version = 11 : i64} {
  func.func @_cell_core_kernel(%arg0: memref<2x15x32x8xf32, #tpu.memory_space<vmem>>, %arg1: memref<2x32x8xf32, #tpu.memory_space<vmem>>, %arg2: memref<2x160x8xf32, #tpu.memory_space<vmem>>, %arg3: memref<1x32x8xf32, #tpu.memory_space<vmem>>, %arg4: memref<1x32x8xf32, #tpu.memory_space<vmem>>, %arg5: memref<2x32x8xf32, #tpu.memory_space<vmem>>, %arg6: memref<2x32x8xf32, #tpu.memory_space<vmem>>) attributes {dimension_semantics = [], scalar_prefetch = 0 : i64, scratch_operands = 0 : i64, tpu.core_type = #tpu.core_type<tc>} {
    %c0 = arith.constant 0 : index
    %c0_0 = arith.constant 0 : index
    %c0_1 = arith.constant 0 : index
    %c0_2 = arith.constant 0 : index
    %0 = vector.load %arg0[%c0, %c0_0, %c0_1, %c0_2] : memref<2x15x32x8xf32, #tpu.memory_space<vmem>>, vector<2x15x32x8xf32>
    %1 = vector.extract_strided_slice %0 {offsets = [0, 2, 0, 0], sizes = [2, 1, 32, 8], strides = [1, 1, 1, 1]} : vector<2x15x32x8xf32> to vector<2x1x32x8xf32>
    %2 = vector.shape_cast %1 : vector<2x1x32x8xf32> to vector<2x32x8xf32>
    %3 = vector.extract_strided_slice %0 {offsets = [0, 9, 0, 0], sizes = [2, 1, 32, 8], strides = [1, 1, 1, 1]} : vector<2x15x32x8xf32> to vector<2x1x32x8xf32>
    %4 = vector.shape_cast %3 : vector<2x1x32x8xf32> to vector<2x32x8xf32>
    %5 = arith.addf %2, %4 : vector<2x32x8xf32>
    %6 = arith.negf %5 : vector<2x32x8xf32>
    %7 = math.exp %6 : vector<2x32x8xf32>
    %cst = arith.constant 1.000000e+00 : f32
    %8 = vector.broadcast %cst : f32 to vector<2x32x8xf32>
    %9 = arith.addf %8, %7 : vector<2x32x8xf32>
    %10 = arith.divf %8, %9 : vector<2x32x8xf32>
    %11 = vector.extract_strided_slice %0 {offsets = [0, 0, 0, 0], sizes = [2, 1, 32, 8], strides = [1, 1, 1, 1]} : vector<2x15x32x8xf32> to vector<2x1x32x8xf32>
    %12 = vector.shape_cast %11 : vector<2x1x32x8xf32> to vector<2x32x8xf32>
    %13 = vector.extract_strided_slice %0 {offsets = [0, 7, 0, 0], sizes = [2, 1, 32, 8], strides = [1, 1, 1, 1]} : vector<2x15x32x8xf32> to vector<2x1x32x8xf32>
    %14 = vector.shape_cast %13 : vector<2x1x32x8xf32> to vector<2x32x8xf32>
    %15 = arith.addf %12, %14 : vector<2x32x8xf32>
    %16 = arith.negf %15 : vector<2x32x8xf32>
    %17 = math.exp %16 : vector<2x32x8xf32>
    %cst_3 = arith.constant 1.000000e+00 : f32
    %18 = vector.broadcast %cst_3 : f32 to vector<2x32x8xf32>
    %19 = arith.addf %18, %17 : vector<2x32x8xf32>
    %20 = arith.divf %18, %19 : vector<2x32x8xf32>
    %21 = vector.extract_strided_slice %0 {offsets = [0, 1, 0, 0], sizes = [2, 1, 32, 8], strides = [1, 1, 1, 1]} : vector<2x15x32x8xf32> to vector<2x1x32x8xf32>
    %22 = vector.shape_cast %21 : vector<2x1x32x8xf32> to vector<2x32x8xf32>
    %23 = vector.extract_strided_slice %0 {offsets = [0, 8, 0, 0], sizes = [2, 1, 32, 8], strides = [1, 1, 1, 1]} : vector<2x15x32x8xf32> to vector<2x1x32x8xf32>
    %24 = vector.shape_cast %23 : vector<2x1x32x8xf32> to vector<2x32x8xf32>
    %25 = arith.addf %22, %24 : vector<2x32x8xf32>
    %26 = math.tanh %25 : vector<2x32x8xf32>
    %27 = arith.mulf %20, %26 : vector<2x32x8xf32>
    %c0_4 = arith.constant 0 : index
    %c0_5 = arith.constant 0 : index
    %c0_6 = arith.constant 0 : index
    %28 = vector.load %arg2[%c0_4, %c0_5, %c0_6] : memref<2x160x8xf32, #tpu.memory_space<vmem>>, vector<2x160x8xf32>
    "tpu.trace_start"() <{level = 10 : i32, message = "blc,bkc->blk"}> : () -> ()
    %cst_7 = arith.constant dense<0.000000e+00> : vector<2x32x160xf32>
    %29 = tpu.matmul %10, %28, %cst_7 {dimension_numbers = #tpu.dot_dimension_numbers<[2], [2], [1], [1], [0, 0, 0, 1, 1, 1], [0], [0]>} : vector<2x32x8xf32>, vector<2x160x8xf32>, vector<2x32x160xf32> -> vector<2x32x160xf32>
    "tpu.trace_stop"() : () -> ()
    %cst_8 = arith.constant dense<0xFF800000> : vector<2x32xf32>
    %30 = vector.multi_reduction <maximumf>, %29, %cst_8 [2] : vector<2x32x160xf32> to vector<2x32xf32>
    %31 = vector.shape_cast %30 : vector<2x32xf32> to vector<2x32x1xf32>
    %32 = vector.broadcast %31 : vector<2x32x1xf32> to vector<2x32x160xf32>
    %33 = arith.subf %29, %32 : vector<2x32x160xf32>
    %34 = math.exp %33 : vector<2x32x160xf32>
    %cst_9 = arith.constant dense<0.000000e+00> : vector<2x32xf32>
    %35 = vector.multi_reduction <add>, %34, %cst_9 [2] : vector<2x32x160xf32> to vector<2x32xf32>
    %36 = vector.shape_cast %35 : vector<2x32xf32> to vector<2x32x1xf32>
    %37 = tpu.reciprocal %36 {approx = true} : vector<2x32x1xf32> -> vector<2x32x1xf32>
    %38 = vector.broadcast %37 : vector<2x32x1xf32> to vector<2x32x160xf32>
    %39 = arith.mulf %34, %38 : vector<2x32x160xf32>
    "tpu.trace_start"() <{level = 10 : i32, message = "blk,bkc->blc"}> : () -> ()
    %cst_10 = arith.constant dense<0.000000e+00> : vector<2x32x8xf32>
    %40 = tpu.matmul %39, %28, %cst_10 {dimension_numbers = #tpu.dot_dimension_numbers<[2], [1], [1], [2], [0, 0, 0, 1, 1, 2], [0], [0]>} : vector<2x32x160xf32>, vector<2x160x8xf32>, vector<2x32x8xf32> -> vector<2x32x8xf32>
    "tpu.trace_stop"() : () -> ()
    %c0_11 = arith.constant 0 : index
    %c0_12 = arith.constant 0 : index
    %c0_13 = arith.constant 0 : index
    %41 = vector.load %arg1[%c0_11, %c0_12, %c0_13] : memref<2x32x8xf32, #tpu.memory_space<vmem>>, vector<2x32x8xf32>
    %42 = arith.addf %41, %40 : vector<2x32x8xf32>
    %cst_14 = arith.constant dense<0.000000e+00> : vector<2x32xf32>
    %43 = vector.multi_reduction <add>, %42, %cst_14 [2] : vector<2x32x8xf32> to vector<2x32xf32>
    %44 = vector.shape_cast %43 : vector<2x32xf32> to vector<2x32x1xf32>
    %cst_15 = arith.constant dense<0.000000e+00> : vector<2x1xf32>
    %45 = vector.multi_reduction <add>, %44, %cst_15 [1] : vector<2x32x1xf32> to vector<2x1xf32>
    %46 = vector.shape_cast %45 : vector<2x1xf32> to vector<2x1x1xf32>
    %cst_16 = arith.constant 3.906250e-03 : f32
    %47 = vector.broadcast %cst_16 : f32 to vector<2x1x1xf32>
    %48 = arith.mulf %46, %47 : vector<2x1x1xf32>
    %49 = vector.broadcast %48 : vector<2x1x1xf32> to vector<2x32x8xf32>
    %50 = arith.subf %42, %49 : vector<2x32x8xf32>
    %51 = arith.mulf %50, %50 : vector<2x32x8xf32>
    %cst_17 = arith.constant dense<0.000000e+00> : vector<2x32xf32>
    %52 = vector.multi_reduction <add>, %51, %cst_17 [2] : vector<2x32x8xf32> to vector<2x32xf32>
    %53 = vector.shape_cast %52 : vector<2x32xf32> to vector<2x32x1xf32>
    %cst_18 = arith.constant dense<0.000000e+00> : vector<2x1xf32>
    %54 = vector.multi_reduction <add>, %53, %cst_18 [1] : vector<2x32x1xf32> to vector<2x1xf32>
    %55 = vector.shape_cast %54 : vector<2x1xf32> to vector<2x1x1xf32>
    %cst_19 = arith.constant 3.906250e-03 : f32
    %56 = vector.broadcast %cst_19 : f32 to vector<2x1x1xf32>
    %57 = arith.mulf %55, %56 : vector<2x1x1xf32>
    %cst_20 = arith.constant 9.99999974E-6 : f32
    %58 = vector.broadcast %cst_20 : f32 to vector<2x1x1xf32>
    %59 = arith.addf %57, %58 : vector<2x1x1xf32>
    %60 = math.rsqrt %59 : vector<2x1x1xf32>
    %61 = vector.broadcast %60 : vector<2x1x1xf32> to vector<2x32x8xf32>
    %62 = arith.mulf %50, %61 : vector<2x32x8xf32>
    %c0_21 = arith.constant 0 : index
    %c0_22 = arith.constant 0 : index
    %c0_23 = arith.constant 0 : index
    %63 = vector.load %arg3[%c0_21, %c0_22, %c0_23] : memref<1x32x8xf32, #tpu.memory_space<vmem>>, vector<1x32x8xf32>
    %64 = vector.broadcast %63 : vector<1x32x8xf32> to vector<2x32x8xf32>
    %65 = arith.mulf %62, %64 : vector<2x32x8xf32>
    %c0_24 = arith.constant 0 : index
    %c0_25 = arith.constant 0 : index
    %c0_26 = arith.constant 0 : index
    %66 = vector.load %arg4[%c0_24, %c0_25, %c0_26] : memref<1x32x8xf32, #tpu.memory_space<vmem>>, vector<1x32x8xf32>
    %67 = vector.broadcast %66 : vector<1x32x8xf32> to vector<2x32x8xf32>
    %68 = arith.addf %65, %67 : vector<2x32x8xf32>
    %69 = arith.addf %68, %27 : vector<2x32x8xf32>
    %c0_27 = arith.constant 0 : index
    %c0_28 = arith.constant 0 : index
    %c0_29 = arith.constant 0 : index
    %70 = vector.load %arg5[%c0_27, %c0_28, %c0_29] : memref<2x32x8xf32, #tpu.memory_space<vmem>>, vector<2x32x8xf32>
    tpu.vector_store %arg5[%c0_27, %c0_28, %c0_29], %69 {strides = array<i32>} : memref<2x32x8xf32, #tpu.memory_space<vmem>>, vector<2x32x8xf32>,
    %71 = vector.extract_strided_slice %0 {offsets = [0, 3, 0, 0], sizes = [2, 1, 32, 8], strides = [1, 1, 1, 1]} : vector<2x15x32x8xf32> to vector<2x1x32x8xf32>
    %72 = vector.shape_cast %71 : vector<2x1x32x8xf32> to vector<2x32x8xf32>
    %73 = vector.extract_strided_slice %0 {offsets = [0, 11, 0, 0], sizes = [2, 1, 32, 8], strides = [1, 1, 1, 1]} : vector<2x15x32x8xf32> to vector<2x1x32x8xf32>
    %74 = vector.shape_cast %73 : vector<2x1x32x8xf32> to vector<2x32x8xf32>
    %75 = arith.addf %72, %74 : vector<2x32x8xf32>
    %76 = arith.negf %75 : vector<2x32x8xf32>
    %77 = math.exp %76 : vector<2x32x8xf32>
    %cst_30 = arith.constant 1.000000e+00 : f32
    %78 = vector.broadcast %cst_30 : f32 to vector<2x32x8xf32>
    %79 = arith.addf %78, %77 : vector<2x32x8xf32>
    %80 = arith.divf %78, %79 : vector<2x32x8xf32>
    %81 = vector.extract_strided_slice %0 {offsets = [0, 5, 0, 0], sizes = [2, 1, 32, 8], strides = [1, 1, 1, 1]} : vector<2x15x32x8xf32> to vector<2x1x32x8xf32>
    %82 = vector.shape_cast %81 : vector<2x1x32x8xf32> to vector<2x32x8xf32>
    %83 = vector.extract_strided_slice %0 {offsets = [0, 12, 0, 0], sizes = [2, 1, 32, 8], strides = [1, 1, 1, 1]} : vector<2x15x32x8xf32> to vector<2x1x32x8xf32>
    %84 = vector.shape_cast %83 : vector<2x1x32x8xf32> to vector<2x32x8xf32>
    %85 = arith.addf %82, %84 : vector<2x32x8xf32>
    %cst_31 = arith.constant 1.000000e+00 : f32
    %86 = vector.broadcast %cst_31 : f32 to vector<2x32x8xf32>
    %87 = arith.addf %85, %86 : vector<2x32x8xf32>
    %88 = arith.negf %87 : vector<2x32x8xf32>
    %89 = math.exp %88 : vector<2x32x8xf32>
    %cst_32 = arith.constant 1.000000e+00 : f32
    %90 = vector.broadcast %cst_32 : f32 to vector<2x32x8xf32>
    %91 = arith.addf %90, %89 : vector<2x32x8xf32>
    %92 = arith.divf %90, %91 : vector<2x32x8xf32>
    %93 = vector.extract_strided_slice %0 {offsets = [0, 4, 0, 0], sizes = [2, 1, 32, 8], strides = [1, 1, 1, 1]} : vector<2x15x32x8xf32> to vector<2x1x32x8xf32>
    %94 = vector.shape_cast %93 : vector<2x1x32x8xf32> to vector<2x32x8xf32>
    %95 = vector.extract_strided_slice %0 {offsets = [0, 13, 0, 0], sizes = [2, 1, 32, 8], strides = [1, 1, 1, 1]} : vector<2x15x32x8xf32> to vector<2x1x32x8xf32>
    %96 = vector.shape_cast %95 : vector<2x1x32x8xf32> to vector<2x32x8xf32>
    %97 = arith.addf %94, %96 : vector<2x32x8xf32>
    %98 = math.tanh %97 : vector<2x32x8xf32>
    %99 = vector.extract_strided_slice %0 {offsets = [0, 14, 0, 0], sizes = [2, 1, 32, 8], strides = [1, 1, 1, 1]} : vector<2x15x32x8xf32> to vector<2x1x32x8xf32>
    %100 = vector.shape_cast %99 : vector<2x1x32x8xf32> to vector<2x32x8xf32>
    %101 = math.tanh %100 : vector<2x32x8xf32>
    %102 = arith.mulf %92, %101 : vector<2x32x8xf32>
    %103 = arith.mulf %80, %98 : vector<2x32x8xf32>
    %104 = arith.addf %102, %103 : vector<2x32x8xf32>
    %c0_33 = arith.constant 0 : index
    %c0_34 = arith.constant 0 : index
    %c0_35 = arith.constant 0 : index
    %105 = vector.load %arg6[%c0_33, %c0_34, %c0_35] : memref<2x32x8xf32, #tpu.memory_space<vmem>>, vector<2x32x8xf32>
    tpu.vector_store %arg6[%c0_33, %c0_34, %c0_35], %104 {strides = array<i32>} : memref<2x32x8xf32, #tpu.memory_space<vmem>>, vector<2x32x8xf32>,
    return
  }
}

</mosaic_0001>

<bundles_post_ra>
// kernel: _lambda_.42
= control target key start
LH: loop header
LB: loop body
LE: loop exit
PB: predicated region body
PF: predicated region fallthrough
CT: control target
= control target key end

     0   :  { %s1694_s1 = inlined_call_operand.vmem [shape: bf16[1024,128], index: 1, kind: input, shape index: {}]   ;;  %s1695_s0 = inlined_call_operand.vmem [shape: bf16[64,1024], index: 0, kind: input, shape index: {}]   ;;  %s1696_s2 = inlined_call_operand.vmem [shape: f32[64,128], index: 2, kind: output, shape index: {}]  }
   0x1   :  { %v1291_v0 = vld [vmem:[%s1694_s1 + $0x40] sm:$0xff]   ;;  %v1295_v4 = vld [vmem:[%s1694_s1 + $0x48] sm:$0xff]   ;;  %v1299_v8 = vld [vmem:[%s1694_s1 + $0x50] sm:$0xff]  }
   0x2   :  { %v1292_v1 = vld [vmem:[%s1694_s1 + $0xc0] sm:$0xff]   ;;  %1131 = vmatprep.subr.bf16.mxu0 %v1291_v0  ;;  %v1296_v5 = vld [vmem:[%s1694_s1 + $0xc8] sm:$0xff]   ;;  %v1300_v9 = vld [vmem:[%s1694_s1 + $0xd0] sm:$0xff]  }
   0x3   :  { %v1293_v2 = vld [vmem:[%s1694_s1] sm:$0xff]   ;;  %1171 = vmatprep.subr.bf16.mxu1 %v1292_v1  ;;  %v1297_v6 = vld [vmem:[%s1694_s1 + $0x8] sm:$0xff]   ;;  %v1301_v10 = vld [vmem:[%s1694_s1 + $0x10] sm:$0xff]  }
   0x4   :  { %v1294_v3 = vld [vmem:[%s1694_s1 + $0x80] sm:$0xff]   ;;  %1132 = vmatpush3.bf16.msra.mxu0 %v1293_v2  ;;  %v1298_v7 = vld [vmem:[%s1694_s1 + $0x88] sm:$0xff]   ;;  %v1302_v11 = vld [vmem:[%s1694_s1 + $0x90] sm:$0xff]  }
   0x5   :  { %1172 = vmatpush3.bf16.msra.mxu1 %v1294_v3  ;;  %1133 = vmatprep.subr.bf16.mxu0 %v1295_v4  ;;  %v1303_v12 = vld [vmem:[%s1694_s1 + $0x58] sm:$0xff]   ;;  %v1307_v16 = vld [vmem:[%s1694_s1 + $0x60] sm:$0xff]   ;;  %v1311_v20 = vld [vmem:[%s1694_s1 + $0x68] sm:$0xff]  }
   0x6   :  { %1173 = vmatprep.subr.bf16.mxu1 %v1296_v5  ;;  %v1304_v13 = vld [vmem:[%s1694_s1 + $0xd8] sm:$0xff]   ;;  %v1308_v17 = vld [vmem:[%s1694_s1 + $0xe0] sm:$0xff]   ;;  %v1312_v21 = vld [vmem:[%s1694_s1 + $0xe8] sm:$0xff]  }
   0x7   :  { %v1305_v14 = vld [vmem:[%s1694_s1 + $0x18] sm:$0xff]   ;;  %v1309_v18 = vld [vmem:[%s1694_s1 + $0x20] sm:$0xff]   ;;  %v1313_v22 = vld [vmem:[%s1694_s1 + $0x28] sm:$0xff]  }
   0x8   :  { %1134 = vmatpush3.bf16.msra.mxu0 %v1297_v6  ;;  %v1306_v15 = vld [vmem:[%s1694_s1 + $0x98] sm:$0xff]   ;;  %v1310_v19 = vld [vmem:[%s1694_s1 + $0xa0] sm:$0xff]   ;;  %v1314_v23 = vld [vmem:[%s1694_s1 + $0xa8] sm:$0xff]  }
   0x9   :  { %1174 = vmatpush3.bf16.msra.mxu1 %v1298_v7  ;;  %1135 = vmatprep.subr.bf16.mxu0 %v1299_v8  ;;  %v1315_v24 = vld [vmem:[%s1694_s1 + $0x70] sm:$0xff]   ;;  %v1319_v28 = vld [vmem:[%s1694_s1 + $0x78] sm:$0xff]   ;;  %v32_v32 = vld [vmem:[%s1695_s0] sm:$0xff] }
   0xa   :  { %1175 = vmatprep.subr.bf16.mxu1 %v1300_v9  ;;  %v1316_v25 = vld [vmem:[%s1694_s1 + $0xf0] sm:$0xff]   ;;  %v1320_v29 = vld [vmem:[%s1694_s1 + $0xf8] sm:$0xff]   ;;  %v36_v33 = vld [vmem:[%s1695_s0 + $0x20] sm:$0xff] }
   0xb   :  { %v1317_v26 = vld [vmem:[%s1694_s1 + $0x30] sm:$0xff]   ;;  %v1321_v30 = vld [vmem:[%s1694_s1 + $0x38] sm:$0xff]   ;;  %v33_v34 = vld [vmem:[%s1695_s0 + $0x8] sm:$0xff]  ;;  %v1035_v35 = vcombine.low %v32_v32, %v36_v33  ;;  %v1036_v36 = vcombine.high %v32_v32, %v36_v33 }
   0xc   :  { %1136 = vmatpush3.bf16.msra.mxu0 %v1301_v10  ;;  %v1318_v27 = vld [vmem:[%s1694_s1 + $0xb0] sm:$0xff]   ;;  %v1322_v31 = vld [vmem:[%s1694_s1 + $0xb8] sm:$0xff]   ;;  %v37_v37 = vld [vmem:[%s1695_s0 + $0x28] sm:$0xff] }
   0xd   :  { %1176 = vmatpush3.bf16.msra.mxu1 %v1302_v11  ;;  %1137 = vmatprep.subr.bf16.mxu0 %v1303_v12  ;;  %v1037_v38 = vcombine.low %v33_v34, %v37_v37  ;;  %v1038_v39 = vcombine.high %v33_v34, %v37_v37  ;;  %v1323_v40 = vld [vmem:[%s1694_s1 + $0x140] sm:$0xff]   ;;  %v1327_v44 = vld [vmem:[%s1694_s1 + $0x148] sm:$0xff]   ;;  %v1331_v56 = vld [vmem:[%s1694_s1 + $0x150] sm:$0xff]  }
   0xe   :  { %1177 = vmatprep.subr.bf16.mxu1 %v1304_v13  ;;  %768 = vmatprep.mubr.bf16.mxu0 %v1036_v36  ;;  %v1324_v41 = vld [vmem:[%s1694_s1 + $0x1c0] sm:$0xff]   ;;  %v1328_v45 = vld [vmem:[%s1694_s1 + $0x1c8] sm:$0xff]   ;;  %v1332_v57 = vld [vmem:[%s1694_s1 + $0x1d0] sm:$0xff]  }
   0xf   :  { %833 = vmatprep.mubr.bf16.mxu1 %v1038_v39  ;;  %v1325_v42 = vld [vmem:[%s1694_s1 + $0x100] sm:$0xff]   ;;  %v1329_v46 = vld [vmem:[%s1694_s1 + $0x108] sm:$0xff]   ;;  %v1333_v58 = vld [vmem:[%s1694_s1 + $0x110] sm:$0xff]  }
  0x10   :  { %1138 = vmatpush3.bf16.msra.mxu0 %v1305_v14  ;;  %v1326_v43 = vld [vmem:[%s1694_s1 + $0x180] sm:$0xff]   ;;  %v1330_v47 = vld [vmem:[%s1694_s1 + $0x188] sm:$0xff]   ;;  %v1334_v59 = vld [vmem:[%s1694_s1 + $0x190] sm:$0xff]  }
  0x11   :  { %1178 = vmatpush3.bf16.msra.mxu1 %v1306_v15  ;;  %1139 = vmatprep.subr.bf16.mxu0 %v1307_v16  ;;  %v40_v48 = vld [vmem:[%s1695_s0 + $0x40] sm:$0xff]  ;;  %v41_v51 = vld [vmem:[%s1695_s0 + $0x48] sm:$0xff]  ;;  %v1335_v60 = vld [vmem:[%s1694_s1 + $0x158] sm:$0xff]  }
  0x12   :  { %1179 = vmatprep.subr.bf16.mxu1 %v1308_v17  ;;  %v44_v49 = vld [vmem:[%s1695_s0 + $0x60] sm:$0xff]  ;;  %v45_v52 = vld [vmem:[%s1695_s0 + $0x68] sm:$0xff]  ;;  %v1336_v61 = vld [vmem:[%s1694_s1 + $0x1d8] sm:$0xff]  }
  0x13   :  { %v1044_v50 = vcombine.high %v40_v48, %v44_v49  ;;  %v1043_v53 = vcombine.low %v40_v48, %v44_v49  ;;  %v1046_v54 = vcombine.high %v41_v51, %v45_v52  ;;  %v1045_v55 = vcombine.low %v41_v51, %v45_v52  ;;  %v1337_v62 = vld [vmem:[%s1694_s1 + $0x118] sm:$0xff]   ;;  %v48_v0 = vld [vmem:[%s1695_s0 + $0x80] sm:$0xff]  ;;  %v49_v2 = vld [vmem:[%s1695_s0 + $0x88] sm:$0xff] }
  0x14   :  { %1140 = vmatpush3.bf16.msra.mxu0 %v1309_v18  ;;  %v1338_v63 = vld [vmem:[%s1694_s1 + $0x198] sm:$0xff]   ;;  %v52_v1 = vld [vmem:[%s1695_s0 + $0xa0] sm:$0xff]  ;;  %v53_v3 = vld [vmem:[%s1695_s0 + $0xa8] sm:$0xff] }
  0x15   :  { %1180 = vmatpush3.bf16.msra.mxu1 %v1310_v19  ;;  %1141 = vmatprep.subr.bf16.mxu0 %v1311_v20  ;;  %v1052_v4 = vcombine.high %v48_v0, %v52_v1  ;;  %v1054_v5 = vcombine.high %v49_v2, %v53_v3  ;;  %v1051_v6 = vcombine.low %v48_v0, %v52_v1  ;;  %v1339_v8 = vld [vmem:[%s1694_s1 + $0x160] sm:$0xff]   ;;  %v1343_v12 = vld [vmem:[%s1694_s1 + $0x168] sm:$0xff]   ;;  %v34_v32 = vld [vmem:[%s1695_s0 + $0x10] sm:$0xff] }
  0x16   :  { %1181 = vmatprep.subr.bf16.mxu1 %v1312_v21  ;;  %v1053_v7 = vcombine.low %v49_v2, %v53_v3  ;;  %v1340_v9 = vld [vmem:[%s1694_s1 + $0x1e0] sm:$0xff]   ;;  %v1344_v13 = vld [vmem:[%s1694_s1 + $0x1e8] sm:$0xff]   ;;  %v38_v33 = vld [vmem:[%s1695_s0 + $0x30] sm:$0xff] }
  0x17   :  { %v1341_v10 = vld [vmem:[%s1694_s1 + $0x120] sm:$0xff]   ;;  %v1345_v14 = vld [vmem:[%s1694_s1 + $0x128] sm:$0xff]   ;;  %v1039_v34 = vcombine.low %v34_v32, %v38_v33  ;;  %v35_v36 = vld [vmem:[%s1695_s0 + $0x18] sm:$0xff] }
  0x18   :  { %1142 = vmatpush3.bf16.msra.mxu0 %v1313_v22  ;;  %v1342_v11 = vld [vmem:[%s1694_s1 + $0x1a0] sm:$0xff]   ;;  %v1346_v15 = vld [vmem:[%s1694_s1 + $0x1a8] sm:$0xff]   ;;  %v39_v37 = vld [vmem:[%s1695_s0 + $0x38] sm:$0xff] }
  0x19   :  { %1182 = vmatpush3.bf16.msra.mxu1 %v1314_v23  ;;  %1143 = vmatprep.subr.bf16.mxu0 %v1315_v24  ;;  %v56_v16 = vld [vmem:[%s1695_s0 + $0xc0] sm:$0xff]  ;;  %v57_v18 = vld [vmem:[%s1695_s0 + $0xc8] sm:$0xff]  ;;  %v1347_v24 = vld [vmem:[%s1694_s1 + $0x170] sm:$0xff]   ;;  %v1041_v39 = vcombine.low %v35_v36, %v39_v37 }
  0x1a   :  { %1183 = vmatprep.subr.bf16.mxu1 %v1316_v25  ;;  %v60_v17 = vld [vmem:[%s1695_s0 + $0xe0] sm:$0xff]  ;;  %v61_v20 = vld [vmem:[%s1695_s0 + $0xe8] sm:$0xff]  ;;  %v1348_v25 = vld [vmem:[%s1694_s1 + $0x1f0] sm:$0xff]  }
  0x1b   :  { %v1060_v19 = vcombine.high %v56_v16, %v60_v17  ;;  %v1059_v21 = vcombine.low %v56_v16, %v60_v17  ;;  %v1062_v22 = vcombine.high %v57_v18, %v61_v20  ;;  %v1061_v23 = vcombine.low %v57_v18, %v61_v20  ;;  %v51_v48 = vld [vmem:[%s1695_s0 + $0x98] sm:$0xff] }
  0x1c   :  { %1144 = vmatpush3.bf16.msra.mxu0 %v1317_v26  ;;  %v1349_v26 = vld [vmem:[%s1694_s1 + $0x130] sm:$0xff]   ;;  %v55_v49 = vld [vmem:[%s1695_s0 + $0xb8] sm:$0xff] }
  0x1d   :  { %1184 = vmatpush3.bf16.msra.mxu1 %v1318_v27  ;;  %1145 = vmatprep.subr.bf16.mxu0 %v1319_v28  ;;  %v1350_v27 = vld [vmem:[%s1694_s1 + $0x1b0] sm:$0xff]   ;;  %v1351_v28 = vld [vmem:[%s1694_s1 + $0x178] sm:$0xff]  }
  0x1e   :  { %1185 = vmatprep.subr.bf16.mxu1 %v1320_v29  ;;  %v1352_v29 = vld [vmem:[%s1694_s1 + $0x1f8] sm:$0xff]  }
  0x20   :  { %1146 = vmatpush3.bf16.msra.mxu0 %v1321_v30  ;;  %v1353_v30 = vld [vmem:[%s1694_s1 + $0x138] sm:$0xff]  }
  0x21   :  { %1186 = vmatpush3.bf16.msra.mxu1 %v1322_v31  ;;  %1211 = vmatprep.subr.bf16.mxu0 %v1323_v40  ;;  %v1354_v31 = vld [vmem:[%s1694_s1 + $0x1b8] sm:$0xff]   ;;  %v1042_v40 = vcombine.high %v35_v36, %v39_v37 }
  0x22   :  { %1251 = vmatprep.subr.bf16.mxu1 %v1324_v41  ;;  %v46_v41 = vld [vmem:[%s1695_s0 + $0x70] sm:$0xff] }
  0x23   :  { %769 = vmatmul.mubr.bf16.vlgmr.msra.gmra.mrb[0].mxu0 %v1035_v35  ;;  %v1040_v35 = vcombine.high %v34_v32, %v38_v33 }
  0x24   :  { %834 = vmatmul.mubr.bf16.vlgmr.msra.gmra.mrb[0].mxu1 %v1037_v38  ;;  %1212 = vmatpush3.bf16.msra.mxu0 %v1325_v42  ;;  %v42_v38 = vld [vmem:[%s1695_s0 + $0x50] sm:$0xff]  ;;  %v43_v42 = vld [vmem:[%s1695_s0 + $0x58] sm:$0xff] }
  0x25   :  { %1252 = vmatpush3.bf16.msra.mxu1 %v1326_v43  ;;  %1213 = vmatprep.subr.bf16.mxu0 %v1327_v44  ;;  %v47_v43 = vld [vmem:[%s1695_s0 + $0x78] sm:$0xff]  ;;  %v1048_v44 = vcombine.high %v42_v38, %v46_v41 }
  0x26   :  { %1253 = vmatprep.subr.bf16.mxu1 %v1328_v45  ;;  %776 = vmatprep.mubr.bf16.mxu0 %v1044_v50  ;;  %v1050_v45 = vcombine.high %v43_v42, %v47_v43  ;;  %v1047_v50 = vcombine.low %v42_v38, %v46_v41  ;;  %v1049_v51 = vcombine.low %v43_v42, %v47_v43 }
  0x27   :  { %841 = vmatprep.mubr.bf16.mxu1 %v1046_v54  ;;  %v58_v54 = vld [vmem:[%s1695_s0 + $0xd0] sm:$0xff] }
  0x28   :  { %1214 = vmatpush3.bf16.msra.mxu0 %v1329_v46  ;;  %v50_v46 = vld [vmem:[%s1695_s0 + $0x90] sm:$0xff] }
  0x29   :  { %1254 = vmatpush3.bf16.msra.mxu1 %v1330_v47  ;;  %1215 = vmatprep.subr.bf16.mxu0 %v1331_v56  ;;  %v54_v47 = vld [vmem:[%s1695_s0 + $0xb0] sm:$0xff]  ;;  %v59_v56 = vld [vmem:[%s1695_s0 + $0xd8] sm:$0xff] }
  0x2a   :  { %1255 = vmatprep.subr.bf16.mxu1 %v1332_v57  ;;  %v1056_v52 = vcombine.high %v50_v46, %v54_v47  ;;  %v63_v57 = vld [vmem:[%s1695_s0 + $0xf8] sm:$0xff] }
  0x2b   :  { %777 = vmatmul.mubr.bf16.gmra.mrb[4].mxu0 %v1043_v53  ;;  %v1058_v53 = vcombine.high %v51_v48, %v55_v49 }
  0x2c   :  { %842 = vmatmul.mubr.bf16.gmra.mrb[4].mxu1 %v1045_v55  ;;  %1216 = vmatpush3.bf16.msra.mxu0 %v1333_v58  ;;  %v62_v55 = vld [vmem:[%s1695_s0 + $0xf0] sm:$0xff]  ;;  %v1055_v58 = vcombine.low %v50_v46, %v54_v47 }
  0x2d   :  { %1256 = vmatpush3.bf16.msra.mxu1 %v1334_v59  ;;  %1217 = vmatprep.subr.bf16.mxu0 %v1335_v60  ;;  %v1057_v59 = vcombine.low %v51_v48, %v55_v49  ;;  %v1064_v60 = vcombine.high %v58_v54, %v62_v55 }
  0x2e   :  { %1257 = vmatprep.subr.bf16.mxu1 %v1336_v61  ;;  %784 = vmatprep.mubr.bf16.mxu0 %v1052_v4  ;;  %v1066_v61 = vcombine.high %v59_v56, %v63_v57 }
  0x2f   :  { %849 = vmatprep.mubr.bf16.mxu1 %v1054_v5 }
  0x30   :  { %1218 = vmatpush3.bf16.msra.mxu0 %v1337_v62  ;;  %v1063_v62 = vcombine.low %v58_v54, %v62_v55 }
  0x31   :  { %1258 = vmatpush3.bf16.msra.mxu1 %v1338_v63  ;;  %1219 = vmatprep.subr.bf16.mxu0 %v1339_v8  ;;  %v1065_v63 = vcombine.low %v59_v56, %v63_v57 }
  0x32   :  { %1259 = vmatprep.subr.bf16.mxu1 %v1340_v9 }
  0x33   :  { %785 = vmatmul.mubr.bf16.gmra.mrb[8].mxu0 %v1051_v6 }
  0x34   :  { %850 = vmatmul.mubr.bf16.gmra.mrb[8].mxu1 %v1053_v7  ;;  %1220 = vmatpush3.bf16.msra.mxu0 %v1341_v10 }
  0x35   :  { %1260 = vmatpush3.bf16.msra.mxu1 %v1342_v11  ;;  %1221 = vmatprep.subr.bf16.mxu0 %v1343_v12 }
  0x36   :  { %1261 = vmatprep.subr.bf16.mxu1 %v1344_v13  ;;  %792 = vmatprep.mubr.bf16.mxu0 %v1060_v19 }
  0x37   :  { %857 = vmatprep.mubr.bf16.mxu1 %v1062_v22 }
  0x38   :  { %1222 = vmatpush3.bf16.msra.mxu0 %v1345_v14 }
  0x39   :  { %1262 = vmatpush3.bf16.msra.mxu1 %v1346_v15  ;;  %1223 = vmatprep.subr.bf16.mxu0 %v1347_v24 }
  0x3a   :  { %1263 = vmatprep.subr.bf16.mxu1 %v1348_v25 }
  0x3b   :  { %793 = vmatmul.mubr.bf16.gmra.mrb[12].mxu0 %v1059_v21 }
  0x3c   :  { %858 = vmatmul.mubr.bf16.gmra.mrb[12].mxu1 %v1061_v23  ;;  %1224 = vmatpush3.bf16.msra.mxu0 %v1349_v26 }
  0x3d   :  { %1264 = vmatpush3.bf16.msra.mxu1 %v1350_v27  ;;  %1225 = vmatprep.subr.bf16.mxu0 %v1351_v28 }
  0x3e   :  { %1265 = vmatprep.subr.bf16.mxu1 %v1352_v29  ;;  %898 = vmatprep.mubr.bf16.mxu0 %v1040_v35 }
  0x3f   :  { %963 = vmatprep.mubr.bf16.mxu1 %v1042_v40 }
  0x40   :  { %1226 = vmatpush3.bf16.msra.mxu0 %v1353_v30 }
  0x41   :  { %1266 = vmatpush3.bf16.msra.mxu1 %v1354_v31 }
  0x43   :  { %899 = vmatmul.mubr.bf16.vlgmr.msra.gmra.mrb[16].mxu0 %v1039_v34 }
  0x44   :  { %964 = vmatmul.mubr.bf16.vlgmr.msra.gmra.mrb[16].mxu1 %v1041_v39  ;;  %906 = vmatprep.mubr.bf16.mxu0 %v1048_v44 }
  0x45   :  { %971 = vmatprep.mubr.bf16.mxu1 %v1050_v45 }
  0x4b   :  { %907 = vmatmul.mubr.bf16.gmra.mrb[20].mxu0 %v1047_v50 }
  0x4c   :  { %972 = vmatmul.mubr.bf16.gmra.mrb[20].mxu1 %v1049_v51  ;;  %914 = vmatprep.mubr.bf16.mxu0 %v1056_v52 }
  0x4d   :  { %979 = vmatprep.mubr.bf16.mxu1 %v1058_v53 }
  0x53   :  { %915 = vmatmul.mubr.bf16.gmra.mrb[24].mxu0 %v1055_v58 }
  0x54   :  { %980 = vmatmul.mubr.bf16.gmra.mrb[24].mxu1 %v1057_v59  ;;  %922 = vmatprep.mubr.bf16.mxu0 %v1064_v60 }
  0x55   :  { %987 = vmatprep.mubr.bf16.mxu1 %v1066_v61 }
  0x5b   :  { %923 = vmatmul.mubr.bf16.gmra.mrb[28].mxu0 %v1063_v62 }
  0x5c   :  { %988 = vmatmul.mubr.bf16.gmra.mrb[28].mxu1 %v1065_v63 }
  0xf6   :  { %v1147_v0 = vpop.f32.mrb[0].mxu0 }
  0xf7   :  { %v1187_v1 = vpop.f32.mrb[0].mxu1  ;;  %v1148_v2 = vpop.f32.mrb[1].mxu0 }
  0xf8   :  { %v1149_v3 = vadd.f32 %v1148_v2, %v1147_v0  ;;  %v1188_v4 = vpop.f32.mrb[1].mxu1  ;;  %v1150_v5 = vpop.f32.mrb[2].mxu0 }
  0xf9   :  { %v1189_v6 = vadd.f32 %v1188_v4, %v1187_v1  ;;  %v1190_v7 = vpop.f32.mrb[2].mxu1  ;;  %v1151_v8 = vpop.f32.mrb[3].mxu0 }
  0xfa   :  { %v1152_v9 = vadd.f32 %v1151_v8, %v1150_v5  ;;  %v1191_v10 = vpop.f32.mrb[3].mxu1 }
  0xfb   :  { %v836_v11 = vadd.f32 %v1189_v6, %v1149_v3  ;;  %v1192_v12 = vadd.f32 %v1191_v10, %v1190_v7 }
  0xfd   :  { %v839_v13 = vadd.f32 %v1192_v12, %v1152_v9 }
  0xfe   :  { %v1153_v14 = vpop.f32.mrb[4].mxu0 }
  0xff   :  { %v1193_v15 = vpop.f32.mrb[4].mxu1  ;;  %v1154_v16 = vpop.f32.mrb[5].mxu0 }
 0x100   :  { %v1155_v17 = vadd.f32 %v1154_v16, %v1153_v14  ;;  %v1194_v18 = vpop.f32.mrb[5].mxu1  ;;  %v1156_v19 = vpop.f32.mrb[6].mxu0 }
 0x101   :  { %v1195_v20 = vadd.f32 %v1194_v18, %v1193_v15  ;;  %v1196_v21 = vpop.f32.mrb[6].mxu1  ;;  %v1157_v22 = vpop.f32.mrb[7].mxu0 }
 0x102   :  { %v1158_v23 = vadd.f32 %v1157_v22, %v1156_v19  ;;  %v1197_v24 = vpop.f32.mrb[7].mxu1 }
 0x103   :  { %v844_v25 = vadd.f32 %v1195_v20, %v1155_v17  ;;  %v1198_v26 = vadd.f32 %v1197_v24, %v1196_v21 }
 0x105   :  { %v847_v27 = vadd.f32 %v1198_v26, %v1158_v23 }
 0x106   :  { %v1159_v28 = vpop.f32.mrb[8].mxu0 }
 0x107   :  { %v1199_v29 = vpop.f32.mrb[8].mxu1  ;;  %v1160_v30 = vpop.f32.mrb[9].mxu0 }
 0x108   :  { %v1200_v31 = vpop.f32.mrb[9].mxu1  ;;  %v1161_v32 = vadd.f32 %v1160_v30, %v1159_v28  ;;  %v1162_v34 = vpop.f32.mrb[10].mxu0 }
 0x109   :  { %v1201_v33 = vadd.f32 %v1200_v31, %v1199_v29  ;;  %v1202_v35 = vpop.f32.mrb[10].mxu1  ;;  %v1163_v36 = vpop.f32.mrb[11].mxu0 }
 0x10a   :  { %v1203_v37 = vpop.f32.mrb[11].mxu1  ;;  %v1164_v39 = vadd.f32 %v1163_v36, %v1162_v34 }
 0x10b   :  { %v1658_v38 = vadd.f32 %v1201_v33, %v1161_v32  ;;  %v1204_v40 = vadd.f32 %v1203_v37, %v1202_v35 }
 0x10d   :  { %v1660_v41 = vadd.f32 %v1204_v40, %v1164_v39 }
 0x10e   :  { %v1165_v42 = vpop.f32.mrb[12].mxu0 }
 0x10f   :  { %v1205_v43 = vpop.f32.mrb[12].mxu1  ;;  %v1166_v44 = vpop.f32.mrb[13].mxu0 }
 0x110   :  { %v1167_v45 = vadd.f32 %v1166_v44, %v1165_v42  ;;  %v1206_v46 = vpop.f32.mrb[13].mxu1  ;;  %v1168_v47 = vpop.f32.mrb[14].mxu0 }
 0x111   :  { %v1207_v48 = vadd.f32 %v1206_v46, %v1205_v43  ;;  %v1208_v49 = vpop.f32.mrb[14].mxu1  ;;  %v1169_v50 = vpop.f32.mrb[15].mxu0 }
 0x112   :  { %v1170_v51 = vadd.f32 %v1169_v50, %v1168_v47  ;;  %v1209_v52 = vpop.f32.mrb[15].mxu1 }
 0x113   :  { %v1662_v53 = vadd.f32 %v1207_v48, %v1167_v45  ;;  %v1210_v54 = vadd.f32 %v1209_v52, %v1208_v49 }
 0x115   :  { %v1664_v55 = vadd.f32 %v1210_v54, %v1170_v51 }
 0x116   :  { %v1227_v56 = vpop.f32.mrb[16].mxu0 }
 0x117   :  { %v1267_v57 = vpop.f32.mrb[16].mxu1  ;;  %v1228_v58 = vpop.f32.mrb[17].mxu0 }
 0x118   :  { %v1229_v59 = vadd.f32 %v1228_v58, %v1227_v56  ;;  %v1268_v60 = vpop.f32.mrb[17].mxu1  ;;  %v1230_v61 = vpop.f32.mrb[18].mxu0 }
 0x119   :  { %v1269_v62 = vadd.f32 %v1268_v60, %v1267_v57  ;;  %v1270_v63 = vpop.f32.mrb[18].mxu1  ;;  %v1231_v0 = vpop.f32.mrb[19].mxu0 }
 0x11a   :  { %v901_v1 = vadd.f32 %v1229_v59, %v836_v11  ;;  %v1232_v2 = vadd.f32 %v1231_v0, %v1230_v61  ;;  %v1271_v3 = vpop.f32.mrb[19].mxu1 }
 0x11b   :  { %v1272_v4 = vadd.f32 %v1271_v3, %v1270_v63 }
 0x11c   :  { %v966_v5 = vadd.f32 %v1269_v62, %v901_v1  ;;  %v904_v6 = vadd.f32 %v1232_v2, %v839_v13 }
 0x11e   :  { %1023 = vst [vmem:[%s1696_s2] sm:$0xff] %v966_v5  ;;  %v969_v7 = vadd.f32 %v1272_v4, %v904_v6  ;;  %v1233_v8 = vpop.f32.mrb[20].mxu0 }
 0x11f   :  { %v1273_v9 = vpop.f32.mrb[20].mxu1  ;;  %v1234_v10 = vpop.f32.mrb[21].mxu0 }
 0x120   :  { %1024 = vst [vmem:[%s1696_s2 + $0x8] sm:$0xff] %v969_v7  ;;  %v1235_v12 = vadd.f32 %v1234_v10, %v1233_v8  ;;  %v1274_v14 = vpop.f32.mrb[21].mxu1  ;;  %v1236_v11 = vpop.f32.mrb[22].mxu0 }
 0x121   :  { %v1275_v15 = vadd.f32 %v1274_v14, %v1273_v9  ;;  %v1276_v16 = vpop.f32.mrb[22].mxu1  ;;  %v1237_v17 = vpop.f32.mrb[23].mxu0 }
 0x122   :  { %v909_v18 = vadd.f32 %v1235_v12, %v844_v25  ;;  %v1238_v13 = vadd.f32 %v1237_v17, %v1236_v11  ;;  %v1277_v19 = vpop.f32.mrb[23].mxu1 }
 0x123   :  { %v1278_v20 = vadd.f32 %v1277_v19, %v1276_v16 }
 0x124   :  { %v974_v21 = vadd.f32 %v1275_v15, %v909_v18  ;;  %v912_v22 = vadd.f32 %v1238_v13, %v847_v27 }
 0x126   :  { %1025 = vst [vmem:[%s1696_s2 + $0x10] sm:$0xff] %v974_v21  ;;  %v977_v23 = vadd.f32 %v1278_v20, %v912_v22  ;;  %v1239_v24 = vpop.f32.mrb[24].mxu0 }
 0x127   :  { %v1279_v26 = vpop.f32.mrb[24].mxu1  ;;  %v1240_v28 = vpop.f32.mrb[25].mxu0 }
 0x128   :  { %1026 = vst [vmem:[%s1696_s2 + $0x18] sm:$0xff] %v977_v23  ;;  %v1241_v29 = vadd.f32 %v1240_v28, %v1239_v24  ;;  %v1280_v30 = vpop.f32.mrb[25].mxu1  ;;  %v1242_v25 = vpop.f32.mrb[26].mxu0 }
 0x129   :  { %v1281_v31 = vadd.f32 %v1280_v30, %v1279_v26  ;;  %v1282_v32 = vpop.f32.mrb[26].mxu1  ;;  %v1243_v33 = vpop.f32.mrb[27].mxu0 }
 0x12a   :  { %v917_v27 = vadd.f32 %v1241_v29, %v1658_v38  ;;  %v1244_v34 = vadd.f32 %v1243_v33, %v1242_v25  ;;  %v1283_v35 = vpop.f32.mrb[27].mxu1 }
 0x12b   :  { %v1284_v36 = vadd.f32 %v1283_v35, %v1282_v32 }
 0x12c   :  { %v982_v37 = vadd.f32 %v1281_v31, %v917_v27  ;;  %v920_v39 = vadd.f32 %v1244_v34, %v1660_v41 }
 0x12e   :  { %1027 = vst [vmem:[%s1696_s2 + $0x20] sm:$0xff] %v982_v37  ;;  %v985_v40 = vadd.f32 %v1284_v36, %v920_v39  ;;  %v1245_v42 = vpop.f32.mrb[28].mxu0 }
 0x12f   :  { %v1285_v43 = vpop.f32.mrb[28].mxu1  ;;  %v1246_v44 = vpop.f32.mrb[29].mxu0 }
 0x130   :  { %1028 = vst [vmem:[%s1696_s2 + $0x28] sm:$0xff] %v985_v40  ;;  %v1247_v45 = vadd.f32 %v1246_v44, %v1245_v42  ;;  %v1286_v38 = vpop.f32.mrb[29].mxu1  ;;  %v1248_v46 = vpop.f32.mrb[30].mxu0 }
 0x131   :  { %v1287_v47 = vadd.f32 %v1286_v38, %v1285_v43  ;;  %v1288_v48 = vpop.f32.mrb[30].mxu1  ;;  %v1249_v49 = vpop.f32.mrb[31].mxu0 }
 0x132   :  { %v925_v41 = vadd.f32 %v1247_v45, %v1662_v53  ;;  %v1250_v50 = vadd.f32 %v1249_v49, %v1248_v46  ;;  %v1289_v51 = vpop.f32.mrb[31].mxu1 }
 0x133   :  { %v1290_v52 = vadd.f32 %v1289_v51, %v1288_v48 }
 0x134   :  { %v990_v54 = vadd.f32 %v1287_v47, %v925_v41  ;;  %v928_v56 = vadd.f32 %v1250_v50, %v1664_v55 }
 0x136   :  { %1029 = vst [vmem:[%s1696_s2 + $0x30] sm:$0xff] %v990_v54  ;;  %v993_v57 = vadd.f32 %v1290_v52, %v928_v56 }
 0x138   :  { %1030 = vst [vmem:[%s1696_s2 + $0x38] sm:$0xff] %v993_v57 }

// kernel: _lambda_.43
= control target key start
LH: loop header
LB: loop body
LE: loop exit
PB: predicated region body
PF: predicated region fallthrough
CT: control target
= control target key end

     0   :  { %vm270_vm0 = vcmask 64512   ;;  %vm489_vm2 = vcmask 261120   ;;  %s2173_s2 = inlined_call_operand.vmem [shape: f32[2,32,8], index: 2, kind: input, shape index: {}, may-alias: {1,2}]   ;;  %s2174_s0 = inlined_call_operand.vmem [shape: f32[2,15,32,8], index: 0, kind: input, shape index: {}]   ;;  %s2175_s1 = inlined_call_operand.vmem [shape: f32[2,32,8], index: 1, kind: input, shape index: {}, may-alias: {1,2}]   ;;  %s2176_s6 = inlined_call_operand.vmem [shape: f32[2,32,8], index: 6, kind: output, shape index: {1}]   ;;  %s2177_s3 = inlined_call_operand.vmem [shape: f32[1,32,8], index: 3, kind: input, shape index: {}]   ;;  %s2178_s4 = inlined_call_operand.vmem [shape: f32[1,32,8], index: 4, kind: input, shape index: {}]   ;;  %s2179_s5 = inlined_call_operand.vmem [shape: f32[2,32,8], index: 5, kind: output, shape index: {0}]  }
   0x1   :  { %v262_v0 = vld [vmem:[%s2173_s2] sm:$0xff]  ;;  %v263_v1 = vld [vmem:[%s2173_s2 + $0x8] sm:$0xff]  ;;  %vm1567_vm1 = vmpackc.low %vm270_vm0, %vm270_vm0 }
   0x2   :  { %v1571_v3 = vpack.c.bf16 %v263_v1, %v262_v0  ;;  %v266_v4 = vld [vmem:[%s2173_s2 + $0x20] sm:$0xff]  ;;  %v267_v5 = vld [vmem:[%s2173_s2 + $0x28] sm:$0xff]  ;;  %v264_v6 = vld [vmem:[%s2173_s2 + $0x10] sm:$0xff] }
   0x3   :  { %v1582_v7 = vpack.c.bf16 %v267_v5, %v266_v4  ;;  %v265_v8 = vld [vmem:[%s2173_s2 + $0x18] sm:$0xff]  ;;  %v268_v9 = vld [vmem:[%s2173_s2 + $0x30] sm:$0xff]  ;;  %v30_v13 = vld [vmem:[%s2174_s0 + $0x40] sm:$0xff] }
   0x4   :  { %v269_v10 = vld [vmem:[%s2173_s2 + $0x38] sm:$0xff]  ;;  %1274 = vmatprep.subr.msk.bf16.mxu0 %vm1567_vm1, %v1571_v3  ;;  %v1596_v11 = vpack.c.bf16 %v265_v8, %v264_v6  ;;  %v54_v14 = vld [vmem:[%s2174_s0 + $0x120] sm:$0xff]  ;;  %v31_v18 = vld [vmem:[%s2174_s0 + $0x48] sm:$0xff] }
   0x5   :  { %v1598_v12 = vpack.c.bf16 %v269_v10, %v268_v9  ;;  %1277 = vmatpush3.bf16.xpose.msk.msra.mxu0 %vm1567_vm1, %v1571_v3  ;;  %1286 = vmatprep.subr.msk.bf16.mxu1 %vm1567_vm1, %v1582_v7  ;;  %v126_v15 = vadd.f32 %v54_v14, %v30_v13  ;;  %v55_v19 = vld [vmem:[%s2174_s0 + $0x128] sm:$0xff]  ;;  %v82_v22 = vld [vmem:[%s2174_s0 + $0x220] sm:$0xff]  ;;  %v32_v27 = vld [vmem:[%s2174_s0 + $0x50] sm:$0xff] }
   0x6   :  { %1289 = vmatpush3.bf16.xpose.msk.msra.mxu1 %vm1567_vm1, %v1582_v7  ;;  %1280 = vmatprep.subr.msk.bf16.mxu0 %vm1567_vm1, %v1596_v11  ;;  %v127_v21 = vadd.f32 %v55_v19, %v31_v18  ;;  %v106_v23 = vld [vmem:[%s2174_s0 + $0x300] sm:$0xff]  ;;  %v83_v24 = vld [vmem:[%s2174_s0 + $0x228] sm:$0xff]  ;;  %v56_v28 = vld [vmem:[%s2174_s0 + $0x130] sm:$0xff] }
   0x7   :  { %1292 = vmatprep.subr.msk.bf16.mxu1 %vm1567_vm1, %v1598_v12  ;;  %v1128_v16 = vmul.f32 -1.442695, %v126_v15  ;;  %v130_v25 = vadd.f32 %v106_v23, %v82_v22  ;;  %v107_v26 = vld [vmem:[%s2174_s0 + $0x308] sm:$0xff]  ;;  %v128_v31 = vadd.f32 %v56_v28, %v32_v27  ;;  %v84_v32 = vld [vmem:[%s2174_s0 + $0x230] sm:$0xff]  ;;  %v33_v34 = vld [vmem:[%s2174_s0 + $0x58] sm:$0xff] }
   0x8   :  { %v1129_v29 = vmul.f32 -1.442695, %v127_v21  ;;  %v131_v30 = vadd.f32 %v107_v26, %v83_v24  ;;  %v108_v33 = vld [vmem:[%s2174_s0 + $0x310] sm:$0xff]  ;;  %v57_v37 = vld [vmem:[%s2174_s0 + $0x138] sm:$0xff] }
   0x9   :  { %1312 = vpow2.f32 %v1128_v16  ;;  %v1132_v35 = vmul.f32 -1.442695, %v130_v25  ;;  %v132_v36 = vadd.f32 %v108_v33, %v84_v32  ;;  %v85_v38 = vld [vmem:[%s2174_s0 + $0x238] sm:$0xff]  ;;  %v1130_v41 = vmul.f32 -1.442695, %v128_v31 }
   0xa   :  { %v109_v39 = vld [vmem:[%s2174_s0 + $0x318] sm:$0xff]  ;;  %v1133_v40 = vmul.f32 -1.442695, %v131_v30  ;;  %v129_v42 = vadd.f32 %v57_v37, %v33_v34 }
   0xb   :  { %v1134_v43 = vmul.f32 -1.442695, %v132_v36  ;;  %v133_v44 = vadd.f32 %v109_v39, %v85_v38 }
   0xc   :  { %v1131_v45 = vmul.f32 -1.442695, %v129_v42 }
   0xd   :  { %1283 = vmatpush3.bf16.xpose.msk.msra.mxu0 %vm1567_vm1, %v1596_v11  ;;  %v1135_v46 = vmul.f32 -1.442695, %v133_v44 }
   0xe   :  { %1295 = vmatpush3.bf16.xpose.msk.msra.mxu1 %vm1567_vm1, %v1598_v12  ;;  %1297 = vmatprep.subr.bf16.mxu0 %v1571_v3 }
   0xf   :  { %1305 = vmatprep.subr.bf16.mxu1 %v1582_v7 }
  0x13   :  { %v1313_v17 = vpop.eup %1312 }
  0x14   :  { %v158_v20 = vadd.f32 1.0, %v1313_v17 }
  0x16   :  { %1314 = vrcp.f32 %v158_v20 }
  0x17   :  { %1316 = vpow2.f32 %v1129_v29 }
  0x18   :  { %1318 = vpow2.f32 %v1132_v35 }
  0x19   :  { %1320 = vpow2.f32 %v1133_v40 }
  0x1a   :  { %1322 = vpow2.f32 %v1130_v41 }
  0x1b   :  { %1324 = vpow2.f32 %v1134_v43 }
  0x1c   :  { %1326 = vpow2.f32 %v1131_v45 }
  0x1d   :  { %1328 = vpow2.f32 %v1135_v46 }
  0x20   :  { %v1315_v47 = vpop.eup %1314 }
  0x21   :  { %1224 = vmatprep.mubr.msk.f32.mxu0 %vm270_vm0, %v1315_v47  ;;  %v1317_v48 = vpop.eup %1316 }
  0x22   :  { %v1319_v49 = vpop.eup %1318  ;;  %v159_v50 = vadd.f32 1.0, %v1317_v48 }
  0x23   :  { %v1321_v51 = vpop.eup %1320  ;;  %v162_v52 = vadd.f32 1.0, %v1319_v49 }
  0x24   :  { %v1323_v53 = vpop.eup %1322  ;;  %1330 = vrcp.f32 %v159_v50  ;;  %v163_v54 = vadd.f32 1.0, %v1321_v51 }
  0x25   :  { %v1325_v55 = vpop.eup %1324  ;;  %1332 = vrcp.f32 %v162_v52  ;;  %v160_v56 = vadd.f32 1.0, %v1323_v53 }
  0x26   :  { %v1327_v57 = vpop.eup %1326  ;;  %1334 = vrcp.f32 %v163_v54  ;;  %v164_v58 = vadd.f32 1.0, %v1325_v55 }
  0x27   :  { %v1329_v59 = vpop.eup %1328  ;;  %1336 = vrcp.f32 %v160_v56  ;;  %v161_v60 = vadd.f32 1.0, %v1327_v57 }
  0x28   :  { %1338 = vrcp.f32 %v164_v58  ;;  %v165_v61 = vadd.f32 1.0, %v1329_v59 }
  0x29   :  { %1340 = vrcp.f32 %v161_v60 }
  0x2a   :  { %1342 = vrcp.f32 %v165_v61 }
  0x2e   :  { %v1331_v62 = vpop.eup %1330 }
  0x2f   :  { %v1333_v63 = vpop.eup %1332  ;;  %1225 = vmatmul.mubr.msk.f32.vlgmr.msra.gmra.mrb[0].mxu0 %vm270_vm0, %v1331_v62 }
  0x30   :  { %v1335_v0 = vpop.eup %1334  ;;  %1238 = vmatprep.mubr.msk.f32.mxu1 %vm270_vm0, %v1333_v63  ;;  %1299 = vmatpush3.bf16.msra.mxu0 %v1571_v3 }
  0x31   :  { %v1337_v1 = vpop.eup %1336  ;;  %1239 = vmatmul.mubr.msk.f32.vlgmr.msra.gmra.mrb[0].mxu1 %vm270_vm0, %v1335_v0  ;;  %1301 = vmatprep.subr.bf16.mxu0 %v1596_v11 }
  0x32   :  { %v1339_v2 = vpop.eup %1338  ;;  %1227 = vmatprep.mubr.msk.f32.mxu0 %vm270_vm0, %v1337_v1  ;;  %1307 = vmatpush3.bf16.msra.mxu1 %v1582_v7 }
  0x33   :  { %v1341_v4 = vpop.eup %1340  ;;  %1241 = vmatprep.mubr.msk.f32.mxu1 %vm270_vm0, %v1339_v2  ;;  %1309 = vmatprep.subr.bf16.mxu1 %v1598_v12 }
  0x34   :  { %v1343_v5 = vpop.eup %1342  ;;  %1228 = vmatmul.mubr.msk.f32.gmra.mrb[2].mxu0 %vm270_vm0, %v1341_v4 }
  0x35   :  { %1242 = vmatmul.mubr.msk.f32.gmra.mrb[2].mxu1 %vm270_vm0, %v1343_v5  ;;  %1303 = vmatpush3.bf16.msra.mxu0 %v1596_v11 }
  0x36   :  { %1311 = vmatpush3.bf16.msra.mxu1 %v1598_v12 }
 0x102   :  { %v1226_v3 = vpop.f32.mrb[0].mxu0 }
 0x103   :  { %v361_v6 = vpop.f32.mrb[1].mxu0  ;;  %v493_v8 = vsel %vm489_vm2, %v1226_v3, -inf }
 0x104   :  { %494 = vmax.xlane.f32.xlu1 %v493_v8  ;;  %v1240_v7 = vpop.f32.mrb[0].mxu1  ;;  %v490_v9 = vsel %vm489_vm2, %v361_v6, -inf }
 0x105   :  { %491 = vmax.xlane.f32.xlu0 %v490_v9  ;;  %v470_v10 = vpop.f32.mrb[1].mxu1  ;;  %v505_v13 = vsel %vm489_vm2, %v1240_v7, -inf }
 0x106   :  { %v502_v14 = vsel %vm489_vm2, %v470_v10, -inf }
 0x107   :  { %v1229_v15 = vpop.f32.mrb[2].mxu0 }
 0x108   :  { %506 = vmax.xlane.f32.xlu1 %v505_v13  ;;  %v1243_v11 = vpop.f32.mrb[2].mxu1  ;;  %v371_v16 = vpop.f32.mrb[3].mxu0  ;;  %v499_v20 = vsel %vm489_vm2, %v1229_v15, -inf }
 0x109   :  { %503 = vmax.xlane.f32.xlu0 %v502_v14  ;;  %v480_v12 = vpop.f32.mrb[3].mxu1  ;;  %v496_v18 = vsel %vm489_vm2, %v371_v16, -inf  ;;  %v511_v19 = vsel %vm489_vm2, %v1243_v11, -inf }
 0x10a   :  { %v508_v17 = vsel %vm489_vm2, %v480_v12, -inf }
 0x10c   :  { %509 = vmax.xlane.f32.xlu1 %v508_v17 }
 0x10d   :  { %497 = vmax.xlane.f32.xlu0 %v496_v18 }
 0x110   :  { %512 = vmax.xlane.f32.xlu1 %v511_v19 }
 0x111   :  { %500 = vmax.xlane.f32.xlu0 %v499_v20 }
 0x191   :  { %v495_v21 = vpop.xlane.xlu1 %494 }
 0x192   :  { %v515_v22 = vsub.f32 %v1226_v3, %v495_v21  ;;  %v492_v23 = vpop.xlane.xlu0 %491  ;;  %v773_v21 = vld [vmem:[%s2175_s1 + $0x8] sm:$0xff] }
 0x193   :  { %v514_v24 = vsub.f32 %v361_v6, %v492_v23 }
 0x194   :  { %v524_v25 = vmul.f32 1.442695, %v515_v22  ;;  %v772_v22 = vld [vmem:[%s2175_s1] sm:$0xff] }
 0x195   :  { %v522_v26 = vmul.f32 1.442695, %v514_v24  ;;  %v507_v27 = vpop.xlane.xlu1 %506 }
 0x196   :  { %1344 = vpow2.f32 %v524_v25  ;;  %v519_v28 = vsub.f32 %v1240_v7, %v507_v27  ;;  %v504_v29 = vpop.xlane.xlu0 %503 }
 0x197   :  { %v518_v30 = vsub.f32 %v470_v10, %v504_v29  ;;  %1346 = vpow2.f32 %v522_v26  ;;  %v777_v26 = vld [vmem:[%s2175_s1 + $0x28] sm:$0xff] }
 0x198   :  { %v532_v31 = vmul.f32 1.442695, %v519_v28  ;;  %v776_v28 = vld [vmem:[%s2175_s1 + $0x20] sm:$0xff] }
 0x199   :  { %v530_v32 = vmul.f32 1.442695, %v518_v30  ;;  %v510_v33 = vpop.xlane.xlu1 %509 }
 0x19a   :  { %1348 = vpow2.f32 %v532_v31  ;;  %v520_v34 = vsub.f32 %v480_v12, %v510_v33  ;;  %v498_v35 = vpop.xlane.xlu0 %497 }
 0x19b   :  { %v516_v36 = vsub.f32 %v371_v16, %v498_v35  ;;  %1350 = vpow2.f32 %v530_v32 }
 0x19c   :  { %v534_v37 = vmul.f32 1.442695, %v520_v34 }
 0x19d   :  { %v526_v38 = vmul.f32 1.442695, %v516_v36  ;;  %v513_v39 = vpop.xlane.xlu1 %512  ;;  %v774_v36 = vld [vmem:[%s2175_s1 + $0x10] sm:$0xff] }
 0x19e   :  { %v521_v40 = vsub.f32 %v1243_v11, %v513_v39  ;;  %v501_v41 = vpop.xlane.xlu0 %500 }
 0x19f   :  { %1352 = vpow2.f32 %v526_v38  ;;  %v517_v42 = vsub.f32 %v1229_v15, %v501_v41 }
 0x1a0   :  { %v1345_v43 = vpop.eup %1344  ;;  %1354 = vpow2.f32 %v534_v37  ;;  %v536_v44 = vmul.f32 1.442695, %v521_v40  ;;  %v775_v40 = vld [vmem:[%s2175_s1 + $0x18] sm:$0xff] }
 0x1a1   :  { %v528_v45 = vmul.f32 1.442695, %v517_v42  ;;  %v541_v46 = vsel %vm489_vm2, %v1345_v43, 0.0  ;;  %v1347_v47 = vpop.eup %1346  ;;  %v778_v42 = vld [vmem:[%s2175_s1 + $0x30] sm:$0xff] }
 0x1a2   :  { %542 = vadd.xlane.f32.xlu0 %v541_v46  ;;  %v538_v50 = vsel %vm489_vm2, %v1347_v47, 0.0 }
 0x1a3   :  { %1356 = vpow2.f32 %v528_v45 }
 0x1a4   :  { %v1349_v48 = vpop.eup %1348  ;;  %1358 = vpow2.f32 %v536_v44  ;;  %v779_v44 = vld [vmem:[%s2175_s1 + $0x38] sm:$0xff] }
 0x1a5   :  { %v553_v49 = vsel %vm489_vm2, %v1349_v48, 0.0  ;;  %v1351_v51 = vpop.eup %1350 }
 0x1a6   :  { %554 = vadd.xlane.f32.xlu1 %v553_v49  ;;  %539 = vadd.xlane.f32.xlu0 %v538_v50  ;;  %v550_v53 = vsel %vm489_vm2, %v1351_v51, 0.0 }
 0x1a9   :  { %v1353_v52 = vpop.eup %1352 }
 0x1aa   :  { %v1355_v54 = vpop.eup %1354  ;;  %551 = vadd.xlane.f32.xlu1 %v550_v53  ;;  %v544_v55 = vsel %vm489_vm2, %v1353_v52, 0.0 }
 0x1ab   :  { %545 = vadd.xlane.f32.xlu0 %v544_v55  ;;  %v556_v57 = vsel %vm489_vm2, %v1355_v54, 0.0 }
 0x1ad   :  { %v1357_v56 = vpop.eup %1356 }
 0x1ae   :  { %v1359_v58 = vpop.eup %1358  ;;  %557 = vadd.xlane.f32.xlu1 %v556_v57  ;;  %v547_v59 = vsel %vm489_vm2, %v1357_v56, 0.0 }
 0x1af   :  { %548 = vadd.xlane.f32.xlu0 %v547_v59  ;;  %v559_v60 = vsel %vm489_vm2, %v1359_v58, 0.0 }
 0x1b2   :  { %560 = vadd.xlane.f32.xlu1 %v559_v60 }
 0x22f   :  { %v543_v61 = vpop.xlane.xlu0 %542 }
 0x230   :  { %1360 = vrcp.f32 %v543_v61 }
 0x233   :  { %v555_v62 = vpop.xlane.xlu1 %554  ;;  %v540_v63 = vpop.xlane.xlu0 %539 }
 0x234   :  { %1362 = vrcp.f32 %v540_v63 }
 0x235   :  { %1364 = vrcp.f32 %v555_v62 }
 0x237   :  { %v552_v0 = vpop.xlane.xlu1 %551 }
 0x238   :  { %1366 = vrcp.f32 %v552_v0  ;;  %v546_v1 = vpop.xlane.xlu0 %545 }
 0x239   :  { %1368 = vrcp.f32 %v546_v1 }
 0x23a   :  { %v1361_v5 = vpop.eup %1360 }
 0x23b   :  { %v558_v2 = vpop.xlane.xlu1 %557  ;;  %v571_v9 = vmul.f32 %v1361_v5, %v1345_v43 }
 0x23c   :  { %1370 = vrcp.f32 %v558_v2  ;;  %v549_v4 = vpop.xlane.xlu0 %548 }
 0x23d   :  { %1372 = vrcp.f32 %v549_v4 }
 0x23e   :  { %v1363_v3 = vpop.eup %1362 }
 0x23f   :  { %v561_v6 = vpop.xlane.xlu1 %560  ;;  %v570_v8 = vmul.f32 %v1363_v3, %v1347_v47  ;;  %v1365_v7 = vpop.eup %1364 }
 0x240   :  { %1374 = vrcp.f32 %v561_v6  ;;  %v575_v15 = vmul.f32 %v1365_v7, %v1349_v48 }
 0x241   :  { %1252 = vmatprep.mubr.msk.f32.mxu0 %vm489_vm2, %v570_v8 }
 0x242   :  { %v1367_v10 = vpop.eup %1366  ;;  %1253 = vmatmul.mubr.msk.f32.vlgmr.msra.gmra.mrb[4].mxu0 %vm489_vm2, %v571_v9 }
 0x243   :  { %v1369_v13 = vpop.eup %1368  ;;  %v574_v14 = vmul.f32 %v1367_v10, %v1351_v51 }
 0x244   :  { %v572_v11 = vmul.f32 %v1369_v13, %v1353_v52 }
 0x245   :  { %1266 = vmatprep.mubr.msk.f32.mxu1 %vm489_vm2, %v574_v14 }
 0x246   :  { %v1371_v16 = vpop.eup %1370  ;;  %1255 = vmatprep.mubr.msk.f32.mxu0 %vm489_vm2, %v572_v11  ;;  %1267 = vmatmul.mubr.msk.f32.vlgmr.msra.gmra.mrb[4].mxu1 %vm489_vm2, %v575_v15 }
 0x247   :  { %v1373_v12 = vpop.eup %1372  ;;  %v576_v17 = vmul.f32 %v1371_v16, %v1355_v54 }
 0x248   :  { %v573_v18 = vmul.f32 %v1373_v12, %v1357_v56 }
 0x249   :  { %1269 = vmatprep.mubr.msk.f32.mxu1 %vm489_vm2, %v576_v17 }
 0x24a   :  { %v1375_v19 = vpop.eup %1374  ;;  %1256 = vmatmul.mubr.msk.f32.gmra.mrb[6].mxu0 %vm489_vm2, %v573_v18 }
 0x24b   :  { %v577_v20 = vmul.f32 %v1375_v19, %v1359_v58 }
 0x24d   :  { %1270 = vmatmul.mubr.msk.f32.gmra.mrb[6].mxu1 %vm489_vm2, %v577_v20 }
 0x315   :  { %v1254_v23 = vpop.f32.mrb[4].mxu0 }
 0x316   :  { %v1715_v24 = vadd.f32 %v1254_v23, %v773_v21  ;;  %v656_v25 = vpop.f32.mrb[5].mxu0 }
 0x317   :  { %v1720_v27 = vadd.f32 %v772_v22, %v656_v25 }
 0x318   :  { %v791_v30 = vsel %vm270_vm0, %v1715_v24, 0.0 }
 0x319   :  { %v1268_v29 = vpop.f32.mrb[4].mxu1  ;;  %792 = vadd.xlane.f32.xlu1 %v791_v30  ;;  %v788_v33 = vsel %vm270_vm0, %v1720_v27, 0.0 }
 0x31a   :  { %v785_v31 = vadd.f32 %v1268_v29, %v777_v26  ;;  %v753_v32 = vpop.f32.mrb[5].mxu1  ;;  %789 = vadd.xlane.f32.xlu0 %v788_v33 }
 0x31b   :  { %v784_v34 = vadd.f32 %v776_v28, %v753_v32 }
 0x31c   :  { %v803_v35 = vsel %vm270_vm0, %v785_v31, 0.0 }
 0x31d   :  { %v1257_v37 = vpop.f32.mrb[6].mxu0  ;;  %v800_v38 = vsel %vm270_vm0, %v784_v34, 0.0  ;;  %804 = vadd.xlane.f32.xlu1 %v803_v35 }
 0x31e   :  { %v666_v39 = vpop.f32.mrb[7].mxu0  ;;  %801 = vadd.xlane.f32.xlu0 %v800_v38  ;;  %v783_v47 = vadd.f32 %v1257_v37, %v775_v40 }
 0x31f   :  { %v782_v41 = vadd.f32 %v774_v36, %v666_v39 }
 0x320   :  { %v1271_v43 = vpop.f32.mrb[6].mxu1  ;;  %v797_v51 = vsel %vm270_vm0, %v783_v47, 0.0 }
 0x321   :  { %v763_v45 = vpop.f32.mrb[7].mxu1  ;;  %v794_v46 = vsel %vm270_vm0, %v782_v41, 0.0  ;;  %v787_v49 = vadd.f32 %v1271_v43, %v779_v44  ;;  %v35_v43 = vld [vmem:[%s2174_s0 + $0x68] sm:$0xff] }
 0x322   :  { %v786_v48 = vadd.f32 %v778_v42, %v763_v45  ;;  %795 = vadd.xlane.f32.xlu0 %v794_v46  ;;  %v58_v42 = vld [vmem:[%s2174_s0 + $0x160] sm:$0xff]  ;;  %v59_v44 = vld [vmem:[%s2174_s0 + $0x168] sm:$0xff]  ;;  %v36_v45 = vld [vmem:[%s2174_s0 + $0x70] sm:$0xff] }
 0x323   :  { %v809_v52 = vsel %vm270_vm0, %v787_v49, 0.0  ;;  %v60_v46 = vld [vmem:[%s2174_s0 + $0x170] sm:$0xff] }
 0x324   :  { %v806_v50 = vsel %vm270_vm0, %v786_v48, 0.0 }
 0x325   :  { %807 = vadd.xlane.f32.xlu1 %v806_v50  ;;  %v86_v50 = vld [vmem:[%s2174_s0 + $0x240] sm:$0xff] }
 0x326   :  { %798 = vadd.xlane.f32.xlu0 %v797_v51  ;;  %v110_v51 = vld [vmem:[%s2174_s0 + $0x340] sm:$0xff] }
 0x329   :  { %810 = vadd.xlane.f32.xlu1 %v809_v52  ;;  %v945_v52 = vadd.f32 %v59_v44, %v35_v43  ;;  %v96_v44 = vld [vmem:[%s2174_s0 + $0x290] sm:$0xff] }
 0x3a6   :  { %v793_v53 = vpop.xlane.xlu1 %792 }
 0x3a7   :  { %v790_v54 = vpop.xlane.xlu0 %789 }
 0x3a8   :  { %v812_v58 = vadd.f32 %v793_v53, %v790_v54  ;;  %v946_v53 = vadd.f32 %v60_v46, %v36_v45  ;;  %v116_v45 = vld [vmem:[%s2174_s0 + $0x370] sm:$0xff] }
 0x3aa   :  { %v805_v56 = vpop.xlane.xlu1 %804 }
 0x3ab   :  { %v802_v55 = vpop.xlane.xlu0 %801 }
 0x3ac   :  { %v821_v60 = vadd.f32 %v805_v56, %v802_v55  ;;  %v948_v56 = vadd.f32 %v110_v51, %v86_v50 }
 0x3af   :  { %v796_v57 = vpop.xlane.xlu0 %795 }
 0x3b0   :  { %v813_v61 = vadd.f32 %v812_v58, %v796_v57  ;;  %v1169_v57 = vmul.f32 -1.442695, %v945_v52  ;;  %v1170_v58 = vmul.f32 -1.442695, %v946_v53 }
 0x3b2   :  { %v808_v59 = vpop.xlane.xlu1 %807 }
 0x3b3   :  { %v799_v62 = vpop.xlane.xlu0 %798  ;;  %v822_v63 = vadd.f32 %v821_v60, %v808_v59  ;;  %v1172_v60 = vmul.f32 -1.442695, %v948_v56 }
 0x3b4   :  { %v814_v0 = vadd.f32 %v813_v61, %v799_v62  ;;  %v87_v61 = vld [vmem:[%s2174_s0 + $0x248] sm:$0xff] }
 0x3b5   :  { %v111_v62 = vld [vmem:[%s2174_s0 + $0x348] sm:$0xff] }
 0x3b6   :  { %v811_v1 = vpop.xlane.xlu1 %810  ;;  %v815_v2 = vrot.slane %v814_v0, 4 }
 0x3b7   :  { %v823_v4 = vadd.f32 %v822_v63, %v811_v1  ;;  %v88_v63 = vld [vmem:[%s2174_s0 + $0x250] sm:$0xff]  ;;  %v89_v1 = vld [vmem:[%s2174_s0 + $0x258] sm:$0xff] }
 0x3b8   :  { %v816_v5 = vadd.f32 %v815_v2, %v814_v0  ;;  %v112_v0 = vld [vmem:[%s2174_s0 + $0x350] sm:$0xff]  ;;  %v113_v2 = vld [vmem:[%s2174_s0 + $0x358] sm:$0xff] }
 0x3b9   :  { %v824_v3 = vrot.slane %v823_v4, 4 }
 0x3ba   :  { %v817_v6 = vrot.slane %v816_v5, 2 }
 0x3bb   :  { %v825_v8 = vadd.f32 %v824_v3, %v823_v4  ;;  %v949_v4 = vadd.f32 %v111_v62, %v87_v61  ;;  %v62_v3 = vld [vmem:[%s2174_s0 + $0x180] sm:$0xff] }
 0x3bc   :  { %v818_v7 = vadd.f32 %v817_v6, %v816_v5  ;;  %v42_v5 = vld [vmem:[%s2174_s0 + $0xa0] sm:$0xff]  ;;  %v950_v6 = vadd.f32 %v112_v0, %v88_v63 }
 0x3bd   :  { %v826_v9 = vrot.slane %v825_v8, 2 }
 0x3be   :  { %v819_v10 = vrot.slane %v818_v7, 1 }
 0x3bf   :  { %v827_v13 = vadd.f32 %v826_v9, %v825_v8  ;;  %v43_v8 = vld [vmem:[%s2174_s0 + $0xa8] sm:$0xff]  ;;  %v951_v9 = vadd.f32 %v113_v2, %v89_v1 }
 0x3c0   :  { %v820_v14 = vadd.f32 %v819_v10, %v818_v7  ;;  %v63_v7 = vld [vmem:[%s2174_s0 + $0x188] sm:$0xff]  ;;  %v44_v10 = vld [vmem:[%s2174_s0 + $0xb0] sm:$0xff] }
 0x3c1   :  { %v828_v15 = vrot.slane %v827_v13, 1 }
 0x3c2   :  { %v830_v11 = vmul.f32 0.00390625, %v820_v14 }
 0x3c3   :  { %v829_v16 = vadd.f32 %v828_v15, %v827_v13  ;;  %v64_v13 = vld [vmem:[%s2174_s0 + $0x190] sm:$0xff]  ;;  %v45_v15 = vld [vmem:[%s2174_s0 + $0xb8] sm:$0xff] }
 0x3c4   :  { %v1748_v17 = vsub.f32 %v1715_v24, %v830_v11  ;;  %v1751_v18 = vsub.f32 %v1720_v27, %v830_v11  ;;  %v1763_v25 = vsub.f32 %v782_v41, %v830_v11  ;;  %v34_v41 = vld [vmem:[%s2174_s0 + $0x60] sm:$0xff] }
 0x3c5   :  { %v831_v12 = vmul.f32 0.00390625, %v829_v16  ;;  %v1173_v16 = vmul.f32 -1.442695, %v949_v4 }
 0x3c6   :  { %v841_v19 = vmul.f32 %v1748_v17, %v1748_v17  ;;  %v840_v20 = vmul.f32 %v1751_v18, %v1751_v18  ;;  %v842_v32 = vmul.f32 %v1763_v25, %v1763_v25 }
 0x3c7   :  { %v1757_v21 = vsub.f32 %v785_v31, %v831_v12  ;;  %v1759_v22 = vsub.f32 %v784_v34, %v831_v12  ;;  %v1761_v23 = vsub.f32 %v786_v48, %v831_v12  ;;  %v1777_v33 = vsub.f32 %v787_v49, %v831_v12  ;;  %v37_v48 = vld [vmem:[%s2174_s0 + $0x78] sm:$0xff] }
 0x3c8   :  { %v851_v24 = vsel %vm270_vm0, %v841_v19, 0.0  ;;  %v848_v26 = vsel %vm270_vm0, %v840_v20, 0.0  ;;  %v1779_v34 = vsub.f32 %v783_v47, %v830_v11  ;;  %v854_v36 = vsel %vm270_vm0, %v842_v32, 0.0  ;;  %v61_v49 = vld [vmem:[%s2174_s0 + $0x178] sm:$0xff]  ;;  %v94_v19 = vld [vmem:[%s2174_s0 + $0x280] sm:$0xff] }
 0x3c9   :  { %v845_v27 = vmul.f32 %v1757_v21, %v1757_v21  ;;  %v844_v28 = vmul.f32 %v1759_v22, %v1759_v22  ;;  %852 = vadd.xlane.f32.xlu1 %v851_v24  ;;  %849 = vadd.xlane.f32.xlu0 %v848_v26  ;;  %v846_v31 = vmul.f32 %v1761_v23, %v1761_v23  ;;  %v65_v11 = vld [vmem:[%s2174_s0 + $0x198] sm:$0xff]  ;;  %v114_v20 = vld [vmem:[%s2174_s0 + $0x360] sm:$0xff]  ;;  %v1174_v24 = vmul.f32 -1.442695, %v950_v6 }
 0x3ca   :  { %v847_v37 = vmul.f32 %v1777_v33, %v1777_v33  ;;  %v843_v38 = vmul.f32 %v1779_v34, %v1779_v34  ;;  %v944_v47 = vadd.f32 %v58_v42, %v34_v41  ;;  %v947_v54 = vadd.f32 %v61_v49, %v37_v48  ;;  %v115_v41 = vld [vmem:[%s2174_s0 + $0x368] sm:$0xff]  ;;  %v97_v48 = vld [vmem:[%s2174_s0 + $0x298] sm:$0xff] }
 0x3cb   :  { %v863_v29 = vsel %vm270_vm0, %v845_v27, 0.0  ;;  %v860_v30 = vsel %vm270_vm0, %v844_v28, 0.0  ;;  %v866_v35 = vsel %vm270_vm0, %v846_v31, 0.0  ;;  %v1000_v12 = vadd.f32 %v62_v3, %v42_v5  ;;  %v117_v49 = vld [vmem:[%s2174_s0 + $0x378] sm:$0xff]  ;;  %v38_v5 = vld [vmem:[%s2174_s0 + $0x80] sm:$0xff] }
 0x3cc   :  { %v869_v39 = vsel %vm270_vm0, %v847_v37, 0.0  ;;  %v857_v40 = vsel %vm270_vm0, %v843_v38, 0.0  ;;  %v1168_v55 = vmul.f32 -1.442695, %v944_v47  ;;  %v1171_v59 = vmul.f32 -1.442695, %v947_v54 }
 0x3cd   :  { %864 = vadd.xlane.f32.xlu1 %v863_v29  ;;  %861 = vadd.xlane.f32.xlu0 %v860_v30  ;;  %v1001_v26 = vadd.f32 %v63_v7, %v43_v8  ;;  %v1175_v28 = vmul.f32 -1.442695, %v951_v9  ;;  %v1002_v29 = vadd.f32 %v64_v13, %v44_v10  ;;  %v1003_v32 = vadd.f32 %v65_v11, %v45_v15  ;;  %v66_v3 = vld [vmem:[%s2174_s0 + $0x1a0] sm:$0xff]  ;;  %v39_v9 = vld [vmem:[%s2174_s0 + $0x88] sm:$0xff] }
 0x3ce   :  { %1376 = vpow2.f32 %v1168_v55  ;;  %v1004_v37 = vadd.f32 %v114_v20, %v94_v19  ;;  %v1008_v38 = vadd.f32 1.0, %v1000_v12  ;;  %v1006_v55 = vadd.f32 %v116_v45, %v96_v44  ;;  %v67_v10 = vld [vmem:[%s2174_s0 + $0x1a8] sm:$0xff] }
 0x3cf   :  { %1378 = vpow2.f32 %v1169_v57  ;;  %v1009_v43 = vadd.f32 1.0, %v1001_v26  ;;  %v1010_v47 = vadd.f32 1.0, %v1002_v29  ;;  %v1011_v51 = vadd.f32 1.0, %v1003_v32  ;;  %v68_v29 = vld [vmem:[%s2174_s0 + $0x1b0] sm:$0xff]  ;;  %v41_v32 = vld [vmem:[%s2174_s0 + $0x98] sm:$0xff] }
 0x3d0   :  { %1380 = vpow2.f32 %v1170_v58  ;;  %v1012_v53 = vadd.f32 1.0, %v1004_v37  ;;  %v1176_v54 = vmul.f32 -1.442695, %v1008_v38  ;;  %v1007_v57 = vadd.f32 %v117_v49, %v97_v48  ;;  %v90_v38 = vld [vmem:[%s2174_s0 + $0x260] sm:$0xff] }
 0x3d1   :  { %867 = vadd.xlane.f32.xlu1 %v866_v35  ;;  %855 = vadd.xlane.f32.xlu0 %v854_v36  ;;  %1382 = vpow2.f32 %v1171_v59  ;;  %v1177_v56 = vmul.f32 -1.442695, %v1009_v43  ;;  %v1178_v58 = vmul.f32 -1.442695, %v1010_v47  ;;  %v1179_v59 = vmul.f32 -1.442695, %v1011_v51 }
 0x3d2   :  { %1384 = vpow2.f32 %v1172_v60  ;;  %v1180_v61 = vmul.f32 -1.442695, %v1012_v53  ;;  %v1014_v62 = vadd.f32 1.0, %v1006_v55  ;;  %v1015_v0 = vadd.f32 1.0, %v1007_v57  ;;  %v119_v51 = vld [vmem:[%s2174_s0 + $0x388] sm:$0xff]  ;;  %v92_v53 = vld [vmem:[%s2174_s0 + $0x270] sm:$0xff] }
 0x3d3   :  { %1386 = vpow2.f32 %v1173_v16  ;;  %v1064_v12 = vadd.f32 %v66_v3, %v38_v5  ;;  %v1065_v20 = vadd.f32 %v67_v10, %v39_v9  ;;  %v121_v57 = vld [vmem:[%s2174_s0 + $0x398] sm:$0xff]  ;;  %v70_v3 = vld [vmem:[%s2174_s0 + $0x1c0] sm:$0xff]  ;;  %v72_v10 = vld [vmem:[%s2174_s0 + $0x1d0] sm:$0xff] }
 0x3d4   :  { %1388 = vpow2.f32 %v1174_v24  ;;  %v1183_v11 = vmul.f32 -1.442695, %v1015_v0 }
 0x3d5   :  { %870 = vadd.xlane.f32.xlu1 %v869_v39  ;;  %858 = vadd.xlane.f32.xlu0 %v857_v40  ;;  %v95_v40 = vld [vmem:[%s2174_s0 + $0x288] sm:$0xff]  ;;  %1390 = vpow2.f32 %v1175_v28  ;;  %v40_v28 = vld [vmem:[%s2174_s0 + $0x90] sm:$0xff] }
 0x3d6   :  { %v1005_v52 = vadd.f32 %v115_v41, %v95_v40  ;;  %v1066_v43 = vadd.f32 %v68_v29, %v40_v28  ;;  %v124_v28 = vld [vmem:[%s2174_s0 + $0x3b0] sm:$0xff] }
 0x3d8   :  { %v1377_v14 = vpop.eup %1376  ;;  %v1013_v60 = vadd.f32 1.0, %v1005_v52 }
 0x3d9   :  { %v1379_v27 = vpop.eup %1378  ;;  %v976_v31 = vadd.f32 1.0, %v1377_v14  ;;  %v1182_v14 = vmul.f32 -1.442695, %v1014_v62 }
 0x3da   :  { %v1381_v30 = vpop.eup %1380  ;;  %v977_v36 = vadd.f32 1.0, %v1379_v27  ;;  %v1181_v8 = vmul.f32 -1.442695, %v1013_v60 }
 0x3db   :  { %v1383_v35 = vpop.eup %1382  ;;  %v978_v42 = vadd.f32 1.0, %v1381_v30  ;;  %1392 = vrcp.f32 %v976_v31 }
 0x3dc   :  { %v1385_v39 = vpop.eup %1384  ;;  %v979_v46 = vadd.f32 1.0, %v1383_v35  ;;  %1394 = vrcp.f32 %v977_v36  ;;  %v69_v35 = vld [vmem:[%s2174_s0 + $0x1b8] sm:$0xff] }
 0x3dd   :  { %v980_v50 = vadd.f32 1.0, %v1385_v39  ;;  %1396 = vrcp.f32 %v978_v42  ;;  %v1387_v63 = vpop.eup %1386  ;;  %v118_v39 = vld [vmem:[%s2174_s0 + $0x380] sm:$0xff] }
 0x3de   :  { %1398 = vrcp.f32 %v979_v46  ;;  %v1389_v1 = vpop.eup %1388  ;;  %v981_v2 = vadd.f32 1.0, %v1387_v63  ;;  %v1067_v46 = vadd.f32 %v69_v35, %v41_v32  ;;  %v1068_v48 = vadd.f32 %v118_v39, %v90_v38 }
 0x3df   :  { %1400 = vrcp.f32 %v980_v50  ;;  %v1391_v4 = vpop.eup %1390  ;;  %v982_v6 = vadd.f32 1.0, %v1389_v1  ;;  %v91_v50 = vld [vmem:[%s2174_s0 + $0x268] sm:$0xff] }
 0x3e0   :  { %1402 = vpow2.f32 %v1176_v54  ;;  %v983_v13 = vadd.f32 1.0, %v1391_v4  ;;  %v120_v54 = vld [vmem:[%s2174_s0 + $0x390] sm:$0xff] }
 0x3e1   :  { %1404 = vpow2.f32 %v1177_v56  ;;  %v93_v56 = vld [vmem:[%s2174_s0 + $0x278] sm:$0xff]  ;;  %v1070_v0 = vadd.f32 %v120_v54, %v92_v53 }
 0x3e2   :  { %1406 = vpow2.f32 %v1178_v58 }
 0x3e3   :  { %1408 = vpow2.f32 %v1179_v59 }
 0x3e4   :  { %1410 = vpow2.f32 %v1180_v61  ;;  %v1069_v61 = vadd.f32 %v119_v51, %v91_v50 }
 0x3e5   :  { %v1891_v7 = vpop.eup %1392  ;;  %1412 = vrcp.f32 %v981_v2  ;;  %v1071_v2 = vadd.f32 %v121_v57, %v93_v56 }
 0x3e6   :  { %v1899_v15 = vpop.eup %1394  ;;  %1414 = vrcp.f32 %v982_v6 }
 0x3e7   :  { %v1901_v16 = vpop.eup %1396  ;;  %1416 = vrcp.f32 %v983_v13 }
 0x3e8   :  { %v1903_v19 = vpop.eup %1398  ;;  %1418 = vpow2.f32 %v1181_v8  ;;  %v71_v8 = vld [vmem:[%s2174_s0 + $0x1c8] sm:$0xff] }
 0x3e9   :  { %v1905_v24 = vpop.eup %1400  ;;  %1420 = vpow2.f32 %v1182_v14  ;;  %v73_v14 = vld [vmem:[%s2174_s0 + $0x1d8] sm:$0xff] }
 0x3ea   :  { %v1403_v26 = vpop.eup %1402  ;;  %1422 = vpow2.f32 %v1183_v11 }
 0x3eb   :  { %v1405_v27 = vpop.eup %1404  ;;  %v1040_v30 = vadd.f32 1.0, %v1403_v26  ;;  %1424 = vtanh.f32 %v1064_v12  ;;  %v122_v12 = vld [vmem:[%s2174_s0 + $0x3a0] sm:$0xff]  ;;  %v123_v26 = vld [vmem:[%s2174_s0 + $0x3a8] sm:$0xff] }
 0x3ec   :  { %v1407_v31 = vpop.eup %1406  ;;  %v1041_v36 = vadd.f32 1.0, %v1405_v27  ;;  %1426 = vtanh.f32 %v1065_v20 }
 0x3ed   :  { %v1409_v37 = vpop.eup %1408  ;;  %v1042_v40 = vadd.f32 1.0, %v1407_v31  ;;  %1428 = vrcp.f32 %v1040_v30  ;;  %v125_v30 = vld [vmem:[%s2174_s0 + $0x3b8] sm:$0xff] }
 0x3ee   :  { %v1411_v41 = vpop.eup %1410  ;;  %v1043_v42 = vadd.f32 1.0, %v1409_v37  ;;  %1430 = vrcp.f32 %v1041_v36 }
 0x3ef   :  { %v1925_v44 = vpop.eup %1412  ;;  %v1044_v45 = vadd.f32 1.0, %v1411_v41  ;;  %1432 = vrcp.f32 %v1042_v40 }
 0x3f0   :  { %v1927_v47 = vpop.eup %1414  ;;  %1434 = vrcp.f32 %v1043_v42 }
 0x3f1   :  { %v1929_v49 = vpop.eup %1416  ;;  %1436 = vrcp.f32 %v1044_v45 }
 0x3f2   :  { %v1419_v52 = vpop.eup %1418  ;;  %1438 = vtanh.f32 %v1066_v43 }
 0x3f3   :  { %v1421_v55 = vpop.eup %1420  ;;  %v1045_v58 = vadd.f32 1.0, %v1419_v52  ;;  %1440 = vtanh.f32 %v1067_v46 }
 0x3f4   :  { %v1423_v59 = vpop.eup %1422  ;;  %v1046_v60 = vadd.f32 1.0, %v1421_v55  ;;  %1442 = vtanh.f32 %v1068_v48 }
 0x3f5   :  { %v1425_v62 = vpop.eup %1424  ;;  %v1047_v63 = vadd.f32 1.0, %v1423_v59  ;;  %1444 = vrcp.f32 %v1045_v58 }
 0x3f6   :  { %v1427_v1 = vpop.eup %1426  ;;  %1446 = vrcp.f32 %v1046_v60  ;;  %v1096_v38 = vmul.f32 %v1425_v62, %v1891_v7 }
 0x3f7   :  { %v1429_v4 = vpop.eup %1428  ;;  %1448 = vrcp.f32 %v1047_v63  ;;  %v1097_v40 = vmul.f32 %v1427_v1, %v1899_v15  ;;  %v74_v1 = vld [vmem:[%s2174_s0 + $0x1e0] sm:$0xff] }
 0x3f8   :  { %v1431_v5 = vpop.eup %1430  ;;  %1450 = vtanh.f32 %v1069_v61 }
 0x3f9   :  { %v1433_v6 = vpop.eup %1432  ;;  %1452 = vtanh.f32 %v1070_v0 }
 0x3fa   :  { %v1435_v9 = vpop.eup %1434  ;;  %1454 = vtanh.f32 %v1071_v2  ;;  %v98_v2 = vld [vmem:[%s2174_s0 + $0x2c0] sm:$0xff] }
 0x3fb   :  { %v1437_v13 = vpop.eup %1436  ;;  %1456 = vtanh.f32 %v70_v3  ;;  %v76_v3 = vld [vmem:[%s2174_s0 + $0x1f0] sm:$0xff] }
 0x3fc   :  { %v1439_v11 = vpop.eup %1438  ;;  %1458 = vtanh.f32 %v71_v8  ;;  %v77_v8 = vld [vmem:[%s2174_s0 + $0x1f8] sm:$0xff] }
 0x3fd   :  { %v1441_v20 = vpop.eup %1440  ;;  %1460 = vtanh.f32 %v72_v10  ;;  %v1098_v43 = vmul.f32 %v1439_v11, %v1901_v16  ;;  %v186_v10 = vadd.f32 %v98_v2, %v74_v1  ;;  %v22_v11 = vld [vmem:[%s2174_s0] sm:$0xff] }
 0x3fe   :  { %v1443_v27 = vpop.eup %1442  ;;  %1462 = vtanh.f32 %v73_v14  ;;  %v1099_v48 = vmul.f32 %v1441_v20, %v1903_v19  ;;  %v46_v14 = vld [vmem:[%s2174_s0 + $0xe0] sm:$0xff]  ;;  %v47_v20 = vld [vmem:[%s2174_s0 + $0xe8] sm:$0xff] }
 0x3ff   :  { %v1445_v29 = vpop.eup %1444  ;;  %1464 = vtanh.f32 %v122_v12  ;;  %v1100_v52 = vmul.f32 %v1443_v27, %v1905_v24 }
 0x400   :  { %v1447_v31 = vpop.eup %1446  ;;  %1466 = vtanh.f32 %v123_v26  ;;  %v23_v26 = vld [vmem:[%s2174_s0 + $0x8] sm:$0xff] }
 0x401   :  { %v1449_v32 = vpop.eup %1448  ;;  %1468 = vtanh.f32 %v124_v28  ;;  %v48_v28 = vld [vmem:[%s2174_s0 + $0xf0] sm:$0xff] }
 0x402   :  { %v1451_v35 = vpop.eup %1450  ;;  %1470 = vtanh.f32 %v125_v30  ;;  %v1140_v30 = vmul.f32 -1.442695, %v186_v10 }
 0x403   :  { %v1453_v36 = vpop.eup %1452  ;;  %v1101_v7 = vmul.f32 %v1451_v35, %v1925_v44  ;;  %v182_v35 = vadd.f32 %v46_v14, %v22_v11 }
 0x404   :  { %v1455_v37 = vpop.eup %1454  ;;  %v1102_v58 = vmul.f32 %v1453_v36, %v1927_v47  ;;  %1472 = vpow2.f32 %v1140_v30 }
 0x405   :  { %v1457_v39 = vpop.eup %1456  ;;  %v1103_v24 = vmul.f32 %v1455_v37, %v1929_v49  ;;  %v183_v37 = vadd.f32 %v47_v20, %v23_v26 }
 0x406   :  { %v1459_v41 = vpop.eup %1458  ;;  %v1088_v42 = vmul.f32 %v1457_v39, %v1429_v4  ;;  %v75_v4 = vld [vmem:[%s2174_s0 + $0x1e8] sm:$0xff] }
 0x407   :  { %v1461_v45 = vpop.eup %1460  ;;  %v1089_v46 = vmul.f32 %v1459_v41, %v1431_v5  ;;  %v99_v5 = vld [vmem:[%s2174_s0 + $0x2c8] sm:$0xff] }
 0x408   :  { %v1463_v50 = vpop.eup %1462  ;;  %v1090_v51 = vmul.f32 %v1461_v45, %v1433_v6  ;;  %v1104_v53 = vadd.f32 %v1096_v38, %v1088_v42  ;;  %v100_v6 = vld [vmem:[%s2174_s0 + $0x2d0] sm:$0xff]  ;;  %v1136_v45 = vmul.f32 -1.442695, %v182_v35 }
 0x409   :  { %v1465_v54 = vpop.eup %1464  ;;  %v1091_v55 = vmul.f32 %v1463_v50, %v1435_v9  ;;  %v1105_v56 = vadd.f32 %v1097_v40, %v1089_v46  ;;  %v101_v9 = vld [vmem:[%s2174_s0 + $0x2d8] sm:$0xff]  ;;  %v188_v12 = vadd.f32 %v100_v6, %v76_v3  ;;  %v1137_v46 = vmul.f32 -1.442695, %v183_v37  ;;  %v51_v37 = vld [vmem:[%s2174_s0 + $0x108] sm:$0xff] }
 0x40a   :  { %v1467_v57 = vpop.eup %1466  ;;  %v1092_v15 = vmul.f32 %v1465_v54, %v1437_v13  ;;  %v1106_v59 = vadd.f32 %v1098_v43, %v1090_v51  ;;  %1112 = vst.msk [vmem:[%s2176_s6] sm:$0xff] %vm270_vm0, %v1104_v53  ;;  %v187_v13 = vadd.f32 %v99_v5, %v75_v4  ;;  %v189_v27 = vadd.f32 %v101_v9, %v77_v8  ;;  %v78_v53 = vld [vmem:[%s2174_s0 + $0x200] sm:$0xff] }
 0x40b   :  { %v1469_v16 = vpop.eup %1468  ;;  %v1093_v19 = vmul.f32 %v1467_v57, %v1445_v29  ;;  %v1107_v60 = vadd.f32 %v1099_v48, %v1091_v55  ;;  %1113 = vst.msk [vmem:[%s2176_s6 + $0x8] sm:$0xff] %vm270_vm0, %v1105_v56  ;;  %v24_v29 = vld [vmem:[%s2174_s0 + $0x10] sm:$0xff]  ;;  %v1142_v38 = vmul.f32 -1.442695, %v188_v12  ;;  %v102_v54 = vld [vmem:[%s2174_s0 + $0x2e0] sm:$0xff]  ;;  %v79_v55 = vld [vmem:[%s2174_s0 + $0x208] sm:$0xff] }
 0x40c   :  { %v1471_v44 = vpop.eup %1470  ;;  %v1094_v61 = vmul.f32 %v1469_v16, %v1447_v31  ;;  %v1108_v62 = vadd.f32 %v1100_v52, %v1092_v15  ;;  %1114 = vst.msk [vmem:[%s2176_s6 + $0x10] sm:$0xff] %vm270_vm0, %v1106_v59  ;;  %v49_v31 = vld [vmem:[%s2174_s0 + $0xf8] sm:$0xff]  ;;  %v1141_v36 = vmul.f32 -1.442695, %v187_v13  ;;  %v184_v39 = vadd.f32 %v48_v28, %v24_v29  ;;  %v80_v15 = vld [vmem:[%s2174_s0 + $0x210] sm:$0xff] }
 0x40d   :  { %v1095_v47 = vmul.f32 %v1471_v44, %v1449_v32  ;;  %v1109_v63 = vadd.f32 %v1101_v7, %v1093_v19  ;;  %1115 = vst.msk [vmem:[%s2176_s6 + $0x18] sm:$0xff] %vm270_vm0, %v1107_v60  ;;  %v25_v32 = vld [vmem:[%s2174_s0 + $0x18] sm:$0xff]  ;;  %v1143_v40 = vmul.f32 -1.442695, %v189_v27  ;;  %v103_v7 = vld [vmem:[%s2174_s0 + $0x2e8] sm:$0xff]  ;;  %v242_v60 = vadd.f32 %v102_v54, %v78_v53 }
 0x40e   :  { %v1110_v49 = vadd.f32 %v1102_v58, %v1094_v61  ;;  %1116 = vst.msk [vmem:[%s2176_s6 + $0x20] sm:$0xff] %vm270_vm0, %v1108_v62  ;;  %v185_v41 = vadd.f32 %v49_v31, %v25_v32  ;;  %1474 = vpow2.f32 %v1141_v36  ;;  %v1138_v48 = vmul.f32 -1.442695, %v184_v39  ;;  %v104_v58 = vld [vmem:[%s2174_s0 + $0x2f0] sm:$0xff]  ;;  %v81_v19 = vld [vmem:[%s2174_s0 + $0x218] sm:$0xff]  ;;  %v1473_v44 = vpop.eup %1472  ;;  %v50_v31 = vld [vmem:[%s2174_s0 + $0x100] sm:$0xff] }
 0x40f   :  { %v1111_v0 = vadd.f32 %v1103_v24, %v1095_v47  ;;  %1117 = vst.msk [vmem:[%s2176_s6 + $0x28] sm:$0xff] %vm270_vm0, %v1109_v63  ;;  %1476 = vpow2.f32 %v1142_v38  ;;  %v105_v24 = vld [vmem:[%s2174_s0 + $0x2f8] sm:$0xff]  ;;  %v243_v61 = vadd.f32 %v103_v7, %v79_v55  ;;  %v218_v3 = vadd.f32 1.0, %v1473_v44  ;;  %v26_v32 = vld [vmem:[%s2174_s0 + $0x20] sm:$0xff]  ;;  %v27_v38 = vld [vmem:[%s2174_s0 + $0x28] sm:$0xff] }
 0x410   :  { %1118 = vst.msk [vmem:[%s2176_s6 + $0x30] sm:$0xff] %vm270_vm0, %v1110_v49  ;;  %1478 = vpow2.f32 %v1143_v40  ;;  %v1139_v50 = vmul.f32 -1.442695, %v185_v41  ;;  %v244_v49 = vadd.f32 %v104_v58, %v80_v15  ;;  %v245_v1 = vadd.f32 %v105_v24, %v81_v19  ;;  %v52_v41 = vld [vmem:[%s2174_s0 + $0x110] sm:$0xff] }
 0x411   :  { %1119 = vst.msk [vmem:[%s2176_s6 + $0x38] sm:$0xff] %vm270_vm0, %v1111_v0  ;;  %1480 = vpow2.f32 %v1136_v45 }
 0x412   :  { %1482 = vpow2.f32 %v1137_v46  ;;  %v53_v46 = vld [vmem:[%s2174_s0 + $0x118] sm:$0xff] }
 0x413   :  { %1484 = vpow2.f32 %v1138_v48  ;;  %v29_v48 = vld [vmem:[%s2174_s0 + $0x38] sm:$0xff] }
 0x414   :  { %1486 = vpow2.f32 %v1139_v50  ;;  %v238_v50 = vadd.f32 %v50_v31, %v26_v32  ;;  %v916_v32 = vld [vmem:[%s2178_s4] sm:$0xff] }
 0x415   :  { %1488 = vtanh.f32 %v242_v60 }
 0x416   :  { %1490 = vtanh.f32 %v243_v61 }
 0x417   :  { %1492 = vtanh.f32 %v244_v49 }
 0x418   :  { %v1475_v62 = vpop.eup %1474  ;;  %1494 = vtanh.f32 %v245_v1 }
 0x419   :  { %v1477_v0 = vpop.eup %1476  ;;  %v219_v10 = vadd.f32 1.0, %v1475_v62  ;;  %1496 = vrcp.f32 %v218_v3 }
 0x41a   :  { %v1479_v5 = vpop.eup %1478  ;;  %v220_v14 = vadd.f32 1.0, %v1477_v0 }
 0x41b   :  { %v1481_v9 = vpop.eup %1480  ;;  %v221_v26 = vadd.f32 1.0, %v1479_v5  ;;  %1498 = vrcp.f32 %v219_v10 }
 0x41c   :  { %v1483_v13 = vpop.eup %1482  ;;  %v214_v29 = vadd.f32 1.0, %v1481_v9  ;;  %1500 = vrcp.f32 %v220_v14  ;;  %v904_v14 = vld [vmem:[%s2177_s3] sm:$0xff] }
 0x41d   :  { %v1485_v20 = vpop.eup %1484  ;;  %v215_v35 = vadd.f32 1.0, %v1483_v13  ;;  %1502 = vrcp.f32 %v221_v26  ;;  %v907_v26 = vld [vmem:[%s2177_s3 + $0x18] sm:$0xff] }
 0x41e   :  { %v1487_v27 = vpop.eup %1486  ;;  %v216_v39 = vadd.f32 1.0, %v1485_v20  ;;  %1504 = vrcp.f32 %v214_v29  ;;  %v906_v20 = vld [vmem:[%s2177_s3 + $0x10] sm:$0xff] }
 0x41f   :  { %1506 = vrcp.f32 %v215_v35  ;;  %v1489_v53 = vpop.eup %1488 }
 0x420   :  { %1508 = vrcp.f32 %v216_v39  ;;  %v917_v39 = vld [vmem:[%s2178_s4 + $0x8] sm:$0xff] }
 0x456   :  { %v853_v42 = vpop.xlane.xlu1 %852  ;;  %v850_v43 = vpop.xlane.xlu0 %849 }
 0x457   :  { %v872_v59 = vadd.f32 %v853_v42, %v850_v43  ;;  %v28_v42 = vld [vmem:[%s2174_s0 + $0x30] sm:$0xff]  ;;  %v217_v43 = vadd.f32 1.0, %v1487_v27 }
 0x458   :  { %v240_v55 = vadd.f32 %v52_v41, %v28_v42  ;;  %v919_v41 = vld [vmem:[%s2178_s4 + $0x18] sm:$0xff] }
 0x459   :  { %1510 = vrcp.f32 %v217_v43 }
 0x45a   :  { %v865_v51 = vpop.xlane.xlu1 %864  ;;  %v862_v52 = vpop.xlane.xlu0 %861  ;;  %1512 = vtanh.f32 %v238_v50 }
 0x45b   :  { %v881_v16 = vadd.f32 %v865_v51, %v862_v52  ;;  %v239_v52 = vadd.f32 %v51_v37, %v27_v38 }
 0x45d   :  { %1514 = vtanh.f32 %v239_v52 }
 0x45e   :  { %v868_v56 = vpop.xlane.xlu1 %867  ;;  %v856_v57 = vpop.xlane.xlu0 %855  ;;  %1516 = vtanh.f32 %v240_v55 }
 0x45f   :  { %v882_v47 = vadd.f32 %v881_v16, %v868_v56  ;;  %v873_v63 = vadd.f32 %v872_v59, %v856_v57  ;;  %v1491_v56 = vpop.eup %1490  ;;  %v241_v57 = vadd.f32 %v53_v46, %v29_v48 }
 0x460   :  { %v1493_v15 = vpop.eup %1492 }
 0x461   :  { %v1495_v16 = vpop.eup %1494  ;;  %1518 = vtanh.f32 %v241_v57 }
 0x462   :  { %v871_v2 = vpop.xlane.xlu1 %870  ;;  %v859_v4 = vpop.xlane.xlu0 %858 }
 0x463   :  { %v883_v6 = vadd.f32 %v882_v47, %v871_v2  ;;  %v874_v8 = vadd.f32 %v873_v63, %v859_v4  ;;  %v1497_v19 = vpop.eup %1496 }
 0x464   :  { %v1499_v44 = vpop.eup %1498 }
 0x465   :  { %v884_v11 = vrot.slane %v883_v6, 4  ;;  %v875_v12 = vrot.slane %v874_v8, 4  ;;  %v1501_v61 = vpop.eup %1500  ;;  %v259_v9 = vmul.f32 %v1499_v44, %v1491_v56 }
 0x466   :  { %v1503_v63 = vpop.eup %1502  ;;  %v260_v10 = vmul.f32 %v1501_v61, %v1493_v15 }
 0x467   :  { %v885_v28 = vadd.f32 %v884_v11, %v883_v6  ;;  %v876_v30 = vadd.f32 %v875_v12, %v874_v8  ;;  %v1505_v49 = vpop.eup %1504  ;;  %v258_v8 = vmul.f32 %v1497_v19, %v1489_v53  ;;  %v261_v13 = vmul.f32 %v1503_v63, %v1495_v16  ;;  %v905_v12 = vld [vmem:[%s2177_s3 + $0x8] sm:$0xff] }
 0x468   :  { %v1507_v0 = vpop.eup %1506 }
 0x469   :  { %v886_v36 = vrot.slane %v885_v28, 2  ;;  %v877_v40 = vrot.slane %v876_v30, 2  ;;  %v1509_v1 = vpop.eup %1508 }
 0x46a   :  { %v1511_v2 = vpop.eup %1510 }
 0x46b   :  { %v887_v45 = vadd.f32 %v886_v36, %v885_v28  ;;  %v878_v51 = vadd.f32 %v877_v40, %v876_v30  ;;  %v1513_v4 = vpop.eup %1512  ;;  %v918_v40 = vld [vmem:[%s2178_s4 + $0x10] sm:$0xff] }
 0x46c   :  { %v1515_v5 = vpop.eup %1514  ;;  %v254_v27 = vmul.f32 %v1513_v4, %v1505_v49 }
 0x46d   :  { %v888_v54 = vrot.slane %v887_v45, 1  ;;  %v879_v7 = vrot.slane %v878_v51, 1  ;;  %v1517_v3 = vpop.eup %1516  ;;  %v255_v28 = vmul.f32 %v1515_v5, %v1507_v0 }
 0x46e   :  { %v1519_v6 = vpop.eup %1518  ;;  %v256_v29 = vmul.f32 %v1517_v3, %v1509_v1 }
 0x46f   :  { %v889_v58 = vadd.f32 %v888_v54, %v887_v45  ;;  %v880_v59 = vadd.f32 %v879_v7, %v878_v51  ;;  %v257_v30 = vmul.f32 %v1519_v6, %v1511_v2 }
 0x471   :  { %v891_v24 = vmul.f32 0.00390625, %v889_v58  ;;  %v890_v60 = vmul.f32 0.00390625, %v880_v59 }
 0x473   :  { %v893_v62 = vadd.f32 1e-05, %v891_v24  ;;  %v892_v47 = vadd.f32 1e-05, %v890_v60 }
 0x475   :  { %1520 = vrsqrt.f32 %v893_v62 }
 0x476   :  { %1522 = vrsqrt.f32 %v892_v47 }
 0x47f   :  { %v1521_v11 = vpop.eup %1520 }
 0x480   :  { %v1523_v31 = vpop.eup %1522  ;;  %v900_v35 = vmul.f32 %v1521_v11, %v1759_v22  ;;  %v901_v36 = vmul.f32 %v1521_v11, %v1757_v21  ;;  %v902_v37 = vmul.f32 %v1521_v11, %v1761_v23  ;;  %v903_v38 = vmul.f32 %v1521_v11, %v1777_v33 }
 0x481   :  { %v896_v22 = vmul.f32 %v1523_v31, %v1751_v18  ;;  %v897_v21 = vmul.f32 %v1523_v31, %v1748_v17  ;;  %v898_v23 = vmul.f32 %v1523_v31, %v1763_v25  ;;  %v899_v33 = vmul.f32 %v1523_v31, %v1779_v34 }
 0x482   :  { %v912_v42 = vmul.f32 %v904_v14, %v900_v35  ;;  %v913_v43 = vmul.f32 %v905_v12, %v901_v36  ;;  %v914_v45 = vmul.f32 %v906_v20, %v902_v37  ;;  %v915_v46 = vmul.f32 %v907_v26, %v903_v38 }
 0x483   :  { %v908_v48 = vmul.f32 %v904_v14, %v896_v22  ;;  %v909_v50 = vmul.f32 %v905_v12, %v897_v21  ;;  %v910_v51 = vmul.f32 %v906_v20, %v898_v23  ;;  %v911_v52 = vmul.f32 %v907_v26, %v899_v33 }
 0x484   :  { %v924_v53 = vadd.f32 %v916_v32, %v912_v42  ;;  %v925_v54 = vadd.f32 %v917_v39, %v913_v43  ;;  %v926_v55 = vadd.f32 %v918_v40, %v914_v45  ;;  %v927_v7 = vadd.f32 %v919_v41, %v915_v46 }
 0x485   :  { %v920_v56 = vadd.f32 %v916_v32, %v908_v48  ;;  %v921_v18 = vadd.f32 %v917_v39, %v909_v50  ;;  %v922_v57 = vadd.f32 %v918_v40, %v910_v51  ;;  %v923_v17 = vadd.f32 %v919_v41, %v911_v52 }
 0x486   :  { %v932_v15 = vadd.f32 %v924_v53, %v258_v8  ;;  %v933_v25 = vadd.f32 %v925_v54, %v259_v9  ;;  %v934_v58 = vadd.f32 %v926_v55, %v260_v10  ;;  %v935_v34 = vadd.f32 %v927_v7, %v261_v13 }
 0x487   :  { %v928_v59 = vadd.f32 %v920_v56, %v254_v27  ;;  %v929_v16 = vadd.f32 %v921_v18, %v255_v28  ;;  %v930_v19 = vadd.f32 %v922_v57, %v256_v29  ;;  %v931_v24 = vadd.f32 %v923_v17, %v257_v30 }
 0x488   :  { %940 = vst.msk [vmem:[%s2179_s5 + $0x20] sm:$0xff] %vm270_vm0, %v932_v15  ;;  %941 = vst.msk [vmem:[%s2179_s5 + $0x28] sm:$0xff] %vm270_vm0, %v933_v25 }
 0x489   :  { %942 = vst.msk [vmem:[%s2179_s5 + $0x30] sm:$0xff] %vm270_vm0, %v934_v58  ;;  %943 = vst.msk [vmem:[%s2179_s5 + $0x38] sm:$0xff] %vm270_vm0, %v935_v34 }
 0x48a   :  { %936 = vst.msk [vmem:[%s2179_s5] sm:$0xff] %vm270_vm0, %v928_v59  ;;  %937 = vst.msk [vmem:[%s2179_s5 + $0x8] sm:$0xff] %vm270_vm0, %v929_v16 }
 0x48b   :  { %938 = vst.msk [vmem:[%s2179_s5 + $0x10] sm:$0xff] %vm270_vm0, %v930_v19  ;;  %939 = vst.msk [vmem:[%s2179_s5 + $0x18] sm:$0xff] %vm270_vm0, %v931_v24 }

// kernel: _lambda_.44
= control target key start
LH: loop header
LB: loop body
LE: loop exit
PB: predicated region body
PF: predicated region fallthrough
CT: control target
= control target key end

     0   :  { %s1582_s1 = inlined_call_operand.vmem [shape: bf16[896,128], index: 1, kind: input, shape index: {}]   ;;  %s1583_s0 = inlined_call_operand.vmem [shape: bf16[64,896], index: 0, kind: input, shape index: {}]   ;;  %s1584_s2 = inlined_call_operand.vmem [shape: f32[64,128], index: 2, kind: output, shape index: {}]  }
   0x1   :  { %v1195_v0 = vld [vmem:[%s1582_s1 + $0x40] sm:$0xff]   ;;  %v1199_v4 = vld [vmem:[%s1582_s1 + $0x48] sm:$0xff]   ;;  %v1203_v8 = vld [vmem:[%s1582_s1 + $0x50] sm:$0xff]  }
   0x2   :  { %v1196_v1 = vld [vmem:[%s1582_s1 + $0xc0] sm:$0xff]   ;;  %1039 = vmatprep.subr.bf16.mxu0 %v1195_v0  ;;  %v1200_v5 = vld [vmem:[%s1582_s1 + $0xc8] sm:$0xff]   ;;  %v1204_v9 = vld [vmem:[%s1582_s1 + $0xd0] sm:$0xff]  }
   0x3   :  { %v1197_v2 = vld [vmem:[%s1582_s1] sm:$0xff]   ;;  %1079 = vmatprep.subr.bf16.mxu1 %v1196_v1  ;;  %v1201_v6 = vld [vmem:[%s1582_s1 + $0x8] sm:$0xff]   ;;  %v1205_v10 = vld [vmem:[%s1582_s1 + $0x10] sm:$0xff]  }
   0x4   :  { %v1198_v3 = vld [vmem:[%s1582_s1 + $0x80] sm:$0xff]   ;;  %1040 = vmatpush3.bf16.msra.mxu0 %v1197_v2  ;;  %v1202_v7 = vld [vmem:[%s1582_s1 + $0x88] sm:$0xff]   ;;  %v1206_v11 = vld [vmem:[%s1582_s1 + $0x90] sm:$0xff]  }
   0x5   :  { %1080 = vmatpush3.bf16.msra.mxu1 %v1198_v3  ;;  %1041 = vmatprep.subr.bf16.mxu0 %v1199_v4  ;;  %v1207_v12 = vld [vmem:[%s1582_s1 + $0x58] sm:$0xff]   ;;  %v1211_v16 = vld [vmem:[%s1582_s1 + $0x60] sm:$0xff]   ;;  %v1215_v20 = vld [vmem:[%s1582_s1 + $0x68] sm:$0xff]  }
   0x6   :  { %1081 = vmatprep.subr.bf16.mxu1 %v1200_v5  ;;  %v1208_v13 = vld [vmem:[%s1582_s1 + $0xd8] sm:$0xff]   ;;  %v1212_v17 = vld [vmem:[%s1582_s1 + $0xe0] sm:$0xff]   ;;  %v1216_v21 = vld [vmem:[%s1582_s1 + $0xe8] sm:$0xff]  }
   0x7   :  { %v1209_v14 = vld [vmem:[%s1582_s1 + $0x18] sm:$0xff]   ;;  %v1213_v18 = vld [vmem:[%s1582_s1 + $0x20] sm:$0xff]   ;;  %v1217_v22 = vld [vmem:[%s1582_s1 + $0x28] sm:$0xff]  }
   0x8   :  { %1042 = vmatpush3.bf16.msra.mxu0 %v1201_v6  ;;  %v1210_v15 = vld [vmem:[%s1582_s1 + $0x98] sm:$0xff]   ;;  %v1214_v19 = vld [vmem:[%s1582_s1 + $0xa0] sm:$0xff]   ;;  %v1218_v23 = vld [vmem:[%s1582_s1 + $0xa8] sm:$0xff]  }
   0x9   :  { %1082 = vmatpush3.bf16.msra.mxu1 %v1202_v7  ;;  %1043 = vmatprep.subr.bf16.mxu0 %v1203_v8  ;;  %v1219_v24 = vld [vmem:[%s1582_s1 + $0x70] sm:$0xff]   ;;  %v1223_v28 = vld [vmem:[%s1582_s1 + $0x78] sm:$0xff]   ;;  %v1229_v33 = vld [vmem:[%s1583_s0 + $0x4] ss:$28 sps:$4 sm:$0xff]  }
   0xa   :  { %1083 = vmatprep.subr.bf16.mxu1 %v1204_v9  ;;  %v1220_v25 = vld [vmem:[%s1582_s1 + $0xf0] sm:$0xff]   ;;  %v1224_v29 = vld [vmem:[%s1582_s1 + $0xf8] sm:$0xff]   ;;  %v1230_v34 = vld [vmem:[%s1583_s0 + $0x8] ss:$28 sps:$4 sm:$0xff]   ;;  %688 = vmatprep.mubr.bf16.mxu0 %v1229_v33 }
   0xb   :  { %v1221_v26 = vld [vmem:[%s1582_s1 + $0x30] sm:$0xff]   ;;  %v1225_v30 = vld [vmem:[%s1582_s1 + $0x38] sm:$0xff]   ;;  %v1232_v35 = vld [vmem:[%s1583_s0 + $0xc] ss:$28 sps:$4 sm:$0xff]  }
   0xc   :  { %1044 = vmatpush3.bf16.msra.mxu0 %v1205_v10  ;;  %v1222_v27 = vld [vmem:[%s1582_s1 + $0xb0] sm:$0xff]   ;;  %v1226_v31 = vld [vmem:[%s1582_s1 + $0xb8] sm:$0xff]   ;;  %v1233_v36 = vld [vmem:[%s1582_s1 + $0x140] sm:$0xff]   ;;  %753 = vmatprep.mubr.bf16.mxu1 %v1232_v35 }
   0xd   :  { %1084 = vmatpush3.bf16.msra.mxu1 %v1206_v11  ;;  %1045 = vmatprep.subr.bf16.mxu0 %v1207_v12  ;;  %v1227_v32 = vld [vmem:[%s1583_s0] ss:$28 sps:$4 sm:$0xff]   ;;  %v1235_v38 = vld [vmem:[%s1582_s1 + $0x148] sm:$0xff]   ;;  %v1242_v43 = vld [vmem:[%s1583_s0 + $0x38] ss:$28 sps:$4 sm:$0xff]  }
   0xe   :  { %1085 = vmatprep.subr.bf16.mxu1 %v1208_v13  ;;  %v1234_v37 = vld [vmem:[%s1582_s1 + $0x100] sm:$0xff]   ;;  %v1237_v40 = vld [vmem:[%s1582_s1 + $0x108] sm:$0xff]   ;;  %v1238_v41 = vld [vmem:[%s1583_s0 + $0x3c] ss:$28 sps:$4 sm:$0xff]  }
   0xf   :  { %v1236_v39 = vld [vmem:[%s1582_s1 + $0x180] sm:$0xff]   ;;  %v1244_v45 = vld [vmem:[%s1582_s1 + $0x150] sm:$0xff]   ;;  %v1245_v46 = vld [vmem:[%s1582_s1 + $0x188] sm:$0xff]  }
  0x10   :  { %1046 = vmatpush3.bf16.msra.mxu0 %v1209_v14  ;;  %v1240_v42 = vld [vmem:[%s1583_s0 + $0x44] ss:$28 sps:$4 sm:$0xff]   ;;  %v1246_v47 = vld [vmem:[%s1582_s1 + $0x110] sm:$0xff]   ;;  %v1247_v48 = vld [vmem:[%s1582_s1 + $0x158] sm:$0xff]  }
  0x11   :  { %1086 = vmatpush3.bf16.msra.mxu1 %v1210_v15  ;;  %1047 = vmatprep.subr.bf16.mxu0 %v1211_v16  ;;  %v1243_v44 = vld [vmem:[%s1583_s0 + $0x40] ss:$28 sps:$4 sm:$0xff]   ;;  %v1248_v49 = vld [vmem:[%s1582_s1 + $0x190] sm:$0xff]   ;;  %v1259_v58 = vld [vmem:[%s1582_s1 + $0x168] sm:$0xff]  }
  0x12   :  { %1087 = vmatprep.subr.bf16.mxu1 %v1212_v17  ;;  %v1249_v50 = vld [vmem:[%s1582_s1 + $0x118] sm:$0xff]   ;;  %v1250_v51 = vld [vmem:[%s1583_s0 + $0x74] ss:$28 sps:$4 sm:$0xff]   ;;  %v1256_v55 = vld [vmem:[%s1582_s1 + $0x160] sm:$0xff]  }
  0x13   :  { %v1252_v52 = vld [vmem:[%s1583_s0 + $0x7c] ss:$28 sps:$4 sm:$0xff]   ;;  %v1254_v53 = vld [vmem:[%s1583_s0 + $0x70] ss:$28 sps:$4 sm:$0xff]   ;;  %v1258_v57 = vld [vmem:[%s1582_s1 + $0x120] sm:$0xff]  }
  0x14   :  { %1048 = vmatpush3.bf16.msra.mxu0 %v1213_v18  ;;  %v1255_v54 = vld [vmem:[%s1583_s0 + $0x78] ss:$28 sps:$4 sm:$0xff]   ;;  %v1260_v59 = vld [vmem:[%s1582_s1 + $0x1a0] sm:$0xff]   ;;  %v1261_v60 = vld [vmem:[%s1582_s1 + $0x128] sm:$0xff]  }
  0x15   :  { %1088 = vmatpush3.bf16.msra.mxu1 %v1214_v19  ;;  %1049 = vmatprep.subr.bf16.mxu0 %v1215_v20  ;;  %v1257_v56 = vld [vmem:[%s1582_s1 + $0x198] sm:$0xff]   ;;  %v1262_v61 = vld [vmem:[%s1583_s0 + $0xac] ss:$28 sps:$4 sm:$0xff]   ;;  %v1264_v62 = vld [vmem:[%s1583_s0 + $0xb4] ss:$28 sps:$4 sm:$0xff]  }
  0x16   :  { %1089 = vmatprep.subr.bf16.mxu1 %v1216_v21  ;;  %v1266_v63 = vld [vmem:[%s1583_s0 + $0xa8] ss:$28 sps:$4 sm:$0xff]   ;;  %v1267_v0 = vld [vmem:[%s1583_s0 + $0xb0] ss:$28 sps:$4 sm:$0xff]   ;;  %v1271_v4 = vld [vmem:[%s1582_s1 + $0x178] sm:$0xff]  }
  0x17   :  { %v1268_v1 = vld [vmem:[%s1582_s1 + $0x170] sm:$0xff]   ;;  %v1269_v2 = vld [vmem:[%s1582_s1 + $0x1a8] sm:$0xff]   ;;  %v1273_v6 = vld [vmem:[%s1582_s1 + $0x138] sm:$0xff]  }
  0x18   :  { %1050 = vmatpush3.bf16.msra.mxu0 %v1217_v22  ;;  %v1270_v3 = vld [vmem:[%s1582_s1 + $0x130] sm:$0xff]   ;;  %v1277_v9 = vld [vmem:[%s1582_s1 + $0x1b8] sm:$0xff]   ;;  %v1280_v11 = vld [vmem:[%s1583_s0 + $0x4c] ss:$28 sps:$4 sm:$0xff]  }
  0x19   :  { %1090 = vmatpush3.bf16.msra.mxu1 %v1218_v23  ;;  %1051 = vmatprep.subr.bf16.mxu0 %v1219_v24  ;;  %v1272_v5 = vld [vmem:[%s1582_s1 + $0x1b0] sm:$0xff]   ;;  %v1286_v13 = vld [vmem:[%s1583_s0 + $0x88] ss:$28 sps:$4 sm:$0xff]   ;;  %v1287_v16 = vld [vmem:[%s1583_s0 + $0xc0] ss:$28 sps:$4 sm:$0xff]  }
  0x1a   :  { %1091 = vmatprep.subr.bf16.mxu1 %v1220_v25  ;;  %v1274_v7 = vld [vmem:[%s1583_s0 + $0x10] ss:$28 sps:$4 sm:$0xff]   ;;  %v1278_v10 = vld [vmem:[%s1583_s0 + $0x18] ss:$28 sps:$4 sm:$0xff]   ;;  %v1282_v14 = vld [vmem:[%s1583_s0 + $0x48] ss:$28 sps:$4 sm:$0xff]  }
  0x1b   :  { %v1276_v8 = vld [vmem:[%s1583_s0 + $0x14] ss:$28 sps:$4 sm:$0xff]   ;;  %v1283_v15 = vld [vmem:[%s1583_s0 + $0x84] ss:$28 sps:$4 sm:$0xff]   ;;  %v1288_v18 = vld [vmem:[%s1583_s0 + $0xbc] ss:$28 sps:$4 sm:$0xff]  }
  0x1c   :  { %1052 = vmatpush3.bf16.msra.mxu0 %v1221_v26  ;;  %v1279_v12 = vld [vmem:[%s1583_s0 + $0x50] ss:$28 sps:$4 sm:$0xff]   ;;  %v1285_v17 = vld [vmem:[%s1583_s0 + $0x80] ss:$28 sps:$4 sm:$0xff]   ;;  %v1290_v19 = vld [vmem:[%s1583_s0 + $0xb8] ss:$28 sps:$4 sm:$0xff]  }
  0x1d   :  { %1092 = vmatpush3.bf16.msra.mxu1 %v1222_v27  ;;  %1053 = vmatprep.subr.bf16.mxu0 %v1223_v28 }
  0x1e   :  { %1093 = vmatprep.subr.bf16.mxu1 %v1224_v29 }
  0x20   :  { %1054 = vmatpush3.bf16.msra.mxu0 %v1225_v30 }
  0x21   :  { %1094 = vmatpush3.bf16.msra.mxu1 %v1226_v31  ;;  %1119 = vmatprep.subr.bf16.mxu0 %v1233_v36 }
  0x22   :  { %1171 = vmatprep.subr.bf16.mxu1 %v1236_v39 }
  0x23   :  { %689 = vmatmul.mubr.bf16.vlgmr.msra.gmra.mrb[0].mxu0 %v1227_v32 }
  0x24   :  { %754 = vmatmul.mubr.bf16.vlgmr.msra.gmra.mrb[0].mxu1 %v1230_v34  ;;  %1120 = vmatpush3.bf16.msra.mxu0 %v1234_v37 }
  0x25   :  { %1121 = vmatprep.subr.bf16.mxu0 %v1235_v38  ;;  %1172 = vmatpush3.bf16.msra.mxu1 %v1236_v39 }
  0x26   :  { %696 = vmatprep.mubr.bf16.mxu0 %v1238_v41  ;;  %761 = vmatprep.mubr.bf16.mxu1 %v1240_v42 }
  0x27   :  { %1173 = vmatprep.subr.bf16.mxu1 %v1245_v46 }
  0x28   :  { %1122 = vmatpush3.bf16.msra.mxu0 %v1237_v40 }
  0x29   :  { %1123 = vmatprep.subr.bf16.mxu0 %v1244_v45  ;;  %1174 = vmatpush3.bf16.msra.mxu1 %v1245_v46 }
  0x2a   :  { %1175 = vmatprep.subr.bf16.mxu1 %v1248_v49 }
  0x2b   :  { %697 = vmatmul.mubr.bf16.gmra.mrb[4].mxu0 %v1242_v43 }
  0x2c   :  { %762 = vmatmul.mubr.bf16.gmra.mrb[4].mxu1 %v1243_v44  ;;  %1124 = vmatpush3.bf16.msra.mxu0 %v1246_v47 }
  0x2d   :  { %1125 = vmatprep.subr.bf16.mxu0 %v1247_v48  ;;  %1176 = vmatpush3.bf16.msra.mxu1 %v1248_v49 }
  0x2e   :  { %704 = vmatprep.mubr.bf16.mxu0 %v1250_v51  ;;  %769 = vmatprep.mubr.bf16.mxu1 %v1252_v52 }
  0x2f   :  { %1177 = vmatprep.subr.bf16.mxu1 %v1257_v56 }
  0x30   :  { %1126 = vmatpush3.bf16.msra.mxu0 %v1249_v50 }
  0x31   :  { %1127 = vmatprep.subr.bf16.mxu0 %v1256_v55  ;;  %1178 = vmatpush3.bf16.msra.mxu1 %v1257_v56 }
  0x32   :  { %1179 = vmatprep.subr.bf16.mxu1 %v1260_v59 }
  0x33   :  { %705 = vmatmul.mubr.bf16.gmra.mrb[8].mxu0 %v1254_v53 }
  0x34   :  { %770 = vmatmul.mubr.bf16.gmra.mrb[8].mxu1 %v1255_v54  ;;  %1128 = vmatpush3.bf16.msra.mxu0 %v1258_v57 }
  0x35   :  { %1129 = vmatprep.subr.bf16.mxu0 %v1259_v58  ;;  %1180 = vmatpush3.bf16.msra.mxu1 %v1260_v59 }
  0x36   :  { %712 = vmatprep.mubr.bf16.mxu0 %v1262_v61  ;;  %777 = vmatprep.mubr.bf16.mxu1 %v1264_v62 }
  0x37   :  { %1181 = vmatprep.subr.bf16.mxu1 %v1269_v2 }
  0x38   :  { %1130 = vmatpush3.bf16.msra.mxu0 %v1261_v60 }
  0x39   :  { %1131 = vmatprep.subr.bf16.mxu0 %v1268_v1  ;;  %1182 = vmatpush3.bf16.msra.mxu1 %v1269_v2 }
  0x3a   :  { %1183 = vmatprep.subr.bf16.mxu1 %v1272_v5 }
  0x3b   :  { %713 = vmatmul.mubr.bf16.gmra.mrb[12].mxu0 %v1266_v63 }
  0x3c   :  { %778 = vmatmul.mubr.bf16.gmra.mrb[12].mxu1 %v1267_v0  ;;  %1132 = vmatpush3.bf16.msra.mxu0 %v1270_v3 }
  0x3d   :  { %1133 = vmatprep.subr.bf16.mxu0 %v1271_v4  ;;  %1184 = vmatpush3.bf16.msra.mxu1 %v1272_v5 }
  0x3e   :  { %818 = vmatprep.mubr.bf16.mxu0 %v1276_v8  ;;  %1185 = vmatprep.subr.bf16.mxu1 %v1277_v9 }
  0x3f   :  { %1187 = vmatprep.mubr.bf16.mxu1 %v1278_v10 }
  0x40   :  { %1134 = vmatpush3.bf16.msra.mxu0 %v1273_v6 }
  0x41   :  { %1186 = vmatpush3.bf16.msra.mxu1 %v1277_v9 }
  0x43   :  { %819 = vmatmul.mubr.bf16.vlgmr.msra.gmra.mrb[16].mxu0 %v1274_v7 }
  0x44   :  { %826 = vmatprep.mubr.bf16.mxu0 %v1280_v11  ;;  %1188 = vmatmul.mubr.bf16.vlgmr.msra.gmra.mrb[16].mxu1 %v1279_v12 }
  0x45   :  { %1191 = vmatprep.mubr.bf16.mxu1 %v1286_v13 }
  0x4b   :  { %827 = vmatmul.mubr.bf16.gmra.mrb[20].mxu0 %v1282_v14 }
  0x4c   :  { %834 = vmatprep.mubr.bf16.mxu0 %v1283_v15  ;;  %1192 = vmatmul.mubr.bf16.gmra.mrb[20].mxu1 %v1287_v16 }
  0x53   :  { %835 = vmatmul.mubr.bf16.gmra.mrb[24].mxu0 %v1285_v17 }
  0x54   :  { %842 = vmatprep.mubr.bf16.mxu0 %v1288_v18 }
  0x5b   :  { %843 = vmatmul.mubr.bf16.gmra.mrb[28].mxu0 %v1290_v19 }
  0xf6   :  { %v1055_v20 = vpop.f32.mrb[0].mxu0 }
  0xf7   :  { %v1095_v21 = vpop.f32.mrb[0].mxu1  ;;  %v1056_v22 = vpop.f32.mrb[1].mxu0 }
  0xf8   :  { %v1057_v23 = vadd.f32 %v1056_v22, %v1055_v20  ;;  %v1096_v24 = vpop.f32.mrb[1].mxu1  ;;  %v1058_v25 = vpop.f32.mrb[2].mxu0 }
  0xf9   :  { %v1097_v26 = vadd.f32 %v1096_v24, %v1095_v21  ;;  %v1098_v27 = vpop.f32.mrb[2].mxu1  ;;  %v1059_v28 = vpop.f32.mrb[3].mxu0 }
  0xfa   :  { %v1060_v29 = vadd.f32 %v1059_v28, %v1058_v25  ;;  %v1099_v30 = vpop.f32.mrb[3].mxu1 }
  0xfb   :  { %v756_v31 = vadd.f32 %v1097_v26, %v1057_v23  ;;  %v1100_v32 = vadd.f32 %v1099_v30, %v1098_v27 }
  0xfd   :  { %v759_v33 = vadd.f32 %v1100_v32, %v1060_v29 }
  0xfe   :  { %v1061_v34 = vpop.f32.mrb[4].mxu0 }
  0xff   :  { %v1101_v35 = vpop.f32.mrb[4].mxu1  ;;  %v1062_v36 = vpop.f32.mrb[5].mxu0 }
 0x100   :  { %v1063_v37 = vadd.f32 %v1062_v36, %v1061_v34  ;;  %v1102_v38 = vpop.f32.mrb[5].mxu1  ;;  %v1064_v39 = vpop.f32.mrb[6].mxu0 }
 0x101   :  { %v1103_v40 = vadd.f32 %v1102_v38, %v1101_v35  ;;  %v1104_v41 = vpop.f32.mrb[6].mxu1  ;;  %v1065_v42 = vpop.f32.mrb[7].mxu0 }
 0x102   :  { %v1066_v43 = vadd.f32 %v1065_v42, %v1064_v39  ;;  %v1105_v44 = vpop.f32.mrb[7].mxu1 }
 0x103   :  { %v764_v45 = vadd.f32 %v1103_v40, %v1063_v37  ;;  %v1106_v46 = vadd.f32 %v1105_v44, %v1104_v41 }
 0x105   :  { %v767_v47 = vadd.f32 %v1106_v46, %v1066_v43 }
 0x106   :  { %v1067_v48 = vpop.f32.mrb[8].mxu0 }
 0x107   :  { %v1107_v49 = vpop.f32.mrb[8].mxu1  ;;  %v1068_v50 = vpop.f32.mrb[9].mxu0 }
 0x108   :  { %v1108_v51 = vpop.f32.mrb[9].mxu1  ;;  %v1069_v52 = vadd.f32 %v1068_v50, %v1067_v48  ;;  %v1070_v54 = vpop.f32.mrb[10].mxu0 }
 0x109   :  { %v1109_v53 = vadd.f32 %v1108_v51, %v1107_v49  ;;  %v1110_v55 = vpop.f32.mrb[10].mxu1  ;;  %v1071_v56 = vpop.f32.mrb[11].mxu0 }
 0x10a   :  { %v1111_v57 = vpop.f32.mrb[11].mxu1  ;;  %v1072_v59 = vadd.f32 %v1071_v56, %v1070_v54 }
 0x10b   :  { %v772_v58 = vadd.f32 %v1109_v53, %v1069_v52  ;;  %v1112_v60 = vadd.f32 %v1111_v57, %v1110_v55 }
 0x10d   :  { %v775_v61 = vadd.f32 %v1112_v60, %v1072_v59 }
 0x10e   :  { %v1073_v62 = vpop.f32.mrb[12].mxu0 }
 0x10f   :  { %v1113_v63 = vpop.f32.mrb[12].mxu1  ;;  %v1074_v0 = vpop.f32.mrb[13].mxu0 }
 0x110   :  { %v1114_v1 = vpop.f32.mrb[13].mxu1  ;;  %v1075_v2 = vadd.f32 %v1074_v0, %v1073_v62  ;;  %v1076_v4 = vpop.f32.mrb[14].mxu0 }
 0x111   :  { %v1115_v3 = vadd.f32 %v1114_v1, %v1113_v63  ;;  %v1116_v5 = vpop.f32.mrb[14].mxu1  ;;  %v1077_v6 = vpop.f32.mrb[15].mxu0 }
 0x112   :  { %v1117_v7 = vpop.f32.mrb[15].mxu1  ;;  %v1078_v9 = vadd.f32 %v1077_v6, %v1076_v4 }
 0x113   :  { %v780_v8 = vadd.f32 %v1115_v3, %v1075_v2  ;;  %v1118_v10 = vadd.f32 %v1117_v7, %v1116_v5 }
 0x115   :  { %v783_v11 = vadd.f32 %v1118_v10, %v1078_v9 }
 0x116   :  { %v1135_v12 = vpop.f32.mrb[16].mxu0 }
 0x117   :  { %v1136_v13 = vpop.f32.mrb[17].mxu0  ;;  %v1189_v18 = vpop.f32.mrb[16].mxu1 }
 0x118   :  { %v1137_v14 = vadd.f32 %v1136_v13, %v1135_v12  ;;  %v1138_v15 = vpop.f32.mrb[18].mxu0  ;;  %v885_v20 = vpop.f32.mrb[17].mxu1 }
 0x119   :  { %v1139_v16 = vpop.f32.mrb[19].mxu0  ;;  %v1190_v22 = vpop.f32.mrb[18].mxu1 }
 0x11a   :  { %v1140_v17 = vadd.f32 %v1139_v16, %v1138_v15  ;;  %v821_v19 = vadd.f32 %v1137_v14, %v756_v31  ;;  %v888_v24 = vpop.f32.mrb[19].mxu1 }
 0x11c   :  { %v886_v21 = vadd.f32 %v885_v20, %v821_v19  ;;  %v824_v23 = vadd.f32 %v1140_v17, %v759_v33 }
 0x11e   :  { %943 = vst [vmem:[%s1584_s2] sm:$0xff] %v886_v21  ;;  %v889_v25 = vadd.f32 %v888_v24, %v824_v23  ;;  %v1141_v26 = vpop.f32.mrb[20].mxu0 }
 0x11f   :  { %v1142_v27 = vpop.f32.mrb[21].mxu0  ;;  %v1193_v34 = vpop.f32.mrb[20].mxu1 }
 0x120   :  { %944 = vst [vmem:[%s1584_s2 + $0x8] sm:$0xff] %v889_v25  ;;  %v1143_v28 = vadd.f32 %v1142_v27, %v1141_v26  ;;  %v1144_v29 = vpop.f32.mrb[22].mxu0  ;;  %v901_v35 = vpop.f32.mrb[21].mxu1 }
 0x121   :  { %v1145_v30 = vpop.f32.mrb[23].mxu0  ;;  %v1194_v37 = vpop.f32.mrb[22].mxu1 }
 0x122   :  { %v829_v31 = vadd.f32 %v1143_v28, %v764_v45  ;;  %v1146_v32 = vadd.f32 %v1145_v30, %v1144_v29  ;;  %v904_v38 = vpop.f32.mrb[23].mxu1 }
 0x124   :  { %v894_v33 = vadd.f32 %v1189_v18, %v829_v31  ;;  %v832_v36 = vadd.f32 %v1146_v32, %v767_v47 }
 0x126   :  { %945 = vst [vmem:[%s1584_s2 + $0x10] sm:$0xff] %v894_v33  ;;  %v897_v39 = vadd.f32 %v1190_v22, %v832_v36  ;;  %v1147_v40 = vpop.f32.mrb[24].mxu0 }
 0x127   :  { %v1148_v41 = vpop.f32.mrb[25].mxu0 }
 0x128   :  { %946 = vst [vmem:[%s1584_s2 + $0x18] sm:$0xff] %v897_v39  ;;  %v1149_v42 = vadd.f32 %v1148_v41, %v1147_v40  ;;  %v1150_v43 = vpop.f32.mrb[26].mxu0 }
 0x129   :  { %v1151_v44 = vpop.f32.mrb[27].mxu0 }
 0x12a   :  { %v1152_v45 = vadd.f32 %v1151_v44, %v1150_v43  ;;  %v837_v46 = vadd.f32 %v1149_v42, %v772_v58 }
 0x12c   :  { %v902_v48 = vadd.f32 %v901_v35, %v837_v46  ;;  %v840_v47 = vadd.f32 %v1152_v45, %v775_v61 }
 0x12e   :  { %947 = vst [vmem:[%s1584_s2 + $0x20] sm:$0xff] %v902_v48  ;;  %v905_v49 = vadd.f32 %v904_v38, %v840_v47  ;;  %v1153_v50 = vpop.f32.mrb[28].mxu0 }
 0x12f   :  { %v1154_v51 = vpop.f32.mrb[29].mxu0 }
 0x130   :  { %948 = vst [vmem:[%s1584_s2 + $0x28] sm:$0xff] %v905_v49  ;;  %v1155_v52 = vadd.f32 %v1154_v51, %v1153_v50  ;;  %v1156_v53 = vpop.f32.mrb[30].mxu0 }
 0x131   :  { %v1157_v54 = vpop.f32.mrb[31].mxu0 }
 0x132   :  { %v845_v55 = vadd.f32 %v1155_v52, %v780_v8  ;;  %v1158_v56 = vadd.f32 %v1157_v54, %v1156_v53 }
 0x134   :  { %v910_v57 = vadd.f32 %v1193_v34, %v845_v55  ;;  %v848_v58 = vadd.f32 %v1158_v56, %v783_v11 }
 0x136   :  { %949 = vst [vmem:[%s1584_s2 + $0x30] sm:$0xff] %v910_v57  ;;  %v913_v59 = vadd.f32 %v1194_v37, %v848_v58 }
 0x138   :  { %950 = vst [vmem:[%s1584_s2 + $0x38] sm:$0xff] %v913_v59 }

// kernel: _lambda_.45
= control target key start
LH: loop header
LB: loop body
LE: loop exit
PB: predicated region body
PF: predicated region fallthrough
CT: control target
= control target key end

     0   :  { %vm163_vm0 = vcmask 64512   ;;  %s439_s0 = inlined_call_operand.vmem [shape: f32[2,15,32,8], index: 0, kind: input, shape index: {}]   ;;  %s440_s1 = inlined_call_operand.vmem [shape: f32[2,4,32,8], index: 1, kind: input, shape index: {}]   ;;  %s441_s2 = inlined_call_operand.vmem [shape: f32[2,32,8], index: 2, kind: output, shape index: {}]  }
   0x1   :  { %v11_v0 = vld [vmem:[%s439_s0 + $0xc0] sm:$0xff]  ;;  %v12_v5 = vld [vmem:[%s439_s0 + $0xc8] sm:$0xff]  ;;  %v13_v11 = vld [vmem:[%s439_s0 + $0xd0] sm:$0xff] }
   0x2   :  { %v15_v1 = vld [vmem:[%s439_s0 + $0x140] sm:$0xff]  ;;  %v16_v6 = vld [vmem:[%s439_s0 + $0x148] sm:$0xff]  ;;  %v17_v12 = vld [vmem:[%s439_s0 + $0x150] sm:$0xff] }
   0x3   :  { %v27_v2 = vld [vmem:[%s440_s1] sm:$0xff]  ;;  %v59_v4 = vadd.f32 %v15_v1, %v11_v0  ;;  %v28_v7 = vld [vmem:[%s440_s1 + $0x8] sm:$0xff]  ;;  %v60_v10 = vadd.f32 %v16_v6, %v12_v5  ;;  %v29_v13 = vld [vmem:[%s440_s1 + $0x10] sm:$0xff]  ;;  %v61_v17 = vadd.f32 %v17_v12, %v13_v11 }
   0x4   :  { %v35_v3 = vld [vmem:[%s440_s1 + $0x40] sm:$0xff]  ;;  %v36_v9 = vld [vmem:[%s440_s1 + $0x48] sm:$0xff]  ;;  %v37_v16 = vld [vmem:[%s440_s1 + $0x50] sm:$0xff] }
   0x5   :  { %v67_v8 = vadd.f32 %v59_v4, %v27_v2  ;;  %v68_v15 = vadd.f32 %v60_v10, %v28_v7  ;;  %v14_v18 = vld [vmem:[%s439_s0 + $0xd8] sm:$0xff]  ;;  %v69_v22 = vadd.f32 %v61_v17, %v29_v13  ;;  %v19_v25 = vld [vmem:[%s439_s0 + $0x2a0] sm:$0xff]  ;;  %v20_v32 = vld [vmem:[%s439_s0 + $0x2a8] sm:$0xff] }
   0x6   :  { %v18_v19 = vld [vmem:[%s439_s0 + $0x158] sm:$0xff]  ;;  %v23_v26 = vld [vmem:[%s439_s0 + $0x320] sm:$0xff]  ;;  %v24_v33 = vld [vmem:[%s439_s0 + $0x328] sm:$0xff] }
   0x7   :  { %v75_v14 = vadd.f32 %v67_v8, %v35_v3  ;;  %v30_v20 = vld [vmem:[%s440_s1 + $0x18] sm:$0xff]  ;;  %v76_v21 = vadd.f32 %v68_v15, %v36_v9  ;;  %v62_v24 = vadd.f32 %v18_v19, %v14_v18  ;;  %v43_v27 = vld [vmem:[%s440_s1 + $0x80] sm:$0xff]  ;;  %v77_v28 = vadd.f32 %v69_v22, %v37_v16  ;;  %v44_v34 = vld [vmem:[%s440_s1 + $0x88] sm:$0xff] }
   0x8   :  { %v38_v23 = vld [vmem:[%s440_s1 + $0x58] sm:$0xff]  ;;  %v51_v30 = vld [vmem:[%s440_s1 + $0xc0] sm:$0xff]  ;;  %v63_v31 = vadd.f32 %v23_v26, %v19_v25  ;;  %v52_v37 = vld [vmem:[%s440_s1 + $0xc8] sm:$0xff]  ;;  %v64_v38 = vadd.f32 %v24_v33, %v20_v32 }
   0x9   :  { %184 = vtanh.f32 %v75_v14  ;;  %v70_v29 = vadd.f32 %v62_v24, %v30_v20  ;;  %v21_v39 = vld [vmem:[%s439_s0 + $0x2b0] sm:$0xff]  ;;  %v22_v46 = vld [vmem:[%s439_s0 + $0x2b8] sm:$0xff]  ;;  %v31_v59 = vld [vmem:[%s440_s1 + $0x20] sm:$0xff] }
   0xa   :  { %186 = vtanh.f32 %v76_v21  ;;  %v71_v36 = vadd.f32 %v63_v31, %v43_v27  ;;  %v25_v40 = vld [vmem:[%s439_s0 + $0x330] sm:$0xff]  ;;  %v72_v43 = vadd.f32 %v64_v38, %v44_v34  ;;  %v26_v47 = vld [vmem:[%s439_s0 + $0x338] sm:$0xff]  ;;  %v39_v60 = vld [vmem:[%s440_s1 + $0x60] sm:$0xff] }
   0xb   :  { %188 = vtanh.f32 %v77_v28  ;;  %v78_v35 = vadd.f32 %v70_v29, %v38_v23  ;;  %v45_v41 = vld [vmem:[%s440_s1 + $0x90] sm:$0xff]  ;;  %v65_v45 = vadd.f32 %v25_v40, %v21_v39  ;;  %v46_v48 = vld [vmem:[%s440_s1 + $0x98] sm:$0xff]  ;;  %v66_v51 = vadd.f32 %v26_v47, %v22_v46  ;;  %v32_v63 = vld [vmem:[%s440_s1 + $0x28] sm:$0xff] }
   0xc   :  { %v79_v42 = vadd.f32 %v71_v36, %v51_v30  ;;  %v53_v44 = vld [vmem:[%s440_s1 + $0xd0] sm:$0xff]  ;;  %v80_v49 = vadd.f32 %v72_v43, %v52_v37  ;;  %v54_v52 = vld [vmem:[%s440_s1 + $0xd8] sm:$0xff]  ;;  %v40_v0 = vld [vmem:[%s440_s1 + $0x68] sm:$0xff]  ;;  %v91_v3 = vadd.f32 %v39_v60, %v31_v59 }
   0xd   :  { %190 = vtanh.f32 %v78_v35  ;;  %v73_v50 = vadd.f32 %v65_v45, %v45_v41  ;;  %v74_v55 = vadd.f32 %v66_v51, %v46_v48  ;;  %v33_v4 = vld [vmem:[%s440_s1 + $0x30] sm:$0xff]  ;;  %v92_v8 = vadd.f32 %v40_v0, %v32_v63  ;;  %v34_v14 = vld [vmem:[%s440_s1 + $0x38] sm:$0xff]  ;;  %v47_v20 = vld [vmem:[%s440_s1 + $0xa0] sm:$0xff] }
   0xe   :  { %192 = vtanh.f32 %v79_v42  ;;  %v41_v5 = vld [vmem:[%s440_s1 + $0x70] sm:$0xff]  ;;  %v42_v15 = vld [vmem:[%s440_s1 + $0x78] sm:$0xff]  ;;  %v55_v21 = vld [vmem:[%s440_s1 + $0xe0] sm:$0xff] }
   0xf   :  { %194 = vtanh.f32 %v80_v49  ;;  %v81_v54 = vadd.f32 %v73_v50, %v53_v44  ;;  %v82_v58 = vadd.f32 %v74_v55, %v54_v52  ;;  %v93_v11 = vadd.f32 %v41_v5, %v33_v4  ;;  %v48_v26 = vld [vmem:[%s440_s1 + $0xa8] sm:$0xff]  ;;  %v49_v31 = vld [vmem:[%s440_s1 + $0xb0] sm:$0xff]  ;;  %v50_v37 = vld [vmem:[%s440_s1 + $0xb8] sm:$0xff] }
  0x10   :  { %v94_v23 = vadd.f32 %v42_v15, %v34_v14  ;;  %v56_v27 = vld [vmem:[%s440_s1 + $0xe8] sm:$0xff]  ;;  %v95_v29 = vadd.f32 %v55_v21, %v47_v20  ;;  %v57_v32 = vld [vmem:[%s440_s1 + $0xf0] sm:$0xff]  ;;  %v58_v38 = vld [vmem:[%s440_s1 + $0xf8] sm:$0xff] }
  0x11   :  { %196 = vtanh.f32 %v81_v54  ;;  %v96_v34 = vadd.f32 %v56_v27, %v48_v26  ;;  %v97_v40 = vadd.f32 %v57_v32, %v49_v31  ;;  %v98_v44 = vadd.f32 %v58_v38, %v50_v37 }
  0x13   :  { %v185_v53 = vpop.eup %184 }
  0x14   :  { %v176_v56 = vmul.f32 -1.442695, %v185_v53  ;;  %v187_v57 = vpop.eup %186 }
  0x15   :  { %v177_v61 = vmul.f32 -1.442695, %v187_v57  ;;  %v189_v62 = vpop.eup %188 }
  0x16   :  { %198 = vpow2.f32 %v176_v56  ;;  %v178_v1 = vmul.f32 -1.442695, %v189_v62 }
  0x17   :  { %200 = vtanh.f32 %v82_v58  ;;  %v191_v2 = vpop.eup %190 }
  0x18   :  { %202 = vpow2.f32 %v177_v61  ;;  %v179_v6 = vmul.f32 -1.442695, %v191_v2  ;;  %v193_v7 = vpop.eup %192 }
  0x19   :  { %204 = vpow2.f32 %v178_v1  ;;  %v180_v9 = vmul.f32 -1.442695, %v193_v7  ;;  %v195_v10 = vpop.eup %194 }
  0x1a   :  { %206 = vpow2.f32 %v179_v6  ;;  %v181_v12 = vmul.f32 -1.442695, %v195_v10 }
  0x1b   :  { %208 = vtanh.f32 %v91_v3  ;;  %v197_v13 = vpop.eup %196 }
  0x1c   :  { %210 = vpow2.f32 %v180_v9  ;;  %v182_v17 = vmul.f32 -1.442695, %v197_v13 }
  0x1d   :  { %212 = vtanh.f32 %v92_v8 }
  0x1e   :  { %214 = vpow2.f32 %v181_v12 }
  0x1f   :  { %216 = vtanh.f32 %v93_v11 }
  0x20   :  { %v199_v16 = vpop.eup %198  ;;  %218 = vpow2.f32 %v182_v17 }
  0x21   :  { %v201_v18 = vpop.eup %200  ;;  %v131_v19 = vadd.f32 1.0, %v199_v16 }
  0x22   :  { %v203_v22 = vpop.eup %202  ;;  %v183_v24 = vmul.f32 -1.442695, %v201_v18 }
  0x23   :  { %220 = vrcp.f32 %v131_v19  ;;  %v132_v25 = vadd.f32 1.0, %v203_v22  ;;  %v205_v28 = vpop.eup %204 }
  0x24   :  { %222 = vpow2.f32 %v183_v24  ;;  %v133_v30 = vadd.f32 1.0, %v205_v28  ;;  %v207_v33 = vpop.eup %206 }
  0x25   :  { %224 = vrcp.f32 %v132_v25  ;;  %v209_v35 = vpop.eup %208  ;;  %v134_v36 = vadd.f32 1.0, %v207_v33 }
  0x26   :  { %226 = vtanh.f32 %v94_v23  ;;  %v211_v39 = vpop.eup %210 }
  0x27   :  { %228 = vrcp.f32 %v133_v30  ;;  %v213_v41 = vpop.eup %212  ;;  %v135_v42 = vadd.f32 1.0, %v211_v39 }
  0x28   :  { %230 = vtanh.f32 %v95_v29  ;;  %v215_v43 = vpop.eup %214 }
  0x29   :  { %232 = vrcp.f32 %v134_v36  ;;  %v217_v45 = vpop.eup %216  ;;  %v136_v46 = vadd.f32 1.0, %v215_v43 }
  0x2a   :  { %234 = vtanh.f32 %v96_v34  ;;  %v219_v47 = vpop.eup %218 }
  0x2b   :  { %236 = vrcp.f32 %v135_v42  ;;  %v137_v49 = vadd.f32 1.0, %v219_v47 }
  0x2c   :  { %238 = vtanh.f32 %v97_v40 }
  0x2d   :  { %v221_v48 = vpop.eup %220  ;;  %240 = vrcp.f32 %v136_v46 }
  0x2e   :  { %v223_v50 = vpop.eup %222  ;;  %v155_v51 = vmul.f32 %v221_v48, %v209_v35  ;;  %242 = vtanh.f32 %v98_v44 }
  0x2f   :  { %v225_v52 = vpop.eup %224  ;;  %244 = vrcp.f32 %v137_v49  ;;  %v138_v53 = vadd.f32 1.0, %v223_v50 }
  0x30   :  { %v227_v54 = vpop.eup %226  ;;  %164 = vst.msk [vmem:[%s441_s2] sm:$0xff] %vm163_vm0, %v155_v51  ;;  %v156_v55 = vmul.f32 %v225_v52, %v213_v41 }
  0x31   :  { %v229_v56 = vpop.eup %228  ;;  %246 = vrcp.f32 %v138_v53 }
  0x32   :  { %v231_v57 = vpop.eup %230  ;;  %165 = vst.msk [vmem:[%s441_s2 + $0x8] sm:$0xff] %vm163_vm0, %v156_v55  ;;  %v157_v58 = vmul.f32 %v229_v56, %v217_v45 }
  0x33   :  { %v233_v59 = vpop.eup %232 }
  0x34   :  { %v235_v60 = vpop.eup %234  ;;  %166 = vst.msk [vmem:[%s441_s2 + $0x10] sm:$0xff] %vm163_vm0, %v157_v58  ;;  %v158_v61 = vmul.f32 %v233_v59, %v227_v54 }
  0x35   :  { %v237_v62 = vpop.eup %236 }
  0x36   :  { %v239_v63 = vpop.eup %238  ;;  %167 = vst.msk [vmem:[%s441_s2 + $0x18] sm:$0xff] %vm163_vm0, %v158_v61  ;;  %v159_v0 = vmul.f32 %v237_v62, %v231_v57 }
  0x37   :  { %v241_v1 = vpop.eup %240 }
  0x38   :  { %v243_v2 = vpop.eup %242  ;;  %168 = vst.msk [vmem:[%s441_s2 + $0x20] sm:$0xff] %vm163_vm0, %v159_v0  ;;  %v160_v3 = vmul.f32 %v241_v1, %v235_v60 }
  0x39   :  { %v245_v4 = vpop.eup %244 }
  0x3a   :  { %169 = vst.msk [vmem:[%s441_s2 + $0x28] sm:$0xff] %vm163_vm0, %v160_v3  ;;  %v161_v5 = vmul.f32 %v245_v4, %v239_v63 }
  0x3b   :  { %v247_v6 = vpop.eup %246 }
  0x3c   :  { %170 = vst.msk [vmem:[%s441_s2 + $0x30] sm:$0xff] %vm163_vm0, %v161_v5  ;;  %v162_v7 = vmul.f32 %v247_v6, %v243_v2 }
  0x3e   :  { %171 = vst.msk [vmem:[%s441_s2 + $0x38] sm:$0xff] %vm163_vm0, %v162_v7 }

// kernel: _lambda_.46
= control target key start
LH: loop header
LB: loop body
LE: loop exit
PB: predicated region body
PF: predicated region fallthrough
CT: control target
= control target key end

     0   :  { %s2160_s1 = inlined_call_operand.vmem [shape: bf16[1280,128], index: 1, kind: input, shape index: {}]   ;;  %s2161_s0 = inlined_call_operand.vmem [shape: bf16[64,1280], index: 0, kind: input, shape index: {}]   ;;  %s2162_s2 = inlined_call_operand.vmem [shape: f32[64,128], index: 2, kind: output, shape index: {}]  }
   0x1   :  { %v1612_v0 = vld [vmem:[%s2160_s1 + $0x40] sm:$0xff]   ;;  %v1616_v4 = vld [vmem:[%s2160_s1 + $0x48] sm:$0xff]   ;;  %v1620_v8 = vld [vmem:[%s2160_s1 + $0x50] sm:$0xff]  }
   0x2   :  { %v1613_v1 = vld [vmem:[%s2160_s1 + $0xc0] sm:$0xff]   ;;  %1396 = vmatprep.subr.bf16.mxu0 %v1612_v0  ;;  %v1617_v5 = vld [vmem:[%s2160_s1 + $0xc8] sm:$0xff]   ;;  %v1621_v9 = vld [vmem:[%s2160_s1 + $0xd0] sm:$0xff]  }
   0x3   :  { %v1614_v2 = vld [vmem:[%s2160_s1] sm:$0xff]   ;;  %1436 = vmatprep.subr.bf16.mxu1 %v1613_v1  ;;  %v1618_v6 = vld [vmem:[%s2160_s1 + $0x8] sm:$0xff]   ;;  %v1622_v10 = vld [vmem:[%s2160_s1 + $0x10] sm:$0xff]  }
   0x4   :  { %v1615_v3 = vld [vmem:[%s2160_s1 + $0x80] sm:$0xff]   ;;  %1397 = vmatpush3.bf16.msra.mxu0 %v1614_v2  ;;  %v1619_v7 = vld [vmem:[%s2160_s1 + $0x88] sm:$0xff]   ;;  %v1623_v11 = vld [vmem:[%s2160_s1 + $0x90] sm:$0xff]  }
   0x5   :  { %1437 = vmatpush3.bf16.msra.mxu1 %v1615_v3  ;;  %1398 = vmatprep.subr.bf16.mxu0 %v1616_v4  ;;  %v1624_v12 = vld [vmem:[%s2160_s1 + $0x58] sm:$0xff]   ;;  %v1628_v16 = vld [vmem:[%s2160_s1 + $0x60] sm:$0xff]   ;;  %v1632_v20 = vld [vmem:[%s2160_s1 + $0x68] sm:$0xff]  }
   0x6   :  { %1438 = vmatprep.subr.bf16.mxu1 %v1617_v5  ;;  %v1625_v13 = vld [vmem:[%s2160_s1 + $0xd8] sm:$0xff]   ;;  %v1629_v17 = vld [vmem:[%s2160_s1 + $0xe0] sm:$0xff]   ;;  %v1633_v21 = vld [vmem:[%s2160_s1 + $0xe8] sm:$0xff]  }
   0x7   :  { %v1626_v14 = vld [vmem:[%s2160_s1 + $0x18] sm:$0xff]   ;;  %v1630_v18 = vld [vmem:[%s2160_s1 + $0x20] sm:$0xff]   ;;  %v1634_v22 = vld [vmem:[%s2160_s1 + $0x28] sm:$0xff]  }
   0x8   :  { %1399 = vmatpush3.bf16.msra.mxu0 %v1618_v6  ;;  %v1627_v15 = vld [vmem:[%s2160_s1 + $0x98] sm:$0xff]   ;;  %v1631_v19 = vld [vmem:[%s2160_s1 + $0xa0] sm:$0xff]   ;;  %v1635_v23 = vld [vmem:[%s2160_s1 + $0xa8] sm:$0xff]  }
   0x9   :  { %1439 = vmatpush3.bf16.msra.mxu1 %v1619_v7  ;;  %1400 = vmatprep.subr.bf16.mxu0 %v1620_v8  ;;  %v1636_v24 = vld [vmem:[%s2160_s1 + $0x70] sm:$0xff]   ;;  %v1640_v28 = vld [vmem:[%s2160_s1 + $0x78] sm:$0xff]   ;;  %v1644_v32 = vld [vmem:[%s2161_s0] ss:$40 sps:$4 sm:$0xff]  }
   0xa   :  { %1440 = vmatprep.subr.bf16.mxu1 %v1621_v9  ;;  %v1637_v25 = vld [vmem:[%s2160_s1 + $0xf0] sm:$0xff]   ;;  %v1641_v29 = vld [vmem:[%s2160_s1 + $0xf8] sm:$0xff]   ;;  %v1646_v33 = vld [vmem:[%s2161_s0 + $0x4] ss:$40 sps:$4 sm:$0xff]  }
   0xb   :  { %v1638_v26 = vld [vmem:[%s2160_s1 + $0x30] sm:$0xff]   ;;  %v1642_v30 = vld [vmem:[%s2160_s1 + $0x38] sm:$0xff]   ;;  %944 = vmatprep.mubr.bf16.mxu0 %v1646_v33  ;;  %v1650_v36 = vld [vmem:[%s2160_s1 + $0x140] sm:$0xff]  }
   0xc   :  { %1401 = vmatpush3.bf16.msra.mxu0 %v1622_v10  ;;  %v1639_v27 = vld [vmem:[%s2160_s1 + $0xb0] sm:$0xff]   ;;  %v1643_v31 = vld [vmem:[%s2160_s1 + $0xb8] sm:$0xff]   ;;  %v1651_v37 = vld [vmem:[%s2160_s1 + $0x1c0] sm:$0xff]  }
   0xd   :  { %1441 = vmatpush3.bf16.msra.mxu1 %v1623_v11  ;;  %1402 = vmatprep.subr.bf16.mxu0 %v1624_v12  ;;  %v1647_v34 = vld [vmem:[%s2161_s0 + $0x8] ss:$40 sps:$4 sm:$0xff]   ;;  %v1649_v35 = vld [vmem:[%s2161_s0 + $0xc] ss:$40 sps:$4 sm:$0xff]   ;;  %v1652_v38 = vld [vmem:[%s2160_s1 + $0x100] sm:$0xff]  }
   0xe   :  { %1442 = vmatprep.subr.bf16.mxu1 %v1625_v13  ;;  %1009 = vmatprep.mubr.bf16.mxu1 %v1649_v35  ;;  %v1653_v39 = vld [vmem:[%s2160_s1 + $0x180] sm:$0xff]   ;;  %v1654_v40 = vld [vmem:[%s2160_s1 + $0x148] sm:$0xff]   ;;  %v1658_v44 = vld [vmem:[%s2161_s0 + $0x54] ss:$40 sps:$4 sm:$0xff]  }
   0xf   :  { %v1655_v41 = vld [vmem:[%s2160_s1 + $0x1c8] sm:$0xff]   ;;  %v1660_v45 = vld [vmem:[%s2161_s0 + $0x5c] ss:$40 sps:$4 sm:$0xff]   ;;  %v1662_v46 = vld [vmem:[%s2161_s0 + $0x50] ss:$40 sps:$4 sm:$0xff]  }
  0x10   :  { %1403 = vmatpush3.bf16.msra.mxu0 %v1626_v14  ;;  %v1656_v42 = vld [vmem:[%s2160_s1 + $0x108] sm:$0xff]   ;;  %v1663_v47 = vld [vmem:[%s2161_s0 + $0x58] ss:$40 sps:$4 sm:$0xff]   ;;  %v1664_v48 = vld [vmem:[%s2160_s1 + $0x150] sm:$0xff]  }
  0x11   :  { %1443 = vmatpush3.bf16.msra.mxu1 %v1627_v15  ;;  %1404 = vmatprep.subr.bf16.mxu0 %v1628_v16  ;;  %v1657_v43 = vld [vmem:[%s2160_s1 + $0x188] sm:$0xff]   ;;  %v1665_v49 = vld [vmem:[%s2160_s1 + $0x1d0] sm:$0xff]   ;;  %v1668_v52 = vld [vmem:[%s2160_s1 + $0x158] sm:$0xff]  }
  0x12   :  { %1444 = vmatprep.subr.bf16.mxu1 %v1629_v17  ;;  %v1666_v50 = vld [vmem:[%s2160_s1 + $0x110] sm:$0xff]   ;;  %v1669_v53 = vld [vmem:[%s2160_s1 + $0x1d8] sm:$0xff]   ;;  %v1672_v56 = vld [vmem:[%s2161_s0 + $0xa4] ss:$40 sps:$4 sm:$0xff]  }
  0x13   :  { %v1667_v51 = vld [vmem:[%s2160_s1 + $0x190] sm:$0xff]   ;;  %v1670_v54 = vld [vmem:[%s2160_s1 + $0x118] sm:$0xff]   ;;  %v1676_v58 = vld [vmem:[%s2161_s0 + $0xa0] ss:$40 sps:$4 sm:$0xff]  }
  0x14   :  { %1405 = vmatpush3.bf16.msra.mxu0 %v1630_v18  ;;  %v1671_v55 = vld [vmem:[%s2160_s1 + $0x198] sm:$0xff]   ;;  %v1674_v57 = vld [vmem:[%s2161_s0 + $0xac] ss:$40 sps:$4 sm:$0xff]   ;;  %v1677_v59 = vld [vmem:[%s2161_s0 + $0xa8] ss:$40 sps:$4 sm:$0xff]  }
  0x15   :  { %1445 = vmatpush3.bf16.msra.mxu1 %v1631_v19  ;;  %1406 = vmatprep.subr.bf16.mxu0 %v1632_v20  ;;  %v1678_v60 = vld [vmem:[%s2160_s1 + $0x160] sm:$0xff]   ;;  %v1682_v0 = vld [vmem:[%s2160_s1 + $0x168] sm:$0xff]   ;;  %v1686_v4 = vld [vmem:[%s2161_s0 + $0xf4] ss:$40 sps:$4 sm:$0xff]  }
  0x16   :  { %1446 = vmatprep.subr.bf16.mxu1 %v1633_v21  ;;  %v1679_v61 = vld [vmem:[%s2160_s1 + $0x1e0] sm:$0xff]   ;;  %v1683_v1 = vld [vmem:[%s2160_s1 + $0x1e8] sm:$0xff]   ;;  %v1690_v6 = vld [vmem:[%s2161_s0 + $0xf0] ss:$40 sps:$4 sm:$0xff]  }
  0x17   :  { %v1680_v62 = vld [vmem:[%s2160_s1 + $0x120] sm:$0xff]   ;;  %v1684_v2 = vld [vmem:[%s2160_s1 + $0x128] sm:$0xff]   ;;  %v1692_v8 = vld [vmem:[%s2160_s1 + $0x170] sm:$0xff]  }
  0x18   :  { %1407 = vmatpush3.bf16.msra.mxu0 %v1634_v22  ;;  %v1681_v63 = vld [vmem:[%s2160_s1 + $0x1a0] sm:$0xff]   ;;  %v1685_v3 = vld [vmem:[%s2160_s1 + $0x1a8] sm:$0xff]   ;;  %v1693_v9 = vld [vmem:[%s2160_s1 + $0x1f0] sm:$0xff]  }
  0x19   :  { %1447 = vmatpush3.bf16.msra.mxu1 %v1635_v23  ;;  %1408 = vmatprep.subr.bf16.mxu0 %v1636_v24  ;;  %v1688_v5 = vld [vmem:[%s2161_s0 + $0xfc] ss:$40 sps:$4 sm:$0xff]   ;;  %v1691_v7 = vld [vmem:[%s2161_s0 + $0xf8] ss:$40 sps:$4 sm:$0xff]   ;;  %v1694_v10 = vld [vmem:[%s2160_s1 + $0x130] sm:$0xff]  }
  0x1a   :  { %1448 = vmatprep.subr.bf16.mxu1 %v1637_v25  ;;  %v1695_v11 = vld [vmem:[%s2160_s1 + $0x1b0] sm:$0xff]   ;;  %v1696_v12 = vld [vmem:[%s2160_s1 + $0x178] sm:$0xff]   ;;  %v1706_v20 = vld [vmem:[%s2160_s1 + $0x240] sm:$0xff]  }
  0x1b   :  { %v1697_v13 = vld [vmem:[%s2160_s1 + $0x1f8] sm:$0xff]   ;;  %v1707_v21 = vld [vmem:[%s2160_s1 + $0x200] sm:$0xff]   ;;  %v1708_v22 = vld [vmem:[%s2160_s1 + $0x248] sm:$0xff]  }
  0x1c   :  { %1409 = vmatpush3.bf16.msra.mxu0 %v1638_v26  ;;  %v1698_v14 = vld [vmem:[%s2160_s1 + $0x138] sm:$0xff]   ;;  %v1709_v23 = vld [vmem:[%s2160_s1 + $0x208] sm:$0xff]   ;;  %v1726_v35 = vld [vmem:[%s2160_s1 + $0x260] sm:$0xff]  }
  0x1d   :  { %1449 = vmatpush3.bf16.msra.mxu1 %v1639_v27  ;;  %1410 = vmatprep.subr.bf16.mxu0 %v1640_v28  ;;  %v1699_v15 = vld [vmem:[%s2160_s1 + $0x1b8] sm:$0xff]   ;;  %v1710_v24 = vld [vmem:[%s2161_s0 + $0x64] ss:$40 sps:$4 sm:$0xff]   ;;  %v1714_v26 = vld [vmem:[%s2161_s0 + $0x60] ss:$40 sps:$4 sm:$0xff]  }
  0x1e   :  { %1450 = vmatprep.subr.bf16.mxu1 %v1641_v29  ;;  %v1700_v16 = vld [vmem:[%s2161_s0 + $0x10] ss:$40 sps:$4 sm:$0xff]   ;;  %v1702_v17 = vld [vmem:[%s2161_s0 + $0x14] ss:$40 sps:$4 sm:$0xff]  }
  0x1f   :  { %v1703_v18 = vld [vmem:[%s2161_s0 + $0x18] ss:$40 sps:$4 sm:$0xff]   ;;  %v1705_v19 = vld [vmem:[%s2161_s0 + $0x1c] ss:$40 sps:$4 sm:$0xff]   ;;  %v1712_v25 = vld [vmem:[%s2161_s0 + $0x6c] ss:$40 sps:$4 sm:$0xff]  }
  0x20   :  { %1411 = vmatpush3.bf16.msra.mxu0 %v1642_v30  ;;  %v1715_v27 = vld [vmem:[%s2161_s0 + $0x68] ss:$40 sps:$4 sm:$0xff]   ;;  %v1718_v30 = vld [vmem:[%s2160_s1 + $0x258] sm:$0xff]  }
  0x21   :  { %1451 = vmatpush3.bf16.msra.mxu1 %v1643_v31  ;;  %1476 = vmatprep.subr.bf16.mxu0 %v1650_v36  ;;  %v1716_v28 = vld [vmem:[%s2160_s1 + $0x250] sm:$0xff]   ;;  %v1719_v31 = vld [vmem:[%s2160_s1 + $0x218] sm:$0xff]  }
  0x22   :  { %1516 = vmatprep.subr.bf16.mxu1 %v1651_v37  ;;  %v1717_v29 = vld [vmem:[%s2160_s1 + $0x210] sm:$0xff]   ;;  %v1722_v33 = vld [vmem:[%s2161_s0 + $0xbc] ss:$40 sps:$4 sm:$0xff]   ;;  %v1725_v36 = vld [vmem:[%s2161_s0 + $0xb8] ss:$40 sps:$4 sm:$0xff]  }
  0x23   :  { %945 = vmatmul.mubr.bf16.vlgmr.msra.gmra.mrb[0].mxu0 %v1644_v32  ;;  %v1720_v32 = vld [vmem:[%s2161_s0 + $0xb4] ss:$40 sps:$4 sm:$0xff]   ;;  %v1727_v37 = vld [vmem:[%s2160_s1 + $0x220] sm:$0xff]  }
  0x24   :  { %1010 = vmatmul.mubr.bf16.vlgmr.msra.gmra.mrb[0].mxu1 %v1647_v34  ;;  %1477 = vmatpush3.bf16.msra.mxu0 %v1652_v38  ;;  %v1724_v34 = vld [vmem:[%s2161_s0 + $0xb0] ss:$40 sps:$4 sm:$0xff]   ;;  %v1728_v38 = vld [vmem:[%s2160_s1 + $0x268] sm:$0xff]  }
  0x25   :  { %1517 = vmatpush3.bf16.msra.mxu1 %v1653_v39  ;;  %1478 = vmatprep.subr.bf16.mxu0 %v1654_v40  ;;  %v1730_v39 = vld [vmem:[%s2161_s0 + $0x104] ss:$40 sps:$4 sm:$0xff]  }
  0x26   :  { %1518 = vmatprep.subr.bf16.mxu1 %v1655_v41  ;;  %952 = vmatprep.mubr.bf16.mxu0 %v1658_v44  ;;  %v1732_v40 = vld [vmem:[%s2161_s0 + $0x10c] ss:$40 sps:$4 sm:$0xff]   ;;  %v1735_v44 = vld [vmem:[%s2161_s0 + $0x108] ss:$40 sps:$4 sm:$0xff]  }
  0x27   :  { %1017 = vmatprep.mubr.bf16.mxu1 %v1660_v45  ;;  %v1729_v41 = vld [vmem:[%s2160_s1 + $0x228] sm:$0xff]   ;;  %v1737_v45 = vld [vmem:[%s2160_s1 + $0x230] sm:$0xff]  }
  0x28   :  { %1479 = vmatpush3.bf16.msra.mxu0 %v1656_v42  ;;  %v1734_v42 = vld [vmem:[%s2161_s0 + $0x100] ss:$40 sps:$4 sm:$0xff]  }
  0x29   :  { %1519 = vmatpush3.bf16.msra.mxu1 %v1657_v43  ;;  %1480 = vmatprep.subr.bf16.mxu0 %v1664_v48  ;;  %v1736_v43 = vld [vmem:[%s2160_s1 + $0x270] sm:$0xff]   ;;  %v1745_v48 = vld [vmem:[%s2161_s0 + $0xc4] ss:$40 sps:$4 sm:$0xff]  }
  0x2a   :  { %1520 = vmatprep.subr.bf16.mxu1 %v1665_v49  ;;  %v1739_v49 = vld [vmem:[%s2160_s1 + $0x238] sm:$0xff]  }
  0x2b   :  { %953 = vmatmul.mubr.bf16.gmra.mrb[4].mxu0 %v1662_v46  ;;  %v1738_v46 = vld [vmem:[%s2160_s1 + $0x278] sm:$0xff]  }
  0x2c   :  { %1018 = vmatmul.mubr.bf16.gmra.mrb[4].mxu1 %v1663_v47  ;;  %1481 = vmatpush3.bf16.msra.mxu0 %v1666_v50  ;;  %v1742_v47 = vld [vmem:[%s2161_s0 + $0x24] ss:$40 sps:$4 sm:$0xff]   ;;  %v1740_v50 = vld [vmem:[%s2161_s0 + $0x20] ss:$40 sps:$4 sm:$0xff]  }
  0x2d   :  { %1521 = vmatpush3.bf16.msra.mxu1 %v1667_v51  ;;  %1482 = vmatprep.subr.bf16.mxu0 %v1668_v52  ;;  %v1743_v51 = vld [vmem:[%s2161_s0 + $0xc0] ss:$40 sps:$4 sm:$0xff]   ;;  %v1746_v52 = vld [vmem:[%s2161_s0 + $0x74] ss:$40 sps:$4 sm:$0xff]  }
  0x2e   :  { %1522 = vmatprep.subr.bf16.mxu1 %v1669_v53  ;;  %960 = vmatprep.mubr.bf16.mxu0 %v1672_v56  ;;  %v1748_v53 = vld [vmem:[%s2161_s0 + $0x114] ss:$40 sps:$4 sm:$0xff]  }
  0x2f   :  { %1025 = vmatprep.mubr.bf16.mxu1 %v1674_v57 }
  0x30   :  { %1483 = vmatpush3.bf16.msra.mxu0 %v1670_v54  ;;  %v1750_v54 = vld [vmem:[%s2161_s0 + $0x70] ss:$40 sps:$4 sm:$0xff]  }
  0x31   :  { %1523 = vmatpush3.bf16.msra.mxu1 %v1671_v55  ;;  %1484 = vmatprep.subr.bf16.mxu0 %v1678_v60  ;;  %v1751_v55 = vld [vmem:[%s2161_s0 + $0x110] ss:$40 sps:$4 sm:$0xff]  }
  0x32   :  { %1524 = vmatprep.subr.bf16.mxu1 %v1679_v61 }
  0x33   :  { %961 = vmatmul.mubr.bf16.gmra.mrb[8].mxu0 %v1676_v58 }
  0x34   :  { %1026 = vmatmul.mubr.bf16.gmra.mrb[8].mxu1 %v1677_v59  ;;  %1485 = vmatpush3.bf16.msra.mxu0 %v1680_v62 }
  0x35   :  { %1525 = vmatpush3.bf16.msra.mxu1 %v1681_v63  ;;  %1486 = vmatprep.subr.bf16.mxu0 %v1682_v0 }
  0x36   :  { %1526 = vmatprep.subr.bf16.mxu1 %v1683_v1  ;;  %968 = vmatprep.mubr.bf16.mxu0 %v1686_v4 }
  0x37   :  { %1033 = vmatprep.mubr.bf16.mxu1 %v1688_v5 }
  0x38   :  { %1487 = vmatpush3.bf16.msra.mxu0 %v1684_v2 }
  0x39   :  { %1527 = vmatpush3.bf16.msra.mxu1 %v1685_v3  ;;  %1488 = vmatprep.subr.bf16.mxu0 %v1692_v8 }
  0x3a   :  { %1528 = vmatprep.subr.bf16.mxu1 %v1693_v9 }
  0x3b   :  { %969 = vmatmul.mubr.bf16.gmra.mrb[12].mxu0 %v1690_v6 }
  0x3c   :  { %1034 = vmatmul.mubr.bf16.gmra.mrb[12].mxu1 %v1691_v7  ;;  %1489 = vmatpush3.bf16.msra.mxu0 %v1694_v10 }
  0x3d   :  { %1529 = vmatpush3.bf16.msra.mxu1 %v1695_v11  ;;  %1490 = vmatprep.subr.bf16.mxu0 %v1696_v12 }
  0x3e   :  { %1530 = vmatprep.subr.bf16.mxu1 %v1697_v13  ;;  %1074 = vmatprep.mubr.bf16.mxu0 %v1702_v17 }
  0x3f   :  { %1139 = vmatprep.mubr.bf16.mxu1 %v1705_v19 }
  0x40   :  { %1491 = vmatpush3.bf16.msra.mxu0 %v1698_v14 }
  0x41   :  { %1531 = vmatpush3.bf16.msra.mxu1 %v1699_v15  ;;  %1556 = vmatprep.subr.bf16.mxu0 %v1706_v20 }
  0x42   :  { %1596 = vmatprep.subr.bf16.mxu1 %v1706_v20 }
  0x43   :  { %1075 = vmatmul.mubr.bf16.vlgmr.msra.gmra.mrb[16].mxu0 %v1700_v16 }
  0x44   :  { %1140 = vmatmul.mubr.bf16.vlgmr.msra.gmra.mrb[16].mxu1 %v1703_v18  ;;  %1557 = vmatpush3.bf16.msra.mxu0 %v1707_v21 }
  0x45   :  { %1604 = vmatpush3.bf16.msra.mxu1 %v1707_v21  ;;  %1558 = vmatprep.subr.bf16.mxu0 %v1708_v22 }
  0x46   :  { %1597 = vmatprep.subr.bf16.mxu1 %v1708_v22  ;;  %1082 = vmatprep.mubr.bf16.mxu0 %v1710_v24 }
  0x47   :  { %1147 = vmatprep.mubr.bf16.mxu1 %v1712_v25 }
  0x48   :  { %1559 = vmatpush3.bf16.msra.mxu0 %v1709_v23 }
  0x49   :  { %1605 = vmatpush3.bf16.msra.mxu1 %v1709_v23  ;;  %1560 = vmatprep.subr.bf16.mxu0 %v1716_v28 }
  0x4a   :  { %1598 = vmatprep.subr.bf16.mxu1 %v1716_v28 }
  0x4b   :  { %1083 = vmatmul.mubr.bf16.gmra.mrb[20].mxu0 %v1714_v26 }
  0x4c   :  { %1148 = vmatmul.mubr.bf16.gmra.mrb[20].mxu1 %v1715_v27  ;;  %1561 = vmatpush3.bf16.msra.mxu0 %v1717_v29 }
  0x4d   :  { %1606 = vmatpush3.bf16.msra.mxu1 %v1717_v29  ;;  %1562 = vmatprep.subr.bf16.mxu0 %v1718_v30 }
  0x4e   :  { %1599 = vmatprep.subr.bf16.mxu1 %v1718_v30  ;;  %1090 = vmatprep.mubr.bf16.mxu0 %v1720_v32 }
  0x4f   :  { %1155 = vmatprep.mubr.bf16.mxu1 %v1722_v33 }
  0x50   :  { %1563 = vmatpush3.bf16.msra.mxu0 %v1719_v31 }
  0x51   :  { %1607 = vmatpush3.bf16.msra.mxu1 %v1719_v31  ;;  %1564 = vmatprep.subr.bf16.mxu0 %v1726_v35 }
  0x52   :  { %1600 = vmatprep.subr.bf16.mxu1 %v1726_v35 }
  0x53   :  { %1091 = vmatmul.mubr.bf16.gmra.mrb[24].mxu0 %v1724_v34 }
  0x54   :  { %1156 = vmatmul.mubr.bf16.gmra.mrb[24].mxu1 %v1725_v36  ;;  %1565 = vmatpush3.bf16.msra.mxu0 %v1727_v37 }
  0x55   :  { %1098 = vmatprep.mubr.bf16.mxu0 %v1730_v39  ;;  %1608 = vmatpush3.bf16.msra.mxu1 %v1727_v37 }
  0x56   :  { %1566 = vmatprep.subr.bf16.mxu0 %v1728_v38  ;;  %1601 = vmatprep.subr.bf16.mxu1 %v1728_v38 }
  0x57   :  { %1163 = vmatprep.mubr.bf16.mxu1 %v1732_v40 }
  0x58   :  { %1567 = vmatpush3.bf16.msra.mxu0 %v1729_v41 }
  0x59   :  { %1609 = vmatpush3.bf16.msra.mxu1 %v1729_v41  ;;  %1568 = vmatprep.subr.bf16.mxu0 %v1736_v43 }
  0x5a   :  { %1602 = vmatprep.subr.bf16.mxu1 %v1736_v43 }
  0x5b   :  { %1099 = vmatmul.mubr.bf16.gmra.mrb[28].mxu0 %v1734_v42 }
  0x5c   :  { %1164 = vmatmul.mubr.bf16.gmra.mrb[28].mxu1 %v1735_v44  ;;  %1204 = vmatprep.mubr.bf16.mxu0 %v1742_v47 }
  0x5d   :  { %1569 = vmatpush3.bf16.msra.mxu0 %v1737_v45  ;;  %1220 = vmatprep.mubr.bf16.mxu1 %v1745_v48 }
  0x5e   :  { %1610 = vmatpush3.bf16.msra.mxu1 %v1737_v45  ;;  %1570 = vmatprep.subr.bf16.mxu0 %v1738_v46 }
  0x5f   :  { %1603 = vmatprep.subr.bf16.mxu1 %v1738_v46 }
  0x61   :  { %1571 = vmatpush3.bf16.msra.mxu0 %v1739_v49 }
  0x62   :  { %1611 = vmatpush3.bf16.msra.mxu1 %v1739_v49 }
  0x64   :  { %1205 = vmatmul.mubr.bf16.vlgmr.msra.gmra.mrb[32].mxu0 %v1740_v50 }
  0x65   :  { %1221 = vmatmul.mubr.bf16.vlgmr.msra.gmra.mrb[32].mxu1 %v1743_v51  ;;  %1212 = vmatprep.mubr.bf16.mxu0 %v1746_v52 }
  0x66   :  { %1228 = vmatprep.mubr.bf16.mxu1 %v1748_v53 }
  0x6c   :  { %1213 = vmatmul.mubr.bf16.gmra.mrb[36].mxu0 %v1750_v54 }
  0x6d   :  { %1229 = vmatmul.mubr.bf16.gmra.mrb[36].mxu1 %v1751_v55 }
  0xf6   :  { %v1412_v56 = vpop.f32.mrb[0].mxu0 }
  0xf7   :  { %v1452_v57 = vpop.f32.mrb[0].mxu1  ;;  %v1413_v58 = vpop.f32.mrb[1].mxu0 }
  0xf8   :  { %v1414_v59 = vadd.f32 %v1413_v58, %v1412_v56  ;;  %v1453_v60 = vpop.f32.mrb[1].mxu1  ;;  %v1415_v61 = vpop.f32.mrb[2].mxu0 }
  0xf9   :  { %v1454_v62 = vadd.f32 %v1453_v60, %v1452_v57  ;;  %v1455_v63 = vpop.f32.mrb[2].mxu1  ;;  %v1416_v0 = vpop.f32.mrb[3].mxu0 }
  0xfa   :  { %v1417_v1 = vadd.f32 %v1416_v0, %v1415_v61  ;;  %v1456_v2 = vpop.f32.mrb[3].mxu1 }
  0xfb   :  { %v1012_v3 = vadd.f32 %v1454_v62, %v1414_v59  ;;  %v1457_v4 = vadd.f32 %v1456_v2, %v1455_v63 }
  0xfd   :  { %v1015_v5 = vadd.f32 %v1457_v4, %v1417_v1 }
  0xfe   :  { %v1418_v6 = vpop.f32.mrb[4].mxu0 }
  0xff   :  { %v1458_v7 = vpop.f32.mrb[4].mxu1  ;;  %v1419_v8 = vpop.f32.mrb[5].mxu0 }
 0x100   :  { %v1420_v9 = vadd.f32 %v1419_v8, %v1418_v6  ;;  %v1459_v10 = vpop.f32.mrb[5].mxu1  ;;  %v1421_v11 = vpop.f32.mrb[6].mxu0 }
 0x101   :  { %v1460_v12 = vadd.f32 %v1459_v10, %v1458_v7  ;;  %v1461_v13 = vpop.f32.mrb[6].mxu1  ;;  %v1422_v14 = vpop.f32.mrb[7].mxu0 }
 0x102   :  { %v1423_v15 = vadd.f32 %v1422_v14, %v1421_v11  ;;  %v1462_v16 = vpop.f32.mrb[7].mxu1 }
 0x103   :  { %v1020_v17 = vadd.f32 %v1460_v12, %v1420_v9  ;;  %v1463_v18 = vadd.f32 %v1462_v16, %v1461_v13 }
 0x105   :  { %v1023_v19 = vadd.f32 %v1463_v18, %v1423_v15 }
 0x106   :  { %v1424_v20 = vpop.f32.mrb[8].mxu0 }
 0x107   :  { %v1464_v21 = vpop.f32.mrb[8].mxu1  ;;  %v1425_v22 = vpop.f32.mrb[9].mxu0 }
 0x108   :  { %v1426_v23 = vadd.f32 %v1425_v22, %v1424_v20  ;;  %v1465_v24 = vpop.f32.mrb[9].mxu1  ;;  %v1427_v25 = vpop.f32.mrb[10].mxu0 }
 0x109   :  { %v1466_v26 = vadd.f32 %v1465_v24, %v1464_v21  ;;  %v1467_v27 = vpop.f32.mrb[10].mxu1  ;;  %v1428_v28 = vpop.f32.mrb[11].mxu0 }
 0x10a   :  { %v1429_v29 = vadd.f32 %v1428_v28, %v1427_v25  ;;  %v1468_v30 = vpop.f32.mrb[11].mxu1 }
 0x10b   :  { %v1028_v31 = vadd.f32 %v1466_v26, %v1426_v23  ;;  %v1469_v32 = vadd.f32 %v1468_v30, %v1467_v27 }
 0x10d   :  { %v1031_v33 = vadd.f32 %v1469_v32, %v1429_v29 }
 0x10e   :  { %v1430_v34 = vpop.f32.mrb[12].mxu0 }
 0x10f   :  { %v1470_v35 = vpop.f32.mrb[12].mxu1  ;;  %v1431_v36 = vpop.f32.mrb[13].mxu0 }
 0x110   :  { %v1471_v37 = vpop.f32.mrb[13].mxu1  ;;  %v1432_v38 = vadd.f32 %v1431_v36, %v1430_v34  ;;  %v1433_v40 = vpop.f32.mrb[14].mxu0 }
 0x111   :  { %v1472_v39 = vadd.f32 %v1471_v37, %v1470_v35  ;;  %v1473_v41 = vpop.f32.mrb[14].mxu1  ;;  %v1434_v42 = vpop.f32.mrb[15].mxu0 }
 0x112   :  { %v1474_v43 = vpop.f32.mrb[15].mxu1  ;;  %v1435_v45 = vadd.f32 %v1434_v42, %v1433_v40 }
 0x113   :  { %v1036_v44 = vadd.f32 %v1472_v39, %v1432_v38  ;;  %v1475_v46 = vadd.f32 %v1474_v43, %v1473_v41 }
 0x115   :  { %v1039_v47 = vadd.f32 %v1475_v46, %v1435_v45 }
 0x116   :  { %v1492_v48 = vpop.f32.mrb[16].mxu0 }
 0x117   :  { %v1493_v49 = vpop.f32.mrb[17].mxu0  ;;  %v1532_v50 = vpop.f32.mrb[16].mxu1 }
 0x118   :  { %v1494_v51 = vadd.f32 %v1493_v49, %v1492_v48  ;;  %v1495_v52 = vpop.f32.mrb[18].mxu0  ;;  %v1533_v53 = vpop.f32.mrb[17].mxu1 }
 0x119   :  { %v1496_v54 = vpop.f32.mrb[19].mxu0  ;;  %v1534_v56 = vadd.f32 %v1533_v53, %v1532_v50  ;;  %v1535_v57 = vpop.f32.mrb[18].mxu1 }
 0x11a   :  { %v1077_v55 = vadd.f32 %v1494_v51, %v1012_v3  ;;  %v1497_v58 = vadd.f32 %v1496_v54, %v1495_v52  ;;  %v1536_v59 = vpop.f32.mrb[19].mxu1 }
 0x11b   :  { %v1537_v62 = vadd.f32 %v1536_v59, %v1535_v57 }
 0x11c   :  { %v1142_v60 = vadd.f32 %v1534_v56, %v1077_v55  ;;  %v1080_v61 = vadd.f32 %v1497_v58, %v1015_v5 }
 0x11e   :  { %v2127_v63 = vadd.f32 %v1537_v62, %v1080_v61  ;;  %v1498_v0 = vpop.f32.mrb[20].mxu0 }
 0x11f   :  { %v1499_v1 = vpop.f32.mrb[21].mxu0  ;;  %v1538_v2 = vpop.f32.mrb[20].mxu1 }
 0x120   :  { %v1500_v4 = vadd.f32 %v1499_v1, %v1498_v0  ;;  %v1501_v6 = vpop.f32.mrb[22].mxu0  ;;  %v1539_v7 = vpop.f32.mrb[21].mxu1 }
 0x121   :  { %v1502_v8 = vpop.f32.mrb[23].mxu0  ;;  %v1540_v10 = vadd.f32 %v1539_v7, %v1538_v2  ;;  %v1541_v11 = vpop.f32.mrb[22].mxu1 }
 0x122   :  { %v1085_v9 = vadd.f32 %v1500_v4, %v1020_v17  ;;  %v1503_v3 = vadd.f32 %v1502_v8, %v1501_v6  ;;  %v1542_v12 = vpop.f32.mrb[23].mxu1 }
 0x123   :  { %v1543_v15 = vadd.f32 %v1542_v12, %v1541_v11 }
 0x124   :  { %v2129_v13 = vadd.f32 %v1540_v10, %v1085_v9  ;;  %v1088_v14 = vadd.f32 %v1503_v3, %v1023_v19 }
 0x126   :  { %v2131_v5 = vadd.f32 %v1543_v15, %v1088_v14  ;;  %v1504_v16 = vpop.f32.mrb[24].mxu0 }
 0x127   :  { %v1505_v18 = vpop.f32.mrb[25].mxu0  ;;  %v1544_v20 = vpop.f32.mrb[24].mxu1 }
 0x128   :  { %v1506_v21 = vadd.f32 %v1505_v18, %v1504_v16  ;;  %v1507_v22 = vpop.f32.mrb[26].mxu0  ;;  %v1545_v23 = vpop.f32.mrb[25].mxu1 }
 0x129   :  { %v1508_v24 = vpop.f32.mrb[27].mxu0  ;;  %v1546_v26 = vadd.f32 %v1545_v23, %v1544_v20  ;;  %v1547_v17 = vpop.f32.mrb[26].mxu1 }
 0x12a   :  { %v1093_v25 = vadd.f32 %v1506_v21, %v1028_v31  ;;  %v1509_v27 = vadd.f32 %v1508_v24, %v1507_v22  ;;  %v1548_v28 = vpop.f32.mrb[27].mxu1 }
 0x12b   :  { %v1549_v32 = vadd.f32 %v1548_v28, %v1547_v17 }
 0x12c   :  { %v1158_v29 = vadd.f32 %v1546_v26, %v1093_v25  ;;  %v1096_v30 = vadd.f32 %v1509_v27, %v1031_v33 }
 0x12e   :  { %v1161_v34 = vadd.f32 %v1549_v32, %v1096_v30  ;;  %v1510_v19 = vpop.f32.mrb[28].mxu0 }
 0x12f   :  { %v1511_v35 = vpop.f32.mrb[29].mxu0  ;;  %v1550_v36 = vpop.f32.mrb[28].mxu1 }
 0x130   :  { %v1512_v37 = vadd.f32 %v1511_v35, %v1510_v19  ;;  %v1513_v38 = vpop.f32.mrb[30].mxu0  ;;  %v1551_v39 = vpop.f32.mrb[29].mxu1 }
 0x131   :  { %v1514_v40 = vpop.f32.mrb[31].mxu0  ;;  %v1552_v42 = vadd.f32 %v1551_v39, %v1550_v36  ;;  %v1553_v43 = vpop.f32.mrb[30].mxu1 }
 0x132   :  { %v1101_v41 = vadd.f32 %v1512_v37, %v1036_v44  ;;  %v1515_v45 = vadd.f32 %v1514_v40, %v1513_v38  ;;  %v1554_v31 = vpop.f32.mrb[31].mxu1 }
 0x133   :  { %v1555_v49 = vadd.f32 %v1554_v31, %v1553_v43 }
 0x134   :  { %v1166_v46 = vadd.f32 %v1552_v42, %v1101_v41  ;;  %v1104_v48 = vadd.f32 %v1515_v45, %v1039_v47 }
 0x136   :  { %v1169_v50 = vadd.f32 %v1555_v49, %v1104_v48 }
 0x137   :  { %v1572_v51 = vpop.f32.mrb[32].mxu0 }
 0x138   :  { %v1584_v33 = vpop.f32.mrb[32].mxu1  ;;  %v1573_v52 = vpop.f32.mrb[33].mxu0 }
 0x139   :  { %v1574_v53 = vadd.f32 %v1573_v52, %v1572_v51  ;;  %v1585_v54 = vpop.f32.mrb[33].mxu1  ;;  %v1575_v55 = vpop.f32.mrb[34].mxu0 }
 0x13a   :  { %v1586_v56 = vadd.f32 %v1585_v54, %v1584_v33  ;;  %v1587_v57 = vpop.f32.mrb[34].mxu1  ;;  %v1576_v58 = vpop.f32.mrb[35].mxu0 }
 0x13b   :  { %v1207_v59 = vadd.f32 %v1574_v53, %v1142_v60  ;;  %v1577_v61 = vadd.f32 %v1576_v58, %v1575_v55  ;;  %v1588_v44 = vpop.f32.mrb[35].mxu1 }
 0x13c   :  { %v1223_v62 = vadd.f32 %v1586_v56, %v1158_v29  ;;  %v1589_v0 = vadd.f32 %v1588_v44, %v1587_v57 }
 0x13d   :  { %1264 = vst [vmem:[%s2162_s2] sm:$0xff] %v1207_v59  ;;  %v1210_v47 = vadd.f32 %v1577_v61, %v2127_v63 }
 0x13e   :  { %1268 = vst [vmem:[%s2162_s2 + $0x20] sm:$0xff] %v1223_v62  ;;  %v1226_v1 = vadd.f32 %v1589_v0, %v1161_v34 }
 0x13f   :  { %1265 = vst [vmem:[%s2162_s2 + $0x8] sm:$0xff] %v1210_v47  ;;  %v1578_v60 = vpop.f32.mrb[36].mxu0 }
 0x140   :  { %1269 = vst [vmem:[%s2162_s2 + $0x28] sm:$0xff] %v1226_v1  ;;  %v1590_v2 = vpop.f32.mrb[36].mxu1  ;;  %v1579_v4 = vpop.f32.mrb[37].mxu0 }
 0x141   :  { %v1580_v6 = vadd.f32 %v1579_v4, %v1578_v60  ;;  %v1591_v7 = vpop.f32.mrb[37].mxu1  ;;  %v1581_v8 = vpop.f32.mrb[38].mxu0 }
 0x142   :  { %v1592_v63 = vadd.f32 %v1591_v7, %v1590_v2  ;;  %v1593_v9 = vpop.f32.mrb[38].mxu1  ;;  %v1582_v10 = vpop.f32.mrb[39].mxu0 }
 0x143   :  { %v1215_v11 = vadd.f32 %v1580_v6, %v2129_v13  ;;  %v1583_v3 = vadd.f32 %v1582_v10, %v1581_v8  ;;  %v1594_v12 = vpop.f32.mrb[39].mxu1 }
 0x144   :  { %v1231_v14 = vadd.f32 %v1592_v63, %v1166_v46  ;;  %v1595_v15 = vadd.f32 %v1594_v12, %v1593_v9 }
 0x145   :  { %1266 = vst [vmem:[%s2162_s2 + $0x10] sm:$0xff] %v1215_v11  ;;  %v1218_v16 = vadd.f32 %v1583_v3, %v2131_v5 }
 0x146   :  { %1270 = vst [vmem:[%s2162_s2 + $0x30] sm:$0xff] %v1231_v14  ;;  %v1234_v18 = vadd.f32 %v1595_v15, %v1169_v50 }
 0x147   :  { %1267 = vst [vmem:[%s2162_s2 + $0x18] sm:$0xff] %v1218_v16 }
 0x148   :  { %1271 = vst [vmem:[%s2162_s2 + $0x38] sm:$0xff] %v1234_v18 }

// kernel: _lambda_.51
= control target key start
LH: loop header
LB: loop body
LE: loop exit
PB: predicated region body
PF: predicated region fallthrough
CT: control target
= control target key end

     0   :  { %vm278_vm0 = vcmask 64512   ;;  %vm521_vm2 = vcmask 523264   ;;  %s2365_s2 = inlined_call_operand.vmem [shape: f32[2,64,8], index: 2, kind: input, shape index: {}]   ;;  %s2366_s0 = inlined_call_operand.vmem [shape: f32[2,15,32,8], index: 0, kind: input, shape index: {}]   ;;  %s2367_s1 = inlined_call_operand.vmem [shape: f32[2,32,8], index: 1, kind: input, shape index: {}]   ;;  %s2368_s6 = inlined_call_operand.vmem [shape: f32[2,32,8], index: 6, kind: output, shape index: {1}]   ;;  %s2369_s3 = inlined_call_operand.vmem [shape: f32[1,32,8], index: 3, kind: input, shape index: {}]   ;;  %s2370_s4 = inlined_call_operand.vmem [shape: f32[1,32,8], index: 4, kind: input, shape index: {}]   ;;  %s2371_s5 = inlined_call_operand.vmem [shape: f32[2,32,8], index: 5, kind: output, shape index: {0}]  }
   0x1   :  { %v262_v0 = vld [vmem:[%s2365_s2] sm:$0xff]  ;;  %v263_v1 = vld [vmem:[%s2365_s2 + $0x8] sm:$0xff]  ;;  %vm1695_vm1 = vmpackc.low %vm278_vm0, %vm278_vm0 }
   0x2   :  { %v1699_v3 = vpack.c.bf16 %v263_v1, %v262_v0  ;;  %v270_v4 = vld [vmem:[%s2365_s2 + $0x40] sm:$0xff]  ;;  %v271_v5 = vld [vmem:[%s2365_s2 + $0x48] sm:$0xff]  ;;  %v264_v6 = vld [vmem:[%s2365_s2 + $0x10] sm:$0xff] }
   0x3   :  { %v1710_v7 = vpack.c.bf16 %v271_v5, %v270_v4  ;;  %v265_v8 = vld [vmem:[%s2365_s2 + $0x18] sm:$0xff]  ;;  %v272_v9 = vld [vmem:[%s2365_s2 + $0x50] sm:$0xff]  ;;  %v266_v13 = vld [vmem:[%s2365_s2 + $0x20] sm:$0xff] }
   0x4   :  { %v273_v10 = vld [vmem:[%s2365_s2 + $0x58] sm:$0xff]  ;;  %1362 = vmatprep.subr.msk.bf16.mxu0 %vm1695_vm1, %v1699_v3  ;;  %v1724_v11 = vpack.c.bf16 %v265_v8, %v264_v6  ;;  %v267_v14 = vld [vmem:[%s2365_s2 + $0x28] sm:$0xff]  ;;  %v274_v15 = vld [vmem:[%s2365_s2 + $0x60] sm:$0xff] }
   0x5   :  { %v1726_v12 = vpack.c.bf16 %v273_v10, %v272_v9  ;;  %1365 = vmatpush3.bf16.xpose.msk.msra.mxu0 %vm1695_vm1, %v1699_v3  ;;  %1386 = vmatprep.subr.msk.bf16.mxu1 %vm1695_vm1, %v1710_v7  ;;  %v275_v16 = vld [vmem:[%s2365_s2 + $0x68] sm:$0xff]  ;;  %v30_v17 = vld [vmem:[%s2366_s0 + $0x40] sm:$0xff]  ;;  %v1758_v18 = vpack.c.bf16 %v267_v14, %v266_v13  ;;  %v268_v23 = vld [vmem:[%s2365_s2 + $0x30] sm:$0xff] }
   0x6   :  { %1389 = vmatpush3.bf16.xpose.msk.msra.mxu1 %vm1695_vm1, %v1710_v7  ;;  %1368 = vmatprep.subr.msk.bf16.mxu0 %vm1695_vm1, %v1724_v11  ;;  %v1760_v19 = vpack.c.bf16 %v275_v16, %v274_v15  ;;  %v54_v20 = vld [vmem:[%s2366_s0 + $0x120] sm:$0xff]  ;;  %v269_v24 = vld [vmem:[%s2365_s2 + $0x38] sm:$0xff]  ;;  %v276_v25 = vld [vmem:[%s2365_s2 + $0x70] sm:$0xff] }
   0x7   :  { %1392 = vmatprep.subr.msk.bf16.mxu1 %vm1695_vm1, %v1726_v12  ;;  %v126_v21 = vadd.f32 %v54_v20, %v30_v17  ;;  %v277_v26 = vld [vmem:[%s2365_s2 + $0x78] sm:$0xff]  ;;  %v1789_v27 = vpack.c.bf16 %v269_v24, %v268_v23  ;;  %v31_v30 = vld [vmem:[%s2366_s0 + $0x48] sm:$0xff]  ;;  %v82_v32 = vld [vmem:[%s2366_s0 + $0x220] sm:$0xff] }
   0x8   :  { %v1791_v28 = vpack.c.bf16 %v277_v26, %v276_v25  ;;  %v55_v31 = vld [vmem:[%s2366_s0 + $0x128] sm:$0xff]  ;;  %v106_v35 = vld [vmem:[%s2366_s0 + $0x300] sm:$0xff]  ;;  %v32_v40 = vld [vmem:[%s2366_s0 + $0x50] sm:$0xff] }
   0x9   :  { %v1160_v22 = vmul.f32 -1.442695, %v126_v21  ;;  %v127_v34 = vadd.f32 %v55_v31, %v31_v30  ;;  %v83_v36 = vld [vmem:[%s2366_s0 + $0x228] sm:$0xff]  ;;  %v130_v38 = vadd.f32 %v106_v35, %v82_v32  ;;  %v56_v41 = vld [vmem:[%s2366_s0 + $0x130] sm:$0xff]  ;;  %v33_v46 = vld [vmem:[%s2366_s0 + $0x58] sm:$0xff] }
   0xa   :  { %v107_v37 = vld [vmem:[%s2366_s0 + $0x308] sm:$0xff]  ;;  %v84_v42 = vld [vmem:[%s2366_s0 + $0x230] sm:$0xff]  ;;  %v128_v44 = vadd.f32 %v56_v41, %v32_v40  ;;  %v57_v47 = vld [vmem:[%s2366_s0 + $0x138] sm:$0xff] }
   0xb   :  { %1440 = vpow2.f32 %v1160_v22  ;;  %v131_v39 = vadd.f32 %v107_v37, %v83_v36  ;;  %v1161_v43 = vmul.f32 -1.442695, %v127_v34  ;;  %v108_v45 = vld [vmem:[%s2366_s0 + $0x310] sm:$0xff]  ;;  %v1164_v48 = vmul.f32 -1.442695, %v130_v38  ;;  %v85_v52 = vld [vmem:[%s2366_s0 + $0x238] sm:$0xff] }
   0xc   :  { %v132_v50 = vadd.f32 %v108_v45, %v84_v42  ;;  %v129_v51 = vadd.f32 %v57_v47, %v33_v46  ;;  %v109_v53 = vld [vmem:[%s2366_s0 + $0x318] sm:$0xff]  ;;  %v1162_v54 = vmul.f32 -1.442695, %v128_v44 }
   0xd   :  { %1371 = vmatpush3.bf16.xpose.msk.msra.mxu0 %vm1695_vm1, %v1724_v11  ;;  %v1165_v49 = vmul.f32 -1.442695, %v131_v39  ;;  %v133_v55 = vadd.f32 %v109_v53, %v85_v52 }
   0xe   :  { %1395 = vmatpush3.bf16.xpose.msk.msra.mxu1 %vm1695_vm1, %v1726_v12  ;;  %1374 = vmatprep.subr.msk.bf16.mxu0 %vm1695_vm1, %v1758_v18  ;;  %v1166_v56 = vmul.f32 -1.442695, %v132_v50  ;;  %v1163_v57 = vmul.f32 -1.442695, %v129_v51 }
   0xf   :  { %1398 = vmatprep.subr.msk.bf16.mxu1 %vm1695_vm1, %v1760_v19  ;;  %v1167_v58 = vmul.f32 -1.442695, %v133_v55 }
  0x15   :  { %1377 = vmatpush3.bf16.xpose.msk.msra.mxu0 %vm1695_vm1, %v1758_v18  ;;  %v1441_v29 = vpop.eup %1440 }
  0x16   :  { %1401 = vmatpush3.bf16.xpose.msk.msra.mxu1 %vm1695_vm1, %v1760_v19  ;;  %1380 = vmatprep.subr.msk.bf16.mxu0 %vm1695_vm1, %v1789_v27  ;;  %v158_v33 = vadd.f32 1.0, %v1441_v29 }
  0x17   :  { %1404 = vmatprep.subr.msk.bf16.mxu1 %vm1695_vm1, %v1791_v28 }
  0x18   :  { %1442 = vrcp.f32 %v158_v33 }
  0x19   :  { %1444 = vpow2.f32 %v1161_v43 }
  0x1a   :  { %1446 = vpow2.f32 %v1164_v48 }
  0x1b   :  { %1448 = vpow2.f32 %v1165_v49 }
  0x1c   :  { %1450 = vpow2.f32 %v1162_v54 }
  0x1d   :  { %1383 = vmatpush3.bf16.xpose.msk.msra.mxu0 %vm1695_vm1, %v1789_v27  ;;  %1452 = vpow2.f32 %v1166_v56 }
  0x1e   :  { %1407 = vmatpush3.bf16.xpose.msk.msra.mxu1 %vm1695_vm1, %v1791_v28  ;;  %1409 = vmatprep.subr.bf16.mxu0 %v1699_v3  ;;  %1454 = vpow2.f32 %v1163_v57 }
  0x1f   :  { %1425 = vmatprep.subr.bf16.mxu1 %v1710_v7  ;;  %1456 = vpow2.f32 %v1167_v58 }
  0x22   :  { %v1443_v59 = vpop.eup %1442 }
  0x23   :  { %1288 = vmatprep.mubr.msk.f32.mxu0 %vm278_vm0, %v1443_v59  ;;  %v1445_v60 = vpop.eup %1444 }
  0x24   :  { %v1447_v61 = vpop.eup %1446  ;;  %v159_v62 = vadd.f32 1.0, %v1445_v60 }
  0x25   :  { %v1449_v63 = vpop.eup %1448  ;;  %v162_v0 = vadd.f32 1.0, %v1447_v61 }
  0x26   :  { %v1451_v1 = vpop.eup %1450  ;;  %1458 = vrcp.f32 %v159_v62  ;;  %v163_v2 = vadd.f32 1.0, %v1449_v63 }
  0x27   :  { %v1453_v4 = vpop.eup %1452  ;;  %1460 = vrcp.f32 %v162_v0  ;;  %v160_v5 = vadd.f32 1.0, %v1451_v1 }
  0x28   :  { %v1455_v6 = vpop.eup %1454  ;;  %1462 = vrcp.f32 %v163_v2  ;;  %v164_v8 = vadd.f32 1.0, %v1453_v4 }
  0x29   :  { %v1457_v9 = vpop.eup %1456  ;;  %1464 = vrcp.f32 %v160_v5  ;;  %v161_v10 = vadd.f32 1.0, %v1455_v6 }
  0x2a   :  { %1466 = vrcp.f32 %v164_v8  ;;  %v165_v13 = vadd.f32 1.0, %v1457_v9 }
  0x2b   :  { %1468 = vrcp.f32 %v161_v10 }
  0x2c   :  { %1470 = vrcp.f32 %v165_v13 }
  0x30   :  { %v1459_v14 = vpop.eup %1458 }
  0x31   :  { %v1461_v15 = vpop.eup %1460  ;;  %1289 = vmatmul.mubr.msk.f32.vlgmr.msra.gmra.mrb[0].mxu0 %vm278_vm0, %v1459_v14 }
  0x32   :  { %v1463_v16 = vpop.eup %1462  ;;  %1310 = vmatprep.mubr.msk.f32.mxu1 %vm278_vm0, %v1461_v15  ;;  %1411 = vmatpush3.bf16.msra.mxu0 %v1699_v3 }
  0x33   :  { %v1465_v17 = vpop.eup %1464  ;;  %1311 = vmatmul.mubr.msk.f32.vlgmr.msra.gmra.mrb[0].mxu1 %vm278_vm0, %v1463_v16  ;;  %1413 = vmatprep.subr.bf16.mxu0 %v1724_v11 }
  0x34   :  { %v1467_v20 = vpop.eup %1466  ;;  %1291 = vmatprep.mubr.msk.f32.mxu0 %vm278_vm0, %v1465_v17  ;;  %1427 = vmatpush3.bf16.msra.mxu1 %v1710_v7 }
  0x35   :  { %v1469_v21 = vpop.eup %1468  ;;  %1313 = vmatprep.mubr.msk.f32.mxu1 %vm278_vm0, %v1467_v20  ;;  %1429 = vmatprep.subr.bf16.mxu1 %v1726_v12 }
  0x36   :  { %v1471_v22 = vpop.eup %1470  ;;  %1292 = vmatmul.mubr.msk.f32.gmra.mrb[2].mxu0 %vm278_vm0, %v1469_v21 }
  0x37   :  { %1314 = vmatmul.mubr.msk.f32.gmra.mrb[2].mxu1 %vm278_vm0, %v1471_v22  ;;  %1415 = vmatpush3.bf16.msra.mxu0 %v1724_v11 }
  0x38   :  { %1417 = vmatprep.subr.bf16.mxu0 %v1758_v18  ;;  %1431 = vmatpush3.bf16.msra.mxu1 %v1726_v12 }
  0x39   :  { %1433 = vmatprep.subr.bf16.mxu1 %v1760_v19 }
  0x3b   :  { %1419 = vmatpush3.bf16.msra.mxu0 %v1758_v18 }
  0x3c   :  { %1421 = vmatprep.subr.bf16.mxu0 %v1789_v27  ;;  %1435 = vmatpush3.bf16.msra.mxu1 %v1760_v19 }
  0x3d   :  { %1437 = vmatprep.subr.bf16.mxu1 %v1791_v28 }
  0x3f   :  { %1423 = vmatpush3.bf16.msra.mxu0 %v1789_v27 }
  0x40   :  { %1439 = vmatpush3.bf16.msra.mxu1 %v1791_v28 }
 0x104   :  { %v1290_v3 = vpop.f32.mrb[0].mxu0 }
 0x105   :  { %v381_v7 = vpop.f32.mrb[1].mxu0  ;;  %v525_v11 = vsel %vm521_vm2, %v1290_v3, -inf }
 0x106   :  { %526 = vmax.xlane.f32.xlu1 %v525_v11  ;;  %v1312_v12 = vpop.f32.mrb[0].mxu1  ;;  %v522_v23 = vsel %vm521_vm2, %v381_v7, -inf }
 0x107   :  { %523 = vmax.xlane.f32.xlu0 %v522_v23  ;;  %v502_v18 = vpop.f32.mrb[1].mxu1  ;;  %v537_v24 = vsel %vm521_vm2, %v1312_v12, -inf }
 0x108   :  { %v534_v19 = vsel %vm521_vm2, %v502_v18, -inf }
 0x109   :  { %v1293_v25 = vpop.f32.mrb[2].mxu0 }
 0x10a   :  { %538 = vmax.xlane.f32.xlu1 %v537_v24  ;;  %v1315_v26 = vpop.f32.mrb[2].mxu1  ;;  %v391_v27 = vpop.f32.mrb[3].mxu0  ;;  %v531_v32 = vsel %vm521_vm2, %v1293_v25, -inf }
 0x10b   :  { %535 = vmax.xlane.f32.xlu0 %v534_v19  ;;  %v512_v28 = vpop.f32.mrb[3].mxu1  ;;  %v528_v30 = vsel %vm521_vm2, %v391_v27, -inf  ;;  %v543_v31 = vsel %vm521_vm2, %v1315_v26, -inf }
 0x10c   :  { %v540_v29 = vsel %vm521_vm2, %v512_v28, -inf }
 0x10e   :  { %541 = vmax.xlane.f32.xlu1 %v540_v29 }
 0x10f   :  { %529 = vmax.xlane.f32.xlu0 %v528_v30 }
 0x112   :  { %544 = vmax.xlane.f32.xlu1 %v543_v31 }
 0x113   :  { %532 = vmax.xlane.f32.xlu0 %v531_v32 }
 0x193   :  { %v527_v33 = vpop.xlane.xlu1 %526 }
 0x194   :  { %v547_v34 = vsub.f32 %v1290_v3, %v527_v33  ;;  %v524_v35 = vpop.xlane.xlu0 %523  ;;  %v805_v33 = vld [vmem:[%s2367_s1 + $0x8] sm:$0xff] }
 0x195   :  { %v546_v36 = vsub.f32 %v381_v7, %v524_v35 }
 0x196   :  { %v556_v37 = vmul.f32 1.442695, %v547_v34  ;;  %v804_v34 = vld [vmem:[%s2367_s1] sm:$0xff] }
 0x197   :  { %v554_v38 = vmul.f32 1.442695, %v546_v36  ;;  %v539_v39 = vpop.xlane.xlu1 %538 }
 0x198   :  { %1472 = vpow2.f32 %v556_v37  ;;  %v551_v40 = vsub.f32 %v1312_v12, %v539_v39  ;;  %v536_v41 = vpop.xlane.xlu0 %535 }
 0x199   :  { %v550_v42 = vsub.f32 %v502_v18, %v536_v41  ;;  %1474 = vpow2.f32 %v554_v38  ;;  %v809_v38 = vld [vmem:[%s2367_s1 + $0x28] sm:$0xff] }
 0x19a   :  { %v564_v43 = vmul.f32 1.442695, %v551_v40  ;;  %v808_v40 = vld [vmem:[%s2367_s1 + $0x20] sm:$0xff] }
 0x19b   :  { %v562_v44 = vmul.f32 1.442695, %v550_v42  ;;  %v542_v45 = vpop.xlane.xlu1 %541 }
 0x19c   :  { %1476 = vpow2.f32 %v564_v43  ;;  %v552_v46 = vsub.f32 %v512_v28, %v542_v45  ;;  %v530_v47 = vpop.xlane.xlu0 %529 }
 0x19d   :  { %v548_v48 = vsub.f32 %v391_v27, %v530_v47  ;;  %1478 = vpow2.f32 %v562_v44 }
 0x19e   :  { %v566_v49 = vmul.f32 1.442695, %v552_v46 }
 0x19f   :  { %v558_v50 = vmul.f32 1.442695, %v548_v48  ;;  %v545_v51 = vpop.xlane.xlu1 %544  ;;  %v806_v48 = vld [vmem:[%s2367_s1 + $0x10] sm:$0xff] }
 0x1a0   :  { %v553_v52 = vsub.f32 %v1315_v26, %v545_v51  ;;  %v533_v53 = vpop.xlane.xlu0 %532 }
 0x1a1   :  { %1480 = vpow2.f32 %v558_v50  ;;  %v549_v54 = vsub.f32 %v1293_v25, %v533_v53 }
 0x1a2   :  { %v1473_v55 = vpop.eup %1472  ;;  %1482 = vpow2.f32 %v566_v49  ;;  %v568_v56 = vmul.f32 1.442695, %v553_v52  ;;  %v807_v52 = vld [vmem:[%s2367_s1 + $0x18] sm:$0xff] }
 0x1a3   :  { %v560_v57 = vmul.f32 1.442695, %v549_v54  ;;  %v573_v58 = vsel %vm521_vm2, %v1473_v55, 0.0  ;;  %v1475_v59 = vpop.eup %1474  ;;  %v810_v54 = vld [vmem:[%s2367_s1 + $0x30] sm:$0xff] }
 0x1a4   :  { %574 = vadd.xlane.f32.xlu0 %v573_v58  ;;  %v570_v62 = vsel %vm521_vm2, %v1475_v59, 0.0 }
 0x1a5   :  { %1484 = vpow2.f32 %v560_v57 }
 0x1a6   :  { %v1477_v60 = vpop.eup %1476  ;;  %1486 = vpow2.f32 %v568_v56  ;;  %v811_v56 = vld [vmem:[%s2367_s1 + $0x38] sm:$0xff] }
 0x1a7   :  { %v585_v61 = vsel %vm521_vm2, %v1477_v60, 0.0  ;;  %v1479_v63 = vpop.eup %1478 }
 0x1a8   :  { %586 = vadd.xlane.f32.xlu1 %v585_v61  ;;  %571 = vadd.xlane.f32.xlu0 %v570_v62  ;;  %v582_v1 = vsel %vm521_vm2, %v1479_v63, 0.0 }
 0x1ab   :  { %v1481_v0 = vpop.eup %1480 }
 0x1ac   :  { %v1483_v2 = vpop.eup %1482  ;;  %583 = vadd.xlane.f32.xlu1 %v582_v1  ;;  %v576_v4 = vsel %vm521_vm2, %v1481_v0, 0.0 }
 0x1ad   :  { %577 = vadd.xlane.f32.xlu0 %v576_v4  ;;  %v588_v6 = vsel %vm521_vm2, %v1483_v2, 0.0 }
 0x1af   :  { %v1485_v5 = vpop.eup %1484 }
 0x1b0   :  { %v1487_v8 = vpop.eup %1486  ;;  %589 = vadd.xlane.f32.xlu1 %v588_v6  ;;  %v579_v9 = vsel %vm521_vm2, %v1485_v5, 0.0 }
 0x1b1   :  { %580 = vadd.xlane.f32.xlu0 %v579_v9  ;;  %v591_v10 = vsel %vm521_vm2, %v1487_v8, 0.0 }
 0x1b4   :  { %592 = vadd.xlane.f32.xlu1 %v591_v10 }
 0x231   :  { %v575_v13 = vpop.xlane.xlu0 %574 }
 0x232   :  { %1488 = vrcp.f32 %v575_v13 }
 0x235   :  { %v587_v14 = vpop.xlane.xlu1 %586  ;;  %v572_v15 = vpop.xlane.xlu0 %571 }
 0x236   :  { %1490 = vrcp.f32 %v572_v15 }
 0x237   :  { %1492 = vrcp.f32 %v587_v14 }
 0x239   :  { %v584_v16 = vpop.xlane.xlu1 %583 }
 0x23a   :  { %1494 = vrcp.f32 %v584_v16  ;;  %v578_v17 = vpop.xlane.xlu0 %577 }
 0x23b   :  { %1496 = vrcp.f32 %v578_v17 }
 0x23c   :  { %v1489_v22 = vpop.eup %1488 }
 0x23d   :  { %v590_v20 = vpop.xlane.xlu1 %589  ;;  %v603_v23 = vmul.f32 %v1489_v22, %v1473_v55 }
 0x23e   :  { %1498 = vrcp.f32 %v590_v20  ;;  %v581_v21 = vpop.xlane.xlu0 %580 }
 0x23f   :  { %1500 = vrcp.f32 %v581_v21 }
 0x240   :  { %v1491_v3 = vpop.eup %1490 }
 0x241   :  { %v593_v7 = vpop.xlane.xlu1 %592  ;;  %v602_v11 = vmul.f32 %v1491_v3, %v1475_v59  ;;  %v1493_v12 = vpop.eup %1492 }
 0x242   :  { %1502 = vrcp.f32 %v593_v7  ;;  %v607_v25 = vmul.f32 %v1493_v12, %v1477_v60 }
 0x243   :  { %1332 = vmatprep.mubr.msk.f32.mxu0 %vm521_vm2, %v602_v11 }
 0x244   :  { %v1495_v18 = vpop.eup %1494  ;;  %1333 = vmatmul.mubr.msk.f32.vlgmr.msra.gmra.mrb[4].mxu0 %vm521_vm2, %v603_v23 }
 0x245   :  { %v1497_v24 = vpop.eup %1496  ;;  %v606_v19 = vmul.f32 %v1495_v18, %v1479_v63 }
 0x246   :  { %v604_v26 = vmul.f32 %v1497_v24, %v1481_v0 }
 0x247   :  { %1354 = vmatprep.mubr.msk.f32.mxu1 %vm521_vm2, %v606_v19 }
 0x248   :  { %v1499_v27 = vpop.eup %1498  ;;  %1335 = vmatprep.mubr.msk.f32.mxu0 %vm521_vm2, %v604_v26  ;;  %1355 = vmatmul.mubr.msk.f32.vlgmr.msra.gmra.mrb[4].mxu1 %vm521_vm2, %v607_v25 }
 0x249   :  { %v1501_v28 = vpop.eup %1500  ;;  %v608_v29 = vmul.f32 %v1499_v27, %v1483_v2 }
 0x24a   :  { %v605_v30 = vmul.f32 %v1501_v28, %v1485_v5 }
 0x24b   :  { %1357 = vmatprep.mubr.msk.f32.mxu1 %vm521_vm2, %v608_v29 }
 0x24c   :  { %v1503_v31 = vpop.eup %1502  ;;  %1336 = vmatmul.mubr.msk.f32.gmra.mrb[6].mxu0 %vm521_vm2, %v605_v30 }
 0x24d   :  { %v609_v32 = vmul.f32 %v1503_v31, %v1487_v8 }
 0x24f   :  { %1358 = vmatmul.mubr.msk.f32.gmra.mrb[6].mxu1 %vm521_vm2, %v609_v32 }
 0x317   :  { %v1334_v35 = vpop.f32.mrb[4].mxu0 }
 0x318   :  { %v1907_v36 = vadd.f32 %v1334_v35, %v805_v33  ;;  %v688_v37 = vpop.f32.mrb[5].mxu0 }
 0x319   :  { %v1912_v39 = vadd.f32 %v804_v34, %v688_v37 }
 0x31a   :  { %v823_v42 = vsel %vm278_vm0, %v1907_v36, 0.0 }
 0x31b   :  { %v1356_v41 = vpop.f32.mrb[4].mxu1  ;;  %824 = vadd.xlane.f32.xlu1 %v823_v42  ;;  %v820_v45 = vsel %vm278_vm0, %v1912_v39, 0.0 }
 0x31c   :  { %v817_v43 = vadd.f32 %v1356_v41, %v809_v38  ;;  %v785_v44 = vpop.f32.mrb[5].mxu1  ;;  %821 = vadd.xlane.f32.xlu0 %v820_v45 }
 0x31d   :  { %v816_v46 = vadd.f32 %v808_v40, %v785_v44 }
 0x31e   :  { %v835_v47 = vsel %vm278_vm0, %v817_v43, 0.0 }
 0x31f   :  { %v1337_v49 = vpop.f32.mrb[6].mxu0  ;;  %v832_v50 = vsel %vm278_vm0, %v816_v46, 0.0  ;;  %836 = vadd.xlane.f32.xlu1 %v835_v47 }
 0x320   :  { %v698_v51 = vpop.f32.mrb[7].mxu0  ;;  %833 = vadd.xlane.f32.xlu0 %v832_v50  ;;  %v815_v59 = vadd.f32 %v1337_v49, %v807_v52 }
 0x321   :  { %v814_v53 = vadd.f32 %v806_v48, %v698_v51 }
 0x322   :  { %v1359_v55 = vpop.f32.mrb[6].mxu1  ;;  %v829_v63 = vsel %vm278_vm0, %v815_v59, 0.0 }
 0x323   :  { %v795_v57 = vpop.f32.mrb[7].mxu1  ;;  %v826_v58 = vsel %vm278_vm0, %v814_v53, 0.0  ;;  %v819_v61 = vadd.f32 %v1359_v55, %v811_v56  ;;  %v35_v55 = vld [vmem:[%s2366_s0 + $0x68] sm:$0xff] }
 0x324   :  { %v818_v60 = vadd.f32 %v810_v54, %v795_v57  ;;  %827 = vadd.xlane.f32.xlu0 %v826_v58  ;;  %v58_v54 = vld [vmem:[%s2366_s0 + $0x160] sm:$0xff]  ;;  %v59_v56 = vld [vmem:[%s2366_s0 + $0x168] sm:$0xff]  ;;  %v36_v57 = vld [vmem:[%s2366_s0 + $0x70] sm:$0xff] }
 0x325   :  { %v841_v0 = vsel %vm278_vm0, %v819_v61, 0.0  ;;  %v60_v58 = vld [vmem:[%s2366_s0 + $0x170] sm:$0xff] }
 0x326   :  { %v838_v62 = vsel %vm278_vm0, %v818_v60, 0.0 }
 0x327   :  { %839 = vadd.xlane.f32.xlu1 %v838_v62  ;;  %v86_v62 = vld [vmem:[%s2366_s0 + $0x240] sm:$0xff] }
 0x328   :  { %830 = vadd.xlane.f32.xlu0 %v829_v63  ;;  %v110_v63 = vld [vmem:[%s2366_s0 + $0x340] sm:$0xff] }
 0x32b   :  { %842 = vadd.xlane.f32.xlu1 %v841_v0  ;;  %v977_v0 = vadd.f32 %v59_v56, %v35_v55  ;;  %v96_v56 = vld [vmem:[%s2366_s0 + $0x290] sm:$0xff] }
 0x3a8   :  { %v825_v1 = vpop.xlane.xlu1 %824 }
 0x3a9   :  { %v822_v2 = vpop.xlane.xlu0 %821 }
 0x3aa   :  { %v844_v8 = vadd.f32 %v825_v1, %v822_v2  ;;  %v978_v1 = vadd.f32 %v60_v58, %v36_v57  ;;  %v116_v57 = vld [vmem:[%s2366_s0 + $0x370] sm:$0xff] }
 0x3ac   :  { %v837_v5 = vpop.xlane.xlu1 %836 }
 0x3ad   :  { %v834_v4 = vpop.xlane.xlu0 %833 }
 0x3ae   :  { %v853_v10 = vadd.f32 %v837_v5, %v834_v4  ;;  %v980_v5 = vadd.f32 %v110_v63, %v86_v62 }
 0x3b1   :  { %v828_v6 = vpop.xlane.xlu0 %827 }
 0x3b2   :  { %v845_v13 = vadd.f32 %v844_v8, %v828_v6  ;;  %v1209_v6 = vmul.f32 -1.442695, %v977_v0  ;;  %v1210_v8 = vmul.f32 -1.442695, %v978_v1 }
 0x3b4   :  { %v840_v9 = vpop.xlane.xlu1 %839 }
 0x3b5   :  { %v831_v14 = vpop.xlane.xlu0 %830  ;;  %v854_v15 = vadd.f32 %v853_v10, %v840_v9  ;;  %v1212_v10 = vmul.f32 -1.442695, %v980_v5 }
 0x3b6   :  { %v846_v16 = vadd.f32 %v845_v13, %v831_v14  ;;  %v87_v13 = vld [vmem:[%s2366_s0 + $0x248] sm:$0xff] }
 0x3b7   :  { %v111_v14 = vld [vmem:[%s2366_s0 + $0x348] sm:$0xff] }
 0x3b8   :  { %v843_v17 = vpop.xlane.xlu1 %842  ;;  %v847_v20 = vrot.slane %v846_v16, 4 }
 0x3b9   :  { %v855_v21 = vadd.f32 %v854_v15, %v843_v17  ;;  %v88_v15 = vld [vmem:[%s2366_s0 + $0x250] sm:$0xff]  ;;  %v89_v17 = vld [vmem:[%s2366_s0 + $0x258] sm:$0xff] }
 0x3ba   :  { %v848_v22 = vadd.f32 %v847_v20, %v846_v16  ;;  %v112_v16 = vld [vmem:[%s2366_s0 + $0x350] sm:$0xff]  ;;  %v113_v20 = vld [vmem:[%s2366_s0 + $0x358] sm:$0xff] }
 0x3bb   :  { %v856_v3 = vrot.slane %v855_v21, 4 }
 0x3bc   :  { %v849_v7 = vrot.slane %v848_v22, 2 }
 0x3bd   :  { %v857_v11 = vadd.f32 %v856_v3, %v855_v21  ;;  %v981_v21 = vadd.f32 %v111_v14, %v87_v13  ;;  %v62_v3 = vld [vmem:[%s2366_s0 + $0x180] sm:$0xff] }
 0x3be   :  { %v850_v12 = vadd.f32 %v849_v7, %v848_v22  ;;  %v42_v22 = vld [vmem:[%s2366_s0 + $0xa0] sm:$0xff]  ;;  %v982_v7 = vadd.f32 %v112_v16, %v88_v15 }
 0x3bf   :  { %v858_v23 = vrot.slane %v857_v11, 2 }
 0x3c0   :  { %v851_v18 = vrot.slane %v850_v12, 1 }
 0x3c1   :  { %v859_v24 = vadd.f32 %v858_v23, %v857_v11  ;;  %v43_v11 = vld [vmem:[%s2366_s0 + $0xa8] sm:$0xff]  ;;  %v983_v23 = vadd.f32 %v113_v20, %v89_v17 }
 0x3c2   :  { %v852_v19 = vadd.f32 %v851_v18, %v850_v12  ;;  %v63_v12 = vld [vmem:[%s2366_s0 + $0x188] sm:$0xff]  ;;  %v44_v18 = vld [vmem:[%s2366_s0 + $0xb0] sm:$0xff] }
 0x3c3   :  { %v860_v25 = vrot.slane %v859_v24, 1 }
 0x3c4   :  { %v862_v26 = vmul.f32 0.00390625, %v852_v19 }
 0x3c5   :  { %v861_v27 = vadd.f32 %v860_v25, %v859_v24  ;;  %v64_v24 = vld [vmem:[%s2366_s0 + $0x190] sm:$0xff]  ;;  %v45_v25 = vld [vmem:[%s2366_s0 + $0xb8] sm:$0xff] }
 0x3c6   :  { %v1940_v29 = vsub.f32 %v1907_v36, %v862_v26  ;;  %v1943_v30 = vsub.f32 %v1912_v39, %v862_v26  ;;  %v1955_v37 = vsub.f32 %v814_v53, %v862_v26  ;;  %v34_v53 = vld [vmem:[%s2366_s0 + $0x60] sm:$0xff] }
 0x3c7   :  { %v863_v28 = vmul.f32 0.00390625, %v861_v27  ;;  %v1213_v27 = vmul.f32 -1.442695, %v981_v21 }
 0x3c8   :  { %v873_v31 = vmul.f32 %v1940_v29, %v1940_v29  ;;  %v872_v32 = vmul.f32 %v1943_v30, %v1943_v30  ;;  %v874_v44 = vmul.f32 %v1955_v37, %v1955_v37 }
 0x3c9   :  { %v1949_v33 = vsub.f32 %v817_v43, %v863_v28  ;;  %v1951_v34 = vsub.f32 %v816_v46, %v863_v28  ;;  %v1953_v35 = vsub.f32 %v818_v60, %v863_v28  ;;  %v1969_v45 = vsub.f32 %v819_v61, %v863_v28  ;;  %v37_v60 = vld [vmem:[%s2366_s0 + $0x78] sm:$0xff] }
 0x3ca   :  { %v883_v36 = vsel %vm278_vm0, %v873_v31, 0.0  ;;  %v880_v38 = vsel %vm278_vm0, %v872_v32, 0.0  ;;  %v1971_v46 = vsub.f32 %v815_v59, %v862_v26  ;;  %v886_v48 = vsel %vm278_vm0, %v874_v44, 0.0  ;;  %v61_v61 = vld [vmem:[%s2366_s0 + $0x178] sm:$0xff]  ;;  %v94_v31 = vld [vmem:[%s2366_s0 + $0x280] sm:$0xff] }
 0x3cb   :  { %v877_v39 = vmul.f32 %v1949_v33, %v1949_v33  ;;  %v876_v40 = vmul.f32 %v1951_v34, %v1951_v34  ;;  %884 = vadd.xlane.f32.xlu1 %v883_v36  ;;  %881 = vadd.xlane.f32.xlu0 %v880_v38  ;;  %v878_v43 = vmul.f32 %v1953_v35, %v1953_v35  ;;  %v65_v26 = vld [vmem:[%s2366_s0 + $0x198] sm:$0xff]  ;;  %v114_v32 = vld [vmem:[%s2366_s0 + $0x360] sm:$0xff]  ;;  %v1214_v36 = vmul.f32 -1.442695, %v982_v7 }
 0x3cc   :  { %v879_v49 = vmul.f32 %v1969_v45, %v1969_v45  ;;  %v875_v50 = vmul.f32 %v1971_v46, %v1971_v46  ;;  %v976_v59 = vadd.f32 %v58_v54, %v34_v53  ;;  %v979_v2 = vadd.f32 %v61_v61, %v37_v60  ;;  %v115_v53 = vld [vmem:[%s2366_s0 + $0x368] sm:$0xff]  ;;  %v97_v60 = vld [vmem:[%s2366_s0 + $0x298] sm:$0xff] }
 0x3cd   :  { %v895_v41 = vsel %vm278_vm0, %v877_v39, 0.0  ;;  %v892_v42 = vsel %vm278_vm0, %v876_v40, 0.0  ;;  %v898_v47 = vsel %vm278_vm0, %v878_v43, 0.0  ;;  %v1032_v28 = vadd.f32 %v62_v3, %v42_v22  ;;  %v117_v61 = vld [vmem:[%s2366_s0 + $0x378] sm:$0xff]  ;;  %v38_v22 = vld [vmem:[%s2366_s0 + $0x80] sm:$0xff] }
 0x3ce   :  { %v901_v51 = vsel %vm278_vm0, %v879_v49, 0.0  ;;  %v889_v52 = vsel %vm278_vm0, %v875_v50, 0.0  ;;  %v1208_v4 = vmul.f32 -1.442695, %v976_v59  ;;  %v1211_v9 = vmul.f32 -1.442695, %v979_v2 }
 0x3cf   :  { %896 = vadd.xlane.f32.xlu1 %v895_v41  ;;  %893 = vadd.xlane.f32.xlu0 %v892_v42  ;;  %v1033_v38 = vadd.f32 %v63_v12, %v43_v11  ;;  %v1215_v40 = vmul.f32 -1.442695, %v983_v23  ;;  %v1034_v41 = vadd.f32 %v64_v24, %v44_v18  ;;  %v1035_v44 = vadd.f32 %v65_v26, %v45_v25  ;;  %v66_v3 = vld [vmem:[%s2366_s0 + $0x1a0] sm:$0xff]  ;;  %v39_v23 = vld [vmem:[%s2366_s0 + $0x88] sm:$0xff] }
 0x3d0   :  { %1504 = vpow2.f32 %v1208_v4  ;;  %v1036_v49 = vadd.f32 %v114_v32, %v94_v31  ;;  %v1040_v50 = vadd.f32 1.0, %v1032_v28  ;;  %v1038_v4 = vadd.f32 %v116_v57, %v96_v56  ;;  %v67_v18 = vld [vmem:[%s2366_s0 + $0x1a8] sm:$0xff] }
 0x3d1   :  { %1506 = vpow2.f32 %v1209_v6  ;;  %v1041_v55 = vadd.f32 1.0, %v1033_v38  ;;  %v1042_v59 = vadd.f32 1.0, %v1034_v41  ;;  %v1043_v63 = vadd.f32 1.0, %v1035_v44  ;;  %v68_v41 = vld [vmem:[%s2366_s0 + $0x1b0] sm:$0xff]  ;;  %v41_v44 = vld [vmem:[%s2366_s0 + $0x98] sm:$0xff] }
 0x3d2   :  { %1508 = vpow2.f32 %v1210_v8  ;;  %v1044_v1 = vadd.f32 1.0, %v1036_v49  ;;  %v1216_v2 = vmul.f32 -1.442695, %v1040_v50  ;;  %v1039_v6 = vadd.f32 %v117_v61, %v97_v60  ;;  %v90_v50 = vld [vmem:[%s2366_s0 + $0x260] sm:$0xff] }
 0x3d3   :  { %899 = vadd.xlane.f32.xlu1 %v898_v47  ;;  %887 = vadd.xlane.f32.xlu0 %v886_v48  ;;  %1510 = vpow2.f32 %v1211_v9  ;;  %v1217_v5 = vmul.f32 -1.442695, %v1041_v55  ;;  %v1218_v8 = vmul.f32 -1.442695, %v1042_v59  ;;  %v1219_v9 = vmul.f32 -1.442695, %v1043_v63 }
 0x3d4   :  { %1512 = vpow2.f32 %v1212_v10  ;;  %v1220_v13 = vmul.f32 -1.442695, %v1044_v1  ;;  %v1046_v14 = vadd.f32 1.0, %v1038_v4  ;;  %v1047_v16 = vadd.f32 1.0, %v1039_v6  ;;  %v119_v63 = vld [vmem:[%s2366_s0 + $0x388] sm:$0xff]  ;;  %v92_v1 = vld [vmem:[%s2366_s0 + $0x270] sm:$0xff] }
 0x3d5   :  { %1514 = vpow2.f32 %v1213_v27  ;;  %v1096_v28 = vadd.f32 %v66_v3, %v38_v22  ;;  %v1097_v32 = vadd.f32 %v67_v18, %v39_v23  ;;  %v121_v6 = vld [vmem:[%s2366_s0 + $0x398] sm:$0xff]  ;;  %v70_v3 = vld [vmem:[%s2366_s0 + $0x1c0] sm:$0xff]  ;;  %v72_v18 = vld [vmem:[%s2366_s0 + $0x1d0] sm:$0xff] }
 0x3d6   :  { %1516 = vpow2.f32 %v1214_v36  ;;  %v1223_v26 = vmul.f32 -1.442695, %v1047_v16 }
 0x3d7   :  { %902 = vadd.xlane.f32.xlu1 %v901_v51  ;;  %890 = vadd.xlane.f32.xlu0 %v889_v52  ;;  %v95_v52 = vld [vmem:[%s2366_s0 + $0x288] sm:$0xff]  ;;  %1518 = vpow2.f32 %v1215_v40  ;;  %v40_v40 = vld [vmem:[%s2366_s0 + $0x90] sm:$0xff] }
 0x3d8   :  { %v1037_v0 = vadd.f32 %v115_v53, %v95_v52  ;;  %v1098_v55 = vadd.f32 %v68_v41, %v40_v40  ;;  %v124_v40 = vld [vmem:[%s2366_s0 + $0x3b0] sm:$0xff] }
 0x3da   :  { %v1505_v19 = vpop.eup %1504  ;;  %v1045_v10 = vadd.f32 1.0, %v1037_v0 }
 0x3db   :  { %v1507_v39 = vpop.eup %1506  ;;  %v1008_v43 = vadd.f32 1.0, %v1505_v19  ;;  %v1222_v19 = vmul.f32 -1.442695, %v1046_v14 }
 0x3dc   :  { %v1509_v42 = vpop.eup %1508  ;;  %v1009_v48 = vadd.f32 1.0, %v1507_v39  ;;  %v1221_v11 = vmul.f32 -1.442695, %v1045_v10 }
 0x3dd   :  { %v1511_v47 = vpop.eup %1510  ;;  %v1010_v54 = vadd.f32 1.0, %v1509_v42  ;;  %1520 = vrcp.f32 %v1008_v43 }
 0x3de   :  { %v1513_v51 = vpop.eup %1512  ;;  %v1011_v58 = vadd.f32 1.0, %v1511_v47  ;;  %1522 = vrcp.f32 %v1009_v48  ;;  %v69_v47 = vld [vmem:[%s2366_s0 + $0x1b8] sm:$0xff] }
 0x3df   :  { %v1012_v62 = vadd.f32 1.0, %v1513_v51  ;;  %1524 = vrcp.f32 %v1010_v54  ;;  %v1515_v15 = vpop.eup %1514  ;;  %v118_v51 = vld [vmem:[%s2366_s0 + $0x380] sm:$0xff] }
 0x3e0   :  { %1526 = vrcp.f32 %v1011_v58  ;;  %v1517_v17 = vpop.eup %1516  ;;  %v1013_v20 = vadd.f32 1.0, %v1515_v15  ;;  %v1099_v58 = vadd.f32 %v69_v47, %v41_v44  ;;  %v1100_v60 = vadd.f32 %v118_v51, %v90_v50 }
 0x3e1   :  { %1528 = vrcp.f32 %v1012_v62  ;;  %v1519_v21 = vpop.eup %1518  ;;  %v1014_v7 = vadd.f32 1.0, %v1517_v17  ;;  %v91_v62 = vld [vmem:[%s2366_s0 + $0x268] sm:$0xff] }
 0x3e2   :  { %1530 = vpow2.f32 %v1216_v2  ;;  %v1015_v24 = vadd.f32 1.0, %v1519_v21  ;;  %v120_v2 = vld [vmem:[%s2366_s0 + $0x390] sm:$0xff] }
 0x3e3   :  { %1532 = vpow2.f32 %v1217_v5  ;;  %v93_v5 = vld [vmem:[%s2366_s0 + $0x278] sm:$0xff]  ;;  %v1102_v16 = vadd.f32 %v120_v2, %v92_v1 }
 0x3e4   :  { %1534 = vpow2.f32 %v1218_v8 }
 0x3e5   :  { %1536 = vpow2.f32 %v1219_v9 }
 0x3e6   :  { %1538 = vpow2.f32 %v1220_v13  ;;  %v1101_v13 = vadd.f32 %v119_v63, %v91_v62 }
 0x3e7   :  { %v2083_v12 = vpop.eup %1520  ;;  %1540 = vrcp.f32 %v1013_v20  ;;  %v1103_v20 = vadd.f32 %v121_v6, %v93_v5 }
 0x3e8   :  { %v2091_v25 = vpop.eup %1522  ;;  %1542 = vrcp.f32 %v1014_v7 }
 0x3e9   :  { %v2093_v27 = vpop.eup %1524  ;;  %1544 = vrcp.f32 %v1015_v24 }
 0x3ea   :  { %v2095_v31 = vpop.eup %1526  ;;  %1546 = vpow2.f32 %v1221_v11  ;;  %v71_v11 = vld [vmem:[%s2366_s0 + $0x1c8] sm:$0xff] }
 0x3eb   :  { %v2097_v36 = vpop.eup %1528  ;;  %1548 = vpow2.f32 %v1222_v19  ;;  %v73_v19 = vld [vmem:[%s2366_s0 + $0x1d8] sm:$0xff] }
 0x3ec   :  { %v1531_v38 = vpop.eup %1530  ;;  %1550 = vpow2.f32 %v1223_v26 }
 0x3ed   :  { %v1533_v39 = vpop.eup %1532  ;;  %v1072_v42 = vadd.f32 1.0, %v1531_v38  ;;  %1552 = vtanh.f32 %v1096_v28  ;;  %v122_v28 = vld [vmem:[%s2366_s0 + $0x3a0] sm:$0xff]  ;;  %v123_v38 = vld [vmem:[%s2366_s0 + $0x3a8] sm:$0xff] }
 0x3ee   :  { %v1535_v43 = vpop.eup %1534  ;;  %v1073_v48 = vadd.f32 1.0, %v1533_v39  ;;  %1554 = vtanh.f32 %v1097_v32 }
 0x3ef   :  { %v1537_v49 = vpop.eup %1536  ;;  %v1074_v52 = vadd.f32 1.0, %v1535_v43  ;;  %1556 = vrcp.f32 %v1072_v42  ;;  %v125_v42 = vld [vmem:[%s2366_s0 + $0x3b8] sm:$0xff] }
 0x3f0   :  { %v1539_v53 = vpop.eup %1538  ;;  %v1075_v54 = vadd.f32 1.0, %v1537_v49  ;;  %1558 = vrcp.f32 %v1073_v48 }
 0x3f1   :  { %v2117_v56 = vpop.eup %1540  ;;  %v1076_v57 = vadd.f32 1.0, %v1539_v53  ;;  %1560 = vrcp.f32 %v1074_v52 }
 0x3f2   :  { %v2119_v59 = vpop.eup %1542  ;;  %1562 = vrcp.f32 %v1075_v54 }
 0x3f3   :  { %v2121_v61 = vpop.eup %1544  ;;  %1564 = vrcp.f32 %v1076_v57 }
 0x3f4   :  { %v1547_v0 = vpop.eup %1546  ;;  %1566 = vtanh.f32 %v1098_v55 }
 0x3f5   :  { %v1549_v4 = vpop.eup %1548  ;;  %v1077_v8 = vadd.f32 1.0, %v1547_v0  ;;  %1568 = vtanh.f32 %v1099_v58 }
 0x3f6   :  { %v1551_v9 = vpop.eup %1550  ;;  %v1078_v10 = vadd.f32 1.0, %v1549_v4  ;;  %1570 = vtanh.f32 %v1100_v60 }
 0x3f7   :  { %v1553_v14 = vpop.eup %1552  ;;  %v1079_v15 = vadd.f32 1.0, %v1551_v9  ;;  %1572 = vrcp.f32 %v1077_v8 }
 0x3f8   :  { %v1555_v17 = vpop.eup %1554  ;;  %1574 = vrcp.f32 %v1078_v10  ;;  %v1128_v50 = vmul.f32 %v1553_v14, %v2083_v12 }
 0x3f9   :  { %v1557_v21 = vpop.eup %1556  ;;  %1576 = vrcp.f32 %v1079_v15  ;;  %v1129_v52 = vmul.f32 %v1555_v17, %v2091_v25  ;;  %v74_v17 = vld [vmem:[%s2366_s0 + $0x1e0] sm:$0xff] }
 0x3fa   :  { %v1559_v22 = vpop.eup %1558  ;;  %1578 = vtanh.f32 %v1101_v13 }
 0x3fb   :  { %v1561_v7 = vpop.eup %1560  ;;  %1580 = vtanh.f32 %v1102_v16 }
 0x3fc   :  { %v1563_v23 = vpop.eup %1562  ;;  %1582 = vtanh.f32 %v1103_v20  ;;  %v98_v20 = vld [vmem:[%s2366_s0 + $0x2c0] sm:$0xff] }
 0x3fd   :  { %v1565_v24 = vpop.eup %1564  ;;  %1584 = vtanh.f32 %v70_v3  ;;  %v76_v3 = vld [vmem:[%s2366_s0 + $0x1f0] sm:$0xff] }
 0x3fe   :  { %v1567_v26 = vpop.eup %1566  ;;  %1586 = vtanh.f32 %v71_v11  ;;  %v77_v11 = vld [vmem:[%s2366_s0 + $0x1f8] sm:$0xff] }
 0x3ff   :  { %v1569_v32 = vpop.eup %1568  ;;  %1588 = vtanh.f32 %v72_v18  ;;  %v1130_v55 = vmul.f32 %v1567_v26, %v2093_v27  ;;  %v186_v18 = vadd.f32 %v98_v20, %v74_v17  ;;  %v22_v26 = vld [vmem:[%s2366_s0] sm:$0xff] }
 0x400   :  { %v1571_v39 = vpop.eup %1570  ;;  %1590 = vtanh.f32 %v73_v19  ;;  %v1131_v60 = vmul.f32 %v1569_v32, %v2095_v31  ;;  %v46_v19 = vld [vmem:[%s2366_s0 + $0xe0] sm:$0xff]  ;;  %v47_v32 = vld [vmem:[%s2366_s0 + $0xe8] sm:$0xff] }
 0x401   :  { %v1573_v41 = vpop.eup %1572  ;;  %1592 = vtanh.f32 %v122_v28  ;;  %v1132_v0 = vmul.f32 %v1571_v39, %v2097_v36 }
 0x402   :  { %v1575_v43 = vpop.eup %1574  ;;  %1594 = vtanh.f32 %v123_v38  ;;  %v23_v38 = vld [vmem:[%s2366_s0 + $0x8] sm:$0xff] }
 0x403   :  { %v1577_v44 = vpop.eup %1576  ;;  %1596 = vtanh.f32 %v124_v40  ;;  %v48_v40 = vld [vmem:[%s2366_s0 + $0xf0] sm:$0xff] }
 0x404   :  { %v1579_v47 = vpop.eup %1578  ;;  %1598 = vtanh.f32 %v125_v42  ;;  %v1172_v42 = vmul.f32 -1.442695, %v186_v18 }
 0x405   :  { %v1581_v48 = vpop.eup %1580  ;;  %v1133_v12 = vmul.f32 %v1579_v47, %v2117_v56  ;;  %v182_v47 = vadd.f32 %v46_v19, %v22_v26 }
 0x406   :  { %v1583_v49 = vpop.eup %1582  ;;  %v1134_v8 = vmul.f32 %v1581_v48, %v2119_v59  ;;  %1600 = vpow2.f32 %v1172_v42 }
 0x407   :  { %v1585_v51 = vpop.eup %1584  ;;  %v1135_v36 = vmul.f32 %v1583_v49, %v2121_v61  ;;  %v183_v49 = vadd.f32 %v47_v32, %v23_v38 }
 0x408   :  { %v1587_v53 = vpop.eup %1586  ;;  %v1120_v54 = vmul.f32 %v1585_v51, %v1557_v21  ;;  %v75_v21 = vld [vmem:[%s2366_s0 + $0x1e8] sm:$0xff] }
 0x409   :  { %v1589_v57 = vpop.eup %1588  ;;  %v1121_v58 = vmul.f32 %v1587_v53, %v1559_v22  ;;  %v99_v22 = vld [vmem:[%s2366_s0 + $0x2c8] sm:$0xff] }
 0x40a   :  { %v1591_v62 = vpop.eup %1590  ;;  %v1122_v63 = vmul.f32 %v1589_v57, %v1561_v7  ;;  %v1136_v1 = vadd.f32 %v1128_v50, %v1120_v54  ;;  %v100_v7 = vld [vmem:[%s2366_s0 + $0x2d0] sm:$0xff]  ;;  %v1168_v57 = vmul.f32 -1.442695, %v182_v47 }
 0x40b   :  { %v1593_v2 = vpop.eup %1592  ;;  %v1123_v4 = vmul.f32 %v1591_v62, %v1563_v23  ;;  %v1137_v5 = vadd.f32 %v1129_v52, %v1121_v58  ;;  %v101_v23 = vld [vmem:[%s2366_s0 + $0x2d8] sm:$0xff]  ;;  %v188_v28 = vadd.f32 %v100_v7, %v76_v3  ;;  %v1169_v58 = vmul.f32 -1.442695, %v183_v49  ;;  %v51_v49 = vld [vmem:[%s2366_s0 + $0x108] sm:$0xff] }
 0x40c   :  { %v1595_v6 = vpop.eup %1594  ;;  %v1124_v25 = vmul.f32 %v1593_v2, %v1565_v24  ;;  %v1138_v9 = vadd.f32 %v1130_v55, %v1122_v63  ;;  %1144 = vst.msk [vmem:[%s2368_s6] sm:$0xff] %vm278_vm0, %v1136_v1  ;;  %v187_v24 = vadd.f32 %v99_v22, %v75_v21  ;;  %v189_v39 = vadd.f32 %v101_v23, %v77_v11  ;;  %v78_v1 = vld [vmem:[%s2366_s0 + $0x200] sm:$0xff] }
 0x40d   :  { %v1597_v27 = vpop.eup %1596  ;;  %v1125_v31 = vmul.f32 %v1595_v6, %v1573_v41  ;;  %v1139_v10 = vadd.f32 %v1131_v60, %v1123_v4  ;;  %1145 = vst.msk [vmem:[%s2368_s6 + $0x8] sm:$0xff] %vm278_vm0, %v1137_v5  ;;  %v24_v41 = vld [vmem:[%s2366_s0 + $0x10] sm:$0xff]  ;;  %v1174_v50 = vmul.f32 -1.442695, %v188_v28  ;;  %v102_v2 = vld [vmem:[%s2366_s0 + $0x2e0] sm:$0xff]  ;;  %v79_v4 = vld [vmem:[%s2366_s0 + $0x208] sm:$0xff] }
 0x40e   :  { %v1599_v56 = vpop.eup %1598  ;;  %v1126_v13 = vmul.f32 %v1597_v27, %v1575_v43  ;;  %v1140_v14 = vadd.f32 %v1132_v0, %v1124_v25  ;;  %1146 = vst.msk [vmem:[%s2368_s6 + $0x10] sm:$0xff] %vm278_vm0, %v1138_v9  ;;  %v49_v43 = vld [vmem:[%s2366_s0 + $0xf8] sm:$0xff]  ;;  %v1173_v48 = vmul.f32 -1.442695, %v187_v24  ;;  %v184_v51 = vadd.f32 %v48_v40, %v24_v41  ;;  %v80_v25 = vld [vmem:[%s2366_s0 + $0x210] sm:$0xff] }
 0x40f   :  { %v1127_v59 = vmul.f32 %v1599_v56, %v1577_v44  ;;  %v1141_v15 = vadd.f32 %v1133_v12, %v1125_v31  ;;  %1147 = vst.msk [vmem:[%s2368_s6 + $0x18] sm:$0xff] %vm278_vm0, %v1139_v10  ;;  %v25_v44 = vld [vmem:[%s2366_s0 + $0x18] sm:$0xff]  ;;  %v1175_v52 = vmul.f32 -1.442695, %v189_v39  ;;  %v103_v12 = vld [vmem:[%s2366_s0 + $0x2e8] sm:$0xff]  ;;  %v242_v10 = vadd.f32 %v102_v2, %v78_v1 }
 0x410   :  { %v1142_v61 = vadd.f32 %v1134_v8, %v1126_v13  ;;  %1148 = vst.msk [vmem:[%s2368_s6 + $0x20] sm:$0xff] %vm278_vm0, %v1140_v14  ;;  %v185_v53 = vadd.f32 %v49_v43, %v25_v44  ;;  %1602 = vpow2.f32 %v1173_v48  ;;  %v1170_v60 = vmul.f32 -1.442695, %v184_v51  ;;  %v104_v8 = vld [vmem:[%s2366_s0 + $0x2f0] sm:$0xff]  ;;  %v81_v31 = vld [vmem:[%s2366_s0 + $0x218] sm:$0xff]  ;;  %v1601_v56 = vpop.eup %1600  ;;  %v50_v43 = vld [vmem:[%s2366_s0 + $0x100] sm:$0xff] }
 0x411   :  { %v1143_v16 = vadd.f32 %v1135_v36, %v1127_v59  ;;  %1149 = vst.msk [vmem:[%s2368_s6 + $0x28] sm:$0xff] %vm278_vm0, %v1141_v15  ;;  %1604 = vpow2.f32 %v1174_v50  ;;  %v105_v36 = vld [vmem:[%s2366_s0 + $0x2f8] sm:$0xff]  ;;  %v243_v13 = vadd.f32 %v103_v12, %v79_v4  ;;  %v218_v3 = vadd.f32 1.0, %v1601_v56  ;;  %v26_v44 = vld [vmem:[%s2366_s0 + $0x20] sm:$0xff]  ;;  %v27_v50 = vld [vmem:[%s2366_s0 + $0x28] sm:$0xff] }
 0x412   :  { %1150 = vst.msk [vmem:[%s2368_s6 + $0x30] sm:$0xff] %vm278_vm0, %v1142_v61  ;;  %1606 = vpow2.f32 %v1175_v52  ;;  %v1171_v62 = vmul.f32 -1.442695, %v185_v53  ;;  %v244_v61 = vadd.f32 %v104_v8, %v80_v25  ;;  %v245_v17 = vadd.f32 %v105_v36, %v81_v31  ;;  %v52_v53 = vld [vmem:[%s2366_s0 + $0x110] sm:$0xff] }
 0x413   :  { %1151 = vst.msk [vmem:[%s2368_s6 + $0x38] sm:$0xff] %vm278_vm0, %v1143_v16  ;;  %1608 = vpow2.f32 %v1168_v57 }
 0x414   :  { %1610 = vpow2.f32 %v1169_v58  ;;  %v53_v58 = vld [vmem:[%s2366_s0 + $0x118] sm:$0xff] }
 0x415   :  { %1612 = vpow2.f32 %v1170_v60  ;;  %v29_v60 = vld [vmem:[%s2366_s0 + $0x38] sm:$0xff] }
 0x416   :  { %1614 = vpow2.f32 %v1171_v62  ;;  %v238_v62 = vadd.f32 %v50_v43, %v26_v44  ;;  %v948_v44 = vld [vmem:[%s2370_s4] sm:$0xff] }
 0x417   :  { %1616 = vtanh.f32 %v242_v10 }
 0x418   :  { %1618 = vtanh.f32 %v243_v13 }
 0x419   :  { %1620 = vtanh.f32 %v244_v61 }
 0x41a   :  { %v1603_v14 = vpop.eup %1602  ;;  %1622 = vtanh.f32 %v245_v17 }
 0x41b   :  { %v1605_v16 = vpop.eup %1604  ;;  %v219_v18 = vadd.f32 1.0, %v1603_v14  ;;  %1624 = vrcp.f32 %v218_v3 }
 0x41c   :  { %v1607_v22 = vpop.eup %1606  ;;  %v220_v19 = vadd.f32 1.0, %v1605_v16 }
 0x41d   :  { %v1609_v23 = vpop.eup %1608  ;;  %v221_v38 = vadd.f32 1.0, %v1607_v22  ;;  %1626 = vrcp.f32 %v219_v18 }
 0x41e   :  { %v1611_v24 = vpop.eup %1610  ;;  %v214_v41 = vadd.f32 1.0, %v1609_v23  ;;  %1628 = vrcp.f32 %v220_v19  ;;  %v936_v19 = vld [vmem:[%s2369_s3] sm:$0xff] }
 0x41f   :  { %v1613_v32 = vpop.eup %1612  ;;  %v215_v47 = vadd.f32 1.0, %v1611_v24  ;;  %1630 = vrcp.f32 %v221_v38  ;;  %v939_v38 = vld [vmem:[%s2369_s3 + $0x18] sm:$0xff] }
 0x420   :  { %v1615_v39 = vpop.eup %1614  ;;  %v216_v51 = vadd.f32 1.0, %v1613_v32  ;;  %1632 = vrcp.f32 %v214_v41  ;;  %v938_v32 = vld [vmem:[%s2369_s3 + $0x10] sm:$0xff] }
 0x421   :  { %1634 = vrcp.f32 %v215_v47  ;;  %v1617_v1 = vpop.eup %1616 }
 0x422   :  { %1636 = vrcp.f32 %v216_v51  ;;  %v949_v51 = vld [vmem:[%s2370_s4 + $0x8] sm:$0xff] }
 0x458   :  { %v885_v54 = vpop.xlane.xlu1 %884  ;;  %v882_v55 = vpop.xlane.xlu0 %881 }
 0x459   :  { %v904_v9 = vadd.f32 %v885_v54, %v882_v55  ;;  %v28_v54 = vld [vmem:[%s2366_s0 + $0x30] sm:$0xff]  ;;  %v217_v55 = vadd.f32 1.0, %v1615_v39 }
 0x45a   :  { %v240_v4 = vadd.f32 %v52_v53, %v28_v54  ;;  %v951_v53 = vld [vmem:[%s2370_s4 + $0x18] sm:$0xff] }
 0x45b   :  { %1638 = vrcp.f32 %v217_v55 }
 0x45c   :  { %v897_v63 = vpop.xlane.xlu1 %896  ;;  %v894_v0 = vpop.xlane.xlu0 %893  ;;  %1640 = vtanh.f32 %v238_v62 }
 0x45d   :  { %v913_v27 = vadd.f32 %v897_v63, %v894_v0  ;;  %v239_v0 = vadd.f32 %v51_v49, %v27_v50 }
 0x45f   :  { %1642 = vtanh.f32 %v239_v0 }
 0x460   :  { %v900_v5 = vpop.xlane.xlu1 %899  ;;  %v888_v6 = vpop.xlane.xlu0 %887  ;;  %1644 = vtanh.f32 %v240_v4 }
 0x461   :  { %v914_v59 = vadd.f32 %v913_v27, %v900_v5  ;;  %v905_v15 = vadd.f32 %v904_v9, %v888_v6  ;;  %v1619_v5 = vpop.eup %1618  ;;  %v241_v6 = vadd.f32 %v53_v58, %v29_v60 }
 0x462   :  { %v1621_v25 = vpop.eup %1620 }
 0x463   :  { %v1623_v27 = vpop.eup %1622  ;;  %1646 = vtanh.f32 %v241_v6 }
 0x464   :  { %v903_v20 = vpop.xlane.xlu1 %902  ;;  %v891_v21 = vpop.xlane.xlu0 %890 }
 0x465   :  { %v915_v7 = vadd.f32 %v914_v59, %v903_v20  ;;  %v906_v11 = vadd.f32 %v905_v15, %v891_v21  ;;  %v1625_v31 = vpop.eup %1624 }
 0x466   :  { %v1627_v56 = vpop.eup %1626 }
 0x467   :  { %v916_v26 = vrot.slane %v915_v7, 4  ;;  %v907_v28 = vrot.slane %v906_v11, 4  ;;  %v1629_v13 = vpop.eup %1628  ;;  %v259_v23 = vmul.f32 %v1627_v56, %v1619_v5 }
 0x468   :  { %v1631_v15 = vpop.eup %1630  ;;  %v260_v18 = vmul.f32 %v1629_v13, %v1621_v25 }
 0x469   :  { %v917_v40 = vadd.f32 %v916_v26, %v915_v7  ;;  %v908_v42 = vadd.f32 %v907_v28, %v906_v11  ;;  %v1633_v61 = vpop.eup %1632  ;;  %v258_v11 = vmul.f32 %v1625_v31, %v1617_v1  ;;  %v261_v24 = vmul.f32 %v1631_v15, %v1623_v27  ;;  %v937_v28 = vld [vmem:[%s2369_s3 + $0x8] sm:$0xff] }
 0x46a   :  { %v1635_v16 = vpop.eup %1634 }
 0x46b   :  { %v918_v48 = vrot.slane %v917_v40, 2  ;;  %v909_v52 = vrot.slane %v908_v42, 2  ;;  %v1637_v17 = vpop.eup %1636 }
 0x46c   :  { %v1639_v20 = vpop.eup %1638 }
 0x46d   :  { %v919_v57 = vadd.f32 %v918_v48, %v917_v40  ;;  %v910_v63 = vadd.f32 %v909_v52, %v908_v42  ;;  %v1641_v21 = vpop.eup %1640  ;;  %v950_v52 = vld [vmem:[%s2370_s4 + $0x10] sm:$0xff] }
 0x46e   :  { %v1643_v22 = vpop.eup %1642  ;;  %v254_v39 = vmul.f32 %v1641_v21, %v1633_v61 }
 0x46f   :  { %v920_v2 = vrot.slane %v919_v57, 1  ;;  %v911_v12 = vrot.slane %v910_v63, 1  ;;  %v1645_v3 = vpop.eup %1644  ;;  %v255_v40 = vmul.f32 %v1643_v22, %v1635_v16 }
 0x470   :  { %v1647_v7 = vpop.eup %1646  ;;  %v256_v41 = vmul.f32 %v1645_v3, %v1637_v17 }
 0x471   :  { %v921_v8 = vadd.f32 %v920_v2, %v919_v57  ;;  %v912_v9 = vadd.f32 %v911_v12, %v910_v63  ;;  %v257_v42 = vmul.f32 %v1647_v7, %v1639_v20 }
 0x473   :  { %v923_v36 = vmul.f32 0.00390625, %v921_v8  ;;  %v922_v10 = vmul.f32 0.00390625, %v912_v9 }
 0x475   :  { %v925_v14 = vadd.f32 1e-05, %v923_v36  ;;  %v924_v59 = vadd.f32 1e-05, %v922_v10 }
 0x477   :  { %1648 = vrsqrt.f32 %v925_v14 }
 0x478   :  { %1650 = vrsqrt.f32 %v924_v59 }
 0x481   :  { %v1649_v26 = vpop.eup %1648 }
 0x482   :  { %v1651_v43 = vpop.eup %1650  ;;  %v932_v47 = vmul.f32 %v1649_v26, %v1951_v34  ;;  %v933_v48 = vmul.f32 %v1649_v26, %v1949_v33  ;;  %v934_v49 = vmul.f32 %v1649_v26, %v1953_v35  ;;  %v935_v50 = vmul.f32 %v1649_v26, %v1969_v45 }
 0x483   :  { %v928_v34 = vmul.f32 %v1651_v43, %v1943_v30  ;;  %v929_v33 = vmul.f32 %v1651_v43, %v1940_v29  ;;  %v930_v35 = vmul.f32 %v1651_v43, %v1955_v37  ;;  %v931_v45 = vmul.f32 %v1651_v43, %v1971_v46 }
 0x484   :  { %v944_v54 = vmul.f32 %v936_v19, %v932_v47  ;;  %v945_v55 = vmul.f32 %v937_v28, %v933_v48  ;;  %v946_v57 = vmul.f32 %v938_v32, %v934_v49  ;;  %v947_v58 = vmul.f32 %v939_v38, %v935_v50 }
 0x485   :  { %v940_v60 = vmul.f32 %v936_v19, %v928_v34  ;;  %v941_v62 = vmul.f32 %v937_v28, %v929_v33  ;;  %v942_v63 = vmul.f32 %v938_v32, %v930_v35  ;;  %v943_v0 = vmul.f32 %v939_v38, %v931_v45 }
 0x486   :  { %v956_v1 = vadd.f32 %v948_v44, %v944_v54  ;;  %v957_v2 = vadd.f32 %v949_v51, %v945_v55  ;;  %v958_v4 = vadd.f32 %v950_v52, %v946_v57  ;;  %v959_v12 = vadd.f32 %v951_v53, %v947_v58 }
 0x487   :  { %v952_v5 = vadd.f32 %v948_v44, %v940_v60  ;;  %v953_v30 = vadd.f32 %v949_v51, %v941_v62  ;;  %v954_v6 = vadd.f32 %v950_v52, %v942_v63  ;;  %v955_v29 = vadd.f32 %v951_v53, %v943_v0 }
 0x488   :  { %v964_v25 = vadd.f32 %v956_v1, %v258_v11  ;;  %v965_v37 = vadd.f32 %v957_v2, %v259_v23  ;;  %v966_v8 = vadd.f32 %v958_v4, %v260_v18  ;;  %v967_v46 = vadd.f32 %v959_v12, %v261_v24 }
 0x489   :  { %v960_v9 = vadd.f32 %v952_v5, %v254_v39  ;;  %v961_v27 = vadd.f32 %v953_v30, %v255_v40  ;;  %v962_v31 = vadd.f32 %v954_v6, %v256_v41  ;;  %v963_v36 = vadd.f32 %v955_v29, %v257_v42 }
 0x48a   :  { %972 = vst.msk [vmem:[%s2371_s5 + $0x20] sm:$0xff] %vm278_vm0, %v964_v25  ;;  %973 = vst.msk [vmem:[%s2371_s5 + $0x28] sm:$0xff] %vm278_vm0, %v965_v37 }
 0x48b   :  { %974 = vst.msk [vmem:[%s2371_s5 + $0x30] sm:$0xff] %vm278_vm0, %v966_v8  ;;  %975 = vst.msk [vmem:[%s2371_s5 + $0x38] sm:$0xff] %vm278_vm0, %v967_v46 }
 0x48c   :  { %968 = vst.msk [vmem:[%s2371_s5] sm:$0xff] %vm278_vm0, %v960_v9  ;;  %969 = vst.msk [vmem:[%s2371_s5 + $0x8] sm:$0xff] %vm278_vm0, %v961_v27 }
 0x48d   :  { %970 = vst.msk [vmem:[%s2371_s5 + $0x10] sm:$0xff] %vm278_vm0, %v962_v31  ;;  %971 = vst.msk [vmem:[%s2371_s5 + $0x18] sm:$0xff] %vm278_vm0, %v963_v36 }

// kernel: _lambda_.59
= control target key start
LH: loop header
LB: loop body
LE: loop exit
PB: predicated region body
PF: predicated region fallthrough
CT: control target
= control target key end

     0   :  { %vm286_vm0 = vcmask 64512   ;;  %vm553_vm2 = vcmask 785408   ;;  %s2557_s2 = inlined_call_operand.vmem [shape: f32[2,96,8], index: 2, kind: input, shape index: {}]   ;;  %s2558_s0 = inlined_call_operand.vmem [shape: f32[2,15,32,8], index: 0, kind: input, shape index: {}]   ;;  %s2559_s1 = inlined_call_operand.vmem [shape: f32[2,32,8], index: 1, kind: input, shape index: {}]   ;;  %s2560_s6 = inlined_call_operand.vmem [shape: f32[2,32,8], index: 6, kind: output, shape index: {1}]   ;;  %s2561_s3 = inlined_call_operand.vmem [shape: f32[1,32,8], index: 3, kind: input, shape index: {}]   ;;  %s2562_s4 = inlined_call_operand.vmem [shape: f32[1,32,8], index: 4, kind: input, shape index: {}]   ;;  %s2563_s5 = inlined_call_operand.vmem [shape: f32[2,32,8], index: 5, kind: output, shape index: {0}]  }
   0x1   :  { %v262_v0 = vld [vmem:[%s2557_s2] sm:$0xff]  ;;  %v263_v1 = vld [vmem:[%s2557_s2 + $0x8] sm:$0xff]  ;;  %vm1823_vm1 = vmpackc.low %vm286_vm0, %vm286_vm0 }
   0x2   :  { %v1827_v3 = vpack.c.bf16 %v263_v1, %v262_v0  ;;  %v274_v4 = vld [vmem:[%s2557_s2 + $0x60] sm:$0xff]  ;;  %v275_v5 = vld [vmem:[%s2557_s2 + $0x68] sm:$0xff]  ;;  %v264_v6 = vld [vmem:[%s2557_s2 + $0x10] sm:$0xff] }
   0x3   :  { %v1838_v7 = vpack.c.bf16 %v275_v5, %v274_v4  ;;  %v265_v8 = vld [vmem:[%s2557_s2 + $0x18] sm:$0xff]  ;;  %v276_v9 = vld [vmem:[%s2557_s2 + $0x70] sm:$0xff]  ;;  %v266_v13 = vld [vmem:[%s2557_s2 + $0x20] sm:$0xff] }
   0x4   :  { %v277_v10 = vld [vmem:[%s2557_s2 + $0x78] sm:$0xff]  ;;  %1450 = vmatprep.subr.msk.bf16.mxu0 %vm1823_vm1, %v1827_v3  ;;  %v1852_v11 = vpack.c.bf16 %v265_v8, %v264_v6  ;;  %v267_v14 = vld [vmem:[%s2557_s2 + $0x28] sm:$0xff]  ;;  %v278_v15 = vld [vmem:[%s2557_s2 + $0x80] sm:$0xff] }
   0x5   :  { %v1854_v12 = vpack.c.bf16 %v277_v10, %v276_v9  ;;  %1453 = vmatpush3.bf16.xpose.msk.msra.mxu0 %vm1823_vm1, %v1827_v3  ;;  %1486 = vmatprep.subr.msk.bf16.mxu1 %vm1823_vm1, %v1838_v7  ;;  %v279_v16 = vld [vmem:[%s2557_s2 + $0x88] sm:$0xff]  ;;  %v1883_v17 = vpack.c.bf16 %v267_v14, %v266_v13  ;;  %v30_v19 = vld [vmem:[%s2558_s0 + $0x40] sm:$0xff]  ;;  %v268_v22 = vld [vmem:[%s2557_s2 + $0x30] sm:$0xff] }
   0x6   :  { %1489 = vmatpush3.bf16.xpose.msk.msra.mxu1 %vm1823_vm1, %v1838_v7  ;;  %1456 = vmatprep.subr.msk.bf16.mxu0 %vm1823_vm1, %v1852_v11  ;;  %v1885_v18 = vpack.c.bf16 %v279_v16, %v278_v15  ;;  %v54_v20 = vld [vmem:[%s2558_s0 + $0x120] sm:$0xff]  ;;  %v269_v23 = vld [vmem:[%s2557_s2 + $0x38] sm:$0xff]  ;;  %v280_v24 = vld [vmem:[%s2557_s2 + $0x90] sm:$0xff] }
   0x7   :  { %1492 = vmatprep.subr.msk.bf16.mxu1 %vm1823_vm1, %v1854_v12  ;;  %v126_v21 = vadd.f32 %v54_v20, %v30_v19  ;;  %v281_v25 = vld [vmem:[%s2557_s2 + $0x98] sm:$0xff]  ;;  %v1917_v27 = vpack.c.bf16 %v269_v23, %v268_v22  ;;  %v270_v29 = vld [vmem:[%s2557_s2 + $0x40] sm:$0xff]  ;;  %v271_v30 = vld [vmem:[%s2557_s2 + $0x48] sm:$0xff] }
   0x8   :  { %v1919_v28 = vpack.c.bf16 %v281_v25, %v280_v24  ;;  %v282_v31 = vld [vmem:[%s2557_s2 + $0xa0] sm:$0xff]  ;;  %v283_v32 = vld [vmem:[%s2557_s2 + $0xa8] sm:$0xff]  ;;  %v1945_v33 = vpack.c.bf16 %v271_v30, %v270_v29  ;;  %v272_v36 = vld [vmem:[%s2557_s2 + $0x50] sm:$0xff] }
   0x9   :  { %v1192_v26 = vmul.f32 -1.442695, %v126_v21  ;;  %v1947_v34 = vpack.c.bf16 %v283_v32, %v282_v31  ;;  %v273_v37 = vld [vmem:[%s2557_s2 + $0x58] sm:$0xff]  ;;  %v31_v38 = vld [vmem:[%s2558_s0 + $0x48] sm:$0xff]  ;;  %v82_v41 = vld [vmem:[%s2558_s0 + $0x220] sm:$0xff] }
   0xa   :  { %v55_v40 = vld [vmem:[%s2558_s0 + $0x128] sm:$0xff]  ;;  %v106_v42 = vld [vmem:[%s2558_s0 + $0x300] sm:$0xff]  ;;  %v284_v43 = vld [vmem:[%s2557_s2 + $0xb0] sm:$0xff]  ;;  %v2009_v60 = vpack.c.bf16 %v273_v37, %v272_v36 }
   0xb   :  { %1568 = vpow2.f32 %v1192_v26  ;;  %v285_v44 = vld [vmem:[%s2557_s2 + $0xb8] sm:$0xff]  ;;  %v127_v45 = vadd.f32 %v55_v40, %v31_v38  ;;  %v130_v46 = vadd.f32 %v106_v42, %v82_v41  ;;  %v83_v47 = vld [vmem:[%s2558_s0 + $0x228] sm:$0xff]  ;;  %v32_v49 = vld [vmem:[%s2558_s0 + $0x50] sm:$0xff] }
   0xc   :  { %v107_v48 = vld [vmem:[%s2558_s0 + $0x308] sm:$0xff]  ;;  %v56_v51 = vld [vmem:[%s2558_s0 + $0x130] sm:$0xff]  ;;  %v33_v58 = vld [vmem:[%s2558_s0 + $0x58] sm:$0xff]  ;;  %v2017_v6 = vpack.c.bf16 %v285_v44, %v284_v43 }
   0xd   :  { %1459 = vmatpush3.bf16.xpose.msk.msra.mxu0 %vm1823_vm1, %v1852_v11  ;;  %v131_v50 = vadd.f32 %v107_v48, %v83_v47  ;;  %v84_v52 = vld [vmem:[%s2558_s0 + $0x230] sm:$0xff]  ;;  %v1193_v54 = vmul.f32 -1.442695, %v127_v45  ;;  %v1196_v55 = vmul.f32 -1.442695, %v130_v46  ;;  %v128_v56 = vadd.f32 %v56_v51, %v32_v49  ;;  %v57_v59 = vld [vmem:[%s2558_s0 + $0x138] sm:$0xff] }
   0xe   :  { %1495 = vmatpush3.bf16.xpose.msk.msra.mxu1 %vm1823_vm1, %v1854_v12  ;;  %1462 = vmatprep.subr.msk.bf16.mxu0 %vm1823_vm1, %v1883_v17  ;;  %v108_v53 = vld [vmem:[%s2558_s0 + $0x310] sm:$0xff]  ;;  %v129_v62 = vadd.f32 %v57_v59, %v33_v58  ;;  %v85_v63 = vld [vmem:[%s2558_s0 + $0x238] sm:$0xff] }
   0xf   :  { %1498 = vmatprep.subr.msk.bf16.mxu1 %vm1823_vm1, %v1885_v18  ;;  %v132_v57 = vadd.f32 %v108_v53, %v84_v52  ;;  %v1197_v61 = vmul.f32 -1.442695, %v131_v50  ;;  %v109_v0 = vld [vmem:[%s2558_s0 + $0x318] sm:$0xff]  ;;  %v1194_v1 = vmul.f32 -1.442695, %v128_v56 }
  0x10   :  { %v133_v5 = vadd.f32 %v109_v0, %v85_v63  ;;  %v1195_v8 = vmul.f32 -1.442695, %v129_v62 }
  0x11   :  { %v1198_v4 = vmul.f32 -1.442695, %v132_v57 }
  0x12   :  { %v1199_v9 = vmul.f32 -1.442695, %v133_v5 }
  0x15   :  { %1465 = vmatpush3.bf16.xpose.msk.msra.mxu0 %vm1823_vm1, %v1883_v17  ;;  %v1569_v35 = vpop.eup %1568 }
  0x16   :  { %1501 = vmatpush3.bf16.xpose.msk.msra.mxu1 %vm1823_vm1, %v1885_v18  ;;  %1468 = vmatprep.subr.msk.bf16.mxu0 %vm1823_vm1, %v1917_v27  ;;  %v158_v39 = vadd.f32 1.0, %v1569_v35 }
  0x17   :  { %1504 = vmatprep.subr.msk.bf16.mxu1 %vm1823_vm1, %v1919_v28 }
  0x18   :  { %1570 = vrcp.f32 %v158_v39 }
  0x19   :  { %1572 = vpow2.f32 %v1193_v54 }
  0x1a   :  { %1574 = vpow2.f32 %v1196_v55 }
  0x1b   :  { %1576 = vpow2.f32 %v1197_v61 }
  0x1c   :  { %1578 = vpow2.f32 %v1194_v1 }
  0x1d   :  { %1471 = vmatpush3.bf16.xpose.msk.msra.mxu0 %vm1823_vm1, %v1917_v27  ;;  %1580 = vpow2.f32 %v1198_v4 }
  0x1e   :  { %1507 = vmatpush3.bf16.xpose.msk.msra.mxu1 %vm1823_vm1, %v1919_v28  ;;  %1474 = vmatprep.subr.msk.bf16.mxu0 %vm1823_vm1, %v1945_v33  ;;  %1582 = vpow2.f32 %v1195_v8 }
  0x1f   :  { %1510 = vmatprep.subr.msk.bf16.mxu1 %vm1823_vm1, %v1947_v34  ;;  %1584 = vpow2.f32 %v1199_v9 }
  0x22   :  { %v1571_v10 = vpop.eup %1570 }
  0x23   :  { %1352 = vmatprep.mubr.msk.f32.mxu0 %vm286_vm0, %v1571_v10  ;;  %v1573_v13 = vpop.eup %1572 }
  0x24   :  { %v1575_v14 = vpop.eup %1574  ;;  %v159_v15 = vadd.f32 1.0, %v1573_v13 }
  0x25   :  { %1477 = vmatpush3.bf16.xpose.msk.msra.mxu0 %vm1823_vm1, %v1945_v33  ;;  %v1577_v16 = vpop.eup %1576  ;;  %v162_v19 = vadd.f32 1.0, %v1575_v14 }
  0x26   :  { %1513 = vmatpush3.bf16.xpose.msk.msra.mxu1 %vm1823_vm1, %v1947_v34  ;;  %1480 = vmatprep.subr.msk.bf16.mxu0 %vm1823_vm1, %v2009_v60  ;;  %v1579_v20 = vpop.eup %1578  ;;  %1586 = vrcp.f32 %v159_v15  ;;  %v163_v21 = vadd.f32 1.0, %v1577_v16 }
  0x27   :  { %1516 = vmatprep.subr.msk.bf16.mxu1 %vm1823_vm1, %v2017_v6  ;;  %v1581_v22 = vpop.eup %1580  ;;  %1588 = vrcp.f32 %v162_v19  ;;  %v160_v23 = vadd.f32 1.0, %v1579_v20 }
  0x28   :  { %v1583_v24 = vpop.eup %1582  ;;  %1590 = vrcp.f32 %v163_v21  ;;  %v164_v25 = vadd.f32 1.0, %v1581_v22 }
  0x29   :  { %v1585_v26 = vpop.eup %1584  ;;  %1592 = vrcp.f32 %v160_v23  ;;  %v161_v29 = vadd.f32 1.0, %v1583_v24 }
  0x2a   :  { %1594 = vrcp.f32 %v164_v25  ;;  %v165_v2 = vadd.f32 1.0, %v1585_v26 }
  0x2b   :  { %1596 = vrcp.f32 %v161_v29 }
  0x2c   :  { %1598 = vrcp.f32 %v165_v2 }
  0x2d   :  { %1483 = vmatpush3.bf16.xpose.msk.msra.mxu0 %vm1823_vm1, %v2009_v60 }
  0x2e   :  { %1519 = vmatpush3.bf16.xpose.msk.msra.mxu1 %vm1823_vm1, %v2017_v6  ;;  %1521 = vmatprep.subr.bf16.mxu0 %v1827_v3 }
  0x2f   :  { %1545 = vmatprep.subr.bf16.mxu1 %v1838_v7 }
  0x30   :  { %v1587_v30 = vpop.eup %1586 }
  0x31   :  { %v1589_v31 = vpop.eup %1588 }
  0x32   :  { %v1591_v32 = vpop.eup %1590  ;;  %1382 = vmatprep.mubr.msk.f32.mxu1 %vm286_vm0, %v1589_v31 }
  0x33   :  { %v1593_v35 = vpop.eup %1592 }
  0x34   :  { %1353 = vmatmul.mubr.msk.f32.vlgmr.msra.gmra.mrb[0].mxu0 %vm286_vm0, %v1587_v30  ;;  %v1595_v36 = vpop.eup %1594 }
  0x35   :  { %1523 = vmatpush3.bf16.msra.mxu0 %v1827_v3  ;;  %1383 = vmatmul.mubr.msk.f32.vlgmr.msra.gmra.mrb[0].mxu1 %vm286_vm0, %v1591_v32  ;;  %v1597_v37 = vpop.eup %1596 }
  0x36   :  { %1525 = vmatprep.subr.bf16.mxu0 %v1852_v11  ;;  %1355 = vmatprep.mubr.msk.f32.mxu0 %vm286_vm0, %v1593_v35  ;;  %v1599_v38 = vpop.eup %1598 }
  0x37   :  { %1547 = vmatpush3.bf16.msra.mxu1 %v1838_v7  ;;  %1385 = vmatprep.mubr.msk.f32.mxu1 %vm286_vm0, %v1595_v36 }
  0x38   :  { %1549 = vmatprep.subr.bf16.mxu1 %v1854_v12  ;;  %1356 = vmatmul.mubr.msk.f32.gmra.mrb[2].mxu0 %vm286_vm0, %v1597_v37 }
  0x39   :  { %1386 = vmatmul.mubr.msk.f32.gmra.mrb[2].mxu1 %vm286_vm0, %v1599_v38  ;;  %1527 = vmatpush3.bf16.msra.mxu0 %v1852_v11 }
  0x3a   :  { %1529 = vmatprep.subr.bf16.mxu0 %v1883_v17 }
  0x3b   :  { %1551 = vmatpush3.bf16.msra.mxu1 %v1854_v12 }
  0x3c   :  { %1553 = vmatprep.subr.bf16.mxu1 %v1885_v18 }
  0x3d   :  { %1531 = vmatpush3.bf16.msra.mxu0 %v1883_v17 }
  0x3e   :  { %1533 = vmatprep.subr.bf16.mxu0 %v1917_v27 }
  0x3f   :  { %1555 = vmatpush3.bf16.msra.mxu1 %v1885_v18 }
  0x40   :  { %1557 = vmatprep.subr.bf16.mxu1 %v1919_v28 }
  0x41   :  { %1535 = vmatpush3.bf16.msra.mxu0 %v1917_v27 }
  0x42   :  { %1537 = vmatprep.subr.bf16.mxu0 %v1945_v33 }
  0x43   :  { %1559 = vmatpush3.bf16.msra.mxu1 %v1919_v28 }
  0x44   :  { %1561 = vmatprep.subr.bf16.mxu1 %v1947_v34 }
  0x45   :  { %1539 = vmatpush3.bf16.msra.mxu0 %v1945_v33 }
  0x46   :  { %1541 = vmatprep.subr.bf16.mxu0 %v2009_v60 }
  0x47   :  { %1563 = vmatpush3.bf16.msra.mxu1 %v1947_v34 }
  0x48   :  { %1565 = vmatprep.subr.bf16.mxu1 %v2017_v6 }
  0x49   :  { %1543 = vmatpush3.bf16.msra.mxu0 %v2009_v60 }
  0x4b   :  { %1567 = vmatpush3.bf16.msra.mxu1 %v2017_v6 }
 0x107   :  { %v1354_v3 = vpop.f32.mrb[0].mxu0 }
 0x108   :  { %v401_v7 = vpop.f32.mrb[1].mxu0  ;;  %v557_v11 = vsel %vm553_vm2, %v1354_v3, -inf  ;;  %v1384_v12 = vpop.f32.mrb[0].mxu1 }
 0x109   :  { %558 = vmax.xlane.f32.xlu1 %v557_v11  ;;  %v554_v17 = vsel %vm553_vm2, %v401_v7, -inf  ;;  %v534_v18 = vpop.f32.mrb[1].mxu1  ;;  %v569_v27 = vsel %vm553_vm2, %v1384_v12, -inf }
 0x10a   :  { %555 = vmax.xlane.f32.xlu0 %v554_v17  ;;  %v566_v28 = vsel %vm553_vm2, %v534_v18, -inf }
 0x10b   :  { %v1357_v33 = vpop.f32.mrb[2].mxu0 }
 0x10c   :  { %v1387_v34 = vpop.f32.mrb[2].mxu1  ;;  %v411_v39 = vpop.f32.mrb[3].mxu0  ;;  %v563_v44 = vsel %vm553_vm2, %v1357_v33, -inf }
 0x10d   :  { %570 = vmax.xlane.f32.xlu1 %v569_v27  ;;  %v544_v40 = vpop.f32.mrb[3].mxu1  ;;  %v560_v42 = vsel %vm553_vm2, %v411_v39, -inf  ;;  %v575_v43 = vsel %vm553_vm2, %v1387_v34, -inf }
 0x10e   :  { %567 = vmax.xlane.f32.xlu0 %v566_v28  ;;  %v572_v41 = vsel %vm553_vm2, %v544_v40, -inf }
 0x111   :  { %573 = vmax.xlane.f32.xlu1 %v572_v41 }
 0x112   :  { %561 = vmax.xlane.f32.xlu0 %v560_v42 }
 0x115   :  { %576 = vmax.xlane.f32.xlu1 %v575_v43 }
 0x116   :  { %564 = vmax.xlane.f32.xlu0 %v563_v44 }
 0x196   :  { %v559_v45 = vpop.xlane.xlu1 %558 }
 0x197   :  { %v579_v46 = vsub.f32 %v1354_v3, %v559_v45  ;;  %v556_v47 = vpop.xlane.xlu0 %555  ;;  %v837_v45 = vld [vmem:[%s2559_s1 + $0x8] sm:$0xff] }
 0x198   :  { %v578_v48 = vsub.f32 %v401_v7, %v556_v47 }
 0x199   :  { %v588_v49 = vmul.f32 1.442695, %v579_v46  ;;  %v836_v46 = vld [vmem:[%s2559_s1] sm:$0xff] }
 0x19a   :  { %v586_v50 = vmul.f32 1.442695, %v578_v48  ;;  %v571_v51 = vpop.xlane.xlu1 %570 }
 0x19b   :  { %1600 = vpow2.f32 %v588_v49  ;;  %v583_v52 = vsub.f32 %v1384_v12, %v571_v51  ;;  %v568_v53 = vpop.xlane.xlu0 %567 }
 0x19c   :  { %v582_v54 = vsub.f32 %v534_v18, %v568_v53  ;;  %1602 = vpow2.f32 %v586_v50  ;;  %v841_v50 = vld [vmem:[%s2559_s1 + $0x28] sm:$0xff] }
 0x19d   :  { %v596_v55 = vmul.f32 1.442695, %v583_v52  ;;  %v840_v52 = vld [vmem:[%s2559_s1 + $0x20] sm:$0xff] }
 0x19e   :  { %v594_v56 = vmul.f32 1.442695, %v582_v54  ;;  %v574_v57 = vpop.xlane.xlu1 %573 }
 0x19f   :  { %1604 = vpow2.f32 %v596_v55  ;;  %v584_v58 = vsub.f32 %v544_v40, %v574_v57  ;;  %v562_v59 = vpop.xlane.xlu0 %561 }
 0x1a0   :  { %v580_v60 = vsub.f32 %v411_v39, %v562_v59  ;;  %1606 = vpow2.f32 %v594_v56 }
 0x1a1   :  { %v598_v61 = vmul.f32 1.442695, %v584_v58 }
 0x1a2   :  { %v590_v62 = vmul.f32 1.442695, %v580_v60  ;;  %v577_v63 = vpop.xlane.xlu1 %576  ;;  %v838_v60 = vld [vmem:[%s2559_s1 + $0x10] sm:$0xff] }
 0x1a3   :  { %v585_v0 = vsub.f32 %v1387_v34, %v577_v63  ;;  %v565_v1 = vpop.xlane.xlu0 %564 }
 0x1a4   :  { %1608 = vpow2.f32 %v590_v62  ;;  %v581_v4 = vsub.f32 %v1357_v33, %v565_v1 }
 0x1a5   :  { %v1601_v5 = vpop.eup %1600  ;;  %1610 = vpow2.f32 %v598_v61  ;;  %v600_v6 = vmul.f32 1.442695, %v585_v0  ;;  %v839_v0 = vld [vmem:[%s2559_s1 + $0x18] sm:$0xff] }
 0x1a6   :  { %v592_v8 = vmul.f32 1.442695, %v581_v4  ;;  %v605_v9 = vsel %vm553_vm2, %v1601_v5, 0.0  ;;  %v1603_v10 = vpop.eup %1602  ;;  %v842_v4 = vld [vmem:[%s2559_s1 + $0x30] sm:$0xff] }
 0x1a7   :  { %606 = vadd.xlane.f32.xlu0 %v605_v9  ;;  %v602_v15 = vsel %vm553_vm2, %v1603_v10, 0.0 }
 0x1a8   :  { %1612 = vpow2.f32 %v592_v8 }
 0x1a9   :  { %v1605_v13 = vpop.eup %1604  ;;  %1614 = vpow2.f32 %v600_v6  ;;  %v843_v6 = vld [vmem:[%s2559_s1 + $0x38] sm:$0xff] }
 0x1aa   :  { %v617_v14 = vsel %vm553_vm2, %v1605_v13, 0.0  ;;  %v1607_v16 = vpop.eup %1606 }
 0x1ab   :  { %618 = vadd.xlane.f32.xlu1 %v617_v14  ;;  %603 = vadd.xlane.f32.xlu0 %v602_v15  ;;  %v614_v20 = vsel %vm553_vm2, %v1607_v16, 0.0 }
 0x1ae   :  { %v1609_v19 = vpop.eup %1608 }
 0x1af   :  { %v1611_v21 = vpop.eup %1610  ;;  %615 = vadd.xlane.f32.xlu1 %v614_v20  ;;  %v608_v22 = vsel %vm553_vm2, %v1609_v19, 0.0 }
 0x1b0   :  { %609 = vadd.xlane.f32.xlu0 %v608_v22  ;;  %v620_v24 = vsel %vm553_vm2, %v1611_v21, 0.0 }
 0x1b2   :  { %v1613_v23 = vpop.eup %1612 }
 0x1b3   :  { %v1615_v25 = vpop.eup %1614  ;;  %621 = vadd.xlane.f32.xlu1 %v620_v24  ;;  %v611_v26 = vsel %vm553_vm2, %v1613_v23, 0.0 }
 0x1b4   :  { %612 = vadd.xlane.f32.xlu0 %v611_v26  ;;  %v623_v29 = vsel %vm553_vm2, %v1615_v25, 0.0 }
 0x1b7   :  { %624 = vadd.xlane.f32.xlu1 %v623_v29 }
 0x234   :  { %v607_v2 = vpop.xlane.xlu0 %606 }
 0x235   :  { %1616 = vrcp.f32 %v607_v2 }
 0x238   :  { %v619_v30 = vpop.xlane.xlu1 %618  ;;  %v604_v31 = vpop.xlane.xlu0 %603 }
 0x239   :  { %1618 = vrcp.f32 %v604_v31 }
 0x23a   :  { %1620 = vrcp.f32 %v619_v30 }
 0x23c   :  { %v616_v32 = vpop.xlane.xlu1 %615 }
 0x23d   :  { %1622 = vrcp.f32 %v616_v32  ;;  %v610_v35 = vpop.xlane.xlu0 %609 }
 0x23e   :  { %1624 = vrcp.f32 %v610_v35 }
 0x23f   :  { %v1617_v38 = vpop.eup %1616 }
 0x240   :  { %v622_v36 = vpop.xlane.xlu1 %621  ;;  %v635_v17 = vmul.f32 %v1617_v38, %v1601_v5 }
 0x241   :  { %1626 = vrcp.f32 %v622_v36  ;;  %v613_v37 = vpop.xlane.xlu0 %612 }
 0x242   :  { %1628 = vrcp.f32 %v613_v37 }
 0x243   :  { %v1619_v3 = vpop.eup %1618 }
 0x244   :  { %v625_v7 = vpop.xlane.xlu1 %624  ;;  %v634_v11 = vmul.f32 %v1619_v3, %v1603_v10  ;;  %v1621_v12 = vpop.eup %1620 }
 0x245   :  { %1630 = vrcp.f32 %v625_v7  ;;  %v639_v33 = vmul.f32 %v1621_v12, %v1605_v13 }
 0x246   :  { %1412 = vmatprep.mubr.msk.f32.mxu0 %vm553_vm2, %v634_v11 }
 0x247   :  { %v1623_v18 = vpop.eup %1622  ;;  %1413 = vmatmul.mubr.msk.f32.vlgmr.msra.gmra.mrb[4].mxu0 %vm553_vm2, %v635_v17 }
 0x248   :  { %v1625_v27 = vpop.eup %1624  ;;  %v638_v28 = vmul.f32 %v1623_v18, %v1607_v16 }
 0x249   :  { %v636_v34 = vmul.f32 %v1625_v27, %v1609_v19 }
 0x24a   :  { %1442 = vmatprep.mubr.msk.f32.mxu1 %vm553_vm2, %v638_v28 }
 0x24b   :  { %v1627_v39 = vpop.eup %1626  ;;  %1415 = vmatprep.mubr.msk.f32.mxu0 %vm553_vm2, %v636_v34  ;;  %1443 = vmatmul.mubr.msk.f32.vlgmr.msra.gmra.mrb[4].mxu1 %vm553_vm2, %v639_v33 }
 0x24c   :  { %v1629_v40 = vpop.eup %1628  ;;  %v640_v41 = vmul.f32 %v1627_v39, %v1611_v21 }
 0x24d   :  { %v637_v42 = vmul.f32 %v1629_v40, %v1613_v23 }
 0x24e   :  { %1445 = vmatprep.mubr.msk.f32.mxu1 %vm553_vm2, %v640_v41 }
 0x24f   :  { %v1631_v43 = vpop.eup %1630  ;;  %1416 = vmatmul.mubr.msk.f32.gmra.mrb[6].mxu0 %vm553_vm2, %v637_v42 }
 0x250   :  { %v641_v44 = vmul.f32 %v1631_v43, %v1615_v25 }
 0x252   :  { %1446 = vmatmul.mubr.msk.f32.gmra.mrb[6].mxu1 %vm553_vm2, %v641_v44 }
 0x31a   :  { %v1414_v47 = vpop.f32.mrb[4].mxu0 }
 0x31b   :  { %v2099_v48 = vadd.f32 %v1414_v47, %v837_v45  ;;  %v720_v49 = vpop.f32.mrb[5].mxu0 }
 0x31c   :  { %v2104_v51 = vadd.f32 %v836_v46, %v720_v49 }
 0x31d   :  { %v855_v54 = vsel %vm286_vm0, %v2099_v48, 0.0 }
 0x31e   :  { %v1444_v53 = vpop.f32.mrb[4].mxu1  ;;  %856 = vadd.xlane.f32.xlu1 %v855_v54  ;;  %v852_v57 = vsel %vm286_vm0, %v2104_v51, 0.0 }
 0x31f   :  { %v849_v55 = vadd.f32 %v1444_v53, %v841_v50  ;;  %v817_v56 = vpop.f32.mrb[5].mxu1  ;;  %853 = vadd.xlane.f32.xlu0 %v852_v57 }
 0x320   :  { %v848_v58 = vadd.f32 %v840_v52, %v817_v56 }
 0x321   :  { %v867_v59 = vsel %vm286_vm0, %v849_v55, 0.0 }
 0x322   :  { %v1417_v61 = vpop.f32.mrb[6].mxu0  ;;  %v864_v62 = vsel %vm286_vm0, %v848_v58, 0.0  ;;  %868 = vadd.xlane.f32.xlu1 %v867_v59 }
 0x323   :  { %v730_v63 = vpop.f32.mrb[7].mxu0  ;;  %865 = vadd.xlane.f32.xlu0 %v864_v62  ;;  %v847_v10 = vadd.f32 %v1417_v61, %v839_v0 }
 0x324   :  { %v846_v1 = vadd.f32 %v838_v60, %v730_v63 }
 0x325   :  { %v1447_v5 = vpop.f32.mrb[6].mxu1  ;;  %v861_v16 = vsel %vm286_vm0, %v847_v10, 0.0 }
 0x326   :  { %v827_v8 = vpop.f32.mrb[7].mxu1  ;;  %v858_v9 = vsel %vm286_vm0, %v846_v1, 0.0  ;;  %v851_v14 = vadd.f32 %v1447_v5, %v843_v6  ;;  %v35_v5 = vld [vmem:[%s2558_s0 + $0x68] sm:$0xff] }
 0x327   :  { %v850_v13 = vadd.f32 %v842_v4, %v827_v8  ;;  %859 = vadd.xlane.f32.xlu0 %v858_v9  ;;  %v58_v4 = vld [vmem:[%s2558_s0 + $0x160] sm:$0xff]  ;;  %v59_v6 = vld [vmem:[%s2558_s0 + $0x168] sm:$0xff]  ;;  %v36_v8 = vld [vmem:[%s2558_s0 + $0x70] sm:$0xff] }
 0x328   :  { %v873_v19 = vsel %vm286_vm0, %v851_v14, 0.0  ;;  %v60_v9 = vld [vmem:[%s2558_s0 + $0x170] sm:$0xff] }
 0x329   :  { %v870_v15 = vsel %vm286_vm0, %v850_v13, 0.0 }
 0x32a   :  { %871 = vadd.xlane.f32.xlu1 %v870_v15  ;;  %v86_v15 = vld [vmem:[%s2558_s0 + $0x240] sm:$0xff] }
 0x32b   :  { %862 = vadd.xlane.f32.xlu0 %v861_v16  ;;  %v110_v16 = vld [vmem:[%s2558_s0 + $0x340] sm:$0xff] }
 0x32e   :  { %874 = vadd.xlane.f32.xlu1 %v873_v19  ;;  %v1009_v19 = vadd.f32 %v59_v6, %v35_v5  ;;  %v96_v6 = vld [vmem:[%s2558_s0 + $0x290] sm:$0xff] }
 0x3ab   :  { %v857_v20 = vpop.xlane.xlu1 %856 }
 0x3ac   :  { %v854_v21 = vpop.xlane.xlu0 %853 }
 0x3ad   :  { %v876_v25 = vadd.f32 %v857_v20, %v854_v21  ;;  %v1010_v20 = vadd.f32 %v60_v9, %v36_v8  ;;  %v116_v8 = vld [vmem:[%s2558_s0 + $0x370] sm:$0xff] }
 0x3af   :  { %v869_v23 = vpop.xlane.xlu1 %868 }
 0x3b0   :  { %v866_v22 = vpop.xlane.xlu0 %865 }
 0x3b1   :  { %v885_v29 = vadd.f32 %v869_v23, %v866_v22  ;;  %v1012_v23 = vadd.f32 %v110_v16, %v86_v15 }
 0x3b4   :  { %v860_v24 = vpop.xlane.xlu0 %859 }
 0x3b5   :  { %v877_v2 = vadd.f32 %v876_v25, %v860_v24  ;;  %v1249_v24 = vmul.f32 -1.442695, %v1009_v19  ;;  %v1250_v25 = vmul.f32 -1.442695, %v1010_v20 }
 0x3b7   :  { %v872_v26 = vpop.xlane.xlu1 %871 }
 0x3b8   :  { %v863_v30 = vpop.xlane.xlu0 %862  ;;  %v886_v31 = vadd.f32 %v885_v29, %v872_v26  ;;  %v1252_v29 = vmul.f32 -1.442695, %v1012_v23 }
 0x3b9   :  { %v878_v32 = vadd.f32 %v877_v2, %v863_v30  ;;  %v87_v2 = vld [vmem:[%s2558_s0 + $0x248] sm:$0xff] }
 0x3ba   :  { %v111_v30 = vld [vmem:[%s2558_s0 + $0x348] sm:$0xff] }
 0x3bb   :  { %v875_v35 = vpop.xlane.xlu1 %874  ;;  %v879_v36 = vrot.slane %v878_v32, 4 }
 0x3bc   :  { %v887_v37 = vadd.f32 %v886_v31, %v875_v35  ;;  %v88_v31 = vld [vmem:[%s2558_s0 + $0x250] sm:$0xff]  ;;  %v89_v35 = vld [vmem:[%s2558_s0 + $0x258] sm:$0xff] }
 0x3bd   :  { %v880_v38 = vadd.f32 %v879_v36, %v878_v32  ;;  %v112_v32 = vld [vmem:[%s2558_s0 + $0x350] sm:$0xff]  ;;  %v113_v36 = vld [vmem:[%s2558_s0 + $0x358] sm:$0xff] }
 0x3be   :  { %v888_v3 = vrot.slane %v887_v37, 4 }
 0x3bf   :  { %v881_v7 = vrot.slane %v880_v38, 2 }
 0x3c0   :  { %v889_v11 = vadd.f32 %v888_v3, %v887_v37  ;;  %v1013_v37 = vadd.f32 %v111_v30, %v87_v2  ;;  %v62_v3 = vld [vmem:[%s2558_s0 + $0x180] sm:$0xff] }
 0x3c1   :  { %v882_v12 = vadd.f32 %v881_v7, %v880_v38  ;;  %v42_v38 = vld [vmem:[%s2558_s0 + $0xa0] sm:$0xff]  ;;  %v1014_v7 = vadd.f32 %v112_v32, %v88_v31 }
 0x3c2   :  { %v890_v17 = vrot.slane %v889_v11, 2 }
 0x3c3   :  { %v883_v18 = vrot.slane %v882_v12, 1 }
 0x3c4   :  { %v891_v27 = vadd.f32 %v890_v17, %v889_v11  ;;  %v43_v11 = vld [vmem:[%s2558_s0 + $0xa8] sm:$0xff]  ;;  %v1015_v17 = vadd.f32 %v113_v36, %v89_v35 }
 0x3c5   :  { %v884_v28 = vadd.f32 %v883_v18, %v882_v12  ;;  %v63_v12 = vld [vmem:[%s2558_s0 + $0x188] sm:$0xff]  ;;  %v44_v18 = vld [vmem:[%s2558_s0 + $0xb0] sm:$0xff] }
 0x3c6   :  { %v892_v33 = vrot.slane %v891_v27, 1 }
 0x3c7   :  { %v894_v34 = vmul.f32 0.00390625, %v884_v28 }
 0x3c8   :  { %v893_v39 = vadd.f32 %v892_v33, %v891_v27  ;;  %v64_v27 = vld [vmem:[%s2558_s0 + $0x190] sm:$0xff]  ;;  %v45_v33 = vld [vmem:[%s2558_s0 + $0xb8] sm:$0xff] }
 0x3c9   :  { %v2132_v41 = vsub.f32 %v2099_v48, %v894_v34  ;;  %v2135_v42 = vsub.f32 %v2104_v51, %v894_v34  ;;  %v2147_v49 = vsub.f32 %v846_v1, %v894_v34  ;;  %v34_v1 = vld [vmem:[%s2558_s0 + $0x60] sm:$0xff] }
 0x3ca   :  { %v895_v40 = vmul.f32 0.00390625, %v893_v39  ;;  %v1253_v39 = vmul.f32 -1.442695, %v1013_v37 }
 0x3cb   :  { %v905_v43 = vmul.f32 %v2132_v41, %v2132_v41  ;;  %v904_v44 = vmul.f32 %v2135_v42, %v2135_v42  ;;  %v906_v56 = vmul.f32 %v2147_v49, %v2147_v49 }
 0x3cc   :  { %v2141_v45 = vsub.f32 %v849_v55, %v895_v40  ;;  %v2143_v46 = vsub.f32 %v848_v58, %v895_v40  ;;  %v2145_v47 = vsub.f32 %v850_v13, %v895_v40  ;;  %v2161_v57 = vsub.f32 %v851_v14, %v895_v40  ;;  %v37_v13 = vld [vmem:[%s2558_s0 + $0x78] sm:$0xff] }
 0x3cd   :  { %v915_v48 = vsel %vm286_vm0, %v905_v43, 0.0  ;;  %v912_v50 = vsel %vm286_vm0, %v904_v44, 0.0  ;;  %v2163_v58 = vsub.f32 %v847_v10, %v894_v34  ;;  %v918_v60 = vsel %vm286_vm0, %v906_v56, 0.0  ;;  %v61_v14 = vld [vmem:[%s2558_s0 + $0x178] sm:$0xff]  ;;  %v94_v43 = vld [vmem:[%s2558_s0 + $0x280] sm:$0xff] }
 0x3ce   :  { %v909_v51 = vmul.f32 %v2141_v45, %v2141_v45  ;;  %v908_v52 = vmul.f32 %v2143_v46, %v2143_v46  ;;  %916 = vadd.xlane.f32.xlu1 %v915_v48  ;;  %913 = vadd.xlane.f32.xlu0 %v912_v50  ;;  %v910_v55 = vmul.f32 %v2145_v47, %v2145_v47  ;;  %v65_v34 = vld [vmem:[%s2558_s0 + $0x198] sm:$0xff]  ;;  %v114_v44 = vld [vmem:[%s2558_s0 + $0x360] sm:$0xff]  ;;  %v1254_v48 = vmul.f32 -1.442695, %v1014_v7 }
 0x3cf   :  { %v911_v61 = vmul.f32 %v2161_v57, %v2161_v57  ;;  %v907_v62 = vmul.f32 %v2163_v58, %v2163_v58  ;;  %v1008_v10 = vadd.f32 %v58_v4, %v34_v1  ;;  %v1011_v21 = vadd.f32 %v61_v14, %v37_v13  ;;  %v115_v1 = vld [vmem:[%s2558_s0 + $0x368] sm:$0xff]  ;;  %v97_v13 = vld [vmem:[%s2558_s0 + $0x298] sm:$0xff] }
 0x3d0   :  { %v927_v53 = vsel %vm286_vm0, %v909_v51, 0.0  ;;  %v924_v54 = vsel %vm286_vm0, %v908_v52, 0.0  ;;  %v930_v59 = vsel %vm286_vm0, %v910_v55, 0.0  ;;  %v1064_v40 = vadd.f32 %v62_v3, %v42_v38  ;;  %v117_v14 = vld [vmem:[%s2558_s0 + $0x378] sm:$0xff]  ;;  %v38_v38 = vld [vmem:[%s2558_s0 + $0x80] sm:$0xff] }
 0x3d1   :  { %v933_v63 = vsel %vm286_vm0, %v911_v61, 0.0  ;;  %v921_v0 = vsel %vm286_vm0, %v907_v62, 0.0  ;;  %v1248_v22 = vmul.f32 -1.442695, %v1008_v10  ;;  %v1251_v26 = vmul.f32 -1.442695, %v1011_v21 }
 0x3d2   :  { %928 = vadd.xlane.f32.xlu1 %v927_v53  ;;  %925 = vadd.xlane.f32.xlu0 %v924_v54  ;;  %v1065_v50 = vadd.f32 %v63_v12, %v43_v11  ;;  %v1255_v52 = vmul.f32 -1.442695, %v1015_v17  ;;  %v1066_v53 = vadd.f32 %v64_v27, %v44_v18  ;;  %v1067_v56 = vadd.f32 %v65_v34, %v45_v33  ;;  %v66_v3 = vld [vmem:[%s2558_s0 + $0x1a0] sm:$0xff]  ;;  %v39_v17 = vld [vmem:[%s2558_s0 + $0x88] sm:$0xff] }
 0x3d3   :  { %1632 = vpow2.f32 %v1248_v22  ;;  %v1068_v61 = vadd.f32 %v114_v44, %v94_v43  ;;  %v1072_v62 = vadd.f32 1.0, %v1064_v40  ;;  %v1070_v22 = vadd.f32 %v116_v8, %v96_v6  ;;  %v67_v18 = vld [vmem:[%s2558_s0 + $0x1a8] sm:$0xff] }
 0x3d4   :  { %1634 = vpow2.f32 %v1249_v24  ;;  %v1073_v5 = vadd.f32 1.0, %v1065_v50  ;;  %v1074_v10 = vadd.f32 1.0, %v1066_v53  ;;  %v1075_v16 = vadd.f32 1.0, %v1067_v56  ;;  %v68_v53 = vld [vmem:[%s2558_s0 + $0x1b0] sm:$0xff]  ;;  %v41_v56 = vld [vmem:[%s2558_s0 + $0x98] sm:$0xff] }
 0x3d5   :  { %1636 = vpow2.f32 %v1250_v25  ;;  %v1076_v20 = vadd.f32 1.0, %v1068_v61  ;;  %v1256_v21 = vmul.f32 -1.442695, %v1072_v62  ;;  %v1071_v24 = vadd.f32 %v117_v14, %v97_v13  ;;  %v90_v62 = vld [vmem:[%s2558_s0 + $0x260] sm:$0xff] }
 0x3d6   :  { %931 = vadd.xlane.f32.xlu1 %v930_v59  ;;  %919 = vadd.xlane.f32.xlu0 %v918_v60  ;;  %1638 = vpow2.f32 %v1251_v26  ;;  %v1257_v23 = vmul.f32 -1.442695, %v1073_v5  ;;  %v1258_v25 = vmul.f32 -1.442695, %v1074_v10  ;;  %v1259_v26 = vmul.f32 -1.442695, %v1075_v16 }
 0x3d7   :  { %1640 = vpow2.f32 %v1252_v29  ;;  %v1260_v2 = vmul.f32 -1.442695, %v1076_v20  ;;  %v1078_v30 = vadd.f32 1.0, %v1070_v22  ;;  %v1079_v32 = vadd.f32 1.0, %v1071_v24  ;;  %v119_v16 = vld [vmem:[%s2558_s0 + $0x388] sm:$0xff]  ;;  %v92_v20 = vld [vmem:[%s2558_s0 + $0x270] sm:$0xff] }
 0x3d8   :  { %1642 = vpow2.f32 %v1253_v39  ;;  %v1128_v40 = vadd.f32 %v66_v3, %v38_v38  ;;  %v1129_v44 = vadd.f32 %v67_v18, %v39_v17  ;;  %v121_v24 = vld [vmem:[%s2558_s0 + $0x398] sm:$0xff]  ;;  %v70_v3 = vld [vmem:[%s2558_s0 + $0x1c0] sm:$0xff]  ;;  %v72_v18 = vld [vmem:[%s2558_s0 + $0x1d0] sm:$0xff] }
 0x3d9   :  { %1644 = vpow2.f32 %v1254_v48  ;;  %v1263_v34 = vmul.f32 -1.442695, %v1079_v32 }
 0x3da   :  { %934 = vadd.xlane.f32.xlu1 %v933_v63  ;;  %922 = vadd.xlane.f32.xlu0 %v921_v0  ;;  %v95_v0 = vld [vmem:[%s2558_s0 + $0x288] sm:$0xff]  ;;  %1646 = vpow2.f32 %v1255_v52  ;;  %v40_v52 = vld [vmem:[%s2558_s0 + $0x90] sm:$0xff] }
 0x3db   :  { %v1069_v19 = vadd.f32 %v115_v1, %v95_v0  ;;  %v1130_v5 = vadd.f32 %v68_v53, %v40_v52  ;;  %v124_v52 = vld [vmem:[%s2558_s0 + $0x3b0] sm:$0xff] }
 0x3dd   :  { %v1633_v28 = vpop.eup %1632  ;;  %v1077_v29 = vadd.f32 1.0, %v1069_v19 }
 0x3de   :  { %v1635_v51 = vpop.eup %1634  ;;  %v1040_v55 = vadd.f32 1.0, %v1633_v28  ;;  %v1262_v28 = vmul.f32 -1.442695, %v1078_v30 }
 0x3df   :  { %v1637_v54 = vpop.eup %1636  ;;  %v1041_v60 = vadd.f32 1.0, %v1635_v51  ;;  %v1261_v11 = vmul.f32 -1.442695, %v1077_v29 }
 0x3e0   :  { %v1639_v59 = vpop.eup %1638  ;;  %v1042_v4 = vadd.f32 1.0, %v1637_v54  ;;  %1648 = vrcp.f32 %v1040_v55 }
 0x3e1   :  { %v1641_v63 = vpop.eup %1640  ;;  %v1043_v9 = vadd.f32 1.0, %v1639_v59  ;;  %1650 = vrcp.f32 %v1041_v60  ;;  %v69_v59 = vld [vmem:[%s2558_s0 + $0x1b8] sm:$0xff] }
 0x3e2   :  { %v1044_v15 = vadd.f32 1.0, %v1641_v63  ;;  %1652 = vrcp.f32 %v1042_v4  ;;  %v1643_v31 = vpop.eup %1642  ;;  %v118_v63 = vld [vmem:[%s2558_s0 + $0x380] sm:$0xff] }
 0x3e3   :  { %1654 = vrcp.f32 %v1043_v9  ;;  %v1645_v35 = vpop.eup %1644  ;;  %v1045_v36 = vadd.f32 1.0, %v1643_v31  ;;  %v1131_v9 = vadd.f32 %v69_v59, %v41_v56  ;;  %v1132_v13 = vadd.f32 %v118_v63, %v90_v62 }
 0x3e4   :  { %1656 = vrcp.f32 %v1044_v15  ;;  %v1647_v37 = vpop.eup %1646  ;;  %v1046_v7 = vadd.f32 1.0, %v1645_v35  ;;  %v91_v15 = vld [vmem:[%s2558_s0 + $0x268] sm:$0xff] }
 0x3e5   :  { %1658 = vpow2.f32 %v1256_v21  ;;  %v1047_v27 = vadd.f32 1.0, %v1647_v37  ;;  %v120_v21 = vld [vmem:[%s2558_s0 + $0x390] sm:$0xff] }
 0x3e6   :  { %1660 = vpow2.f32 %v1257_v23  ;;  %v93_v23 = vld [vmem:[%s2558_s0 + $0x278] sm:$0xff]  ;;  %v1134_v32 = vadd.f32 %v120_v21, %v92_v20 }
 0x3e7   :  { %1662 = vpow2.f32 %v1258_v25 }
 0x3e8   :  { %1664 = vpow2.f32 %v1259_v26 }
 0x3e9   :  { %1666 = vpow2.f32 %v1260_v2  ;;  %v1133_v2 = vadd.f32 %v119_v16, %v91_v15 }
 0x3ea   :  { %v2275_v12 = vpop.eup %1648  ;;  %1668 = vrcp.f32 %v1045_v36  ;;  %v1135_v36 = vadd.f32 %v121_v24, %v93_v23 }
 0x3eb   :  { %v2283_v33 = vpop.eup %1650  ;;  %1670 = vrcp.f32 %v1046_v7 }
 0x3ec   :  { %v2285_v39 = vpop.eup %1652  ;;  %1672 = vrcp.f32 %v1047_v27 }
 0x3ed   :  { %v2287_v43 = vpop.eup %1654  ;;  %1674 = vpow2.f32 %v1261_v11  ;;  %v71_v11 = vld [vmem:[%s2558_s0 + $0x1c8] sm:$0xff] }
 0x3ee   :  { %v2289_v48 = vpop.eup %1656  ;;  %1676 = vpow2.f32 %v1262_v28  ;;  %v73_v28 = vld [vmem:[%s2558_s0 + $0x1d8] sm:$0xff] }
 0x3ef   :  { %v1659_v50 = vpop.eup %1658  ;;  %1678 = vpow2.f32 %v1263_v34 }
 0x3f0   :  { %v1661_v51 = vpop.eup %1660  ;;  %v1104_v54 = vadd.f32 1.0, %v1659_v50  ;;  %1680 = vtanh.f32 %v1128_v40  ;;  %v122_v40 = vld [vmem:[%s2558_s0 + $0x3a0] sm:$0xff]  ;;  %v123_v50 = vld [vmem:[%s2558_s0 + $0x3a8] sm:$0xff] }
 0x3f1   :  { %v1663_v55 = vpop.eup %1662  ;;  %v1105_v60 = vadd.f32 1.0, %v1661_v51  ;;  %1682 = vtanh.f32 %v1129_v44 }
 0x3f2   :  { %v1665_v61 = vpop.eup %1664  ;;  %v1106_v0 = vadd.f32 1.0, %v1663_v55  ;;  %1684 = vrcp.f32 %v1104_v54  ;;  %v125_v54 = vld [vmem:[%s2558_s0 + $0x3b8] sm:$0xff] }
 0x3f3   :  { %v1667_v1 = vpop.eup %1666  ;;  %v1107_v4 = vadd.f32 1.0, %v1665_v61  ;;  %1686 = vrcp.f32 %v1105_v60 }
 0x3f4   :  { %v2309_v6 = vpop.eup %1668  ;;  %v1108_v8 = vadd.f32 1.0, %v1667_v1  ;;  %1688 = vrcp.f32 %v1106_v0 }
 0x3f5   :  { %v2311_v10 = vpop.eup %1670  ;;  %1690 = vrcp.f32 %v1107_v4 }
 0x3f6   :  { %v2313_v14 = vpop.eup %1672  ;;  %1692 = vrcp.f32 %v1108_v8 }
 0x3f7   :  { %v1675_v19 = vpop.eup %1674  ;;  %1694 = vtanh.f32 %v1130_v5 }
 0x3f8   :  { %v1677_v22 = vpop.eup %1676  ;;  %v1109_v25 = vadd.f32 1.0, %v1675_v19  ;;  %1696 = vtanh.f32 %v1131_v9 }
 0x3f9   :  { %v1679_v26 = vpop.eup %1678  ;;  %v1110_v29 = vadd.f32 1.0, %v1677_v22  ;;  %1698 = vtanh.f32 %v1132_v13 }
 0x3fa   :  { %v1681_v30 = vpop.eup %1680  ;;  %v1111_v31 = vadd.f32 1.0, %v1679_v26  ;;  %1700 = vrcp.f32 %v1109_v25 }
 0x3fb   :  { %v1683_v35 = vpop.eup %1682  ;;  %1702 = vrcp.f32 %v1110_v29  ;;  %v1160_v62 = vmul.f32 %v1681_v30, %v2275_v12 }
 0x3fc   :  { %v1685_v37 = vpop.eup %1684  ;;  %1704 = vrcp.f32 %v1111_v31  ;;  %v1161_v0 = vmul.f32 %v1683_v35, %v2283_v33  ;;  %v74_v35 = vld [vmem:[%s2558_s0 + $0x1e0] sm:$0xff] }
 0x3fd   :  { %v1687_v38 = vpop.eup %1686  ;;  %1706 = vtanh.f32 %v1133_v2 }
 0x3fe   :  { %v1689_v7 = vpop.eup %1688  ;;  %1708 = vtanh.f32 %v1134_v32 }
 0x3ff   :  { %v1691_v17 = vpop.eup %1690  ;;  %1710 = vtanh.f32 %v1135_v36  ;;  %v98_v36 = vld [vmem:[%s2558_s0 + $0x2c0] sm:$0xff] }
 0x400   :  { %v1693_v27 = vpop.eup %1692  ;;  %1712 = vtanh.f32 %v70_v3  ;;  %v76_v3 = vld [vmem:[%s2558_s0 + $0x1f0] sm:$0xff] }
 0x401   :  { %v1695_v34 = vpop.eup %1694  ;;  %1714 = vtanh.f32 %v71_v11  ;;  %v77_v11 = vld [vmem:[%s2558_s0 + $0x1f8] sm:$0xff] }
 0x402   :  { %v1697_v44 = vpop.eup %1696  ;;  %1716 = vtanh.f32 %v72_v18  ;;  %v1162_v5 = vmul.f32 %v1695_v34, %v2285_v39  ;;  %v186_v18 = vadd.f32 %v98_v36, %v74_v35  ;;  %v22_v34 = vld [vmem:[%s2558_s0] sm:$0xff] }
 0x403   :  { %v1699_v51 = vpop.eup %1698  ;;  %1718 = vtanh.f32 %v73_v28  ;;  %v1163_v13 = vmul.f32 %v1697_v44, %v2287_v43  ;;  %v46_v28 = vld [vmem:[%s2558_s0 + $0xe0] sm:$0xff]  ;;  %v47_v44 = vld [vmem:[%s2558_s0 + $0xe8] sm:$0xff] }
 0x404   :  { %v1701_v53 = vpop.eup %1700  ;;  %1720 = vtanh.f32 %v122_v40  ;;  %v1164_v19 = vmul.f32 %v1699_v51, %v2289_v48 }
 0x405   :  { %v1703_v55 = vpop.eup %1702  ;;  %1722 = vtanh.f32 %v123_v50  ;;  %v23_v50 = vld [vmem:[%s2558_s0 + $0x8] sm:$0xff] }
 0x406   :  { %v1705_v56 = vpop.eup %1704  ;;  %1724 = vtanh.f32 %v124_v52  ;;  %v48_v52 = vld [vmem:[%s2558_s0 + $0xf0] sm:$0xff] }
 0x407   :  { %v1707_v59 = vpop.eup %1706  ;;  %1726 = vtanh.f32 %v125_v54  ;;  %v1204_v54 = vmul.f32 -1.442695, %v186_v18 }
 0x408   :  { %v1709_v60 = vpop.eup %1708  ;;  %v1165_v12 = vmul.f32 %v1707_v59, %v2309_v6  ;;  %v182_v59 = vadd.f32 %v46_v28, %v22_v34 }
 0x409   :  { %v1711_v61 = vpop.eup %1710  ;;  %v1166_v25 = vmul.f32 %v1709_v60, %v2311_v10  ;;  %1728 = vpow2.f32 %v1204_v54 }
 0x40a   :  { %v1713_v63 = vpop.eup %1712  ;;  %v1167_v48 = vmul.f32 %v1711_v61, %v2313_v14  ;;  %v183_v61 = vadd.f32 %v47_v44, %v23_v50 }
 0x40b   :  { %v1715_v1 = vpop.eup %1714  ;;  %v1152_v4 = vmul.f32 %v1713_v63, %v1685_v37  ;;  %v75_v37 = vld [vmem:[%s2558_s0 + $0x1e8] sm:$0xff] }
 0x40c   :  { %v1717_v8 = vpop.eup %1716  ;;  %v1153_v9 = vmul.f32 %v1715_v1, %v1687_v38  ;;  %v99_v38 = vld [vmem:[%s2558_s0 + $0x2c8] sm:$0xff] }
 0x40d   :  { %v1719_v15 = vpop.eup %1718  ;;  %v1154_v16 = vmul.f32 %v1717_v8, %v1689_v7  ;;  %v1168_v20 = vadd.f32 %v1160_v62, %v1152_v4  ;;  %v100_v7 = vld [vmem:[%s2558_s0 + $0x2d0] sm:$0xff]  ;;  %v1200_v8 = vmul.f32 -1.442695, %v182_v59 }
 0x40e   :  { %v1721_v21 = vpop.eup %1720  ;;  %v1155_v22 = vmul.f32 %v1719_v15, %v1691_v17  ;;  %v1169_v23 = vadd.f32 %v1161_v0, %v1153_v9  ;;  %v101_v17 = vld [vmem:[%s2558_s0 + $0x2d8] sm:$0xff]  ;;  %v188_v40 = vadd.f32 %v100_v7, %v76_v3  ;;  %v1201_v9 = vmul.f32 -1.442695, %v183_v61  ;;  %v51_v61 = vld [vmem:[%s2558_s0 + $0x108] sm:$0xff] }
 0x40f   :  { %v1723_v24 = vpop.eup %1722  ;;  %v1156_v33 = vmul.f32 %v1721_v21, %v1693_v27  ;;  %v1170_v26 = vadd.f32 %v1162_v5, %v1154_v16  ;;  %1176 = vst.msk [vmem:[%s2560_s6] sm:$0xff] %vm286_vm0, %v1168_v20  ;;  %v187_v27 = vadd.f32 %v99_v38, %v75_v37  ;;  %v189_v51 = vadd.f32 %v101_v17, %v77_v11  ;;  %v78_v20 = vld [vmem:[%s2558_s0 + $0x200] sm:$0xff] }
 0x410   :  { %v1725_v39 = vpop.eup %1724  ;;  %v1157_v43 = vmul.f32 %v1723_v24, %v1701_v53  ;;  %v1171_v29 = vadd.f32 %v1163_v13, %v1155_v22  ;;  %1177 = vst.msk [vmem:[%s2560_s6 + $0x8] sm:$0xff] %vm286_vm0, %v1169_v23  ;;  %v24_v53 = vld [vmem:[%s2558_s0 + $0x10] sm:$0xff]  ;;  %v1206_v62 = vmul.f32 -1.442695, %v188_v40  ;;  %v102_v21 = vld [vmem:[%s2558_s0 + $0x2e0] sm:$0xff]  ;;  %v79_v22 = vld [vmem:[%s2558_s0 + $0x208] sm:$0xff] }
 0x411   :  { %v1727_v6 = vpop.eup %1726  ;;  %v1158_v2 = vmul.f32 %v1725_v39, %v1703_v55  ;;  %v1172_v30 = vadd.f32 %v1164_v19, %v1156_v33  ;;  %1178 = vst.msk [vmem:[%s2560_s6 + $0x10] sm:$0xff] %vm286_vm0, %v1170_v26  ;;  %v49_v55 = vld [vmem:[%s2558_s0 + $0xf8] sm:$0xff]  ;;  %v1205_v60 = vmul.f32 -1.442695, %v187_v27  ;;  %v184_v63 = vadd.f32 %v48_v52, %v24_v53  ;;  %v80_v33 = vld [vmem:[%s2558_s0 + $0x210] sm:$0xff] }
 0x412   :  { %v1159_v10 = vmul.f32 %v1727_v6, %v1705_v56  ;;  %v1173_v31 = vadd.f32 %v1165_v12, %v1157_v43  ;;  %1179 = vst.msk [vmem:[%s2560_s6 + $0x18] sm:$0xff] %vm286_vm0, %v1171_v29  ;;  %v25_v56 = vld [vmem:[%s2558_s0 + $0x18] sm:$0xff]  ;;  %v1207_v0 = vmul.f32 -1.442695, %v189_v51  ;;  %v103_v12 = vld [vmem:[%s2558_s0 + $0x2e8] sm:$0xff]  ;;  %v242_v29 = vadd.f32 %v102_v21, %v78_v20 }
 0x413   :  { %v1174_v14 = vadd.f32 %v1166_v25, %v1158_v2  ;;  %1180 = vst.msk [vmem:[%s2560_s6 + $0x20] sm:$0xff] %vm286_vm0, %v1172_v30  ;;  %v185_v1 = vadd.f32 %v49_v55, %v25_v56  ;;  %1730 = vpow2.f32 %v1205_v60  ;;  %v1202_v13 = vmul.f32 -1.442695, %v184_v63  ;;  %v104_v25 = vld [vmem:[%s2558_s0 + $0x2f0] sm:$0xff]  ;;  %v81_v43 = vld [vmem:[%s2558_s0 + $0x218] sm:$0xff]  ;;  %v1729_v6 = vpop.eup %1728  ;;  %v50_v55 = vld [vmem:[%s2558_s0 + $0x100] sm:$0xff] }
 0x414   :  { %v1175_v32 = vadd.f32 %v1167_v48, %v1159_v10  ;;  %1181 = vst.msk [vmem:[%s2560_s6 + $0x28] sm:$0xff] %vm286_vm0, %v1173_v31  ;;  %1732 = vpow2.f32 %v1206_v62  ;;  %v105_v48 = vld [vmem:[%s2558_s0 + $0x2f8] sm:$0xff]  ;;  %v243_v2 = vadd.f32 %v103_v12, %v79_v22  ;;  %v218_v3 = vadd.f32 1.0, %v1729_v6  ;;  %v26_v56 = vld [vmem:[%s2558_s0 + $0x20] sm:$0xff]  ;;  %v27_v62 = vld [vmem:[%s2558_s0 + $0x28] sm:$0xff] }
 0x415   :  { %1182 = vst.msk [vmem:[%s2560_s6 + $0x30] sm:$0xff] %vm286_vm0, %v1174_v14  ;;  %1734 = vpow2.f32 %v1207_v0  ;;  %v1203_v15 = vmul.f32 -1.442695, %v185_v1  ;;  %v244_v14 = vadd.f32 %v104_v25, %v80_v33  ;;  %v245_v35 = vadd.f32 %v105_v48, %v81_v43  ;;  %v52_v1 = vld [vmem:[%s2558_s0 + $0x110] sm:$0xff] }
 0x416   :  { %1183 = vst.msk [vmem:[%s2560_s6 + $0x38] sm:$0xff] %vm286_vm0, %v1175_v32  ;;  %1736 = vpow2.f32 %v1200_v8 }
 0x417   :  { %1738 = vpow2.f32 %v1201_v9  ;;  %v53_v9 = vld [vmem:[%s2558_s0 + $0x118] sm:$0xff] }
 0x418   :  { %1740 = vpow2.f32 %v1202_v13  ;;  %v29_v13 = vld [vmem:[%s2558_s0 + $0x38] sm:$0xff] }
 0x419   :  { %1742 = vpow2.f32 %v1203_v15  ;;  %v238_v15 = vadd.f32 %v50_v55, %v26_v56  ;;  %v980_v56 = vld [vmem:[%s2562_s4] sm:$0xff] }
 0x41a   :  { %1744 = vtanh.f32 %v242_v29 }
 0x41b   :  { %1746 = vtanh.f32 %v243_v2 }
 0x41c   :  { %1748 = vtanh.f32 %v244_v14 }
 0x41d   :  { %v1731_v30 = vpop.eup %1730  ;;  %1750 = vtanh.f32 %v245_v35 }
 0x41e   :  { %v1733_v32 = vpop.eup %1732  ;;  %v219_v18 = vadd.f32 1.0, %v1731_v30  ;;  %1752 = vrcp.f32 %v218_v3 }
 0x41f   :  { %v1735_v38 = vpop.eup %1734  ;;  %v220_v28 = vadd.f32 1.0, %v1733_v32 }
 0x420   :  { %v1737_v17 = vpop.eup %1736  ;;  %v221_v50 = vadd.f32 1.0, %v1735_v38  ;;  %1754 = vrcp.f32 %v219_v18 }
 0x421   :  { %v1739_v27 = vpop.eup %1738  ;;  %v214_v53 = vadd.f32 1.0, %v1737_v17  ;;  %1756 = vrcp.f32 %v220_v28  ;;  %v968_v28 = vld [vmem:[%s2561_s3] sm:$0xff] }
 0x422   :  { %v1741_v44 = vpop.eup %1740  ;;  %v215_v59 = vadd.f32 1.0, %v1739_v27  ;;  %1758 = vrcp.f32 %v221_v50  ;;  %v971_v50 = vld [vmem:[%s2561_s3 + $0x18] sm:$0xff] }
 0x423   :  { %v1743_v51 = vpop.eup %1742  ;;  %v216_v63 = vadd.f32 1.0, %v1741_v44  ;;  %1760 = vrcp.f32 %v214_v53  ;;  %v970_v44 = vld [vmem:[%s2561_s3 + $0x10] sm:$0xff] }
 0x424   :  { %1762 = vrcp.f32 %v215_v59  ;;  %v1745_v20 = vpop.eup %1744 }
 0x425   :  { %1764 = vrcp.f32 %v216_v63  ;;  %v981_v63 = vld [vmem:[%s2562_s4 + $0x8] sm:$0xff] }
 0x45b   :  { %v917_v4 = vpop.xlane.xlu1 %916  ;;  %v914_v5 = vpop.xlane.xlu0 %913 }
 0x45c   :  { %v936_v26 = vadd.f32 %v917_v4, %v914_v5  ;;  %v28_v4 = vld [vmem:[%s2558_s0 + $0x30] sm:$0xff]  ;;  %v217_v5 = vadd.f32 1.0, %v1743_v51 }
 0x45d   :  { %v240_v22 = vadd.f32 %v52_v1, %v28_v4  ;;  %v983_v1 = vld [vmem:[%s2562_s4 + $0x18] sm:$0xff] }
 0x45e   :  { %1766 = vrcp.f32 %v217_v5 }
 0x45f   :  { %v929_v16 = vpop.xlane.xlu1 %928  ;;  %v926_v19 = vpop.xlane.xlu0 %925  ;;  %1768 = vtanh.f32 %v238_v15 }
 0x460   :  { %v945_v39 = vadd.f32 %v929_v16, %v926_v19  ;;  %v239_v19 = vadd.f32 %v51_v61, %v27_v62 }
 0x462   :  { %1770 = vtanh.f32 %v239_v19 }
 0x463   :  { %v932_v23 = vpop.xlane.xlu1 %931  ;;  %v920_v24 = vpop.xlane.xlu0 %919  ;;  %1772 = vtanh.f32 %v240_v22 }
 0x464   :  { %v946_v10 = vadd.f32 %v945_v39, %v932_v23  ;;  %v937_v31 = vadd.f32 %v936_v26, %v920_v24  ;;  %v1747_v23 = vpop.eup %1746  ;;  %v241_v24 = vadd.f32 %v53_v9, %v29_v13 }
 0x465   :  { %v1749_v33 = vpop.eup %1748 }
 0x466   :  { %v1751_v39 = vpop.eup %1750  ;;  %1774 = vtanh.f32 %v241_v24 }
 0x467   :  { %v935_v36 = vpop.xlane.xlu1 %934  ;;  %v923_v37 = vpop.xlane.xlu0 %922 }
 0x468   :  { %v947_v7 = vadd.f32 %v946_v10, %v935_v36  ;;  %v938_v11 = vadd.f32 %v937_v31, %v923_v37  ;;  %v1753_v43 = vpop.eup %1752 }
 0x469   :  { %v1755_v6 = vpop.eup %1754 }
 0x46a   :  { %v948_v34 = vrot.slane %v947_v7, 4  ;;  %v939_v40 = vrot.slane %v938_v11, 4  ;;  %v1757_v2 = vpop.eup %1756  ;;  %v259_v17 = vmul.f32 %v1755_v6, %v1747_v23 }
 0x46b   :  { %v1759_v31 = vpop.eup %1758  ;;  %v260_v18 = vmul.f32 %v1757_v2, %v1749_v33 }
 0x46c   :  { %v949_v52 = vadd.f32 %v948_v34, %v947_v7  ;;  %v940_v54 = vadd.f32 %v939_v40, %v938_v11  ;;  %v1761_v14 = vpop.eup %1760  ;;  %v258_v11 = vmul.f32 %v1753_v43, %v1745_v20  ;;  %v261_v27 = vmul.f32 %v1759_v31, %v1751_v39  ;;  %v969_v40 = vld [vmem:[%s2561_s3 + $0x8] sm:$0xff] }
 0x46d   :  { %v1763_v32 = vpop.eup %1762 }
 0x46e   :  { %v950_v60 = vrot.slane %v949_v52, 2  ;;  %v941_v0 = vrot.slane %v940_v54, 2  ;;  %v1765_v35 = vpop.eup %1764 }
 0x46f   :  { %v1767_v36 = vpop.eup %1766 }
 0x470   :  { %v951_v8 = vadd.f32 %v950_v60, %v949_v52  ;;  %v942_v16 = vadd.f32 %v941_v0, %v940_v54  ;;  %v1769_v37 = vpop.eup %1768  ;;  %v982_v0 = vld [vmem:[%s2562_s4 + $0x10] sm:$0xff] }
 0x471   :  { %v1771_v38 = vpop.eup %1770  ;;  %v254_v51 = vmul.f32 %v1769_v37, %v1761_v14 }
 0x472   :  { %v952_v21 = vrot.slane %v951_v8, 1  ;;  %v943_v12 = vrot.slane %v942_v16, 1  ;;  %v1773_v3 = vpop.eup %1772  ;;  %v255_v52 = vmul.f32 %v1771_v38, %v1763_v32 }
 0x473   :  { %v1775_v7 = vpop.eup %1774  ;;  %v256_v53 = vmul.f32 %v1773_v3, %v1765_v35 }
 0x474   :  { %v953_v25 = vadd.f32 %v952_v21, %v951_v8  ;;  %v944_v26 = vadd.f32 %v943_v12, %v942_v16  ;;  %v257_v54 = vmul.f32 %v1775_v7, %v1767_v36 }
 0x476   :  { %v955_v48 = vmul.f32 0.00390625, %v953_v25  ;;  %v954_v29 = vmul.f32 0.00390625, %v944_v26 }
 0x478   :  { %v957_v30 = vadd.f32 1e-05, %v955_v48  ;;  %v956_v10 = vadd.f32 1e-05, %v954_v29 }
 0x47a   :  { %1776 = vrsqrt.f32 %v957_v30 }
 0x47b   :  { %1778 = vrsqrt.f32 %v956_v10 }
 0x484   :  { %v1777_v34 = vpop.eup %1776 }
 0x485   :  { %v1779_v55 = vpop.eup %1778  ;;  %v964_v59 = vmul.f32 %v1777_v34, %v2143_v46  ;;  %v965_v60 = vmul.f32 %v1777_v34, %v2141_v45  ;;  %v966_v61 = vmul.f32 %v1777_v34, %v2145_v47  ;;  %v967_v62 = vmul.f32 %v1777_v34, %v2161_v57 }
 0x486   :  { %v960_v46 = vmul.f32 %v1779_v55, %v2135_v42  ;;  %v961_v45 = vmul.f32 %v1779_v55, %v2132_v41  ;;  %v962_v47 = vmul.f32 %v1779_v55, %v2147_v49  ;;  %v963_v57 = vmul.f32 %v1779_v55, %v2163_v58 }
 0x487   :  { %v976_v4 = vmul.f32 %v968_v28, %v964_v59  ;;  %v977_v5 = vmul.f32 %v969_v40, %v965_v60  ;;  %v978_v8 = vmul.f32 %v970_v44, %v966_v61  ;;  %v979_v9 = vmul.f32 %v971_v50, %v967_v62 }
 0x488   :  { %v972_v13 = vmul.f32 %v968_v28, %v960_v46  ;;  %v973_v15 = vmul.f32 %v969_v40, %v961_v45  ;;  %v974_v16 = vmul.f32 %v970_v44, %v962_v47  ;;  %v975_v19 = vmul.f32 %v971_v50, %v963_v57 }
 0x489   :  { %v988_v20 = vadd.f32 %v980_v56, %v976_v4  ;;  %v989_v21 = vadd.f32 %v981_v63, %v977_v5  ;;  %v990_v22 = vadd.f32 %v982_v0, %v978_v8  ;;  %v991_v12 = vadd.f32 %v983_v1, %v979_v9 }
 0x48a   :  { %v984_v23 = vadd.f32 %v980_v56, %v972_v13  ;;  %v985_v42 = vadd.f32 %v981_v63, %v973_v15  ;;  %v986_v24 = vadd.f32 %v982_v0, %v974_v16  ;;  %v987_v41 = vadd.f32 %v983_v1, %v975_v19 }
 0x48b   :  { %v996_v33 = vadd.f32 %v988_v20, %v258_v11  ;;  %v997_v49 = vadd.f32 %v989_v21, %v259_v17  ;;  %v998_v25 = vadd.f32 %v990_v22, %v260_v18  ;;  %v999_v58 = vadd.f32 %v991_v12, %v261_v27 }
 0x48c   :  { %v992_v26 = vadd.f32 %v984_v23, %v254_v51  ;;  %v993_v39 = vadd.f32 %v985_v42, %v255_v52  ;;  %v994_v43 = vadd.f32 %v986_v24, %v256_v53  ;;  %v995_v48 = vadd.f32 %v987_v41, %v257_v54 }
 0x48d   :  { %1004 = vst.msk [vmem:[%s2563_s5 + $0x20] sm:$0xff] %vm286_vm0, %v996_v33  ;;  %1005 = vst.msk [vmem:[%s2563_s5 + $0x28] sm:$0xff] %vm286_vm0, %v997_v49 }
 0x48e   :  { %1006 = vst.msk [vmem:[%s2563_s5 + $0x30] sm:$0xff] %vm286_vm0, %v998_v25  ;;  %1007 = vst.msk [vmem:[%s2563_s5 + $0x38] sm:$0xff] %vm286_vm0, %v999_v58 }
 0x48f   :  { %1000 = vst.msk [vmem:[%s2563_s5] sm:$0xff] %vm286_vm0, %v992_v26  ;;  %1001 = vst.msk [vmem:[%s2563_s5 + $0x8] sm:$0xff] %vm286_vm0, %v993_v39 }
 0x490   :  { %1002 = vst.msk [vmem:[%s2563_s5 + $0x10] sm:$0xff] %vm286_vm0, %v994_v43  ;;  %1003 = vst.msk [vmem:[%s2563_s5 + $0x18] sm:$0xff] %vm286_vm0, %v995_v48 }

// kernel: _lambda_.67
= control target key start
LH: loop header
LB: loop body
LE: loop exit
PB: predicated region body
PF: predicated region fallthrough
CT: control target
= control target key end

     0   :  { %vm294_vm0 = vcmask 64512   ;;  %s2676_s2 = inlined_call_operand.vmem [shape: f32[2,128,8], index: 2, kind: input, shape index: {}]   ;;  %s2677_s0 = inlined_call_operand.vmem [shape: f32[2,15,32,8], index: 0, kind: input, shape index: {}]   ;;  %s2678_s1 = inlined_call_operand.vmem [shape: f32[2,32,8], index: 1, kind: input, shape index: {}]   ;;  %s2679_s6 = inlined_call_operand.vmem [shape: f32[2,32,8], index: 6, kind: output, shape index: {1}]   ;;  %s2680_s3 = inlined_call_operand.vmem [shape: f32[1,32,8], index: 3, kind: input, shape index: {}]   ;;  %s2681_s4 = inlined_call_operand.vmem [shape: f32[1,32,8], index: 4, kind: input, shape index: {}]   ;;  %s2682_s5 = inlined_call_operand.vmem [shape: f32[2,32,8], index: 5, kind: output, shape index: {0}]  }
   0x1   :  { %v262_v0 = vld [vmem:[%s2676_s2] sm:$0xff]  ;;  %v263_v1 = vld [vmem:[%s2676_s2 + $0x8] sm:$0xff]  ;;  %vm1902_vm1 = vmpackc.low %vm294_vm0, %vm294_vm0 }
   0x2   :  { %v1906_v3 = vpack.c.bf16 %v263_v1, %v262_v0  ;;  %v278_v4 = vld [vmem:[%s2676_s2 + $0x80] sm:$0xff]  ;;  %v279_v5 = vld [vmem:[%s2676_s2 + $0x88] sm:$0xff]  ;;  %v264_v6 = vld [vmem:[%s2676_s2 + $0x10] sm:$0xff] }
   0x3   :  { %v1917_v7 = vpack.c.bf16 %v279_v5, %v278_v4  ;;  %v265_v8 = vld [vmem:[%s2676_s2 + $0x18] sm:$0xff]  ;;  %v280_v9 = vld [vmem:[%s2676_s2 + $0x90] sm:$0xff]  ;;  %v266_v13 = vld [vmem:[%s2676_s2 + $0x20] sm:$0xff] }
   0x4   :  { %v281_v10 = vld [vmem:[%s2676_s2 + $0x98] sm:$0xff]  ;;  %1489 = vmatprep.subr.msk.bf16.mxu0 %vm1902_vm1, %v1906_v3  ;;  %v1931_v11 = vpack.c.bf16 %v265_v8, %v264_v6  ;;  %v267_v14 = vld [vmem:[%s2676_s2 + $0x28] sm:$0xff]  ;;  %v282_v15 = vld [vmem:[%s2676_s2 + $0xa0] sm:$0xff] }
   0x5   :  { %v1933_v12 = vpack.c.bf16 %v281_v10, %v280_v9  ;;  %1492 = vmatpush3.bf16.xpose.msk.msra.mxu0 %vm1902_vm1, %v1906_v3  ;;  %1537 = vmatprep.subr.msk.bf16.mxu1 %vm1902_vm1, %v1917_v7  ;;  %v283_v16 = vld [vmem:[%s2676_s2 + $0xa8] sm:$0xff]  ;;  %v1962_v17 = vpack.c.bf16 %v267_v14, %v266_v13  ;;  %v30_v19 = vld [vmem:[%s2677_s0 + $0x40] sm:$0xff]  ;;  %v268_v20 = vld [vmem:[%s2676_s2 + $0x30] sm:$0xff] }
   0x6   :  { %1540 = vmatpush3.bf16.xpose.msk.msra.mxu1 %vm1902_vm1, %v1917_v7  ;;  %1495 = vmatprep.subr.msk.bf16.mxu0 %vm1902_vm1, %v1931_v11  ;;  %v1964_v18 = vpack.c.bf16 %v283_v16, %v282_v15  ;;  %v269_v21 = vld [vmem:[%s2676_s2 + $0x38] sm:$0xff]  ;;  %v284_v22 = vld [vmem:[%s2676_s2 + $0xb0] sm:$0xff]  ;;  %v54_v24 = vld [vmem:[%s2677_s0 + $0x120] sm:$0xff] }
   0x7   :  { %1543 = vmatprep.subr.msk.bf16.mxu1 %vm1902_vm1, %v1933_v12  ;;  %v285_v23 = vld [vmem:[%s2676_s2 + $0xb8] sm:$0xff]  ;;  %v126_v25 = vadd.f32 %v54_v24, %v30_v19  ;;  %v1996_v26 = vpack.c.bf16 %v269_v21, %v268_v20  ;;  %v270_v29 = vld [vmem:[%s2676_s2 + $0x40] sm:$0xff]  ;;  %v271_v30 = vld [vmem:[%s2676_s2 + $0x48] sm:$0xff] }
   0x8   :  { %v1998_v27 = vpack.c.bf16 %v285_v23, %v284_v22  ;;  %v286_v31 = vld [vmem:[%s2676_s2 + $0xc0] sm:$0xff]  ;;  %v287_v32 = vld [vmem:[%s2676_s2 + $0xc8] sm:$0xff]  ;;  %v2024_v33 = vpack.c.bf16 %v271_v30, %v270_v29  ;;  %v272_v35 = vld [vmem:[%s2676_s2 + $0x50] sm:$0xff] }
   0x9   :  { %v1183_v28 = vmul.f32 -1.442695, %v126_v25  ;;  %v2026_v34 = vpack.c.bf16 %v287_v32, %v286_v31  ;;  %v273_v36 = vld [vmem:[%s2676_s2 + $0x58] sm:$0xff]  ;;  %v288_v37 = vld [vmem:[%s2676_s2 + $0xd0] sm:$0xff]  ;;  %v31_v40 = vld [vmem:[%s2677_s0 + $0x48] sm:$0xff] }
   0xa   :  { %v289_v39 = vld [vmem:[%s2676_s2 + $0xd8] sm:$0xff]  ;;  %v55_v41 = vld [vmem:[%s2677_s0 + $0x128] sm:$0xff]  ;;  %v82_v44 = vld [vmem:[%s2677_s0 + $0x220] sm:$0xff]  ;;  %v2067_v47 = vpack.c.bf16 %v273_v36, %v272_v35 }
   0xb   :  { %1647 = vpow2.f32 %v1183_v28  ;;  %v127_v43 = vadd.f32 %v55_v41, %v31_v40  ;;  %v106_v45 = vld [vmem:[%s2677_s0 + $0x300] sm:$0xff]  ;;  %v83_v46 = vld [vmem:[%s2677_s0 + $0x228] sm:$0xff]  ;;  %v32_v50 = vld [vmem:[%s2677_s0 + $0x50] sm:$0xff]  ;;  %v2087_v58 = vpack.c.bf16 %v289_v39, %v288_v37 }
   0xc   :  { %v130_v48 = vadd.f32 %v106_v45, %v82_v44  ;;  %v107_v49 = vld [vmem:[%s2677_s0 + $0x308] sm:$0xff]  ;;  %v56_v51 = vld [vmem:[%s2677_s0 + $0x130] sm:$0xff]  ;;  %v33_v57 = vld [vmem:[%s2677_s0 + $0x58] sm:$0xff] }
   0xd   :  { %1498 = vmatpush3.bf16.xpose.msk.msra.mxu0 %vm1902_vm1, %v1931_v11  ;;  %v1184_v52 = vmul.f32 -1.442695, %v127_v43  ;;  %v131_v53 = vadd.f32 %v107_v49, %v83_v46  ;;  %v128_v54 = vadd.f32 %v56_v51, %v32_v50  ;;  %v84_v55 = vld [vmem:[%s2677_s0 + $0x230] sm:$0xff]  ;;  %v57_v61 = vld [vmem:[%s2677_s0 + $0x138] sm:$0xff]  ;;  %v274_v9 = vld [vmem:[%s2676_s2 + $0x60] sm:$0xff] }
   0xe   :  { %1546 = vmatpush3.bf16.xpose.msk.msra.mxu1 %vm1902_vm1, %v1933_v12  ;;  %1501 = vmatprep.subr.msk.bf16.mxu0 %vm1902_vm1, %v1962_v17  ;;  %v108_v56 = vld [vmem:[%s2677_s0 + $0x310] sm:$0xff]  ;;  %v1187_v59 = vmul.f32 -1.442695, %v130_v48  ;;  %v85_v62 = vld [vmem:[%s2677_s0 + $0x238] sm:$0xff]  ;;  %v129_v4 = vadd.f32 %v57_v61, %v33_v57  ;;  %v275_v10 = vld [vmem:[%s2676_s2 + $0x68] sm:$0xff] }
   0xf   :  { %1549 = vmatprep.subr.msk.bf16.mxu1 %vm1902_vm1, %v1964_v18  ;;  %v132_v60 = vadd.f32 %v108_v56, %v84_v55  ;;  %v109_v63 = vld [vmem:[%s2677_s0 + $0x318] sm:$0xff]  ;;  %v1188_v0 = vmul.f32 -1.442695, %v131_v53  ;;  %v1185_v1 = vmul.f32 -1.442695, %v128_v54  ;;  %v290_v14 = vld [vmem:[%s2676_s2 + $0xe0] sm:$0xff]  ;;  %v2122_v16 = vpack.c.bf16 %v275_v10, %v274_v9 }
  0x10   :  { %v133_v6 = vadd.f32 %v109_v63, %v85_v62  ;;  %v1186_v8 = vmul.f32 -1.442695, %v129_v4  ;;  %v291_v15 = vld [vmem:[%s2676_s2 + $0xe8] sm:$0xff]  ;;  %v276_v23 = vld [vmem:[%s2676_s2 + $0x70] sm:$0xff]  ;;  %v277_v24 = vld [vmem:[%s2676_s2 + $0x78] sm:$0xff] }
  0x11   :  { %v1189_v5 = vmul.f32 -1.442695, %v132_v60  ;;  %v2124_v19 = vpack.c.bf16 %v291_v15, %v290_v14  ;;  %v292_v28 = vld [vmem:[%s2676_s2 + $0xf0] sm:$0xff]  ;;  %v293_v29 = vld [vmem:[%s2676_s2 + $0xf8] sm:$0xff]  ;;  %v2151_v35 = vpack.c.bf16 %v277_v24, %v276_v23 }
  0x12   :  { %v1190_v13 = vmul.f32 -1.442695, %v133_v6  ;;  %v2153_v37 = vpack.c.bf16 %v293_v29, %v292_v28 }
  0x15   :  { %1504 = vmatpush3.bf16.xpose.msk.msra.mxu0 %vm1902_vm1, %v1962_v17  ;;  %v1648_v38 = vpop.eup %1647 }
  0x16   :  { %1552 = vmatpush3.bf16.xpose.msk.msra.mxu1 %vm1902_vm1, %v1964_v18  ;;  %1507 = vmatprep.subr.msk.bf16.mxu0 %vm1902_vm1, %v1996_v26  ;;  %v158_v42 = vadd.f32 1.0, %v1648_v38 }
  0x17   :  { %1555 = vmatprep.subr.msk.bf16.mxu1 %vm1902_vm1, %v1998_v27 }
  0x18   :  { %1649 = vrcp.f32 %v158_v42 }
  0x19   :  { %1651 = vpow2.f32 %v1184_v52 }
  0x1a   :  { %1653 = vpow2.f32 %v1187_v59 }
  0x1b   :  { %1655 = vpow2.f32 %v1188_v0 }
  0x1c   :  { %1657 = vpow2.f32 %v1185_v1 }
  0x1d   :  { %1510 = vmatpush3.bf16.xpose.msk.msra.mxu0 %vm1902_vm1, %v1996_v26  ;;  %1659 = vpow2.f32 %v1189_v5 }
  0x1e   :  { %1558 = vmatpush3.bf16.xpose.msk.msra.mxu1 %vm1902_vm1, %v1998_v27  ;;  %1513 = vmatprep.subr.msk.bf16.mxu0 %vm1902_vm1, %v2024_v33  ;;  %1661 = vpow2.f32 %v1186_v8 }
  0x1f   :  { %1561 = vmatprep.subr.msk.bf16.mxu1 %vm1902_vm1, %v2026_v34  ;;  %1663 = vpow2.f32 %v1190_v13 }
  0x22   :  { %v1650_v20 = vpop.eup %1649 }
  0x23   :  { %1367 = vmatprep.mubr.msk.f32.mxu0 %vm294_vm0, %v1650_v20  ;;  %v1652_v21 = vpop.eup %1651 }
  0x24   :  { %v1654_v22 = vpop.eup %1653  ;;  %v159_v36 = vadd.f32 1.0, %v1652_v21 }
  0x25   :  { %1516 = vmatpush3.bf16.xpose.msk.msra.mxu0 %vm1902_vm1, %v2024_v33  ;;  %v1656_v25 = vpop.eup %1655  ;;  %v162_v30 = vadd.f32 1.0, %v1654_v22 }
  0x26   :  { %1564 = vmatpush3.bf16.xpose.msk.msra.mxu1 %vm1902_vm1, %v2026_v34  ;;  %1519 = vmatprep.subr.msk.bf16.mxu0 %vm1902_vm1, %v2067_v47  ;;  %v1658_v31 = vpop.eup %1657  ;;  %v163_v38 = vadd.f32 1.0, %v1656_v25 }
  0x27   :  { %1567 = vmatprep.subr.msk.bf16.mxu1 %vm1902_vm1, %v2087_v58  ;;  %v1660_v32 = vpop.eup %1659  ;;  %1665 = vrcp.f32 %v162_v30  ;;  %v160_v40 = vadd.f32 1.0, %v1658_v31 }
  0x28   :  { %v1662_v39 = vpop.eup %1661  ;;  %v164_v42 = vadd.f32 1.0, %v1660_v32  ;;  %1667 = vrcp.f32 %v159_v36 }
  0x29   :  { %v1664_v41 = vpop.eup %1663  ;;  %1669 = vrcp.f32 %v163_v38  ;;  %v161_v43 = vadd.f32 1.0, %v1662_v39 }
  0x2a   :  { %1671 = vrcp.f32 %v160_v40  ;;  %v165_v44 = vadd.f32 1.0, %v1664_v41 }
  0x2b   :  { %1673 = vrcp.f32 %v164_v42 }
  0x2c   :  { %1675 = vrcp.f32 %v161_v43 }
  0x2d   :  { %1522 = vmatpush3.bf16.xpose.msk.msra.mxu0 %vm1902_vm1, %v2067_v47  ;;  %1677 = vrcp.f32 %v165_v44 }
  0x2e   :  { %1570 = vmatpush3.bf16.xpose.msk.msra.mxu1 %vm1902_vm1, %v2087_v58  ;;  %1525 = vmatprep.subr.msk.bf16.mxu0 %vm1902_vm1, %v2122_v16 }
  0x2f   :  { %1573 = vmatprep.subr.msk.bf16.mxu1 %vm1902_vm1, %v2124_v19 }
  0x31   :  { %v1666_v45 = vpop.eup %1665 }
  0x32   :  { %1405 = vmatprep.mubr.msk.f32.mxu1 %vm294_vm0, %v1666_v45  ;;  %v1668_v46 = vpop.eup %1667 }
  0x33   :  { %v1670_v48 = vpop.eup %1669 }
  0x34   :  { %v1672_v49 = vpop.eup %1671 }
  0x35   :  { %1528 = vmatpush3.bf16.xpose.msk.msra.mxu0 %vm1902_vm1, %v2122_v16  ;;  %v1674_v50 = vpop.eup %1673 }
  0x36   :  { %1576 = vmatpush3.bf16.xpose.msk.msra.mxu1 %vm1902_vm1, %v2124_v19  ;;  %1531 = vmatprep.subr.msk.bf16.mxu0 %vm1902_vm1, %v2151_v35  ;;  %v1676_v51 = vpop.eup %1675 }
  0x37   :  { %1579 = vmatprep.subr.msk.bf16.mxu1 %vm1902_vm1, %v2153_v37  ;;  %v1678_v52 = vpop.eup %1677 }
  0x3d   :  { %1534 = vmatpush3.bf16.xpose.msk.msra.mxu0 %vm1902_vm1, %v2151_v35 }
  0x3e   :  { %1582 = vmatpush3.bf16.xpose.msk.msra.mxu1 %vm1902_vm1, %v2153_v37  ;;  %1584 = vmatprep.subr.bf16.mxu0 %v1906_v3 }
  0x3f   :  { %1616 = vmatprep.subr.bf16.mxu1 %v1917_v7 }
  0x44   :  { %1368 = vmatmul.mubr.msk.f32.vlgmr.msra.gmra.mrb[0].mxu0 %vm294_vm0, %v1668_v46 }
  0x45   :  { %1406 = vmatmul.mubr.msk.f32.vlgmr.msra.gmra.mrb[0].mxu1 %vm294_vm0, %v1670_v48  ;;  %1370 = vmatprep.mubr.msk.f32.mxu0 %vm294_vm0, %v1672_v49 }
  0x46   :  { %1408 = vmatprep.mubr.msk.f32.mxu1 %vm294_vm0, %v1674_v50  ;;  %1586 = vmatpush3.bf16.msra.mxu0 %v1906_v3 }
  0x47   :  { %1588 = vmatprep.subr.bf16.mxu0 %v1931_v11  ;;  %1618 = vmatpush3.bf16.msra.mxu1 %v1917_v7 }
  0x48   :  { %1371 = vmatmul.mubr.msk.f32.gmra.mrb[2].mxu0 %vm294_vm0, %v1676_v51  ;;  %1620 = vmatprep.subr.bf16.mxu1 %v1933_v12 }
  0x49   :  { %1409 = vmatmul.mubr.msk.f32.gmra.mrb[2].mxu1 %vm294_vm0, %v1678_v52 }
  0x4a   :  { %1590 = vmatpush3.bf16.msra.mxu0 %v1931_v11 }
  0x4b   :  { %1592 = vmatprep.subr.bf16.mxu0 %v1962_v17  ;;  %1622 = vmatpush3.bf16.msra.mxu1 %v1933_v12 }
  0x4c   :  { %1624 = vmatprep.subr.bf16.mxu1 %v1964_v18 }
  0x4e   :  { %1594 = vmatpush3.bf16.msra.mxu0 %v1962_v17 }
  0x4f   :  { %1596 = vmatprep.subr.bf16.mxu0 %v1996_v26  ;;  %1626 = vmatpush3.bf16.msra.mxu1 %v1964_v18 }
  0x50   :  { %1628 = vmatprep.subr.bf16.mxu1 %v1998_v27 }
  0x52   :  { %1598 = vmatpush3.bf16.msra.mxu0 %v1996_v26 }
  0x53   :  { %1600 = vmatprep.subr.bf16.mxu0 %v2024_v33  ;;  %1630 = vmatpush3.bf16.msra.mxu1 %v1998_v27 }
  0x54   :  { %1632 = vmatprep.subr.bf16.mxu1 %v2026_v34 }
  0x56   :  { %1602 = vmatpush3.bf16.msra.mxu0 %v2024_v33 }
  0x57   :  { %1604 = vmatprep.subr.bf16.mxu0 %v2067_v47  ;;  %1634 = vmatpush3.bf16.msra.mxu1 %v2026_v34 }
  0x58   :  { %1636 = vmatprep.subr.bf16.mxu1 %v2087_v58 }
  0x5a   :  { %1606 = vmatpush3.bf16.msra.mxu0 %v2067_v47 }
  0x5b   :  { %1608 = vmatprep.subr.bf16.mxu0 %v2122_v16  ;;  %1638 = vmatpush3.bf16.msra.mxu1 %v2087_v58 }
  0x5c   :  { %1640 = vmatprep.subr.bf16.mxu1 %v2124_v19 }
  0x5e   :  { %1610 = vmatpush3.bf16.msra.mxu0 %v2122_v16 }
  0x5f   :  { %1612 = vmatprep.subr.bf16.mxu0 %v2151_v35  ;;  %1642 = vmatpush3.bf16.msra.mxu1 %v2124_v19 }
  0x60   :  { %1644 = vmatprep.subr.bf16.mxu1 %v2153_v37 }
  0x62   :  { %1614 = vmatpush3.bf16.msra.mxu0 %v2151_v35 }
  0x63   :  { %1646 = vmatpush3.bf16.msra.mxu1 %v2153_v37 }
 0x117   :  { %v1369_v2 = vpop.f32.mrb[0].mxu0 }
 0x118   :  { %587 = vmax.xlane.f32.xlu1 %v1369_v2  ;;  %v421_v3 = vpop.f32.mrb[1].mxu0  ;;  %v1407_v7 = vpop.f32.mrb[0].mxu1 }
 0x119   :  { %585 = vmax.xlane.f32.xlu0 %v421_v3  ;;  %v566_v11 = vpop.f32.mrb[1].mxu1 }
 0x11b   :  { %v1372_v12 = vpop.f32.mrb[2].mxu0 }
 0x11c   :  { %595 = vmax.xlane.f32.xlu1 %v1407_v7  ;;  %v1410_v17 = vpop.f32.mrb[2].mxu1  ;;  %v431_v18 = vpop.f32.mrb[3].mxu0 }
 0x11d   :  { %593 = vmax.xlane.f32.xlu0 %v566_v11  ;;  %v576_v26 = vpop.f32.mrb[3].mxu1 }
 0x120   :  { %597 = vmax.xlane.f32.xlu1 %v576_v26 }
 0x121   :  { %589 = vmax.xlane.f32.xlu0 %v431_v18 }
 0x124   :  { %599 = vmax.xlane.f32.xlu1 %v1410_v17 }
 0x125   :  { %591 = vmax.xlane.f32.xlu0 %v1372_v12 }
 0x1a5   :  { %v588_v27 = vpop.xlane.xlu1 %587 }
 0x1a6   :  { %v602_v33 = vsub.f32 %v1369_v2, %v588_v27  ;;  %v586_v34 = vpop.xlane.xlu0 %585  ;;  %v828_v2 = vld [vmem:[%s2678_s1 + $0x8] sm:$0xff] }
 0x1a7   :  { %v601_v47 = vsub.f32 %v421_v3, %v586_v34  ;;  %v827_v3 = vld [vmem:[%s2678_s1] sm:$0xff] }
 0x1a8   :  { %v611_v53 = vmul.f32 1.442695, %v602_v33 }
 0x1a9   :  { %v609_v54 = vmul.f32 1.442695, %v601_v47  ;;  %v596_v55 = vpop.xlane.xlu1 %595 }
 0x1aa   :  { %1679 = vpow2.f32 %v611_v53  ;;  %v606_v56 = vsub.f32 %v1407_v7, %v596_v55  ;;  %v594_v57 = vpop.xlane.xlu0 %593 }
 0x1ab   :  { %v605_v58 = vsub.f32 %v566_v11, %v594_v57  ;;  %1681 = vpow2.f32 %v609_v54 }
 0x1ac   :  { %v619_v59 = vmul.f32 1.442695, %v606_v56  ;;  %v829_v56 = vld [vmem:[%s2678_s1 + $0x10] sm:$0xff] }
 0x1ad   :  { %v598_v60 = vpop.xlane.xlu1 %597  ;;  %v617_v61 = vmul.f32 1.442695, %v605_v58 }
 0x1ae   :  { %1683 = vpow2.f32 %v619_v59  ;;  %v607_v62 = vsub.f32 %v576_v26, %v598_v60  ;;  %v590_v63 = vpop.xlane.xlu0 %589  ;;  %v831_v26 = vld [vmem:[%s2678_s1 + $0x20] sm:$0xff]  ;;  %v830_v60 = vld [vmem:[%s2678_s1 + $0x18] sm:$0xff] }
 0x1af   :  { %v603_v0 = vsub.f32 %v431_v18, %v590_v63  ;;  %1685 = vpow2.f32 %v617_v61 }
 0x1b0   :  { %v621_v5 = vmul.f32 1.442695, %v607_v62  ;;  %v833_v62 = vld [vmem:[%s2678_s1 + $0x30] sm:$0xff] }
 0x1b1   :  { %v613_v1 = vmul.f32 1.442695, %v603_v0  ;;  %v600_v4 = vpop.xlane.xlu1 %599  ;;  %v834_v0 = vld [vmem:[%s2678_s1 + $0x38] sm:$0xff] }
 0x1b2   :  { %v608_v6 = vsub.f32 %v1410_v17, %v600_v4  ;;  %v592_v8 = vpop.xlane.xlu0 %591  ;;  %v832_v17 = vld [vmem:[%s2678_s1 + $0x28] sm:$0xff] }
 0x1b3   :  { %1687 = vpow2.f32 %v613_v1  ;;  %v604_v9 = vsub.f32 %v1372_v12, %v592_v8 }
 0x1b4   :  { %v1680_v10 = vpop.eup %1679  ;;  %1689 = vpow2.f32 %v621_v5  ;;  %v623_v14 = vmul.f32 1.442695, %v608_v6 }
 0x1b5   :  { %v615_v13 = vmul.f32 1.442695, %v604_v9  ;;  %627 = vadd.xlane.f32.xlu0 %v1680_v10  ;;  %v1682_v15 = vpop.eup %1681 }
 0x1b7   :  { %1691 = vpow2.f32 %v615_v13 }
 0x1b8   :  { %v1684_v16 = vpop.eup %1683  ;;  %1693 = vpow2.f32 %v623_v14 }
 0x1b9   :  { %635 = vadd.xlane.f32.xlu1 %v1684_v16  ;;  %625 = vadd.xlane.f32.xlu0 %v1682_v15  ;;  %v1686_v19 = vpop.eup %1685 }
 0x1bd   :  { %v1688_v20 = vpop.eup %1687  ;;  %633 = vadd.xlane.f32.xlu1 %v1686_v19 }
 0x1be   :  { %629 = vadd.xlane.f32.xlu0 %v1688_v20  ;;  %v1690_v21 = vpop.eup %1689 }
 0x1c1   :  { %v1692_v22 = vpop.eup %1691  ;;  %637 = vadd.xlane.f32.xlu1 %v1690_v21 }
 0x1c2   :  { %631 = vadd.xlane.f32.xlu0 %v1692_v22  ;;  %v1694_v23 = vpop.eup %1693 }
 0x1c5   :  { %639 = vadd.xlane.f32.xlu1 %v1694_v23 }
 0x242   :  { %v628_v24 = vpop.xlane.xlu0 %627 }
 0x243   :  { %1695 = vrcp.f32 %v628_v24 }
 0x246   :  { %v636_v25 = vpop.xlane.xlu1 %635  ;;  %v626_v28 = vpop.xlane.xlu0 %625 }
 0x247   :  { %1697 = vrcp.f32 %v626_v28 }
 0x248   :  { %1699 = vrcp.f32 %v636_v25 }
 0x24a   :  { %v634_v29 = vpop.xlane.xlu1 %633 }
 0x24b   :  { %1701 = vrcp.f32 %v634_v29  ;;  %v630_v30 = vpop.xlane.xlu0 %629 }
 0x24c   :  { %1703 = vrcp.f32 %v630_v30 }
 0x24d   :  { %v1696_v35 = vpop.eup %1695 }
 0x24e   :  { %v638_v31 = vpop.xlane.xlu1 %637  ;;  %v650_v40 = vmul.f32 %v1696_v35, %v1680_v10 }
 0x24f   :  { %1705 = vrcp.f32 %v638_v31  ;;  %v632_v32 = vpop.xlane.xlu0 %631 }
 0x250   :  { %1707 = vrcp.f32 %v632_v32 }
 0x251   :  { %v1698_v36 = vpop.eup %1697 }
 0x252   :  { %v640_v37 = vpop.xlane.xlu1 %639  ;;  %v649_v38 = vmul.f32 %v1698_v36, %v1682_v15  ;;  %v1700_v39 = vpop.eup %1699 }
 0x253   :  { %1709 = vrcp.f32 %v640_v37  ;;  %v654_v44 = vmul.f32 %v1700_v39, %v1684_v16 }
 0x254   :  { %1443 = vmatprep.mubr.f32.mxu0 %v649_v38 }
 0x255   :  { %v1702_v41 = vpop.eup %1701  ;;  %1444 = vmatmul.mubr.f32.vlgmr.msra.gmra.mrb[4].mxu0 %v650_v40 }
 0x256   :  { %v1704_v42 = vpop.eup %1703  ;;  %v653_v43 = vmul.f32 %v1702_v41, %v1686_v19 }
 0x257   :  { %v651_v45 = vmul.f32 %v1704_v42, %v1688_v20 }
 0x258   :  { %1481 = vmatprep.mubr.f32.mxu1 %v653_v43 }
 0x259   :  { %v1706_v46 = vpop.eup %1705  ;;  %1446 = vmatprep.mubr.f32.mxu0 %v651_v45  ;;  %1482 = vmatmul.mubr.f32.vlgmr.msra.gmra.mrb[4].mxu1 %v654_v44 }
 0x25a   :  { %v1708_v48 = vpop.eup %1707  ;;  %v655_v49 = vmul.f32 %v1706_v46, %v1690_v21 }
 0x25b   :  { %v652_v50 = vmul.f32 %v1708_v48, %v1692_v22 }
 0x25c   :  { %1484 = vmatprep.mubr.f32.mxu1 %v655_v49 }
 0x25d   :  { %v1710_v51 = vpop.eup %1709  ;;  %1447 = vmatmul.mubr.f32.gmra.mrb[6].mxu0 %v652_v50 }
 0x25e   :  { %v656_v52 = vmul.f32 %v1710_v51, %v1694_v23 }
 0x260   :  { %1485 = vmatmul.mubr.f32.gmra.mrb[6].mxu1 %v656_v52 }
 0x328   :  { %v1445_v7 = vpop.f32.mrb[4].mxu0 }
 0x329   :  { %v2218_v11 = vadd.f32 %v1445_v7, %v828_v2  ;;  %v723_v12 = vpop.f32.mrb[5].mxu0 }
 0x32a   :  { %v2223_v18 = vadd.f32 %v827_v3, %v723_v12 }
 0x32b   :  { %v846_v33 = vsel %vm294_vm0, %v2218_v11, 0.0 }
 0x32c   :  { %v1483_v27 = vpop.f32.mrb[4].mxu1  ;;  %847 = vadd.xlane.f32.xlu1 %v846_v33  ;;  %v843_v53 = vsel %vm294_vm0, %v2223_v18, 0.0 }
 0x32d   :  { %v840_v34 = vadd.f32 %v1483_v27, %v832_v17  ;;  %v808_v47 = vpop.f32.mrb[5].mxu1  ;;  %844 = vadd.xlane.f32.xlu0 %v843_v53 }
 0x32e   :  { %v839_v54 = vadd.f32 %v831_v26, %v808_v47 }
 0x32f   :  { %v858_v55 = vsel %vm294_vm0, %v840_v34, 0.0 }
 0x330   :  { %v1448_v57 = vpop.f32.mrb[6].mxu0  ;;  %v855_v58 = vsel %vm294_vm0, %v839_v54, 0.0  ;;  %859 = vadd.xlane.f32.xlu1 %v858_v55 }
 0x331   :  { %v733_v59 = vpop.f32.mrb[7].mxu0  ;;  %856 = vadd.xlane.f32.xlu0 %v855_v58  ;;  %v838_v5 = vadd.f32 %v1448_v57, %v830_v60 }
 0x332   :  { %v837_v61 = vadd.f32 %v829_v56, %v733_v59 }
 0x333   :  { %v1486_v63 = vpop.f32.mrb[6].mxu1  ;;  %v852_v10 = vsel %vm294_vm0, %v838_v5, 0.0 }
 0x334   :  { %v818_v1 = vpop.f32.mrb[7].mxu1  ;;  %v849_v4 = vsel %vm294_vm0, %v837_v61, 0.0  ;;  %v842_v8 = vadd.f32 %v1486_v63, %v834_v0  ;;  %v35_v63 = vld [vmem:[%s2677_s0 + $0x68] sm:$0xff] }
 0x335   :  { %v841_v6 = vadd.f32 %v833_v62, %v818_v1  ;;  %850 = vadd.xlane.f32.xlu0 %v849_v4  ;;  %v58_v62 = vld [vmem:[%s2677_s0 + $0x160] sm:$0xff]  ;;  %v59_v0 = vld [vmem:[%s2677_s0 + $0x168] sm:$0xff]  ;;  %v36_v1 = vld [vmem:[%s2677_s0 + $0x70] sm:$0xff] }
 0x336   :  { %v864_v13 = vsel %vm294_vm0, %v842_v8, 0.0  ;;  %v60_v4 = vld [vmem:[%s2677_s0 + $0x170] sm:$0xff] }
 0x337   :  { %v861_v9 = vsel %vm294_vm0, %v841_v6, 0.0 }
 0x338   :  { %862 = vadd.xlane.f32.xlu1 %v861_v9  ;;  %v86_v9 = vld [vmem:[%s2677_s0 + $0x240] sm:$0xff] }
 0x339   :  { %853 = vadd.xlane.f32.xlu0 %v852_v10  ;;  %v110_v10 = vld [vmem:[%s2677_s0 + $0x340] sm:$0xff] }
 0x33c   :  { %865 = vadd.xlane.f32.xlu1 %v864_v13  ;;  %v1000_v13 = vadd.f32 %v59_v0, %v35_v63  ;;  %v96_v0 = vld [vmem:[%s2677_s0 + $0x290] sm:$0xff] }
 0x3b9   :  { %v848_v14 = vpop.xlane.xlu1 %847 }
 0x3ba   :  { %v845_v15 = vpop.xlane.xlu0 %844 }
 0x3bb   :  { %v867_v21 = vadd.f32 %v848_v14, %v845_v15  ;;  %v1001_v14 = vadd.f32 %v60_v4, %v36_v1  ;;  %v116_v1 = vld [vmem:[%s2677_s0 + $0x370] sm:$0xff] }
 0x3bd   :  { %v860_v19 = vpop.xlane.xlu1 %859 }
 0x3be   :  { %v857_v16 = vpop.xlane.xlu0 %856 }
 0x3bf   :  { %v876_v23 = vadd.f32 %v860_v19, %v857_v16  ;;  %v1003_v19 = vadd.f32 %v110_v10, %v86_v9 }
 0x3c2   :  { %v851_v20 = vpop.xlane.xlu0 %850 }
 0x3c3   :  { %v868_v24 = vadd.f32 %v867_v21, %v851_v20  ;;  %v1240_v20 = vmul.f32 -1.442695, %v1000_v13  ;;  %v1241_v21 = vmul.f32 -1.442695, %v1001_v14 }
 0x3c5   :  { %v863_v22 = vpop.xlane.xlu1 %862 }
 0x3c6   :  { %v854_v25 = vpop.xlane.xlu0 %853  ;;  %v877_v28 = vadd.f32 %v876_v23, %v863_v22  ;;  %v1243_v23 = vmul.f32 -1.442695, %v1003_v19 }
 0x3c7   :  { %v869_v29 = vadd.f32 %v868_v24, %v854_v25  ;;  %v87_v24 = vld [vmem:[%s2677_s0 + $0x248] sm:$0xff] }
 0x3c8   :  { %v111_v25 = vld [vmem:[%s2677_s0 + $0x348] sm:$0xff] }
 0x3c9   :  { %v866_v30 = vpop.xlane.xlu1 %865  ;;  %v870_v31 = vrot.slane %v869_v29, 4 }
 0x3ca   :  { %v878_v32 = vadd.f32 %v877_v28, %v866_v30  ;;  %v88_v28 = vld [vmem:[%s2677_s0 + $0x250] sm:$0xff]  ;;  %v89_v30 = vld [vmem:[%s2677_s0 + $0x258] sm:$0xff] }
 0x3cb   :  { %v871_v35 = vadd.f32 %v870_v31, %v869_v29  ;;  %v112_v29 = vld [vmem:[%s2677_s0 + $0x350] sm:$0xff]  ;;  %v113_v31 = vld [vmem:[%s2677_s0 + $0x358] sm:$0xff] }
 0x3cc   :  { %v879_v36 = vrot.slane %v878_v32, 4 }
 0x3cd   :  { %v872_v37 = vrot.slane %v871_v35, 2 }
 0x3ce   :  { %v880_v38 = vadd.f32 %v879_v36, %v878_v32  ;;  %v1004_v32 = vadd.f32 %v111_v25, %v87_v24  ;;  %v62_v36 = vld [vmem:[%s2677_s0 + $0x180] sm:$0xff] }
 0x3cf   :  { %v873_v39 = vadd.f32 %v872_v37, %v871_v35  ;;  %v42_v35 = vld [vmem:[%s2677_s0 + $0xa0] sm:$0xff]  ;;  %v1005_v37 = vadd.f32 %v112_v29, %v88_v28 }
 0x3d0   :  { %v881_v40 = vrot.slane %v880_v38, 2 }
 0x3d1   :  { %v874_v41 = vrot.slane %v873_v39, 1 }
 0x3d2   :  { %v882_v42 = vadd.f32 %v881_v40, %v880_v38  ;;  %v43_v38 = vld [vmem:[%s2677_s0 + $0xa8] sm:$0xff]  ;;  %v1006_v40 = vadd.f32 %v113_v31, %v89_v30 }
 0x3d3   :  { %v875_v43 = vadd.f32 %v874_v41, %v873_v39  ;;  %v63_v39 = vld [vmem:[%s2677_s0 + $0x188] sm:$0xff]  ;;  %v44_v41 = vld [vmem:[%s2677_s0 + $0xb0] sm:$0xff] }
 0x3d4   :  { %v883_v44 = vrot.slane %v882_v42, 1 }
 0x3d5   :  { %v885_v45 = vmul.f32 0.00390625, %v875_v43 }
 0x3d6   :  { %v884_v46 = vadd.f32 %v883_v44, %v882_v42  ;;  %v64_v42 = vld [vmem:[%s2677_s0 + $0x190] sm:$0xff]  ;;  %v45_v44 = vld [vmem:[%s2677_s0 + $0xb8] sm:$0xff] }
 0x3d7   :  { %v2251_v49 = vsub.f32 %v2218_v11, %v885_v45  ;;  %v2254_v50 = vsub.f32 %v2223_v18, %v885_v45  ;;  %v2266_v12 = vsub.f32 %v837_v61, %v885_v45  ;;  %v34_v61 = vld [vmem:[%s2677_s0 + $0x60] sm:$0xff] }
 0x3d8   :  { %v886_v48 = vmul.f32 0.00390625, %v884_v46  ;;  %v1244_v46 = vmul.f32 -1.442695, %v1004_v32 }
 0x3d9   :  { %v896_v51 = vmul.f32 %v2251_v49, %v2251_v49  ;;  %v895_v52 = vmul.f32 %v2254_v50, %v2254_v50  ;;  %v897_v47 = vmul.f32 %v2266_v12, %v2266_v12 }
 0x3da   :  { %v2260_v2 = vsub.f32 %v840_v34, %v886_v48  ;;  %v2262_v3 = vsub.f32 %v839_v54, %v886_v48  ;;  %v2264_v7 = vsub.f32 %v841_v6, %v886_v48  ;;  %v2280_v53 = vsub.f32 %v842_v8, %v886_v48  ;;  %v37_v6 = vld [vmem:[%s2677_s0 + $0x78] sm:$0xff] }
 0x3db   :  { %v906_v11 = vsel %vm294_vm0, %v896_v51, 0.0  ;;  %v903_v17 = vsel %vm294_vm0, %v895_v52, 0.0  ;;  %v2282_v54 = vsub.f32 %v838_v5, %v885_v45  ;;  %v909_v56 = vsel %vm294_vm0, %v897_v47, 0.0  ;;  %v61_v8 = vld [vmem:[%s2677_s0 + $0x178] sm:$0xff]  ;;  %v94_v51 = vld [vmem:[%s2677_s0 + $0x280] sm:$0xff] }
 0x3dc   :  { %v900_v18 = vmul.f32 %v2260_v2, %v2260_v2  ;;  %v899_v26 = vmul.f32 %v2262_v3, %v2262_v3  ;;  %907 = vadd.xlane.f32.xlu1 %v906_v11  ;;  %904 = vadd.xlane.f32.xlu0 %v903_v17  ;;  %v901_v34 = vmul.f32 %v2264_v7, %v2264_v7  ;;  %v65_v45 = vld [vmem:[%s2677_s0 + $0x198] sm:$0xff]  ;;  %v114_v52 = vld [vmem:[%s2677_s0 + $0x360] sm:$0xff]  ;;  %v1245_v11 = vmul.f32 -1.442695, %v1005_v37 }
 0x3dd   :  { %v902_v57 = vmul.f32 %v2280_v53, %v2280_v53  ;;  %v898_v58 = vmul.f32 %v2282_v54, %v2282_v54  ;;  %v999_v5 = vadd.f32 %v58_v62, %v34_v61  ;;  %v1002_v15 = vadd.f32 %v61_v8, %v37_v6  ;;  %v115_v61 = vld [vmem:[%s2677_s0 + $0x368] sm:$0xff]  ;;  %v97_v6 = vld [vmem:[%s2677_s0 + $0x298] sm:$0xff] }
 0x3de   :  { %v918_v27 = vsel %vm294_vm0, %v900_v18, 0.0  ;;  %v915_v33 = vsel %vm294_vm0, %v899_v26, 0.0  ;;  %v921_v55 = vsel %vm294_vm0, %v901_v34, 0.0  ;;  %v1055_v48 = vadd.f32 %v62_v36, %v42_v35  ;;  %v117_v8 = vld [vmem:[%s2677_s0 + $0x378] sm:$0xff]  ;;  %v38_v35 = vld [vmem:[%s2677_s0 + $0x80] sm:$0xff] }
 0x3df   :  { %v924_v59 = vsel %vm294_vm0, %v902_v57, 0.0  ;;  %v912_v60 = vsel %vm294_vm0, %v898_v58, 0.0  ;;  %v1239_v16 = vmul.f32 -1.442695, %v999_v5  ;;  %v1242_v22 = vmul.f32 -1.442695, %v1002_v15 }
 0x3e0   :  { %919 = vadd.xlane.f32.xlu1 %v918_v27  ;;  %916 = vadd.xlane.f32.xlu0 %v915_v33  ;;  %v1056_v17 = vadd.f32 %v63_v39, %v43_v38  ;;  %v1246_v26 = vmul.f32 -1.442695, %v1006_v40  ;;  %v1057_v27 = vadd.f32 %v64_v42, %v44_v41  ;;  %v1058_v47 = vadd.f32 %v65_v45, %v45_v44  ;;  %v66_v36 = vld [vmem:[%s2677_s0 + $0x1a0] sm:$0xff]  ;;  %v39_v40 = vld [vmem:[%s2677_s0 + $0x88] sm:$0xff] }
 0x3e1   :  { %1711 = vpow2.f32 %v1239_v16  ;;  %v1059_v57 = vadd.f32 %v114_v52, %v94_v51  ;;  %v1063_v58 = vadd.f32 1.0, %v1055_v48  ;;  %v1061_v16 = vadd.f32 %v116_v1, %v96_v0  ;;  %v67_v41 = vld [vmem:[%s2677_s0 + $0x1a8] sm:$0xff] }
 0x3e2   :  { %1713 = vpow2.f32 %v1240_v20  ;;  %v1064_v63 = vadd.f32 1.0, %v1056_v17  ;;  %v1065_v5 = vadd.f32 1.0, %v1057_v27  ;;  %v1066_v10 = vadd.f32 1.0, %v1058_v47  ;;  %v68_v27 = vld [vmem:[%s2677_s0 + $0x1b0] sm:$0xff]  ;;  %v41_v47 = vld [vmem:[%s2677_s0 + $0x98] sm:$0xff] }
 0x3e3   :  { %1715 = vpow2.f32 %v1241_v21  ;;  %v1067_v14 = vadd.f32 1.0, %v1059_v57  ;;  %v1247_v15 = vmul.f32 -1.442695, %v1063_v58  ;;  %v1062_v20 = vadd.f32 %v117_v8, %v97_v6  ;;  %v90_v58 = vld [vmem:[%s2677_s0 + $0x260] sm:$0xff] }
 0x3e4   :  { %922 = vadd.xlane.f32.xlu1 %v921_v55  ;;  %910 = vadd.xlane.f32.xlu0 %v909_v56  ;;  %1717 = vpow2.f32 %v1242_v22  ;;  %v1248_v19 = vmul.f32 -1.442695, %v1064_v63  ;;  %v1249_v21 = vmul.f32 -1.442695, %v1065_v5  ;;  %v1250_v22 = vmul.f32 -1.442695, %v1066_v10 }
 0x3e5   :  { %1719 = vpow2.f32 %v1243_v23  ;;  %v1251_v24 = vmul.f32 -1.442695, %v1067_v14  ;;  %v1069_v25 = vadd.f32 1.0, %v1061_v16  ;;  %v1070_v29 = vadd.f32 1.0, %v1062_v20  ;;  %v119_v10 = vld [vmem:[%s2677_s0 + $0x388] sm:$0xff]  ;;  %v92_v14 = vld [vmem:[%s2677_s0 + $0x270] sm:$0xff] }
 0x3e6   :  { %1721 = vpow2.f32 %v1244_v46  ;;  %v1119_v48 = vadd.f32 %v66_v36, %v38_v35  ;;  %v1120_v52 = vadd.f32 %v67_v41, %v39_v40  ;;  %v121_v20 = vld [vmem:[%s2677_s0 + $0x398] sm:$0xff]  ;;  %v70_v36 = vld [vmem:[%s2677_s0 + $0x1c0] sm:$0xff]  ;;  %v72_v41 = vld [vmem:[%s2677_s0 + $0x1d0] sm:$0xff] }
 0x3e7   :  { %1723 = vpow2.f32 %v1245_v11  ;;  %v1254_v45 = vmul.f32 -1.442695, %v1070_v29 }
 0x3e8   :  { %925 = vadd.xlane.f32.xlu1 %v924_v59  ;;  %913 = vadd.xlane.f32.xlu0 %v912_v60  ;;  %v95_v60 = vld [vmem:[%s2677_s0 + $0x288] sm:$0xff]  ;;  %1725 = vpow2.f32 %v1246_v26  ;;  %v40_v26 = vld [vmem:[%s2677_s0 + $0x90] sm:$0xff] }
 0x3e9   :  { %v1060_v13 = vadd.f32 %v115_v61, %v95_v60  ;;  %v1121_v63 = vadd.f32 %v68_v27, %v40_v26  ;;  %v124_v26 = vld [vmem:[%s2677_s0 + $0x3b0] sm:$0xff] }
 0x3eb   :  { %v1712_v43 = vpop.eup %1711  ;;  %v1068_v23 = vadd.f32 1.0, %v1060_v13 }
 0x3ec   :  { %v1714_v18 = vpop.eup %1713  ;;  %v1031_v34 = vadd.f32 1.0, %v1712_v43  ;;  %v1253_v43 = vmul.f32 -1.442695, %v1069_v25 }
 0x3ed   :  { %v1716_v33 = vpop.eup %1715  ;;  %v1032_v56 = vadd.f32 1.0, %v1714_v18  ;;  %v1252_v38 = vmul.f32 -1.442695, %v1068_v23 }
 0x3ee   :  { %v1718_v55 = vpop.eup %1717  ;;  %v1033_v62 = vadd.f32 1.0, %v1716_v33  ;;  %1727 = vrcp.f32 %v1031_v34 }
 0x3ef   :  { %v1720_v59 = vpop.eup %1719  ;;  %v1034_v4 = vadd.f32 1.0, %v1718_v55  ;;  %1729 = vrcp.f32 %v1032_v56  ;;  %v69_v55 = vld [vmem:[%s2677_s0 + $0x1b8] sm:$0xff] }
 0x3f0   :  { %v1035_v9 = vadd.f32 1.0, %v1720_v59  ;;  %1731 = vrcp.f32 %v1033_v62  ;;  %v1722_v28 = vpop.eup %1721  ;;  %v118_v59 = vld [vmem:[%s2677_s0 + $0x380] sm:$0xff] }
 0x3f1   :  { %1733 = vrcp.f32 %v1034_v4  ;;  %v1724_v30 = vpop.eup %1723  ;;  %v1036_v31 = vadd.f32 1.0, %v1722_v28  ;;  %v1122_v4 = vadd.f32 %v69_v55, %v41_v47  ;;  %v1123_v6 = vadd.f32 %v118_v59, %v90_v58 }
 0x3f2   :  { %1735 = vrcp.f32 %v1035_v9  ;;  %v1726_v32 = vpop.eup %1725  ;;  %v1037_v37 = vadd.f32 1.0, %v1724_v30  ;;  %v91_v9 = vld [vmem:[%s2677_s0 + $0x268] sm:$0xff] }
 0x3f3   :  { %1737 = vpow2.f32 %v1247_v15  ;;  %v1038_v42 = vadd.f32 1.0, %v1726_v32  ;;  %v120_v15 = vld [vmem:[%s2677_s0 + $0x390] sm:$0xff] }
 0x3f4   :  { %1739 = vpow2.f32 %v1248_v19  ;;  %v93_v19 = vld [vmem:[%s2677_s0 + $0x278] sm:$0xff]  ;;  %v1125_v29 = vadd.f32 %v120_v15, %v92_v14 }
 0x3f5   :  { %1741 = vpow2.f32 %v1249_v21 }
 0x3f6   :  { %1743 = vpow2.f32 %v1250_v22 }
 0x3f7   :  { %1745 = vpow2.f32 %v1251_v24  ;;  %v1124_v24 = vadd.f32 %v119_v10, %v91_v9 }
 0x3f8   :  { %v2394_v39 = vpop.eup %1727  ;;  %1747 = vrcp.f32 %v1036_v31  ;;  %v1126_v31 = vadd.f32 %v121_v20, %v93_v19 }
 0x3f9   :  { %v2402_v44 = vpop.eup %1729  ;;  %1749 = vrcp.f32 %v1037_v37 }
 0x3fa   :  { %v2404_v46 = vpop.eup %1731  ;;  %1751 = vrcp.f32 %v1038_v42 }
 0x3fb   :  { %v2406_v51 = vpop.eup %1733  ;;  %1753 = vpow2.f32 %v1252_v38  ;;  %v71_v38 = vld [vmem:[%s2677_s0 + $0x1c8] sm:$0xff] }
 0x3fc   :  { %v2408_v11 = vpop.eup %1735  ;;  %1755 = vpow2.f32 %v1253_v43  ;;  %v73_v43 = vld [vmem:[%s2677_s0 + $0x1d8] sm:$0xff] }
 0x3fd   :  { %v1738_v17 = vpop.eup %1737  ;;  %1757 = vpow2.f32 %v1254_v45 }
 0x3fe   :  { %v1740_v18 = vpop.eup %1739  ;;  %v1095_v33 = vadd.f32 1.0, %v1738_v17  ;;  %1759 = vtanh.f32 %v1119_v48  ;;  %v122_v48 = vld [vmem:[%s2677_s0 + $0x3a0] sm:$0xff]  ;;  %v123_v17 = vld [vmem:[%s2677_s0 + $0x3a8] sm:$0xff] }
 0x3ff   :  { %v1742_v34 = vpop.eup %1741  ;;  %v1096_v56 = vadd.f32 1.0, %v1740_v18  ;;  %1761 = vtanh.f32 %v1120_v52 }
 0x400   :  { %v1744_v57 = vpop.eup %1743  ;;  %v1097_v60 = vadd.f32 1.0, %v1742_v34  ;;  %1763 = vrcp.f32 %v1095_v33  ;;  %v125_v33 = vld [vmem:[%s2677_s0 + $0x3b8] sm:$0xff] }
 0x401   :  { %v1746_v61 = vpop.eup %1745  ;;  %v1098_v62 = vadd.f32 1.0, %v1744_v57  ;;  %1765 = vrcp.f32 %v1096_v56 }
 0x402   :  { %v2428_v0 = vpop.eup %1747  ;;  %v1099_v1 = vadd.f32 1.0, %v1746_v61  ;;  %1767 = vrcp.f32 %v1097_v60 }
 0x403   :  { %v2430_v5 = vpop.eup %1749  ;;  %1769 = vrcp.f32 %v1098_v62 }
 0x404   :  { %v2432_v8 = vpop.eup %1751  ;;  %1771 = vrcp.f32 %v1099_v1 }
 0x405   :  { %v1754_v13 = vpop.eup %1753  ;;  %1773 = vtanh.f32 %v1121_v63 }
 0x406   :  { %v1756_v16 = vpop.eup %1755  ;;  %v1100_v21 = vadd.f32 1.0, %v1754_v13  ;;  %1775 = vtanh.f32 %v1122_v4 }
 0x407   :  { %v1758_v22 = vpop.eup %1757  ;;  %v1101_v23 = vadd.f32 1.0, %v1756_v16  ;;  %1777 = vtanh.f32 %v1123_v6 }
 0x408   :  { %v1760_v25 = vpop.eup %1759  ;;  %v1102_v28 = vadd.f32 1.0, %v1758_v22  ;;  %1779 = vrcp.f32 %v1100_v21 }
 0x409   :  { %v1762_v30 = vpop.eup %1761  ;;  %1781 = vrcp.f32 %v1101_v23  ;;  %v1151_v58 = vmul.f32 %v1760_v25, %v2394_v39 }
 0x40a   :  { %v1764_v32 = vpop.eup %1763  ;;  %1783 = vrcp.f32 %v1102_v28  ;;  %v1152_v60 = vmul.f32 %v1762_v30, %v2402_v44  ;;  %v74_v30 = vld [vmem:[%s2677_s0 + $0x1e0] sm:$0xff] }
 0x40b   :  { %v1766_v35 = vpop.eup %1765  ;;  %1785 = vtanh.f32 %v1124_v24 }
 0x40c   :  { %v1768_v37 = vpop.eup %1767  ;;  %1787 = vtanh.f32 %v1125_v29 }
 0x40d   :  { %v1770_v40 = vpop.eup %1769  ;;  %1789 = vtanh.f32 %v1126_v31  ;;  %v98_v31 = vld [vmem:[%s2677_s0 + $0x2c0] sm:$0xff] }
 0x40e   :  { %v1772_v42 = vpop.eup %1771  ;;  %1791 = vtanh.f32 %v70_v36  ;;  %v76_v36 = vld [vmem:[%s2677_s0 + $0x1f0] sm:$0xff] }
 0x40f   :  { %v1774_v45 = vpop.eup %1773  ;;  %1793 = vtanh.f32 %v71_v38  ;;  %v77_v38 = vld [vmem:[%s2677_s0 + $0x1f8] sm:$0xff] }
 0x410   :  { %v1776_v52 = vpop.eup %1775  ;;  %1795 = vtanh.f32 %v72_v41  ;;  %v1153_v63 = vmul.f32 %v1774_v45, %v2404_v46  ;;  %v186_v41 = vadd.f32 %v98_v31, %v74_v30  ;;  %v22_v45 = vld [vmem:[%s2677_s0] sm:$0xff] }
 0x411   :  { %v1778_v18 = vpop.eup %1777  ;;  %1797 = vtanh.f32 %v73_v43  ;;  %v1154_v6 = vmul.f32 %v1776_v52, %v2406_v51  ;;  %v46_v43 = vld [vmem:[%s2677_s0 + $0xe0] sm:$0xff]  ;;  %v47_v52 = vld [vmem:[%s2677_s0 + $0xe8] sm:$0xff] }
 0x412   :  { %v1780_v27 = vpop.eup %1779  ;;  %1799 = vtanh.f32 %v122_v48  ;;  %v1155_v13 = vmul.f32 %v1778_v18, %v2408_v11 }
 0x413   :  { %v1782_v34 = vpop.eup %1781  ;;  %1801 = vtanh.f32 %v123_v17  ;;  %v23_v17 = vld [vmem:[%s2677_s0 + $0x8] sm:$0xff] }
 0x414   :  { %v1784_v47 = vpop.eup %1783  ;;  %1803 = vtanh.f32 %v124_v26  ;;  %v48_v26 = vld [vmem:[%s2677_s0 + $0xf0] sm:$0xff] }
 0x415   :  { %v1786_v55 = vpop.eup %1785  ;;  %1805 = vtanh.f32 %v125_v33  ;;  %v1195_v33 = vmul.f32 -1.442695, %v186_v41 }
 0x416   :  { %v1788_v56 = vpop.eup %1787  ;;  %v1156_v39 = vmul.f32 %v1786_v55, %v2428_v0  ;;  %v182_v55 = vadd.f32 %v46_v43, %v22_v45 }
 0x417   :  { %v1790_v57 = vpop.eup %1789  ;;  %v1157_v21 = vmul.f32 %v1788_v56, %v2430_v5  ;;  %1807 = vpow2.f32 %v1195_v33 }
 0x418   :  { %v1792_v59 = vpop.eup %1791  ;;  %v1158_v11 = vmul.f32 %v1790_v57, %v2432_v8  ;;  %v183_v57 = vadd.f32 %v47_v52, %v23_v17 }
 0x419   :  { %v1794_v61 = vpop.eup %1793  ;;  %v1143_v62 = vmul.f32 %v1792_v59, %v1764_v32  ;;  %v75_v32 = vld [vmem:[%s2677_s0 + $0x1e8] sm:$0xff] }
 0x41a   :  { %v1796_v1 = vpop.eup %1795  ;;  %v1144_v4 = vmul.f32 %v1794_v61, %v1766_v35  ;;  %v99_v35 = vld [vmem:[%s2677_s0 + $0x2c8] sm:$0xff] }
 0x41b   :  { %v1798_v9 = vpop.eup %1797  ;;  %v1145_v10 = vmul.f32 %v1796_v1, %v1768_v37  ;;  %v1159_v14 = vadd.f32 %v1151_v58, %v1143_v62  ;;  %v100_v37 = vld [vmem:[%s2677_s0 + $0x2d0] sm:$0xff]  ;;  %v1191_v1 = vmul.f32 -1.442695, %v182_v55 }
 0x41c   :  { %v1800_v15 = vpop.eup %1799  ;;  %v1146_v16 = vmul.f32 %v1798_v9, %v1770_v40  ;;  %v1160_v19 = vadd.f32 %v1152_v60, %v1144_v4  ;;  %v101_v40 = vld [vmem:[%s2677_s0 + $0x2d8] sm:$0xff]  ;;  %v188_v48 = vadd.f32 %v100_v37, %v76_v36  ;;  %v1192_v4 = vmul.f32 -1.442695, %v183_v57  ;;  %v51_v57 = vld [vmem:[%s2677_s0 + $0x108] sm:$0xff] }
 0x41d   :  { %v1802_v20 = vpop.eup %1801  ;;  %v1147_v44 = vmul.f32 %v1800_v15, %v1772_v42  ;;  %v1161_v22 = vadd.f32 %v1153_v63, %v1145_v10  ;;  %1167 = vst.msk [vmem:[%s2679_s6] sm:$0xff] %vm294_vm0, %v1159_v14  ;;  %v187_v42 = vadd.f32 %v99_v35, %v75_v32  ;;  %v189_v18 = vadd.f32 %v101_v40, %v77_v38  ;;  %v78_v14 = vld [vmem:[%s2677_s0 + $0x200] sm:$0xff] }
 0x41e   :  { %v1804_v46 = vpop.eup %1803  ;;  %v1148_v51 = vmul.f32 %v1802_v20, %v1780_v27  ;;  %v1162_v23 = vadd.f32 %v1154_v6, %v1146_v16  ;;  %1168 = vst.msk [vmem:[%s2679_s6 + $0x8] sm:$0xff] %vm294_vm0, %v1160_v19  ;;  %v24_v27 = vld [vmem:[%s2677_s0 + $0x10] sm:$0xff]  ;;  %v1197_v58 = vmul.f32 -1.442695, %v188_v48  ;;  %v102_v15 = vld [vmem:[%s2677_s0 + $0x2e0] sm:$0xff]  ;;  %v79_v16 = vld [vmem:[%s2677_s0 + $0x208] sm:$0xff] }
 0x41f   :  { %v1806_v0 = vpop.eup %1805  ;;  %v1149_v24 = vmul.f32 %v1804_v46, %v1782_v34  ;;  %v1163_v25 = vadd.f32 %v1155_v13, %v1147_v44  ;;  %1169 = vst.msk [vmem:[%s2679_s6 + $0x10] sm:$0xff] %vm294_vm0, %v1161_v22  ;;  %v49_v34 = vld [vmem:[%s2677_s0 + $0xf8] sm:$0xff]  ;;  %v1196_v56 = vmul.f32 -1.442695, %v187_v42  ;;  %v184_v59 = vadd.f32 %v48_v26, %v24_v27  ;;  %v80_v44 = vld [vmem:[%s2677_s0 + $0x210] sm:$0xff] }
 0x420   :  { %v1150_v5 = vmul.f32 %v1806_v0, %v1784_v47  ;;  %v1164_v28 = vadd.f32 %v1156_v39, %v1148_v51  ;;  %1170 = vst.msk [vmem:[%s2679_s6 + $0x18] sm:$0xff] %vm294_vm0, %v1162_v23  ;;  %v25_v47 = vld [vmem:[%s2677_s0 + $0x18] sm:$0xff]  ;;  %v1198_v60 = vmul.f32 -1.442695, %v189_v18  ;;  %v103_v39 = vld [vmem:[%s2677_s0 + $0x2e8] sm:$0xff]  ;;  %v242_v23 = vadd.f32 %v102_v15, %v78_v14 }
 0x421   :  { %v1165_v8 = vadd.f32 %v1157_v21, %v1149_v24  ;;  %1171 = vst.msk [vmem:[%s2679_s6 + $0x20] sm:$0xff] %vm294_vm0, %v1163_v25  ;;  %v185_v61 = vadd.f32 %v49_v34, %v25_v47  ;;  %1809 = vpow2.f32 %v1196_v56  ;;  %v1193_v6 = vmul.f32 -1.442695, %v184_v59  ;;  %v104_v21 = vld [vmem:[%s2677_s0 + $0x2f0] sm:$0xff]  ;;  %v81_v51 = vld [vmem:[%s2677_s0 + $0x218] sm:$0xff]  ;;  %v1808_v0 = vpop.eup %1807  ;;  %v50_v34 = vld [vmem:[%s2677_s0 + $0x100] sm:$0xff] }
 0x422   :  { %v1166_v29 = vadd.f32 %v1158_v11, %v1150_v5  ;;  %1172 = vst.msk [vmem:[%s2679_s6 + $0x28] sm:$0xff] %vm294_vm0, %v1164_v28  ;;  %1811 = vpow2.f32 %v1197_v58  ;;  %v105_v11 = vld [vmem:[%s2677_s0 + $0x2f8] sm:$0xff]  ;;  %v243_v24 = vadd.f32 %v103_v39, %v79_v16  ;;  %v218_v36 = vadd.f32 1.0, %v1808_v0  ;;  %v26_v47 = vld [vmem:[%s2677_s0 + $0x20] sm:$0xff]  ;;  %v27_v58 = vld [vmem:[%s2677_s0 + $0x28] sm:$0xff] }
 0x423   :  { %1173 = vst.msk [vmem:[%s2679_s6 + $0x30] sm:$0xff] %vm294_vm0, %v1165_v8  ;;  %1813 = vpow2.f32 %v1198_v60  ;;  %v1194_v9 = vmul.f32 -1.442695, %v185_v61  ;;  %v244_v8 = vadd.f32 %v104_v21, %v80_v44  ;;  %v245_v30 = vadd.f32 %v105_v11, %v81_v51  ;;  %v52_v61 = vld [vmem:[%s2677_s0 + $0x110] sm:$0xff] }
 0x424   :  { %1174 = vst.msk [vmem:[%s2679_s6 + $0x38] sm:$0xff] %vm294_vm0, %v1166_v29  ;;  %1815 = vpow2.f32 %v1191_v1 }
 0x425   :  { %1817 = vpow2.f32 %v1192_v4  ;;  %v53_v4 = vld [vmem:[%s2677_s0 + $0x118] sm:$0xff] }
 0x426   :  { %1819 = vpow2.f32 %v1193_v6  ;;  %v29_v6 = vld [vmem:[%s2677_s0 + $0x38] sm:$0xff] }
 0x427   :  { %1821 = vpow2.f32 %v1194_v9  ;;  %v238_v9 = vadd.f32 %v50_v34, %v26_v47  ;;  %v971_v47 = vld [vmem:[%s2681_s4] sm:$0xff] }
 0x428   :  { %1823 = vtanh.f32 %v242_v23 }
 0x429   :  { %1825 = vtanh.f32 %v243_v24 }
 0x42a   :  { %1827 = vtanh.f32 %v244_v8 }
 0x42b   :  { %v1810_v25 = vpop.eup %1809  ;;  %1829 = vtanh.f32 %v245_v30 }
 0x42c   :  { %v1812_v29 = vpop.eup %1811  ;;  %v219_v41 = vadd.f32 1.0, %v1810_v25  ;;  %1831 = vrcp.f32 %v218_v36 }
 0x42d   :  { %v1814_v35 = vpop.eup %1813  ;;  %v220_v43 = vadd.f32 1.0, %v1812_v29 }
 0x42e   :  { %v1816_v40 = vpop.eup %1815  ;;  %v221_v17 = vadd.f32 1.0, %v1814_v35  ;;  %1833 = vrcp.f32 %v219_v41 }
 0x42f   :  { %v1818_v42 = vpop.eup %1817  ;;  %v214_v27 = vadd.f32 1.0, %v1816_v40  ;;  %1835 = vrcp.f32 %v220_v43  ;;  %v959_v43 = vld [vmem:[%s2680_s3] sm:$0xff] }
 0x430   :  { %v1820_v52 = vpop.eup %1819  ;;  %v215_v55 = vadd.f32 1.0, %v1818_v42  ;;  %1837 = vrcp.f32 %v221_v17  ;;  %v962_v17 = vld [vmem:[%s2680_s3 + $0x18] sm:$0xff] }
 0x431   :  { %v1822_v18 = vpop.eup %1821  ;;  %v216_v59 = vadd.f32 1.0, %v1820_v52  ;;  %1839 = vrcp.f32 %v214_v27  ;;  %v961_v52 = vld [vmem:[%s2680_s3 + $0x10] sm:$0xff] }
 0x432   :  { %1841 = vrcp.f32 %v215_v55  ;;  %v1824_v14 = vpop.eup %1823 }
 0x433   :  { %1843 = vrcp.f32 %v216_v59  ;;  %v972_v59 = vld [vmem:[%s2681_s4 + $0x8] sm:$0xff] }
 0x469   :  { %v908_v62 = vpop.xlane.xlu1 %907  ;;  %v905_v63 = vpop.xlane.xlu0 %904 }
 0x46a   :  { %v927_v22 = vadd.f32 %v908_v62, %v905_v63  ;;  %v28_v62 = vld [vmem:[%s2677_s0 + $0x30] sm:$0xff]  ;;  %v217_v63 = vadd.f32 1.0, %v1822_v18 }
 0x46b   :  { %v240_v16 = vadd.f32 %v52_v61, %v28_v62  ;;  %v974_v61 = vld [vmem:[%s2681_s4 + $0x18] sm:$0xff] }
 0x46c   :  { %1845 = vrcp.f32 %v217_v63 }
 0x46d   :  { %v920_v10 = vpop.xlane.xlu1 %919  ;;  %v917_v13 = vpop.xlane.xlu0 %916  ;;  %1847 = vtanh.f32 %v238_v9 }
 0x46e   :  { %v936_v46 = vadd.f32 %v920_v10, %v917_v13  ;;  %v239_v13 = vadd.f32 %v51_v57, %v27_v58 }
 0x470   :  { %1849 = vtanh.f32 %v239_v13 }
 0x471   :  { %v923_v19 = vpop.xlane.xlu1 %922  ;;  %v911_v20 = vpop.xlane.xlu0 %910  ;;  %1851 = vtanh.f32 %v240_v16 }
 0x472   :  { %v937_v5 = vadd.f32 %v936_v46, %v923_v19  ;;  %v928_v28 = vadd.f32 %v927_v22, %v911_v20  ;;  %v1826_v19 = vpop.eup %1825  ;;  %v241_v20 = vadd.f32 %v53_v4, %v29_v6 }
 0x473   :  { %v1828_v44 = vpop.eup %1827 }
 0x474   :  { %v1830_v46 = vpop.eup %1829  ;;  %1853 = vtanh.f32 %v241_v20 }
 0x475   :  { %v926_v31 = vpop.xlane.xlu1 %925  ;;  %v914_v32 = vpop.xlane.xlu0 %913 }
 0x476   :  { %v938_v37 = vadd.f32 %v937_v5, %v926_v31  ;;  %v929_v38 = vadd.f32 %v928_v28, %v914_v32  ;;  %v1832_v51 = vpop.eup %1831 }
 0x477   :  { %v1834_v0 = vpop.eup %1833 }
 0x478   :  { %v939_v45 = vrot.slane %v938_v37, 4  ;;  %v930_v48 = vrot.slane %v929_v38, 4  ;;  %v1836_v24 = vpop.eup %1835  ;;  %v259_v40 = vmul.f32 %v1834_v0, %v1826_v19 }
 0x479   :  { %v1838_v28 = vpop.eup %1837  ;;  %v260_v41 = vmul.f32 %v1836_v24, %v1828_v44 }
 0x47a   :  { %v940_v26 = vadd.f32 %v939_v45, %v938_v37  ;;  %v931_v33 = vadd.f32 %v930_v48, %v929_v38  ;;  %v1840_v8 = vpop.eup %1839  ;;  %v258_v38 = vmul.f32 %v1832_v51, %v1824_v14  ;;  %v261_v42 = vmul.f32 %v1838_v28, %v1830_v46  ;;  %v960_v48 = vld [vmem:[%s2680_s3 + $0x8] sm:$0xff] }
 0x47b   :  { %v1842_v29 = vpop.eup %1841 }
 0x47c   :  { %v941_v56 = vrot.slane %v940_v26, 2  ;;  %v932_v60 = vrot.slane %v931_v33, 2  ;;  %v1844_v30 = vpop.eup %1843 }
 0x47d   :  { %v1846_v31 = vpop.eup %1845 }
 0x47e   :  { %v942_v1 = vadd.f32 %v941_v56, %v940_v26  ;;  %v933_v10 = vadd.f32 %v932_v60, %v931_v33  ;;  %v1848_v32 = vpop.eup %1847  ;;  %v973_v60 = vld [vmem:[%s2681_s4 + $0x10] sm:$0xff] }
 0x47f   :  { %v1850_v35 = vpop.eup %1849  ;;  %v254_v18 = vmul.f32 %v1848_v32, %v1840_v8 }
 0x480   :  { %v943_v15 = vrot.slane %v942_v1, 1  ;;  %v934_v39 = vrot.slane %v933_v10, 1  ;;  %v1852_v36 = vpop.eup %1851  ;;  %v255_v26 = vmul.f32 %v1850_v35, %v1842_v29 }
 0x481   :  { %v1854_v37 = vpop.eup %1853  ;;  %v256_v27 = vmul.f32 %v1852_v36, %v1844_v30 }
 0x482   :  { %v944_v21 = vadd.f32 %v943_v15, %v942_v1  ;;  %v935_v22 = vadd.f32 %v934_v39, %v933_v10  ;;  %v257_v33 = vmul.f32 %v1854_v37, %v1846_v31 }
 0x484   :  { %v946_v11 = vmul.f32 0.00390625, %v944_v21  ;;  %v945_v23 = vmul.f32 0.00390625, %v935_v22 }
 0x486   :  { %v948_v25 = vadd.f32 1e-05, %v946_v11  ;;  %v947_v5 = vadd.f32 1e-05, %v945_v23 }
 0x488   :  { %1855 = vrsqrt.f32 %v948_v25 }
 0x489   :  { %1857 = vrsqrt.f32 %v947_v5 }
 0x492   :  { %v1856_v45 = vpop.eup %1855 }
 0x493   :  { %v1858_v34 = vpop.eup %1857  ;;  %v955_v55 = vmul.f32 %v1856_v45, %v2262_v3  ;;  %v956_v56 = vmul.f32 %v1856_v45, %v2260_v2  ;;  %v957_v57 = vmul.f32 %v1856_v45, %v2264_v7  ;;  %v958_v58 = vmul.f32 %v1856_v45, %v2280_v53 }
 0x494   :  { %v951_v3 = vmul.f32 %v1858_v34, %v2254_v50  ;;  %v952_v2 = vmul.f32 %v1858_v34, %v2251_v49  ;;  %v953_v7 = vmul.f32 %v1858_v34, %v2266_v12  ;;  %v954_v53 = vmul.f32 %v1858_v34, %v2282_v54 }
 0x495   :  { %v967_v62 = vmul.f32 %v959_v43, %v955_v55  ;;  %v968_v63 = vmul.f32 %v960_v48, %v956_v56  ;;  %v969_v1 = vmul.f32 %v961_v52, %v957_v57  ;;  %v970_v4 = vmul.f32 %v962_v17, %v958_v58 }
 0x496   :  { %v963_v6 = vmul.f32 %v959_v43, %v951_v3  ;;  %v964_v9 = vmul.f32 %v960_v48, %v952_v2  ;;  %v965_v10 = vmul.f32 %v961_v52, %v953_v7  ;;  %v966_v13 = vmul.f32 %v962_v17, %v954_v53 }
 0x497   :  { %v979_v14 = vadd.f32 %v971_v47, %v967_v62  ;;  %v980_v15 = vadd.f32 %v972_v59, %v968_v63  ;;  %v981_v16 = vadd.f32 %v973_v60, %v969_v1  ;;  %v982_v39 = vadd.f32 %v974_v61, %v970_v4 }
 0x498   :  { %v975_v19 = vadd.f32 %v971_v47, %v963_v6  ;;  %v976_v50 = vadd.f32 %v972_v59, %v964_v9  ;;  %v977_v20 = vadd.f32 %v973_v60, %v965_v10  ;;  %v978_v49 = vadd.f32 %v974_v61, %v966_v13 }
 0x499   :  { %v987_v44 = vadd.f32 %v979_v14, %v258_v38  ;;  %v988_v12 = vadd.f32 %v980_v15, %v259_v40  ;;  %v989_v21 = vadd.f32 %v981_v16, %v260_v41  ;;  %v990_v54 = vadd.f32 %v982_v39, %v261_v42 }
 0x49a   :  { %v983_v22 = vadd.f32 %v975_v19, %v254_v18  ;;  %v984_v46 = vadd.f32 %v976_v50, %v255_v26  ;;  %v985_v51 = vadd.f32 %v977_v20, %v256_v27  ;;  %v986_v11 = vadd.f32 %v978_v49, %v257_v33 }
 0x49b   :  { %995 = vst.msk [vmem:[%s2682_s5 + $0x20] sm:$0xff] %vm294_vm0, %v987_v44  ;;  %996 = vst.msk [vmem:[%s2682_s5 + $0x28] sm:$0xff] %vm294_vm0, %v988_v12 }
 0x49c   :  { %997 = vst.msk [vmem:[%s2682_s5 + $0x30] sm:$0xff] %vm294_vm0, %v989_v21  ;;  %998 = vst.msk [vmem:[%s2682_s5 + $0x38] sm:$0xff] %vm294_vm0, %v990_v54 }
 0x49d   :  { %991 = vst.msk [vmem:[%s2682_s5] sm:$0xff] %vm294_vm0, %v983_v22  ;;  %992 = vst.msk [vmem:[%s2682_s5 + $0x8] sm:$0xff] %vm294_vm0, %v984_v46 }
 0x49e   :  { %993 = vst.msk [vmem:[%s2682_s5 + $0x10] sm:$0xff] %vm294_vm0, %v985_v51  ;;  %994 = vst.msk [vmem:[%s2682_s5 + $0x18] sm:$0xff] %vm294_vm0, %v986_v11 }

// kernel: _lambda_.74
= control target key start
LH: loop header
LB: loop body
LE: loop exit
PB: predicated region body
PF: predicated region fallthrough
CT: control target
= control target key end

     0   :  { %s283_s1 = inlined_call_operand.vmem [shape: bf16[128,128], index: 1, kind: input, shape index: {}]   ;;  %s284_s0 = inlined_call_operand.vmem [shape: bf16[32,128], index: 0, kind: input, shape index: {}]   ;;  %s285_s2 = inlined_call_operand.vmem [shape: f32[32,128], index: 2, kind: output, shape index: {}]  }
   0x1   :  { %v216_v0 = vld [vmem:[%s283_s1] sm:$0xff]   ;;  %v217_v1 = vld [vmem:[%s283_s1 + $0x8] sm:$0xff]   ;;  %v218_v2 = vld [vmem:[%s283_s1 + $0x10] sm:$0xff]  }
   0x2   :  { %196 = vmatprep.subr.bf16.mxu0 %v216_v0  ;;  %v219_v3 = vld [vmem:[%s283_s1 + $0x18] sm:$0xff]   ;;  %v224_v4 = vld [vmem:[%s284_s0] sm:$0xff]   ;;  %v221_v6 = vld [vmem:[%s283_s1 + $0x28] sm:$0xff]  }
   0x3   :  { %197 = vmatpush3.bf16.msra.mxu0 %v216_v0  ;;  %212 = vmatprep.mubr.bf16.mxu0 %v224_v4  ;;  %v220_v5 = vld [vmem:[%s283_s1 + $0x20] sm:$0xff]   ;;  %v222_v7 = vld [vmem:[%s283_s1 + $0x30] sm:$0xff]   ;;  %v223_v8 = vld [vmem:[%s283_s1 + $0x38] sm:$0xff]  }
   0x4   :  { %198 = vmatprep.subr.bf16.mxu0 %v217_v1  ;;  %v225_v9 = vld [vmem:[%s284_s0 + $0x8] sm:$0xff]  }
   0x7   :  { %199 = vmatpush3.bf16.msra.mxu0 %v217_v1 }
   0x8   :  { %200 = vmatprep.subr.bf16.mxu0 %v218_v2 }
   0xb   :  { %201 = vmatpush3.bf16.msra.mxu0 %v218_v2 }
   0xc   :  { %202 = vmatprep.subr.bf16.mxu0 %v219_v3 }
   0xf   :  { %203 = vmatpush3.bf16.msra.mxu0 %v219_v3 }
  0x10   :  { %204 = vmatprep.subr.bf16.mxu0 %v220_v5 }
  0x13   :  { %205 = vmatpush3.bf16.msra.mxu0 %v220_v5 }
  0x14   :  { %206 = vmatprep.subr.bf16.mxu0 %v221_v6 }
  0x17   :  { %207 = vmatpush3.bf16.msra.mxu0 %v221_v6 }
  0x18   :  { %208 = vmatprep.subr.bf16.mxu0 %v222_v7 }
  0x1b   :  { %209 = vmatpush3.bf16.msra.mxu0 %v222_v7 }
  0x1c   :  { %210 = vmatprep.subr.bf16.mxu0 %v223_v8 }
  0x1f   :  { %211 = vmatpush3.bf16.msra.mxu0 %v223_v8 }
  0x22   :  { %213 = vmatmul.mubr.bf16.vlgmr.msra.gmra.mrb[0].mxu0 %v225_v9 }
  0xf5   :  { %v214_v10 = vpop.f32.mrb[0].mxu0 }
  0xf6   :  { %170 = vst [vmem:[%s285_s2 + $0x10] sm:$0xff] %v214_v10  ;;  %v138_v11 = vpop.f32.mrb[1].mxu0 }
  0xf7   :  { %168 = vst [vmem:[%s285_s2] sm:$0xff] %v138_v11  ;;  %v215_v12 = vpop.f32.mrb[2].mxu0 }
  0xf8   :  { %171 = vst [vmem:[%s285_s2 + $0x18] sm:$0xff] %v215_v12  ;;  %v141_v13 = vpop.f32.mrb[3].mxu0 }
  0xf9   :  { %169 = vst [vmem:[%s285_s2 + $0x8] sm:$0xff] %v141_v13 }

// kernel: _lambda_.76
= control target key start
LH: loop header
LB: loop body
LE: loop exit
PB: predicated region body
PF: predicated region fallthrough
CT: control target
= control target key end

     0   :  { %vm302_vm0 = vcmask 64512   ;;  %v1770_v0 = vmov 0.0|0.0   ;;  %v1771_v7 = vmov 0.0   ;;  %vm625_vm2 = vcmask 261120   ;;  %s2665_s2 = inlined_call_operand.vmem [shape: f32[2,160,8], index: 2, kind: input, shape index: {}]   ;;  %s2666_s0 = inlined_call_operand.vmem [shape: f32[2,15,32,8], index: 0, kind: input, shape index: {}]   ;;  %s2667_s1 = inlined_call_operand.vmem [shape: f32[2,32,8], index: 1, kind: input, shape index: {}]   ;;  %s2668_s6 = inlined_call_operand.vmem [shape: f32[2,32,8], index: 6, kind: output, shape index: {1}]   ;;  %s2669_s3 = inlined_call_operand.vmem [shape: f32[1,32,8], index: 3, kind: input, shape index: {}]   ;;  %s2670_s4 = inlined_call_operand.vmem [shape: f32[1,32,8], index: 4, kind: input, shape index: {}]   ;;  %s2671_s5 = inlined_call_operand.vmem [shape: f32[2,32,8], index: 5, kind: output, shape index: {0}]  }
   0x1   :  { %1400 = vmatprep.subr.bf16.mxu0 %v1770_v0  ;;  %v262_v1 = vld [vmem:[%s2665_s2] sm:$0xff]  ;;  %v263_v2 = vld [vmem:[%s2665_s2 + $0x8] sm:$0xff]  ;;  %vm1816_vm1 = vmpackc.low %vm302_vm0, %vm302_vm0  ;;  %1440 = vmatprep.subr.bf16.mxu1 %v1770_v0 }
   0x2   :  { %v1821_v4 = vpack.c.bf16 %v263_v2, %v262_v1  ;;  %v282_v5 = vld [vmem:[%s2665_s2 + $0xa0] sm:$0xff]  ;;  %v283_v6 = vld [vmem:[%s2665_s2 + $0xa8] sm:$0xff]  ;;  %439 = vmatprep.mubr.f32.mxu0 %v1771_v7  ;;  %600 = vmatprep.mubr.f32.mxu1 %v1771_v7  ;;  %v264_v9 = vld [vmem:[%s2665_s2 + $0x10] sm:$0xff] }
   0x3   :  { %v1831_v8 = vpack.c.bf16 %v283_v6, %v282_v5  ;;  %v265_v10 = vld [vmem:[%s2665_s2 + $0x18] sm:$0xff]  ;;  %v284_v11 = vld [vmem:[%s2665_s2 + $0xb0] sm:$0xff]  ;;  %v266_v15 = vld [vmem:[%s2665_s2 + $0x20] sm:$0xff] }
   0x4   :  { %1403 = vmatpush1.bf16.xpose.msk.msra.mxu0 %vm1816_vm1, %v1821_v4  ;;  %v285_v12 = vld [vmem:[%s2665_s2 + $0xb8] sm:$0xff]  ;;  %v1853_v13 = vpack.c.bf16 %v265_v10, %v264_v9  ;;  %v267_v16 = vld [vmem:[%s2665_s2 + $0x28] sm:$0xff]  ;;  %v286_v17 = vld [vmem:[%s2665_s2 + $0xc0] sm:$0xff] }
   0x5   :  { %1443 = vmatpush1.bf16.xpose.msk.msra.mxu1 %vm1816_vm1, %v1831_v8  ;;  %1404 = vmatprep.subr.bf16.mxu0 %v1770_v0  ;;  %v1855_v14 = vpack.c.bf16 %v285_v12, %v284_v11  ;;  %v287_v18 = vld [vmem:[%s2665_s2 + $0xc8] sm:$0xff]  ;;  %v1877_v19 = vpack.c.bf16 %v267_v16, %v266_v15  ;;  %v268_v21 = vld [vmem:[%s2665_s2 + $0x30] sm:$0xff]  ;;  %v269_v22 = vld [vmem:[%s2665_s2 + $0x38] sm:$0xff] }
   0x6   :  { %1444 = vmatprep.subr.bf16.mxu1 %v1770_v0  ;;  %v1879_v20 = vpack.c.bf16 %v287_v18, %v286_v17  ;;  %v288_v23 = vld [vmem:[%s2665_s2 + $0xd0] sm:$0xff]  ;;  %v289_v24 = vld [vmem:[%s2665_s2 + $0xd8] sm:$0xff]  ;;  %v1901_v25 = vpack.c.bf16 %v269_v22, %v268_v21  ;;  %v270_v27 = vld [vmem:[%s2665_s2 + $0x40] sm:$0xff] }
   0x7   :  { %v1903_v26 = vpack.c.bf16 %v289_v24, %v288_v23  ;;  %v271_v28 = vld [vmem:[%s2665_s2 + $0x48] sm:$0xff]  ;;  %v290_v29 = vld [vmem:[%s2665_s2 + $0xe0] sm:$0xff]  ;;  %v272_v33 = vld [vmem:[%s2665_s2 + $0x50] sm:$0xff] }
   0x8   :  { %v291_v30 = vld [vmem:[%s2665_s2 + $0xe8] sm:$0xff]  ;;  %v1925_v31 = vpack.c.bf16 %v271_v28, %v270_v27  ;;  %v273_v34 = vld [vmem:[%s2665_s2 + $0x58] sm:$0xff]  ;;  %v292_v35 = vld [vmem:[%s2665_s2 + $0xf0] sm:$0xff] }
   0x9   :  { %v1927_v32 = vpack.c.bf16 %v291_v30, %v290_v29  ;;  %v293_v36 = vld [vmem:[%s2665_s2 + $0xf8] sm:$0xff]  ;;  %v1949_v37 = vpack.c.bf16 %v273_v34, %v272_v33  ;;  %v30_v39 = vld [vmem:[%s2666_s0 + $0x40] sm:$0xff]  ;;  %v275_v44 = vld [vmem:[%s2665_s2 + $0x68] sm:$0xff] }
   0xa   :  { %v1951_v38 = vpack.c.bf16 %v293_v36, %v292_v35  ;;  %v54_v40 = vld [vmem:[%s2666_s0 + $0x120] sm:$0xff]  ;;  %v295_v47 = vld [vmem:[%s2665_s2 + $0x108] sm:$0xff]  ;;  %v32_v59 = vld [vmem:[%s2666_s0 + $0x50] sm:$0xff] }
   0xb   :  { %v82_v41 = vld [vmem:[%s2666_s0 + $0x220] sm:$0xff]  ;;  %v126_v46 = vadd.f32 %v54_v40, %v30_v39  ;;  %v31_v49 = vld [vmem:[%s2666_s0 + $0x48] sm:$0xff]  ;;  %v56_v60 = vld [vmem:[%s2666_s0 + $0x130] sm:$0xff] }
   0xc   :  { %1407 = vmatpush1.bf16.xpose.msk.msra.mxu0 %vm1816_vm1, %v1853_v13  ;;  %v106_v42 = vld [vmem:[%s2666_s0 + $0x300] sm:$0xff]  ;;  %v55_v50 = vld [vmem:[%s2666_s0 + $0x128] sm:$0xff]  ;;  %v84_v61 = vld [vmem:[%s2666_s0 + $0x230] sm:$0xff]  ;;  %v128_v6 = vadd.f32 %v56_v60, %v32_v59 }
   0xd   :  { %1447 = vmatpush1.bf16.xpose.msk.msra.mxu1 %vm1816_vm1, %v1855_v14  ;;  %1408 = vmatprep.subr.bf16.mxu0 %v1770_v0  ;;  %v274_v43 = vld [vmem:[%s2665_s2 + $0x60] sm:$0xff]  ;;  %v130_v48 = vadd.f32 %v106_v42, %v82_v41  ;;  %v83_v51 = vld [vmem:[%s2666_s0 + $0x228] sm:$0xff]  ;;  %v1312_v55 = vmul.f32 -1.442695, %v126_v46  ;;  %v127_v56 = vadd.f32 %v55_v50, %v31_v49  ;;  %v108_v62 = vld [vmem:[%s2666_s0 + $0x310] sm:$0xff] }
   0xe   :  { %1448 = vmatprep.subr.bf16.mxu1 %v1770_v0  ;;  %v294_v45 = vld [vmem:[%s2665_s2 + $0x100] sm:$0xff]  ;;  %v107_v52 = vld [vmem:[%s2666_s0 + $0x308] sm:$0xff]  ;;  %v1997_v53 = vpack.c.bf16 %v275_v44, %v274_v43  ;;  %v276_v63 = vld [vmem:[%s2665_s2 + $0x70] sm:$0xff]  ;;  %v132_v11 = vadd.f32 %v108_v62, %v84_v61  ;;  %v1314_v22 = vmul.f32 -1.442695, %v128_v6 }
   0xf   :  { %v1999_v54 = vpack.c.bf16 %v295_v47, %v294_v45  ;;  %v1316_v57 = vmul.f32 -1.442695, %v130_v48  ;;  %v131_v58 = vadd.f32 %v107_v52, %v83_v51  ;;  %v277_v1 = vld [vmem:[%s2665_s2 + $0x78] sm:$0xff]  ;;  %v296_v2 = vld [vmem:[%s2665_s2 + $0x110] sm:$0xff]  ;;  %1542 = vpow2.f32 %v1312_v55  ;;  %v278_v28 = vld [vmem:[%s2665_s2 + $0x80] sm:$0xff] }
  0x10   :  { %v1313_v5 = vmul.f32 -1.442695, %v127_v56  ;;  %v297_v9 = vld [vmem:[%s2665_s2 + $0x118] sm:$0xff]  ;;  %v2045_v18 = vpack.c.bf16 %v277_v1, %v276_v63  ;;  %v1318_v24 = vmul.f32 -1.442695, %v132_v11  ;;  %v279_v29 = vld [vmem:[%s2665_s2 + $0x88] sm:$0xff] }
  0x11   :  { %1544 = vpow2.f32 %v1316_v57  ;;  %v1317_v10 = vmul.f32 -1.442695, %v131_v58  ;;  %v33_v12 = vld [vmem:[%s2666_s0 + $0x58] sm:$0xff]  ;;  %v2047_v21 = vpack.c.bf16 %v297_v9, %v296_v2  ;;  %v298_v33 = vld [vmem:[%s2665_s2 + $0x120] sm:$0xff]  ;;  %v299_v34 = vld [vmem:[%s2665_s2 + $0x128] sm:$0xff]  ;;  %v2069_v40 = vpack.c.bf16 %v279_v29, %v278_v28 }
  0x12   :  { %v57_v15 = vld [vmem:[%s2666_s0 + $0x138] sm:$0xff]  ;;  %1546 = vpow2.f32 %v1313_v5  ;;  %v2071_v41 = vpack.c.bf16 %v299_v34, %v298_v33  ;;  %v280_v46 = vld [vmem:[%s2665_s2 + $0x90] sm:$0xff] }
  0x13   :  { %v85_v16 = vld [vmem:[%s2666_s0 + $0x238] sm:$0xff]  ;;  %v129_v23 = vadd.f32 %v57_v15, %v33_v12  ;;  %1548 = vpow2.f32 %v1317_v10  ;;  %v300_v48 = vld [vmem:[%s2665_s2 + $0x130] sm:$0xff] }
  0x14   :  { %1411 = vmatpush1.bf16.xpose.msk.msra.mxu0 %vm1816_vm1, %v1877_v19  ;;  %v109_v17 = vld [vmem:[%s2666_s0 + $0x318] sm:$0xff]  ;;  %1550 = vpow2.f32 %v1314_v22 }
  0x15   :  { %1451 = vmatpush1.bf16.xpose.msk.msra.mxu1 %vm1816_vm1, %v1879_v20  ;;  %1412 = vmatprep.subr.bf16.mxu0 %v1770_v0  ;;  %v133_v27 = vadd.f32 %v109_v17, %v85_v16  ;;  %v1315_v30 = vmul.f32 -1.442695, %v129_v23  ;;  %1552 = vpow2.f32 %v1318_v24  ;;  %v281_v47 = vld [vmem:[%s2665_s2 + $0x98] sm:$0xff] }
  0x16   :  { %1452 = vmatprep.subr.bf16.mxu1 %v1770_v0  ;;  %v301_v49 = vld [vmem:[%s2665_s2 + $0x138] sm:$0xff]  ;;  %v2093_v56 = vpack.c.bf16 %v281_v47, %v280_v46 }
  0x17   :  { %v1319_v35 = vmul.f32 -1.442695, %v133_v27  ;;  %1554 = vpow2.f32 %v1315_v30  ;;  %v2095_v57 = vpack.c.bf16 %v301_v49, %v300_v48 }
  0x19   :  { %v1543_v36 = vpop.eup %1542  ;;  %1556 = vpow2.f32 %v1319_v35 }
  0x1a   :  { %v158_v42 = vadd.f32 1.0, %v1543_v36 }
  0x1b   :  { %v1545_v39 = vpop.eup %1544 }
  0x1c   :  { %1415 = vmatpush1.bf16.xpose.msk.msra.mxu0 %vm1816_vm1, %v1901_v25  ;;  %v1547_v43 = vpop.eup %1546  ;;  %v162_v44 = vadd.f32 1.0, %v1545_v39  ;;  %1558 = vrcp.f32 %v158_v42 }
  0x1d   :  { %1455 = vmatpush1.bf16.xpose.msk.msra.mxu1 %vm1816_vm1, %v1903_v26  ;;  %1416 = vmatprep.subr.bf16.mxu0 %v1770_v0  ;;  %v1549_v45 = vpop.eup %1548  ;;  %v159_v50 = vadd.f32 1.0, %v1547_v43 }
  0x1e   :  { %1456 = vmatprep.subr.bf16.mxu1 %v1770_v0  ;;  %v1551_v51 = vpop.eup %1550  ;;  %1560 = vrcp.f32 %v162_v44  ;;  %v163_v52 = vadd.f32 1.0, %v1549_v45 }
  0x1f   :  { %v1553_v55 = vpop.eup %1552  ;;  %1562 = vrcp.f32 %v159_v50  ;;  %v160_v58 = vadd.f32 1.0, %v1551_v51 }
  0x20   :  { %1564 = vrcp.f32 %v163_v52  ;;  %v164_v60 = vadd.f32 1.0, %v1553_v55 }
  0x21   :  { %v1555_v59 = vpop.eup %1554  ;;  %1566 = vrcp.f32 %v160_v58 }
  0x22   :  { %v161_v62 = vadd.f32 1.0, %v1555_v59  ;;  %1568 = vrcp.f32 %v164_v60 }
  0x23   :  { %v1557_v61 = vpop.eup %1556 }
  0x24   :  { %1419 = vmatpush1.bf16.xpose.msk.msra.mxu0 %vm1816_vm1, %v1925_v31  ;;  %v165_v63 = vadd.f32 1.0, %v1557_v61  ;;  %1570 = vrcp.f32 %v161_v62 }
  0x25   :  { %1459 = vmatpush1.bf16.xpose.msk.msra.mxu1 %vm1816_vm1, %v1927_v32  ;;  %1420 = vmatprep.subr.bf16.mxu0 %v1770_v0 }
  0x26   :  { %1460 = vmatprep.subr.bf16.mxu1 %v1770_v0  ;;  %v1559_v1 = vpop.eup %1558  ;;  %1572 = vrcp.f32 %v165_v63 }
  0x28   :  { %v1561_v2 = vpop.eup %1560 }
  0x29   :  { %v1563_v5 = vpop.eup %1562 }
  0x2a   :  { %v1565_v3 = vpop.eup %1564 }
  0x2b   :  { %v1567_v6 = vpop.eup %1566 }
  0x2c   :  { %1423 = vmatpush1.bf16.xpose.msk.msra.mxu0 %vm1816_vm1, %v1949_v37  ;;  %v1569_v9 = vpop.eup %1568 }
  0x2d   :  { %1463 = vmatpush1.bf16.xpose.msk.msra.mxu1 %vm1816_vm1, %v1951_v38  ;;  %1424 = vmatprep.subr.bf16.mxu0 %v1770_v0 }
  0x2e   :  { %1464 = vmatprep.subr.bf16.mxu1 %v1770_v0 }
  0x34   :  { %1427 = vmatpush1.bf16.xpose.msk.msra.mxu0 %vm1816_vm1, %v1997_v53 }
  0x35   :  { %1467 = vmatpush1.bf16.xpose.msk.msra.mxu1 %vm1816_vm1, %v1999_v54  ;;  %1428 = vmatprep.subr.bf16.mxu0 %v1770_v0 }
  0x36   :  { %1468 = vmatprep.subr.bf16.mxu1 %v1770_v0 }
  0x3c   :  { %1431 = vmatpush1.bf16.xpose.msk.msra.mxu0 %vm1816_vm1, %v2045_v18 }
  0x3d   :  { %1471 = vmatpush1.bf16.xpose.msk.msra.mxu1 %vm1816_vm1, %v2047_v21  ;;  %1432 = vmatprep.subr.bf16.mxu0 %v1770_v0 }
  0x3e   :  { %1472 = vmatprep.subr.bf16.mxu1 %v1770_v0 }
  0x44   :  { %1435 = vmatpush1.bf16.xpose.msk.msra.mxu0 %vm1816_vm1, %v2069_v40 }
  0x45   :  { %1475 = vmatpush1.bf16.xpose.msk.msra.mxu1 %vm1816_vm1, %v2071_v41  ;;  %1436 = vmatprep.subr.bf16.mxu0 %v1770_v0 }
  0x46   :  { %1476 = vmatprep.subr.bf16.mxu1 %v1770_v0 }
  0x4c   :  { %1439 = vmatpush1.bf16.xpose.msk.msra.mxu0 %vm1816_vm1, %v2093_v56 }
  0x4d   :  { %1479 = vmatpush1.bf16.xpose.msk.msra.mxu1 %vm1816_vm1, %v2095_v57  ;;  %1480 = vmatprep.subr.bf16.mxu0 %v1770_v0 }
  0x4e   :  { %1510 = vmatprep.subr.bf16.mxu1 %v1770_v0 }
  0x53   :  { %1348 = vmatmul.mubr.msk.f32.vlgmr.msra.gmra.mrb[0].mxu0 %vm302_vm0, %v1559_v1 }
  0x54   :  { %1372 = vmatmul.mubr.msk.f32.vlgmr.msra.gmra.mrb[0].mxu1 %vm302_vm0, %v1561_v2  ;;  %445 = vmatprep.mubr.f32.mxu0 %v1771_v7 }
  0x55   :  { %606 = vmatprep.mubr.f32.mxu1 %v1771_v7  ;;  %1482 = vmatpush1.bf16.msra.mxu0 %v1821_v4  ;;  %v1571_v4 = vpop.eup %1570 }
  0x56   :  { %1483 = vmatprep.subr.bf16.mxu0 %v1770_v0  ;;  %1512 = vmatpush1.bf16.msra.mxu1 %v1831_v8  ;;  %v1573_v8 = vpop.eup %1572 }
  0x57   :  { %1349 = vmatmul.mubr.msk.f32.gmra.mrb[2].mxu0 %vm302_vm0, %v1563_v5  ;;  %1513 = vmatprep.subr.bf16.mxu1 %v1770_v0 }
  0x58   :  { %1373 = vmatmul.mubr.msk.f32.gmra.mrb[2].mxu1 %vm302_vm0, %v1565_v3  ;;  %451 = vmatprep.mubr.f32.mxu0 %v1771_v7 }
  0x59   :  { %612 = vmatprep.mubr.f32.mxu1 %v1771_v7  ;;  %1485 = vmatpush1.bf16.msra.mxu0 %v1853_v13 }
  0x5a   :  { %1486 = vmatprep.subr.bf16.mxu0 %v1770_v0  ;;  %1515 = vmatpush1.bf16.msra.mxu1 %v1855_v14 }
  0x5b   :  { %1350 = vmatmul.mubr.msk.f32.gmra.mrb[4].mxu0 %vm302_vm0, %v1567_v6  ;;  %1516 = vmatprep.subr.bf16.mxu1 %v1770_v0 }
  0x5c   :  { %1374 = vmatmul.mubr.msk.f32.gmra.mrb[4].mxu1 %vm302_vm0, %v1569_v9  ;;  %457 = vmatprep.mubr.f32.mxu0 %v1771_v7 }
  0x5d   :  { %618 = vmatprep.mubr.f32.mxu1 %v1771_v7  ;;  %1488 = vmatpush1.bf16.msra.mxu0 %v1877_v19 }
  0x5e   :  { %1489 = vmatprep.subr.bf16.mxu0 %v1770_v0  ;;  %1518 = vmatpush1.bf16.msra.mxu1 %v1879_v20 }
  0x5f   :  { %1351 = vmatmul.mubr.msk.f32.gmra.mrb[6].mxu0 %vm302_vm0, %v1571_v4  ;;  %1519 = vmatprep.subr.bf16.mxu1 %v1770_v0 }
  0x60   :  { %1375 = vmatmul.mubr.msk.f32.gmra.mrb[6].mxu1 %vm302_vm0, %v1573_v8 }
  0x61   :  { %1491 = vmatpush1.bf16.msra.mxu0 %v1901_v25 }
  0x62   :  { %1492 = vmatprep.subr.bf16.mxu0 %v1770_v0  ;;  %1521 = vmatpush1.bf16.msra.mxu1 %v1903_v26 }
  0x63   :  { %1522 = vmatprep.subr.bf16.mxu1 %v1770_v0 }
  0x65   :  { %1494 = vmatpush1.bf16.msra.mxu0 %v1925_v31 }
  0x66   :  { %1495 = vmatprep.subr.bf16.mxu0 %v1770_v0  ;;  %1524 = vmatpush1.bf16.msra.mxu1 %v1927_v32 }
  0x67   :  { %1525 = vmatprep.subr.bf16.mxu1 %v1770_v0 }
  0x69   :  { %1497 = vmatpush1.bf16.msra.mxu0 %v1949_v37 }
  0x6a   :  { %1498 = vmatprep.subr.bf16.mxu0 %v1770_v0  ;;  %1527 = vmatpush1.bf16.msra.mxu1 %v1951_v38 }
  0x6b   :  { %1528 = vmatprep.subr.bf16.mxu1 %v1770_v0 }
  0x6d   :  { %1500 = vmatpush1.bf16.msra.mxu0 %v1997_v53 }
  0x6e   :  { %1501 = vmatprep.subr.bf16.mxu0 %v1770_v0  ;;  %1530 = vmatpush1.bf16.msra.mxu1 %v1999_v54 }
  0x6f   :  { %1531 = vmatprep.subr.bf16.mxu1 %v1770_v0 }
  0x71   :  { %1503 = vmatpush1.bf16.msra.mxu0 %v2045_v18 }
  0x72   :  { %1504 = vmatprep.subr.bf16.mxu0 %v1770_v0  ;;  %1533 = vmatpush1.bf16.msra.mxu1 %v2047_v21 }
  0x73   :  { %1534 = vmatprep.subr.bf16.mxu1 %v1770_v0 }
  0x75   :  { %1506 = vmatpush1.bf16.msra.mxu0 %v2069_v40 }
  0x76   :  { %1507 = vmatprep.subr.bf16.mxu0 %v1770_v0  ;;  %1536 = vmatpush1.bf16.msra.mxu1 %v2071_v41 }
  0x77   :  { %1537 = vmatprep.subr.bf16.mxu1 %v1770_v0 }
  0x79   :  { %1509 = vmatpush1.bf16.msra.mxu0 %v2093_v56 }
  0x7a   :  { %1539 = vmatpush1.bf16.msra.mxu1 %v2095_v57 }
 0x126   :  { %v441_v7 = vpop.f32.mrb[0].mxu0 }
 0x127   :  { %v443_v13 = vpop.f32.mrb[1].mxu0  ;;  %v602_v14 = vpop.f32.mrb[0].mxu1 }
 0x128   :  { %v604_v19 = vpop.f32.mrb[1].mxu1  ;;  %v626_v20 = vsel %vm625_vm2, %v443_v13, -inf }
 0x129   :  { %v642_v25 = vsel %vm625_vm2, %v604_v19, -inf  ;;  %v627_v26 = vmax.f32 %v441_v7, %v626_v20 }
 0x12a   :  { %v447_v31 = vpop.f32.mrb[2].mxu0  ;;  %v643_v32 = vmax.f32 %v602_v14, %v642_v25 }
 0x12b   :  { %628 = vmax.xlane.f32.xlu0 %v627_v26  ;;  %v449_v37 = vpop.f32.mrb[3].mxu0  ;;  %v608_v38 = vpop.f32.mrb[2].mxu1 }
 0x12c   :  { %v610_v0 = vpop.f32.mrb[3].mxu1  ;;  %v630_v53 = vsel %vm625_vm2, %v449_v37, -inf }
 0x12d   :  { %v646_v54 = vsel %vm625_vm2, %v610_v0, -inf  ;;  %v631_v10 = vmax.f32 %v447_v31, %v630_v53 }
 0x12e   :  { %v453_v11 = vpop.f32.mrb[4].mxu0  ;;  %v647_v12 = vmax.f32 %v608_v38, %v646_v54 }
 0x12f   :  { %644 = vmax.xlane.f32.xlu0 %v643_v32  ;;  %632 = vmax.xlane.f32.xlu1 %v631_v10  ;;  %v455_v15 = vpop.f32.mrb[5].mxu0  ;;  %v614_v16 = vpop.f32.mrb[4].mxu1 }
 0x130   :  { %v634_v17 = vsel %vm625_vm2, %v455_v15, -inf  ;;  %v616_v18 = vpop.f32.mrb[5].mxu1 }
 0x131   :  { %v650_v21 = vsel %vm625_vm2, %v616_v18, -inf  ;;  %v635_v22 = vmax.f32 %v453_v11, %v634_v17 }
 0x132   :  { %v459_v23 = vpop.f32.mrb[6].mxu0  ;;  %v651_v24 = vmax.f32 %v614_v16, %v650_v21 }
 0x133   :  { %648 = vmax.xlane.f32.xlu1 %v647_v12  ;;  %636 = vmax.xlane.f32.xlu0 %v635_v22  ;;  %v461_v27 = vpop.f32.mrb[7].mxu0  ;;  %v2163_v28 = vpop.f32.mrb[6].mxu1 }
 0x134   :  { %v638_v29 = vsel %vm625_vm2, %v461_v27, -inf  ;;  %v2166_v30 = vpop.f32.mrb[7].mxu1 }
 0x135   :  { %v654_v33 = vsel %vm625_vm2, %v2166_v30, -inf  ;;  %v639_v34 = vmax.f32 %v459_v23, %v638_v29 }
 0x136   :  { %v655_v35 = vmax.f32 %v2163_v28, %v654_v33 }
 0x137   :  { %652 = vmax.xlane.f32.xlu1 %v651_v24  ;;  %640 = vmax.xlane.f32.xlu0 %v639_v34 }
 0x13b   :  { %656 = vmax.xlane.f32.xlu1 %v655_v35 }
 0x1b8   :  { %v629_v36 = vpop.xlane.xlu0 %628 }
 0x1b9   :  { %v658_v39 = vsub.f32 %v441_v7, %v629_v36  ;;  %v659_v40 = vsub.f32 %v443_v13, %v629_v36 }
 0x1bb   :  { %v674_v41 = vmul.f32 1.442695, %v658_v39  ;;  %v676_v42 = vmul.f32 1.442695, %v659_v40 }
 0x1bc   :  { %v645_v43 = vpop.xlane.xlu0 %644  ;;  %v633_v44 = vpop.xlane.xlu1 %632 }
 0x1bd   :  { %1574 = vpow2.f32 %v674_v41  ;;  %v666_v45 = vsub.f32 %v602_v14, %v645_v43  ;;  %v667_v46 = vsub.f32 %v604_v19, %v645_v43  ;;  %v660_v47 = vsub.f32 %v447_v31, %v633_v44 }
 0x1be   :  { %1576 = vpow2.f32 %v676_v42  ;;  %v661_v48 = vsub.f32 %v449_v37, %v633_v44 }
 0x1bf   :  { %v690_v49 = vmul.f32 1.442695, %v666_v45  ;;  %v692_v50 = vmul.f32 1.442695, %v667_v46  ;;  %v678_v51 = vmul.f32 1.442695, %v660_v47 }
 0x1c0   :  { %v680_v52 = vmul.f32 1.442695, %v661_v48  ;;  %v649_v55 = vpop.xlane.xlu1 %648  ;;  %v637_v56 = vpop.xlane.xlu0 %636 }
 0x1c1   :  { %1578 = vpow2.f32 %v690_v49  ;;  %v668_v57 = vsub.f32 %v608_v38, %v649_v55  ;;  %v669_v58 = vsub.f32 %v610_v0, %v649_v55  ;;  %v662_v59 = vsub.f32 %v453_v11, %v637_v56 }
 0x1c2   :  { %1580 = vpow2.f32 %v692_v50  ;;  %v663_v60 = vsub.f32 %v455_v15, %v637_v56 }
 0x1c3   :  { %1582 = vpow2.f32 %v678_v51  ;;  %v694_v61 = vmul.f32 1.442695, %v668_v57  ;;  %v696_v62 = vmul.f32 1.442695, %v669_v58  ;;  %v682_v63 = vmul.f32 1.442695, %v662_v59 }
 0x1c4   :  { %1584 = vpow2.f32 %v680_v52  ;;  %v684_v1 = vmul.f32 1.442695, %v663_v60  ;;  %v653_v2 = vpop.xlane.xlu1 %652  ;;  %v641_v5 = vpop.xlane.xlu0 %640 }
 0x1c5   :  { %1586 = vpow2.f32 %v694_v61  ;;  %v670_v3 = vsub.f32 %v614_v16, %v653_v2  ;;  %v671_v6 = vsub.f32 %v616_v18, %v653_v2  ;;  %v664_v9 = vsub.f32 %v459_v23, %v641_v5 }
 0x1c6   :  { %1588 = vpow2.f32 %v696_v62  ;;  %v665_v4 = vsub.f32 %v461_v27, %v641_v5 }
 0x1c7   :  { %v2171_v8 = vpop.eup %1574  ;;  %1590 = vpow2.f32 %v682_v63  ;;  %v698_v7 = vmul.f32 1.442695, %v670_v3  ;;  %v700_v13 = vmul.f32 1.442695, %v671_v6  ;;  %v686_v14 = vmul.f32 1.442695, %v664_v9 }
 0x1c8   :  { %v2173_v19 = vpop.eup %1576  ;;  %1592 = vpow2.f32 %v684_v1  ;;  %v688_v20 = vmul.f32 1.442695, %v665_v4  ;;  %v657_v25 = vpop.xlane.xlu1 %656 }
 0x1c9   :  { %1594 = vpow2.f32 %v698_v7  ;;  %v672_v26 = vsub.f32 %v2163_v28, %v657_v25  ;;  %v673_v31 = vsub.f32 %v2166_v30, %v657_v25  ;;  %v706_v32 = vsel %vm625_vm2, %v2173_v19, 0.0 }
 0x1ca   :  { %1596 = vpow2.f32 %v700_v13  ;;  %v707_v37 = vadd.f32 %v2171_v8, %v706_v32  ;;  %v956_v32 = vld [vmem:[%s2667_s1] sm:$0xff] }
 0x1cb   :  { %v1579_v38 = vpop.eup %1578  ;;  %1598 = vpow2.f32 %v686_v14  ;;  %v702_v0 = vmul.f32 1.442695, %v672_v26  ;;  %v704_v53 = vmul.f32 1.442695, %v673_v31 }
 0x1cc   :  { %v1581_v54 = vpop.eup %1580  ;;  %1600 = vpow2.f32 %v688_v20  ;;  %708 = vadd.xlane.f32.xlu0 %v707_v37 }
 0x1cd   :  { %v1583_v10 = vpop.eup %1582  ;;  %1602 = vpow2.f32 %v702_v0  ;;  %v722_v11 = vsel %vm625_vm2, %v1581_v54, 0.0 }
 0x1ce   :  { %v1585_v12 = vpop.eup %1584  ;;  %1604 = vpow2.f32 %v704_v53  ;;  %v723_v15 = vadd.f32 %v1579_v38, %v722_v11  ;;  %v960_v53 = vld [vmem:[%s2667_s1 + $0x20] sm:$0xff]  ;;  %v957_v11 = vld [vmem:[%s2667_s1 + $0x8] sm:$0xff] }
 0x1cf   :  { %v1587_v16 = vpop.eup %1586  ;;  %v710_v17 = vsel %vm625_vm2, %v1585_v12, 0.0 }
 0x1d0   :  { %v1589_v18 = vpop.eup %1588  ;;  %724 = vadd.xlane.f32.xlu1 %v723_v15  ;;  %v711_v21 = vadd.f32 %v1583_v10, %v710_v17  ;;  %v961_v17 = vld [vmem:[%s2667_s1 + $0x28] sm:$0xff] }
 0x1d1   :  { %v1591_v22 = vpop.eup %1590  ;;  %v726_v23 = vsel %vm625_vm2, %v1589_v18, 0.0 }
 0x1d2   :  { %v1593_v24 = vpop.eup %1592  ;;  %712 = vadd.xlane.f32.xlu0 %v711_v21  ;;  %v727_v27 = vadd.f32 %v1587_v16, %v726_v23 }
 0x1d3   :  { %v1595_v28 = vpop.eup %1594  ;;  %v714_v29 = vsel %vm625_vm2, %v1593_v24, 0.0 }
 0x1d4   :  { %v1597_v30 = vpop.eup %1596  ;;  %728 = vadd.xlane.f32.xlu1 %v727_v27  ;;  %v715_v33 = vadd.f32 %v1591_v22, %v714_v29 }
 0x1d5   :  { %v1599_v34 = vpop.eup %1598  ;;  %v730_v35 = vsel %vm625_vm2, %v1597_v30, 0.0 }
 0x1d6   :  { %v1601_v36 = vpop.eup %1600  ;;  %716 = vadd.xlane.f32.xlu0 %v715_v33  ;;  %v731_v39 = vadd.f32 %v1595_v28, %v730_v35  ;;  %v962_v33 = vld [vmem:[%s2667_s1 + $0x30] sm:$0xff] }
 0x1d7   :  { %v1603_v40 = vpop.eup %1602  ;;  %v718_v41 = vsel %vm625_vm2, %v1601_v36, 0.0 }
 0x1d8   :  { %v1605_v42 = vpop.eup %1604  ;;  %732 = vadd.xlane.f32.xlu1 %v731_v39  ;;  %v719_v43 = vadd.f32 %v1599_v34, %v718_v41 }
 0x1d9   :  { %v734_v44 = vsel %vm625_vm2, %v1605_v42, 0.0 }
 0x1da   :  { %720 = vadd.xlane.f32.xlu0 %v719_v43  ;;  %v735_v45 = vadd.f32 %v1603_v40, %v734_v44 }
 0x1dc   :  { %736 = vadd.xlane.f32.xlu1 %v735_v45  ;;  %v963_v45 = vld [vmem:[%s2667_s1 + $0x38] sm:$0xff] }
 0x259   :  { %v709_v46 = vpop.xlane.xlu0 %708 }
 0x25a   :  { %1606 = vrcp.f32 %v709_v46 }
 0x25d   :  { %v725_v47 = vpop.xlane.xlu1 %724 }
 0x25e   :  { %1608 = vrcp.f32 %v725_v47 }
 0x25f   :  { %v713_v48 = vpop.xlane.xlu0 %712 }
 0x260   :  { %1610 = vrcp.f32 %v713_v48 }
 0x261   :  { %v729_v49 = vpop.xlane.xlu1 %728 }
 0x262   :  { %1612 = vrcp.f32 %v729_v49 }
 0x263   :  { %v717_v50 = vpop.xlane.xlu0 %716 }
 0x264   :  { %v1607_v51 = vpop.eup %1606  ;;  %1614 = vrcp.f32 %v717_v50 }
 0x265   :  { %v746_v52 = vmul.f32 %v1607_v51, %v2171_v8  ;;  %v733_v55 = vpop.xlane.xlu1 %732  ;;  %v747_v56 = vmul.f32 %v1607_v51, %v2173_v19 }
 0x266   :  { %1616 = vrcp.f32 %v733_v55 }
 0x267   :  { %v721_v57 = vpop.xlane.xlu0 %720  ;;  %1376 = vmatprep.mubr.msk.f32.mxu0 %vm625_vm2, %v747_v56 }
 0x268   :  { %v1609_v58 = vpop.eup %1608  ;;  %1618 = vrcp.f32 %v721_v57  ;;  %839 = vmatmul.mubr.f32.vlgmr.msra.gmra.mrb[8].mxu0 %v746_v52 }
 0x269   :  { %v754_v59 = vmul.f32 %v1609_v58, %v1579_v38  ;;  %v737_v60 = vpop.xlane.xlu1 %736  ;;  %v755_v61 = vmul.f32 %v1609_v58, %v1581_v54 }
 0x26a   :  { %v1611_v62 = vpop.eup %1610  ;;  %1620 = vrcp.f32 %v737_v60 }
 0x26b   :  { %v749_v63 = vmul.f32 %v1611_v62, %v1585_v12  ;;  %1380 = vmatprep.mubr.msk.f32.mxu1 %vm625_vm2, %v755_v61  ;;  %v748_v1 = vmul.f32 %v1611_v62, %v1583_v10 }
 0x26c   :  { %v1613_v2 = vpop.eup %1612  ;;  %936 = vmatmul.mubr.f32.vlgmr.msra.gmra.mrb[8].mxu1 %v754_v59 }
 0x26d   :  { %1377 = vmatprep.mubr.msk.f32.mxu0 %vm625_vm2, %v749_v63  ;;  %v757_v5 = vmul.f32 %v1613_v2, %v1589_v18  ;;  %v756_v3 = vmul.f32 %v1613_v2, %v1587_v16 }
 0x26e   :  { %v1615_v6 = vpop.eup %1614  ;;  %844 = vmatmul.mubr.f32.gmra.mrb[10].mxu0 %v748_v1 }
 0x26f   :  { %v751_v9 = vmul.f32 %v1615_v6, %v1593_v24  ;;  %1381 = vmatprep.mubr.msk.f32.mxu1 %vm625_vm2, %v757_v5  ;;  %v750_v4 = vmul.f32 %v1615_v6, %v1591_v22  ;;  %v958_v24 = vld [vmem:[%s2667_s1 + $0x10] sm:$0xff] }
 0x270   :  { %v1617_v8 = vpop.eup %1616  ;;  %941 = vmatmul.mubr.f32.gmra.mrb[10].mxu1 %v756_v3 }
 0x271   :  { %1378 = vmatprep.mubr.msk.f32.mxu0 %vm625_vm2, %v751_v9  ;;  %v759_v7 = vmul.f32 %v1617_v8, %v1597_v30  ;;  %v758_v13 = vmul.f32 %v1617_v8, %v1595_v28 }
 0x272   :  { %v1619_v14 = vpop.eup %1618  ;;  %849 = vmatmul.mubr.f32.gmra.mrb[12].mxu0 %v750_v4 }
 0x273   :  { %v753_v19 = vmul.f32 %v1619_v14, %v1601_v36  ;;  %1382 = vmatprep.mubr.msk.f32.mxu1 %vm625_vm2, %v759_v7  ;;  %v752_v20 = vmul.f32 %v1619_v14, %v1599_v34 }
 0x274   :  { %v1621_v25 = vpop.eup %1620  ;;  %946 = vmatmul.mubr.f32.gmra.mrb[12].mxu1 %v758_v13 }
 0x275   :  { %1379 = vmatprep.mubr.msk.f32.mxu0 %vm625_vm2, %v753_v19  ;;  %v761_v26 = vmul.f32 %v1621_v25, %v1605_v42  ;;  %v760_v31 = vmul.f32 %v1621_v25, %v1603_v40  ;;  %v959_v40 = vld [vmem:[%s2667_s1 + $0x18] sm:$0xff] }
 0x276   :  { %854 = vmatmul.mubr.f32.gmra.mrb[14].mxu0 %v752_v20 }
 0x277   :  { %1383 = vmatprep.mubr.msk.f32.mxu1 %vm625_vm2, %v761_v26 }
 0x278   :  { %951 = vmatmul.mubr.f32.gmra.mrb[14].mxu1 %v760_v31 }
 0x33b   :  { %v840_v37 = vpop.f32.mrb[8].mxu0 }
 0x33c   :  { %v2200_v38 = vadd.f32 %v956_v32, %v840_v37  ;;  %v842_v0 = vpop.f32.mrb[9].mxu0 }
 0x33e   :  { %v972_v54 = vsel %vm302_vm0, %v2200_v38, 0.0 }
 0x33f   :  { %v937_v10 = vpop.f32.mrb[8].mxu1  ;;  %973 = vadd.xlane.f32.xlu0 %v972_v54 }
 0x340   :  { %v2210_v12 = vadd.f32 %v960_v53, %v937_v10  ;;  %v939_v15 = vpop.f32.mrb[9].mxu1 }
 0x341   :  { %v845_v16 = vpop.f32.mrb[10].mxu0 }
 0x342   :  { %v965_v18 = vadd.f32 %v957_v11, %v845_v16  ;;  %v847_v21 = vpop.f32.mrb[11].mxu0  ;;  %v984_v22 = vsel %vm302_vm0, %v2210_v12, 0.0 }
 0x343   :  { %v942_v23 = vpop.f32.mrb[10].mxu1  ;;  %985 = vadd.xlane.f32.xlu0 %v984_v22 }
 0x344   :  { %v2220_v27 = vadd.f32 %v961_v17, %v942_v23  ;;  %v975_v28 = vsel %vm302_vm0, %v965_v18, 0.0  ;;  %v944_v29 = vpop.f32.mrb[11].mxu1 }
 0x345   :  { %976 = vadd.xlane.f32.xlu1 %v975_v28  ;;  %v850_v30 = vpop.f32.mrb[12].mxu0 }
 0x346   :  { %v966_v34 = vadd.f32 %v958_v24, %v850_v30  ;;  %v852_v35 = vpop.f32.mrb[13].mxu0  ;;  %v987_v36 = vsel %vm302_vm0, %v2220_v27, 0.0 }
 0x347   :  { %v947_v39 = vpop.f32.mrb[12].mxu1 }
 0x348   :  { %v970_v41 = vadd.f32 %v962_v33, %v947_v39  ;;  %v978_v42 = vsel %vm302_vm0, %v966_v34, 0.0  ;;  %v949_v43 = vpop.f32.mrb[13].mxu1 }
 0x349   :  { %988 = vadd.xlane.f32.xlu1 %v987_v36  ;;  %979 = vadd.xlane.f32.xlu0 %v978_v42  ;;  %v855_v44 = vpop.f32.mrb[14].mxu0  ;;  %v34_v42 = vld [vmem:[%s2666_s0 + $0x60] sm:$0xff] }
 0x34a   :  { %v967_v46 = vadd.f32 %v959_v40, %v855_v44  ;;  %v857_v47 = vpop.f32.mrb[15].mxu0  ;;  %v990_v48 = vsel %vm302_vm0, %v970_v41, 0.0  ;;  %v58_v43 = vld [vmem:[%s2666_s0 + $0x160] sm:$0xff]  ;;  %v35_v44 = vld [vmem:[%s2666_s0 + $0x68] sm:$0xff] }
 0x34b   :  { %v952_v49 = vpop.f32.mrb[14].mxu1  ;;  %v60_v47 = vld [vmem:[%s2666_s0 + $0x170] sm:$0xff] }
 0x34c   :  { %v971_v50 = vadd.f32 %v963_v45, %v952_v49  ;;  %v981_v51 = vsel %vm302_vm0, %v967_v46, 0.0  ;;  %v954_v52 = vpop.f32.mrb[15].mxu1  ;;  %v59_v45 = vld [vmem:[%s2666_s0 + $0x168] sm:$0xff]  ;;  %v37_v49 = vld [vmem:[%s2666_s0 + $0x78] sm:$0xff] }
 0x34d   :  { %991 = vadd.xlane.f32.xlu1 %v990_v48  ;;  %982 = vadd.xlane.f32.xlu0 %v981_v51  ;;  %v1128_v48 = vadd.f32 %v58_v43, %v34_v42  ;;  %v86_v51 = vld [vmem:[%s2666_s0 + $0x240] sm:$0xff]  ;;  %v115_v42 = vld [vmem:[%s2666_s0 + $0x368] sm:$0xff] }
 0x34e   :  { %v993_v55 = vsel %vm302_vm0, %v971_v50, 0.0  ;;  %v110_v52 = vld [vmem:[%s2666_s0 + $0x340] sm:$0xff] }
 0x351   :  { %994 = vadd.xlane.f32.xlu1 %v993_v55  ;;  %v1129_v55 = vadd.f32 %v59_v45, %v35_v44  ;;  %v96_v45 = vld [vmem:[%s2666_s0 + $0x290] sm:$0xff] }
 0x3cc   :  { %v974_v56 = vpop.xlane.xlu0 %973 }
 0x3d0   :  { %v986_v57 = vpop.xlane.xlu0 %985 }
 0x3d2   :  { %v977_v58 = vpop.xlane.xlu1 %976 }
 0x3d3   :  { %v996_v61 = vadd.f32 %v977_v58, %v974_v56  ;;  %v1384_v58 = vmul.f32 -1.442695, %v1128_v48 }
 0x3d5   :  { %1622 = vpow2.f32 %v1384_v58 }
 0x3d6   :  { %v989_v59 = vpop.xlane.xlu1 %988  ;;  %v980_v60 = vpop.xlane.xlu0 %979 }
 0x3d7   :  { %v997_v62 = vadd.f32 %v996_v61, %v980_v60  ;;  %v1005_v2 = vadd.f32 %v989_v59, %v986_v57  ;;  %v1132_v59 = vadd.f32 %v110_v52, %v86_v51  ;;  %v1385_v60 = vmul.f32 -1.442695, %v1129_v55 }
 0x3d9   :  { %1624 = vpow2.f32 %v1385_v60 }
 0x3da   :  { %v992_v63 = vpop.xlane.xlu1 %991  ;;  %v983_v1 = vpop.xlane.xlu0 %982 }
 0x3db   :  { %v998_v5 = vadd.f32 %v997_v62, %v983_v1  ;;  %v1006_v3 = vadd.f32 %v1005_v2, %v992_v63  ;;  %v1388_v63 = vmul.f32 -1.442695, %v1132_v59  ;;  %v87_v1 = vld [vmem:[%s2666_s0 + $0x248] sm:$0xff] }
 0x3dc   :  { %v111_v2 = vld [vmem:[%s2666_s0 + $0x348] sm:$0xff] }
 0x3dd   :  { %v999_v6 = vrot.slane %v998_v5, 4 }
 0x3de   :  { %v995_v9 = vpop.xlane.xlu1 %994 }
 0x3df   :  { %v1000_v4 = vadd.f32 %v999_v6, %v998_v5  ;;  %v1007_v8 = vadd.f32 %v1006_v3, %v995_v9  ;;  %v88_v5 = vld [vmem:[%s2666_s0 + $0x250] sm:$0xff]  ;;  %v89_v6 = vld [vmem:[%s2666_s0 + $0x258] sm:$0xff] }
 0x3e0   :  { %v112_v3 = vld [vmem:[%s2666_s0 + $0x350] sm:$0xff]  ;;  %v113_v9 = vld [vmem:[%s2666_s0 + $0x358] sm:$0xff] }
 0x3e1   :  { %v1001_v7 = vrot.slane %v1000_v4, 2  ;;  %v1008_v13 = vrot.slane %v1007_v8, 4 }
 0x3e3   :  { %v1002_v14 = vadd.f32 %v1001_v7, %v1000_v4  ;;  %v1009_v19 = vadd.f32 %v1008_v13, %v1007_v8  ;;  %v1133_v4 = vadd.f32 %v111_v2, %v87_v1  ;;  %v42_v8 = vld [vmem:[%s2666_s0 + $0xa0] sm:$0xff]  ;;  %v1134_v13 = vadd.f32 %v112_v3, %v88_v5 }
 0x3e4   :  { %v62_v7 = vld [vmem:[%s2666_s0 + $0x180] sm:$0xff] }
 0x3e5   :  { %v1003_v20 = vrot.slane %v1002_v14, 1  ;;  %v1010_v25 = vrot.slane %v1009_v19, 2 }
 0x3e7   :  { %v1004_v26 = vadd.f32 %v1003_v20, %v1002_v14  ;;  %v1011_v31 = vadd.f32 %v1010_v25, %v1009_v19  ;;  %v43_v14 = vld [vmem:[%s2666_s0 + $0xa8] sm:$0xff]  ;;  %v1135_v20 = vadd.f32 %v113_v9, %v89_v6  ;;  %v44_v25 = vld [vmem:[%s2666_s0 + $0xb0] sm:$0xff] }
 0x3e8   :  { %v63_v19 = vld [vmem:[%s2666_s0 + $0x188] sm:$0xff] }
 0x3e9   :  { %v1014_v32 = vmul.f32 0.00390625, %v1004_v26  ;;  %v1012_v37 = vrot.slane %v1011_v31, 1  ;;  %v64_v26 = vld [vmem:[%s2666_s0 + $0x190] sm:$0xff] }
 0x3eb   :  { %v1013_v0 = vadd.f32 %v1012_v37, %v1011_v31  ;;  %v2238_v53 = vsub.f32 %v965_v18, %v1014_v32  ;;  %v2241_v54 = vsub.f32 %v2200_v38, %v1014_v32  ;;  %v2247_v16 = vsub.f32 %v966_v34, %v1014_v32  ;;  %v1623_v31 = vpop.eup %1622  ;;  %v65_v37 = vld [vmem:[%s2666_s0 + $0x198] sm:$0xff] }
 0x3ec   :  { %v2265_v29 = vsub.f32 %v967_v46, %v1014_v32  ;;  %v36_v46 = vld [vmem:[%s2666_s0 + $0x70] sm:$0xff]  ;;  %v45_v32 = vld [vmem:[%s2666_s0 + $0xb8] sm:$0xff] }
 0x3ed   :  { %v1015_v10 = vmul.f32 0.00390625, %v1013_v0  ;;  %v1025_v11 = vmul.f32 %v2238_v53, %v2238_v53  ;;  %v1024_v15 = vmul.f32 %v2241_v54, %v2241_v54  ;;  %v1026_v28 = vmul.f32 %v2247_v16, %v2247_v16 }
 0x3ee   :  { %v1027_v39 = vmul.f32 %v2265_v29, %v2265_v29  ;;  %v1130_v56 = vadd.f32 %v60_v47, %v36_v46  ;;  %v1389_v0 = vmul.f32 -1.442695, %v1133_v4  ;;  %v116_v46 = vld [vmem:[%s2666_s0 + $0x370] sm:$0xff] }
 0x3ef   :  { %v1035_v17 = vsel %vm302_vm0, %v1025_v11, 0.0  ;;  %v1032_v21 = vsel %vm302_vm0, %v1024_v15, 0.0  ;;  %v2252_v22 = vsub.f32 %v2220_v27, %v1015_v10  ;;  %v2255_v18 = vsub.f32 %v2210_v12, %v1015_v10  ;;  %v94_v11 = vld [vmem:[%s2666_s0 + $0x280] sm:$0xff] }
 0x3f0   :  { %1036 = vadd.xlane.f32.xlu1 %v1035_v17  ;;  %1033 = vadd.xlane.f32.xlu0 %v1032_v21  ;;  %v2257_v38 = vsub.f32 %v970_v41, %v1015_v10  ;;  %v2271_v33 = vsub.f32 %v971_v50, %v1015_v10  ;;  %v1038_v35 = vsel %vm302_vm0, %v1026_v28, 0.0  ;;  %v1041_v41 = vsel %vm302_vm0, %v1027_v39, 0.0  ;;  %v61_v50 = vld [vmem:[%s2666_s0 + $0x178] sm:$0xff]  ;;  %v114_v15 = vld [vmem:[%s2666_s0 + $0x360] sm:$0xff] }
 0x3f1   :  { %v1029_v23 = vmul.f32 %v2252_v22, %v2252_v22  ;;  %v1028_v24 = vmul.f32 %v2255_v18, %v2255_v18  ;;  %v1131_v57 = vadd.f32 %v61_v50, %v37_v49  ;;  %v1386_v61 = vmul.f32 -1.442695, %v1130_v56  ;;  %v97_v49 = vld [vmem:[%s2666_s0 + $0x298] sm:$0xff] }
 0x3f2   :  { %v1030_v30 = vmul.f32 %v2257_v38, %v2257_v38  ;;  %v1031_v36 = vmul.f32 %v2271_v33, %v2271_v33  ;;  %v1184_v10 = vadd.f32 %v62_v7, %v42_v8  ;;  %v1390_v17 = vmul.f32 -1.442695, %v1134_v13  ;;  %v117_v50 = vld [vmem:[%s2666_s0 + $0x378] sm:$0xff]  ;;  %v38_v8 = vld [vmem:[%s2666_s0 + $0x80] sm:$0xff] }
 0x3f3   :  { %v1047_v27 = vsel %vm302_vm0, %v1029_v23, 0.0  ;;  %v1044_v12 = vsel %vm302_vm0, %v1028_v24, 0.0  ;;  %v1387_v62 = vmul.f32 -1.442695, %v1131_v57  ;;  %1626 = vpow2.f32 %v1386_v61  ;;  %v1625_v23 = vpop.eup %1624  ;;  %v66_v7 = vld [vmem:[%s2666_s0 + $0x1a0] sm:$0xff] }
 0x3f4   :  { %1048 = vadd.xlane.f32.xlu1 %v1047_v27  ;;  %1045 = vadd.xlane.f32.xlu0 %v1044_v12  ;;  %v1050_v34 = vsel %vm302_vm0, %v1030_v30, 0.0  ;;  %v1053_v40 = vsel %vm302_vm0, %v1031_v36, 0.0  ;;  %v1185_v21 = vadd.f32 %v63_v19, %v43_v14  ;;  %v1391_v24 = vmul.f32 -1.442695, %v1135_v20  ;;  %v39_v20 = vld [vmem:[%s2666_s0 + $0x88] sm:$0xff] }
 0x3f5   :  { %1628 = vpow2.f32 %v1387_v62  ;;  %v1186_v28 = vadd.f32 %v64_v26, %v44_v25  ;;  %v1160_v12 = vadd.f32 1.0, %v1623_v31  ;;  %v1187_v30 = vadd.f32 %v65_v37, %v45_v32  ;;  %v67_v25 = vld [vmem:[%s2666_s0 + $0x1a8] sm:$0xff] }
 0x3f6   :  { %1630 = vpow2.f32 %v1388_v63  ;;  %v1188_v36 = vadd.f32 %v114_v15, %v94_v11  ;;  %v1192_v39 = vadd.f32 1.0, %v1184_v10  ;;  %v1193_v44 = vadd.f32 1.0, %v1185_v21 }
 0x3f7   :  { %1632 = vpow2.f32 %v1389_v0  ;;  %v1194_v48 = vadd.f32 1.0, %v1186_v28  ;;  %v1195_v52 = vadd.f32 1.0, %v1187_v30  ;;  %v1190_v58 = vadd.f32 %v116_v46, %v96_v45  ;;  %v68_v28 = vld [vmem:[%s2666_s0 + $0x1b0] sm:$0xff]  ;;  %v41_v30 = vld [vmem:[%s2666_s0 + $0x98] sm:$0xff] }
 0x3f8   :  { %1051 = vadd.xlane.f32.xlu1 %v1050_v34  ;;  %1039 = vadd.xlane.f32.xlu0 %v1038_v35  ;;  %v1161_v35 = vadd.f32 1.0, %v1625_v23  ;;  %1634 = vpow2.f32 %v1390_v17  ;;  %v1196_v56 = vadd.f32 1.0, %v1188_v36  ;;  %v1392_v57 = vmul.f32 -1.442695, %v1192_v39  ;;  %v90_v39 = vld [vmem:[%s2666_s0 + $0x260] sm:$0xff] }
 0x3f9   :  { %1636 = vpow2.f32 %v1391_v24  ;;  %v1393_v59 = vmul.f32 -1.442695, %v1193_v44  ;;  %v1191_v60 = vadd.f32 %v117_v50, %v97_v49  ;;  %v1394_v61 = vmul.f32 -1.442695, %v1194_v48  ;;  %v40_v24 = vld [vmem:[%s2666_s0 + $0x90] sm:$0xff] }
 0x3fa   :  { %1638 = vrcp.f32 %v1160_v12  ;;  %v1395_v62 = vmul.f32 -1.442695, %v1195_v52  ;;  %v1396_v1 = vmul.f32 -1.442695, %v1196_v56  ;;  %v1198_v2 = vadd.f32 1.0, %v1190_v58  ;;  %v119_v52 = vld [vmem:[%s2666_s0 + $0x388] sm:$0xff] }
 0x3fb   :  { %1640 = vrcp.f32 %v1161_v35  ;;  %v1199_v3 = vadd.f32 1.0, %v1191_v60  ;;  %v1248_v10 = vadd.f32 %v66_v7, %v38_v8  ;;  %v1249_v15 = vadd.f32 %v67_v25, %v39_v20  ;;  %v92_v56 = vld [vmem:[%s2666_s0 + $0x270] sm:$0xff]  ;;  %v121_v60 = vld [vmem:[%s2666_s0 + $0x398] sm:$0xff]  ;;  %v70_v7 = vld [vmem:[%s2666_s0 + $0x1c0] sm:$0xff] }
 0x3fc   :  { %1054 = vadd.xlane.f32.xlu1 %v1053_v40  ;;  %1042 = vadd.xlane.f32.xlu0 %v1041_v41  ;;  %v95_v41 = vld [vmem:[%s2666_s0 + $0x288] sm:$0xff]  ;;  %v1398_v31 = vmul.f32 -1.442695, %v1198_v2  ;;  %v1250_v44 = vadd.f32 %v68_v28, %v40_v24  ;;  %v72_v25 = vld [vmem:[%s2666_s0 + $0x1d0] sm:$0xff] }
 0x3fd   :  { %v1627_v27 = vpop.eup %1626  ;;  %v1189_v55 = vadd.f32 %v115_v42, %v95_v41  ;;  %v1399_v37 = vmul.f32 -1.442695, %v1199_v3  ;;  %v124_v24 = vld [vmem:[%s2666_s0 + $0x3b0] sm:$0xff] }
 0x3fe   :  { %v1162_v43 = vadd.f32 1.0, %v1627_v27 }
 0x3ff   :  { %v1629_v34 = vpop.eup %1628  ;;  %v1197_v63 = vadd.f32 1.0, %v1189_v55 }
 0x400   :  { %v1631_v40 = vpop.eup %1630  ;;  %v1163_v47 = vadd.f32 1.0, %v1629_v34  ;;  %1642 = vrcp.f32 %v1162_v43  ;;  %v69_v34 = vld [vmem:[%s2666_s0 + $0x1b8] sm:$0xff] }
 0x401   :  { %v1164_v51 = vadd.f32 1.0, %v1631_v40  ;;  %v1633_v5 = vpop.eup %1632  ;;  %v1397_v14 = vmul.f32 -1.442695, %v1197_v63  ;;  %v118_v40 = vld [vmem:[%s2666_s0 + $0x380] sm:$0xff] }
 0x402   :  { %1644 = vrcp.f32 %v1163_v47  ;;  %v1635_v6 = vpop.eup %1634  ;;  %v1165_v9 = vadd.f32 1.0, %v1633_v5  ;;  %v1251_v47 = vadd.f32 %v69_v34, %v41_v30  ;;  %v1252_v49 = vadd.f32 %v118_v40, %v90_v39 }
 0x403   :  { %1646 = vrcp.f32 %v1164_v51  ;;  %v1637_v4 = vpop.eup %1636  ;;  %v1166_v13 = vadd.f32 1.0, %v1635_v6  ;;  %v91_v51 = vld [vmem:[%s2666_s0 + $0x268] sm:$0xff] }
 0x404   :  { %1648 = vpow2.f32 %v1392_v57  ;;  %v2383_v19 = vpop.eup %1638  ;;  %v1167_v26 = vadd.f32 1.0, %v1637_v4  ;;  %v120_v57 = vld [vmem:[%s2666_s0 + $0x390] sm:$0xff] }
 0x405   :  { %1650 = vpow2.f32 %v1393_v59  ;;  %v2391_v32 = vpop.eup %1640  ;;  %v93_v59 = vld [vmem:[%s2666_s0 + $0x278] sm:$0xff]  ;;  %v1254_v3 = vadd.f32 %v120_v57, %v92_v56 }
 0x406   :  { %1652 = vpow2.f32 %v1394_v61 }
 0x407   :  { %1654 = vpow2.f32 %v1395_v62 }
 0x408   :  { %1656 = vpow2.f32 %v1396_v1  ;;  %v1253_v1 = vadd.f32 %v119_v52, %v91_v51 }
 0x409   :  { %1658 = vrcp.f32 %v1165_v9  ;;  %v1255_v9 = vadd.f32 %v121_v60, %v93_v59 }
 0x40a   :  { %1660 = vrcp.f32 %v1166_v13  ;;  %v2393_v0 = vpop.eup %1642 }
 0x40b   :  { %1662 = vrcp.f32 %v1167_v26 }
 0x40c   :  { %v2395_v11 = vpop.eup %1644  ;;  %1664 = vpow2.f32 %v1397_v14  ;;  %v71_v14 = vld [vmem:[%s2666_s0 + $0x1c8] sm:$0xff] }
 0x40d   :  { %v2397_v17 = vpop.eup %1646  ;;  %1666 = vpow2.f32 %v1398_v31  ;;  %v73_v31 = vld [vmem:[%s2666_s0 + $0x1d8] sm:$0xff] }
 0x40e   :  { %v1649_v21 = vpop.eup %1648  ;;  %1668 = vpow2.f32 %v1399_v37 }
 0x40f   :  { %v1651_v23 = vpop.eup %1650  ;;  %v1224_v27 = vadd.f32 1.0, %v1649_v21  ;;  %1670 = vtanh.f32 %v1248_v10  ;;  %v122_v10 = vld [vmem:[%s2666_s0 + $0x3a0] sm:$0xff]  ;;  %v123_v21 = vld [vmem:[%s2666_s0 + $0x3a8] sm:$0xff] }
 0x410   :  { %v1653_v12 = vpop.eup %1652  ;;  %v1225_v35 = vadd.f32 1.0, %v1651_v23  ;;  %1672 = vtanh.f32 %v1249_v15 }
 0x411   :  { %v1655_v36 = vpop.eup %1654  ;;  %v1226_v41 = vadd.f32 1.0, %v1653_v12  ;;  %1674 = vrcp.f32 %v1224_v27  ;;  %v125_v27 = vld [vmem:[%s2666_s0 + $0x3b8] sm:$0xff] }
 0x412   :  { %v1657_v42 = vpop.eup %1656  ;;  %v1227_v43 = vadd.f32 1.0, %v1655_v36  ;;  %1676 = vrcp.f32 %v1225_v35 }
 0x413   :  { %v2417_v45 = vpop.eup %1658  ;;  %v1228_v46 = vadd.f32 1.0, %v1657_v42  ;;  %1678 = vrcp.f32 %v1226_v41 }
 0x414   :  { %v2419_v48 = vpop.eup %1660  ;;  %1680 = vrcp.f32 %v1227_v43 }
 0x415   :  { %v2421_v50 = vpop.eup %1662  ;;  %1682 = vrcp.f32 %v1228_v46 }
 0x416   :  { %v1665_v55 = vpop.eup %1664  ;;  %1684 = vtanh.f32 %v1250_v44 }
 0x417   :  { %v1667_v58 = vpop.eup %1666  ;;  %v1229_v61 = vadd.f32 1.0, %v1665_v55  ;;  %1686 = vtanh.f32 %v1251_v47 }
 0x418   :  { %v1669_v62 = vpop.eup %1668  ;;  %v1230_v63 = vadd.f32 1.0, %v1667_v58  ;;  %1688 = vtanh.f32 %v1252_v49 }
 0x419   :  { %v1671_v2 = vpop.eup %1670  ;;  %v1231_v5 = vadd.f32 1.0, %v1669_v62  ;;  %1690 = vrcp.f32 %v1229_v61 }
 0x41a   :  { %v1673_v6 = vpop.eup %1672  ;;  %1692 = vrcp.f32 %v1230_v63  ;;  %v1280_v39 = vmul.f32 %v1671_v2, %v2383_v19 }
 0x41b   :  { %v1675_v4 = vpop.eup %1674  ;;  %1694 = vrcp.f32 %v1231_v5  ;;  %v1281_v41 = vmul.f32 %v1673_v6, %v2391_v32  ;;  %v74_v6 = vld [vmem:[%s2666_s0 + $0x1e0] sm:$0xff] }
 0x41c   :  { %v1677_v8 = vpop.eup %1676  ;;  %1696 = vtanh.f32 %v1253_v1 }
 0x41d   :  { %v1679_v13 = vpop.eup %1678  ;;  %1698 = vtanh.f32 %v1254_v3 }
 0x41e   :  { %v1681_v20 = vpop.eup %1680  ;;  %1700 = vtanh.f32 %v1255_v9  ;;  %v98_v9 = vld [vmem:[%s2666_s0 + $0x2c0] sm:$0xff] }
 0x41f   :  { %v1683_v26 = vpop.eup %1682  ;;  %1702 = vtanh.f32 %v70_v7  ;;  %v76_v7 = vld [vmem:[%s2666_s0 + $0x1f0] sm:$0xff] }
 0x420   :  { %v1685_v37 = vpop.eup %1684  ;;  %1704 = vtanh.f32 %v71_v14  ;;  %v77_v14 = vld [vmem:[%s2666_s0 + $0x1f8] sm:$0xff] }
 0x421   :  { %v1687_v15 = vpop.eup %1686  ;;  %1706 = vtanh.f32 %v72_v25  ;;  %v1282_v44 = vmul.f32 %v1685_v37, %v2393_v0  ;;  %v186_v25 = vadd.f32 %v98_v9, %v74_v6  ;;  %v22_v37 = vld [vmem:[%s2666_s0] sm:$0xff] }
 0x422   :  { %v1689_v23 = vpop.eup %1688  ;;  %1708 = vtanh.f32 %v73_v31  ;;  %v1283_v49 = vmul.f32 %v1687_v15, %v2395_v11  ;;  %v46_v31 = vld [vmem:[%s2666_s0 + $0xe0] sm:$0xff]  ;;  %v47_v15 = vld [vmem:[%s2666_s0 + $0xe8] sm:$0xff] }
 0x423   :  { %v1691_v28 = vpop.eup %1690  ;;  %1710 = vtanh.f32 %v122_v10  ;;  %v1284_v55 = vmul.f32 %v1689_v23, %v2397_v17 }
 0x424   :  { %v1693_v12 = vpop.eup %1692  ;;  %1712 = vtanh.f32 %v123_v21  ;;  %v23_v21 = vld [vmem:[%s2666_s0 + $0x8] sm:$0xff] }
 0x425   :  { %v1695_v30 = vpop.eup %1694  ;;  %1714 = vtanh.f32 %v124_v24  ;;  %v48_v24 = vld [vmem:[%s2666_s0 + $0xf0] sm:$0xff] }
 0x426   :  { %v1697_v34 = vpop.eup %1696  ;;  %1716 = vtanh.f32 %v125_v27  ;;  %v1324_v27 = vmul.f32 -1.442695, %v186_v25 }
 0x427   :  { %v1699_v35 = vpop.eup %1698  ;;  %v1285_v19 = vmul.f32 %v1697_v34, %v2417_v45  ;;  %v182_v34 = vadd.f32 %v46_v31, %v22_v37 }
 0x428   :  { %v1701_v36 = vpop.eup %1700  ;;  %v1286_v61 = vmul.f32 %v1699_v35, %v2419_v48  ;;  %1718 = vpow2.f32 %v1324_v27 }
 0x429   :  { %v1703_v40 = vpop.eup %1702  ;;  %v1287_v17 = vmul.f32 %v1701_v36, %v2421_v50  ;;  %v183_v36 = vadd.f32 %v47_v15, %v23_v21 }
 0x42a   :  { %v1705_v42 = vpop.eup %1704  ;;  %v1272_v43 = vmul.f32 %v1703_v40, %v1675_v4  ;;  %v75_v4 = vld [vmem:[%s2666_s0 + $0x1e8] sm:$0xff] }
 0x42b   :  { %v1707_v46 = vpop.eup %1706  ;;  %v1273_v47 = vmul.f32 %v1705_v42, %v1677_v8  ;;  %v99_v8 = vld [vmem:[%s2666_s0 + $0x2c8] sm:$0xff] }
 0x42c   :  { %v1709_v51 = vpop.eup %1708  ;;  %v1274_v52 = vmul.f32 %v1707_v46, %v1679_v13  ;;  %v1288_v56 = vadd.f32 %v1280_v39, %v1272_v43  ;;  %v100_v13 = vld [vmem:[%s2666_s0 + $0x2d0] sm:$0xff]  ;;  %v1320_v46 = vmul.f32 -1.442695, %v182_v34 }
 0x42d   :  { %v1711_v57 = vpop.eup %1710  ;;  %v1275_v58 = vmul.f32 %v1709_v51, %v1681_v20  ;;  %v1289_v59 = vadd.f32 %v1281_v41, %v1273_v47  ;;  %v101_v20 = vld [vmem:[%s2666_s0 + $0x2d8] sm:$0xff]  ;;  %v188_v10 = vadd.f32 %v100_v13, %v76_v7  ;;  %v1321_v47 = vmul.f32 -1.442695, %v183_v36  ;;  %v51_v36 = vld [vmem:[%s2666_s0 + $0x108] sm:$0xff] }
 0x42e   :  { %v1713_v60 = vpop.eup %1712  ;;  %v1276_v32 = vmul.f32 %v1711_v57, %v1683_v26  ;;  %v1290_v62 = vadd.f32 %v1282_v44, %v1274_v52  ;;  %1296 = vst.msk [vmem:[%s2668_s6] sm:$0xff] %vm302_vm0, %v1288_v56  ;;  %v187_v26 = vadd.f32 %v99_v8, %v75_v4  ;;  %v189_v23 = vadd.f32 %v101_v20, %v77_v14  ;;  %v78_v56 = vld [vmem:[%s2666_s0 + $0x200] sm:$0xff] }
 0x42f   :  { %v1715_v0 = vpop.eup %1714  ;;  %v1277_v11 = vmul.f32 %v1713_v60, %v1691_v28  ;;  %v1291_v63 = vadd.f32 %v1283_v49, %v1275_v58  ;;  %1297 = vst.msk [vmem:[%s2668_s6 + $0x8] sm:$0xff] %vm302_vm0, %v1289_v59  ;;  %v24_v28 = vld [vmem:[%s2666_s0 + $0x10] sm:$0xff]  ;;  %v1326_v39 = vmul.f32 -1.442695, %v188_v10  ;;  %v102_v57 = vld [vmem:[%s2666_s0 + $0x2e0] sm:$0xff]  ;;  %v79_v58 = vld [vmem:[%s2666_s0 + $0x208] sm:$0xff] }
 0x430   :  { %v1717_v45 = vpop.eup %1716  ;;  %v1278_v1 = vmul.f32 %v1715_v0, %v1693_v12  ;;  %v1292_v2 = vadd.f32 %v1284_v55, %v1276_v32  ;;  %1298 = vst.msk [vmem:[%s2668_s6 + $0x10] sm:$0xff] %vm302_vm0, %v1290_v62  ;;  %v49_v12 = vld [vmem:[%s2666_s0 + $0xf8] sm:$0xff]  ;;  %v1325_v35 = vmul.f32 -1.442695, %v187_v26  ;;  %v184_v40 = vadd.f32 %v48_v24, %v24_v28  ;;  %v80_v32 = vld [vmem:[%s2666_s0 + $0x210] sm:$0xff] }
 0x431   :  { %v1279_v48 = vmul.f32 %v1717_v45, %v1695_v30  ;;  %v1293_v5 = vadd.f32 %v1285_v19, %v1277_v11  ;;  %1299 = vst.msk [vmem:[%s2668_s6 + $0x18] sm:$0xff] %vm302_vm0, %v1291_v63  ;;  %v25_v30 = vld [vmem:[%s2666_s0 + $0x18] sm:$0xff]  ;;  %v1327_v41 = vmul.f32 -1.442695, %v189_v23  ;;  %v103_v19 = vld [vmem:[%s2666_s0 + $0x2e8] sm:$0xff]  ;;  %v242_v63 = vadd.f32 %v102_v57, %v78_v56 }
 0x432   :  { %v1294_v50 = vadd.f32 %v1286_v61, %v1278_v1  ;;  %1300 = vst.msk [vmem:[%s2668_s6 + $0x20] sm:$0xff] %vm302_vm0, %v1292_v2  ;;  %v185_v42 = vadd.f32 %v49_v12, %v25_v30  ;;  %1720 = vpow2.f32 %v1325_v35  ;;  %v1322_v49 = vmul.f32 -1.442695, %v184_v40  ;;  %v104_v61 = vld [vmem:[%s2666_s0 + $0x2f0] sm:$0xff]  ;;  %v81_v11 = vld [vmem:[%s2666_s0 + $0x218] sm:$0xff]  ;;  %v1719_v45 = vpop.eup %1718  ;;  %v50_v12 = vld [vmem:[%s2666_s0 + $0x100] sm:$0xff] }
 0x433   :  { %v1295_v3 = vadd.f32 %v1287_v17, %v1279_v48  ;;  %1301 = vst.msk [vmem:[%s2668_s6 + $0x28] sm:$0xff] %vm302_vm0, %v1293_v5  ;;  %1722 = vpow2.f32 %v1326_v39  ;;  %v105_v17 = vld [vmem:[%s2666_s0 + $0x2f8] sm:$0xff]  ;;  %v243_v1 = vadd.f32 %v103_v19, %v79_v58  ;;  %v218_v7 = vadd.f32 1.0, %v1719_v45  ;;  %v26_v30 = vld [vmem:[%s2666_s0 + $0x20] sm:$0xff]  ;;  %v27_v39 = vld [vmem:[%s2666_s0 + $0x28] sm:$0xff] }
 0x434   :  { %1302 = vst.msk [vmem:[%s2668_s6 + $0x30] sm:$0xff] %vm302_vm0, %v1294_v50  ;;  %1724 = vpow2.f32 %v1327_v41  ;;  %v1323_v51 = vmul.f32 -1.442695, %v185_v42  ;;  %v244_v50 = vadd.f32 %v104_v61, %v80_v32  ;;  %v245_v6 = vadd.f32 %v105_v17, %v81_v11  ;;  %v52_v42 = vld [vmem:[%s2666_s0 + $0x110] sm:$0xff] }
 0x435   :  { %1303 = vst.msk [vmem:[%s2668_s6 + $0x38] sm:$0xff] %vm302_vm0, %v1295_v3  ;;  %1726 = vpow2.f32 %v1320_v46 }
 0x436   :  { %1728 = vpow2.f32 %v1321_v47  ;;  %v53_v47 = vld [vmem:[%s2666_s0 + $0x118] sm:$0xff] }
 0x437   :  { %1730 = vpow2.f32 %v1322_v49  ;;  %v29_v49 = vld [vmem:[%s2666_s0 + $0x38] sm:$0xff] }
 0x438   :  { %1732 = vpow2.f32 %v1323_v51  ;;  %v238_v51 = vadd.f32 %v50_v12, %v26_v30  ;;  %v1100_v30 = vld [vmem:[%s2670_s4] sm:$0xff] }
 0x439   :  { %1734 = vtanh.f32 %v242_v63 }
 0x43a   :  { %1736 = vtanh.f32 %v243_v1 }
 0x43b   :  { %1738 = vtanh.f32 %v244_v50 }
 0x43c   :  { %v1721_v2 = vpop.eup %1720  ;;  %1740 = vtanh.f32 %v245_v6 }
 0x43d   :  { %v1723_v3 = vpop.eup %1722  ;;  %v219_v25 = vadd.f32 1.0, %v1721_v2  ;;  %1742 = vrcp.f32 %v218_v7 }
 0x43e   :  { %v1725_v8 = vpop.eup %1724  ;;  %v220_v31 = vadd.f32 1.0, %v1723_v3 }
 0x43f   :  { %v1727_v20 = vpop.eup %1726  ;;  %v221_v21 = vadd.f32 1.0, %v1725_v8  ;;  %1744 = vrcp.f32 %v219_v25 }
 0x440   :  { %v1729_v26 = vpop.eup %1728  ;;  %v214_v28 = vadd.f32 1.0, %v1727_v20  ;;  %1746 = vrcp.f32 %v220_v31  ;;  %v1088_v31 = vld [vmem:[%s2669_s3] sm:$0xff] }
 0x441   :  { %v1731_v15 = vpop.eup %1730  ;;  %v215_v34 = vadd.f32 1.0, %v1729_v26  ;;  %1748 = vrcp.f32 %v221_v21  ;;  %v1091_v21 = vld [vmem:[%s2669_s3 + $0x18] sm:$0xff] }
 0x442   :  { %v1733_v23 = vpop.eup %1732  ;;  %v216_v40 = vadd.f32 1.0, %v1731_v15  ;;  %1750 = vrcp.f32 %v214_v28  ;;  %v1090_v15 = vld [vmem:[%s2669_s3 + $0x10] sm:$0xff] }
 0x443   :  { %1752 = vrcp.f32 %v215_v34  ;;  %v1735_v56 = vpop.eup %1734 }
 0x444   :  { %1754 = vrcp.f32 %v216_v40  ;;  %v1101_v40 = vld [vmem:[%s2670_s4 + $0x8] sm:$0xff] }
 0x47d   :  { %v1037_v43 = vpop.xlane.xlu1 %1036  ;;  %v1034_v44 = vpop.xlane.xlu0 %1033 }
 0x47e   :  { %v1056_v62 = vadd.f32 %v1037_v43, %v1034_v44  ;;  %v28_v43 = vld [vmem:[%s2666_s0 + $0x30] sm:$0xff]  ;;  %v217_v44 = vadd.f32 1.0, %v1733_v23 }
 0x47f   :  { %v240_v58 = vadd.f32 %v52_v42, %v28_v43  ;;  %v1103_v42 = vld [vmem:[%s2670_s4 + $0x18] sm:$0xff] }
 0x480   :  { %1756 = vrcp.f32 %v217_v44 }
 0x481   :  { %v1049_v52 = vpop.xlane.xlu1 %1048  ;;  %v1046_v55 = vpop.xlane.xlu0 %1045  ;;  %1758 = vtanh.f32 %v238_v51 }
 0x482   :  { %v1065_v0 = vadd.f32 %v1049_v52, %v1046_v55  ;;  %v239_v55 = vadd.f32 %v51_v36, %v27_v39 }
 0x484   :  { %1760 = vtanh.f32 %v239_v55 }
 0x485   :  { %v1052_v59 = vpop.xlane.xlu1 %1051  ;;  %v1040_v60 = vpop.xlane.xlu0 %1039  ;;  %1762 = vtanh.f32 %v240_v58 }
 0x486   :  { %v1066_v48 = vadd.f32 %v1065_v0, %v1052_v59  ;;  %v1057_v5 = vadd.f32 %v1056_v62, %v1040_v60  ;;  %v1737_v59 = vpop.eup %1736  ;;  %v241_v60 = vadd.f32 %v53_v47, %v29_v49 }
 0x487   :  { %v1739_v32 = vpop.eup %1738 }
 0x488   :  { %v1741_v0 = vpop.eup %1740  ;;  %1764 = vtanh.f32 %v241_v60 }
 0x489   :  { %v1055_v9 = vpop.xlane.xlu1 %1054  ;;  %v1043_v4 = vpop.xlane.xlu0 %1042 }
 0x48a   :  { %v1067_v13 = vadd.f32 %v1066_v48, %v1055_v9  ;;  %v1058_v14 = vadd.f32 %v1057_v5, %v1043_v4  ;;  %v1743_v11 = vpop.eup %1742 }
 0x48b   :  { %v1745_v45 = vpop.eup %1744 }
 0x48c   :  { %v1068_v37 = vrot.slane %v1067_v13, 4  ;;  %v1059_v10 = vrot.slane %v1058_v14, 4  ;;  %v1747_v1 = vpop.eup %1746  ;;  %v259_v20 = vmul.f32 %v1745_v45, %v1737_v59 }
 0x48d   :  { %v1749_v5 = vpop.eup %1748  ;;  %v260_v25 = vmul.f32 %v1747_v1, %v1739_v32 }
 0x48e   :  { %v1069_v24 = vadd.f32 %v1068_v37, %v1067_v13  ;;  %v1060_v27 = vadd.f32 %v1059_v10, %v1058_v14  ;;  %v1751_v50 = vpop.eup %1750  ;;  %v258_v14 = vmul.f32 %v1743_v11, %v1735_v56  ;;  %v261_v26 = vmul.f32 %v1749_v5, %v1741_v0  ;;  %v1089_v10 = vld [vmem:[%s2669_s3 + $0x8] sm:$0xff] }
 0x48f   :  { %v1753_v3 = vpop.eup %1752 }
 0x490   :  { %v1070_v35 = vrot.slane %v1069_v24, 2  ;;  %v1061_v41 = vrot.slane %v1060_v27, 2  ;;  %v1755_v6 = vpop.eup %1754 }
 0x491   :  { %v1757_v9 = vpop.eup %1756 }
 0x492   :  { %v1071_v46 = vadd.f32 %v1070_v35, %v1069_v24  ;;  %v1062_v52 = vadd.f32 %v1061_v41, %v1060_v27  ;;  %v1759_v4 = vpop.eup %1758  ;;  %v1102_v41 = vld [vmem:[%s2670_s4 + $0x10] sm:$0xff] }
 0x493   :  { %v1761_v8 = vpop.eup %1760  ;;  %v254_v23 = vmul.f32 %v1759_v4, %v1751_v50 }
 0x494   :  { %v1072_v57 = vrot.slane %v1071_v46, 1  ;;  %v1063_v19 = vrot.slane %v1062_v52, 1  ;;  %v1763_v7 = vpop.eup %1762  ;;  %v255_v24 = vmul.f32 %v1761_v8, %v1753_v3 }
 0x495   :  { %v1765_v13 = vpop.eup %1764  ;;  %v256_v28 = vmul.f32 %v1763_v7, %v1755_v6 }
 0x496   :  { %v1073_v61 = vadd.f32 %v1072_v57, %v1071_v46  ;;  %v1064_v62 = vadd.f32 %v1063_v19, %v1062_v52  ;;  %v257_v27 = vmul.f32 %v1765_v13, %v1757_v9 }
 0x498   :  { %v1075_v17 = vmul.f32 0.00390625, %v1073_v61  ;;  %v1074_v63 = vmul.f32 0.00390625, %v1064_v62 }
 0x49a   :  { %v1077_v2 = vadd.f32 1e-05, %v1075_v17  ;;  %v1076_v48 = vadd.f32 1e-05, %v1074_v63 }
 0x49c   :  { %1766 = vrsqrt.f32 %v1077_v2 }
 0x49d   :  { %1768 = vrsqrt.f32 %v1076_v48 }
 0x4a6   :  { %v1767_v37 = vpop.eup %1766 }
 0x4a7   :  { %v1769_v12 = vpop.eup %1768  ;;  %v1084_v34 = vmul.f32 %v1767_v37, %v2255_v18  ;;  %v1085_v35 = vmul.f32 %v1767_v37, %v2252_v22  ;;  %v1086_v36 = vmul.f32 %v1767_v37, %v2257_v38  ;;  %v1087_v39 = vmul.f32 %v1767_v37, %v2271_v33 }
 0x4a8   :  { %v1080_v18 = vmul.f32 %v1769_v12, %v2241_v54  ;;  %v1081_v22 = vmul.f32 %v1769_v12, %v2238_v53  ;;  %v1082_v38 = vmul.f32 %v1769_v12, %v2247_v16  ;;  %v1083_v33 = vmul.f32 %v1769_v12, %v2265_v29 }
 0x4a9   :  { %v1096_v43 = vmul.f32 %v1088_v31, %v1084_v34  ;;  %v1097_v44 = vmul.f32 %v1089_v10, %v1085_v35  ;;  %v1098_v46 = vmul.f32 %v1090_v15, %v1086_v36  ;;  %v1099_v47 = vmul.f32 %v1091_v21, %v1087_v39 }
 0x4aa   :  { %v1092_v49 = vmul.f32 %v1088_v31, %v1080_v18  ;;  %v1093_v51 = vmul.f32 %v1089_v10, %v1081_v22  ;;  %v1094_v52 = vmul.f32 %v1090_v15, %v1082_v38  ;;  %v1095_v55 = vmul.f32 %v1091_v21, %v1083_v33 }
 0x4ab   :  { %v1108_v56 = vadd.f32 %v1100_v30, %v1096_v43  ;;  %v1109_v57 = vadd.f32 %v1101_v40, %v1097_v44  ;;  %v1110_v58 = vadd.f32 %v1102_v41, %v1098_v46  ;;  %v1111_v19 = vadd.f32 %v1103_v42, %v1099_v47 }
 0x4ac   :  { %v1104_v59 = vadd.f32 %v1100_v30, %v1092_v49  ;;  %v1105_v54 = vadd.f32 %v1101_v40, %v1093_v51  ;;  %v1106_v60 = vadd.f32 %v1102_v41, %v1094_v52  ;;  %v1107_v53 = vadd.f32 %v1103_v42, %v1095_v55 }
 0x4ad   :  { %v1116_v32 = vadd.f32 %v1108_v56, %v258_v14  ;;  %v1117_v16 = vadd.f32 %v1109_v57, %v259_v20  ;;  %v1118_v61 = vadd.f32 %v1110_v58, %v260_v25  ;;  %v1119_v29 = vadd.f32 %v1111_v19, %v261_v26 }
 0x4ae   :  { %v1112_v62 = vadd.f32 %v1104_v59, %v254_v23  ;;  %v1113_v0 = vadd.f32 %v1105_v54, %v255_v24  ;;  %v1114_v11 = vadd.f32 %v1106_v60, %v256_v28  ;;  %v1115_v17 = vadd.f32 %v1107_v53, %v257_v27 }
 0x4af   :  { %1124 = vst.msk [vmem:[%s2671_s5 + $0x20] sm:$0xff] %vm302_vm0, %v1116_v32  ;;  %1125 = vst.msk [vmem:[%s2671_s5 + $0x28] sm:$0xff] %vm302_vm0, %v1117_v16 }
 0x4b0   :  { %1126 = vst.msk [vmem:[%s2671_s5 + $0x30] sm:$0xff] %vm302_vm0, %v1118_v61  ;;  %1127 = vst.msk [vmem:[%s2671_s5 + $0x38] sm:$0xff] %vm302_vm0, %v1119_v29 }
 0x4b1   :  { %1120 = vst.msk [vmem:[%s2671_s5] sm:$0xff] %vm302_vm0, %v1112_v62  ;;  %1121 = vst.msk [vmem:[%s2671_s5 + $0x8] sm:$0xff] %vm302_vm0, %v1113_v0 }
 0x4b2   :  { %1122 = vst.msk [vmem:[%s2671_s5 + $0x10] sm:$0xff] %vm302_vm0, %v1114_v11  ;;  %1123 = vst.msk [vmem:[%s2671_s5 + $0x18] sm:$0xff] %vm302_vm0, %v1115_v17 }

</bundles_post_ra>
